<compile_context>
chip_gen: v7x
topology: tpu7x:2x2x1
jax: 0.10.0
libtpu: 0.0.40
codegen_flags: <defaults>
</compile_context>

<pallas_src>
import jax
import jax.numpy as jnp
from jax.experimental import pallas as pl
from jax.experimental.pallas import tpu as pltpu

K = 7
STRIDE = 2
PAD = 3
C = 64
NUM_LAYERS = 4
BN_EPS = 1e-5
MATMUL_PRECISION = jax.lax.Precision.HIGHEST  # full-f32 MXU passes


# ---------------------------------------------------------------------------
# Fully fused network kernel: 4x (conv+ReLU+BN) -> max-pool -> FC,
# one batch element per grid step, everything resident in VMEM.
# ---------------------------------------------------------------------------
def fused_net_kernel(x_ref, w_ref, scale_ref, bias_ref, wfc_ref, bfc_ref, o_ref,
                     act_scr, a_scr, b_scr):
    # x_ref:     (L, C)            one batch element, channels-last (C on lanes)
    # w_ref:     (NL, K, C, C)     conv weights as (layer, tap, C_in, C_out)
    # scale_ref: (NL, 1, C)        gamma / sqrt(var + eps)
    # bias_ref:  (NL, 1, C)        beta - mean * scale
    # wfc_ref:   (C, NC)           FC weight (pre-transposed), bfc_ref: (1, NC)
    # o_ref:     (1, NC)
    # act_scr:   (L//2, C)         layer output -> next layer's input (VMEM)
    # a_scr/b_scr: (P, C)          zero-padded even/odd phase buffers
    n_layers = w_ref.shape[0]
    l_in = x_ref.shape[0]

    y = None
    for l in range(n_layers):                       # static: fully unrolled
        l_out = l_in // 2
        src = x_ref if l == 0 else act_scr
        # Deinterleave the layer input into even/odd rows (only strided reads).
        a = src[pl.ds(0, l_out, stride=STRIDE), :]  # a[m] = x[2m]
        b = src[pl.ds(1, l_out, stride=STRIDE), :]  # b[m] = x[2m+1]
        # Zero-padded phase buffers: a_pad[j] = a[j-1], b_pad[j] = b[j-2];
        # the untouched halo rows provide the conv zero padding (PAD=3).
        a_scr[...] = jnp.zeros_like(a_scr)
        b_scr[...] = jnp.zeros_like(b_scr)
        a_scr[pl.ds(1, l_out), :] = a
        b_scr[pl.ds(2, l_out), :] = b
        # y[i] = sum_t x[2i + t - 3] @ w[t]; even taps hit the odd phase (b),
        # odd taps the even phase (a).  Each tap is a contiguous view -> MXU dot.
        taps = ((b_scr, 0), (a_scr, 0), (b_scr, 1), (a_scr, 1),
                (b_scr, 2), (a_scr, 2), (b_scr, 3))
        acc = None
        for t, (ph, off) in enumerate(taps):
            d = jnp.dot(ph[pl.ds(off, l_out), :], w_ref[l, t],
                        preferred_element_type=jnp.float32,
                        precision=MATMUL_PRECISION)
            acc = d if acc is None else acc + d
        y = jnp.maximum(acc, 0.0)                   # ReLU (before BN, as in forward())
        y = y * scale_ref[l] + bias_ref[l]          # eval-mode BatchNorm affine
        if l + 1 < n_layers:
            act_scr[pl.ds(0, l_out), :] = y         # becomes next layer's input
        l_in = l_out

    pooled = jnp.max(y, axis=0, keepdims=True)      # AdaptiveMaxPool1d(1): (1, C)
    out = jnp.dot(pooled, wfc_ref[...],
                  preferred_element_type=jnp.float32,
                  precision=MATMUL_PRECISION) + bfc_ref[...]
    o_ref[...] = out.astype(o_ref.dtype)


# ---------------------------------------------------------------------------
# One-time parameter packing (outside the forward: jit-time constants / 1 DMA each)
# ---------------------------------------------------------------------------
def pack_params(params):
    w_list, s_list, b_list = [], [], []
    for (w_oik, gamma, beta, mean, var) in params["layers"]:
        w_list.append(jnp.transpose(w_oik, (2, 1, 0)))      # (K, Cin, Cout)
        scale = gamma / jnp.sqrt(var + BN_EPS)
        s_list.append(scale.reshape(1, -1))
        b_list.append((beta - mean * scale).reshape(1, -1))
    w_all = jnp.stack(w_list)                                # (NL, K, C, C)
    scale_all = jnp.stack(s_list)                            # (NL, 1, C)
    bias_all = jnp.stack(b_list)                             # (NL, 1, C)
    wfc, bfc = params["fc"]                                  # torch: (nc, C), (nc,)
    return w_all, scale_all, bias_all, wfc.T, bfc.reshape(1, -1)


def conv1d_forward(x_ncl, packed):
    w_all, scale_all, bias_all, wfc_t, bfc_row = packed
    N, Cin, L = x_ncl.shape
    n_layers, k, _, _ = w_all.shape
    num_classes = wfc_t.shape[1]
    assert Cin == C and k == K

    # Static shape checks: every layer must halve the length, and the phase
    # buffer reads (rows up to L_out + 2) must stay inside the scratch.
    half = L // 2
    phase_rows = ((half + 3 + 7) // 8) * 8
    l_in = L
    for _ in range(n_layers):
        l_out = (l_in + 2 * PAD - K) // STRIDE + 1
        assert l_in % 2 == 0 and l_out == l_in // 2, (l_in, l_out)
        assert l_out + 3 <= phase_rows and l_out <= half
        l_in = l_out
    assert l_in >= 1

    x_nlc = jnp.transpose(x_ncl, (0, 2, 1))                  # NCL -> NLC (C on lanes)

    out = pl.pallas_call(
        fused_net_kernel,
        out_shape=jax.ShapeDtypeStruct((N, 1, num_classes), x_ncl.dtype),
        grid_spec=pltpu.PrefetchScalarGridSpec(
            num_scalar_prefetch=0,
            grid=(N,),
            in_specs=[
                pl.BlockSpec((None, L, C), lambda n: (n, 0, 0)),
                pl.BlockSpec((n_layers, K, C, C), lambda n: (0, 0, 0, 0)),
                pl.BlockSpec((n_layers, 1, C), lambda n: (0, 0, 0)),
                pl.BlockSpec((n_layers, 1, C), lambda n: (0, 0, 0)),
                pl.BlockSpec((C, num_classes), lambda n: (0, 0)),
                pl.BlockSpec((1, num_classes), lambda n: (0, 0)),
            ],
            out_specs=pl.BlockSpec((None, 1, num_classes), lambda n: (n, 0, 0)),
            scratch_shapes=[
                pltpu.VMEM((half, C), jnp.float32),          # activation carry
                pltpu.VMEM((phase_rows, C), jnp.float32),    # even-phase (padded)
                pltpu.VMEM((phase_rows, C), jnp.float32),    # odd-phase (padded)
            ],
        ),
        compiler_params=pltpu.CompilerParams(dimension_semantics=("parallel",)),
    )(x_nlc, w_all, scale_all, bias_all, wfc_t, bfc_row)
    return out.reshape(N, num_classes)


# ---------------------------------------------------------------------------
# Pure-JAX reference (lax.conv, HIGHEST precision) for a tight correctness check
# ---------------------------------------------------------------------------
def reference_forward(x_ncl, params):
    x = x_ncl
    for (w_oik, gamma, beta, mean, var) in params["layers"]:
        y = jax.lax.conv_general_dilated(
            x, w_oik, window_strides=(STRIDE,), padding=[(PAD, PAD)],
            dimension_numbers=("NCH", "OIH", "NCH"),
            precision=MATMUL_PRECISION)
        y = jnp.maximum(y, 0.0)
        scale = gamma / jnp.sqrt(var + BN_EPS)
        bias = beta - mean * scale
        x = y * scale[None, :, None] + bias[None, :, None]
    pooled = jnp.max(x, axis=2)
    wfc, bfc = params["fc"]
    return jnp.dot(pooled, wfc.T, precision=MATMUL_PRECISION) + bfc


if __name__ == "__main__":
    num_classes = 10
    N, L = 2, 64                                             # lengths: 64 -> 32 -> 16 -> 8 -> 4

    key = jax.random.PRNGKey(0)
    keys = jax.random.split(key, NUM_LAYERS * 5 + 3)

    layers = []
    ki = 0
    for _ in range(NUM_LAYERS):
        w = 0.05 * jax.random.normal(keys[ki], (C, C, K), jnp.float32); ki += 1   # torch (Cout, Cin, K)
        gamma = 1.0 + 0.1 * jax.random.normal(keys[ki], (C,), jnp.float32); ki += 1
        beta = 0.1 * jax.random.normal(keys[ki], (C,), jnp.float32); ki += 1
        mean = 0.1 * jax.random.normal(keys[ki], (C,), jnp.float32); ki += 1
        var = jax.random.uniform(keys[ki], (C,), jnp.float32, 0.5, 1.5); ki += 1
        layers.append((w, gamma, beta, mean, var))

    wfc = 0.1 * jax.random.normal(keys[ki], (num_classes, C), jnp.float32); ki += 1  # torch (nc, 64)
    bfc = 0.1 * jax.random.normal(keys[ki], (num_classes,), jnp.float32); ki += 1
    params = {"layers": layers, "fc": (wfc, bfc)}

    x = jax.random.normal(keys[ki], (N, C, L), jnp.float32)  # NCL, as PyTorch

    packed = pack_params(params)                             # one-time weight packing
    out = jax.block_until_ready(jax.jit(conv1d_forward)(x, packed))

    ref = jax.block_until_ready(reference_forward(x, params))
    assert out.shape == (N, num_classes), out.shape
    # All-f32 pipeline with HIGHEST-precision matmuls on both sides: expected
    # agreement ~1e-5; 1e-3 keeps margin while still catching any indexing,
    # padding or weight-packing bug (those produce O(0.1-1) errors).
    max_err = float(jnp.max(jnp.abs(out - ref)))
    assert jnp.allclose(out, ref, rtol=1e-3, atol=1e-3), max_err

    print("KERNEL_OK")
</pallas_src>

<mosaic_0001>
module attributes {stable_mosaic.version = 11 : i64} {
  func.func @fused_net_kernel(%arg0: i32, %arg1: memref<1x64x64xf32, #tpu.memory_space<vmem>>, %arg2: memref<4x7x64x64xf32, #tpu.memory_space<vmem>>, %arg3: memref<4x1x64xf32, #tpu.memory_space<vmem>>, %arg4: memref<4x1x64xf32, #tpu.memory_space<vmem>>, %arg5: memref<64x10xf32, #tpu.memory_space<vmem>>, %arg6: memref<1x10xf32, #tpu.memory_space<vmem>>, %arg7: memref<1x1x10xf32, #tpu.memory_space<vmem>>, %arg8: memref<32x64xf32, #tpu.memory_space<vmem>>, %arg9: memref<40x64xf32, #tpu.memory_space<vmem>>, %arg10: memref<40x64xf32, #tpu.memory_space<vmem>>) attributes {dimension_semantics = [#tpu.dimension_semantics<parallel>], iteration_bounds = array<i64: 2>, scalar_prefetch = 0 : i64, scratch_operands = 3 : i64, tpu.core_type = #tpu.core_type<tc>, window_params = [{transform_indices = @transform_0, window_bounds = array<i64: 1, 64, 64>}, {pipeline_mode = #tpu.pipeline_mode<synchronous>, transform_indices = @transform_1, window_bounds = array<i64: 4, 7, 64, 64>}, {pipeline_mode = #tpu.pipeline_mode<synchronous>, transform_indices = @transform_2, window_bounds = array<i64: 4, 1, 64>}, {pipeline_mode = #tpu.pipeline_mode<synchronous>, transform_indices = @transform_3, window_bounds = array<i64: 4, 1, 64>}, {pipeline_mode = #tpu.pipeline_mode<synchronous>, transform_indices = @transform_4, window_bounds = array<i64: 64, 10>}, {pipeline_mode = #tpu.pipeline_mode<synchronous>, transform_indices = @transform_5, window_bounds = array<i64: 1, 10>}, {transform_indices = @transform_6, window_bounds = array<i64: 1, 1, 10>}]} {
    %c0 = arith.constant 0 : index
    %c0_0 = arith.constant 0 : index
    %c0_1 = arith.constant 0 : index
    %0 = tpu.strided_load %arg1[%c0, %c0_0, %c0_1] {strides = array<i32: 1, 2, 1>} : memref<1x64x64xf32, #tpu.memory_space<vmem>>, vector<1x32x64xf32>
    %1 = vector.shape_cast %0 : vector<1x32x64xf32> to vector<32x64xf32>
    %c0_2 = arith.constant 0 : index
    %c1 = arith.constant 1 : index
    %c0_3 = arith.constant 0 : index
    %2 = tpu.strided_load %arg1[%c0_2, %c1, %c0_3] {strides = array<i32: 1, 2, 1>} : memref<1x64x64xf32, #tpu.memory_space<vmem>>, vector<1x32x64xf32>
    %3 = vector.shape_cast %2 : vector<1x32x64xf32> to vector<32x64xf32>
    %cst = arith.constant 0.000000e+00 : f32
    %4 = vector.broadcast %cst : f32 to vector<40x64xf32>
    %c0_4 = arith.constant 0 : index
    %c0_5 = arith.constant 0 : index
    %5 = vector.load %arg9[%c0_4, %c0_5] : memref<40x64xf32, #tpu.memory_space<vmem>>, vector<40x64xf32>
    tpu.vector_store %arg9[%c0_4, %c0_5], %4 {strides = array<i32>} : memref<40x64xf32, #tpu.memory_space<vmem>>, vector<40x64xf32>,
    %cst_6 = arith.constant 0.000000e+00 : f32
    %6 = vector.broadcast %cst_6 : f32 to vector<40x64xf32>
    %c0_7 = arith.constant 0 : index
    %c0_8 = arith.constant 0 : index
    %7 = vector.load %arg10[%c0_7, %c0_8] : memref<40x64xf32, #tpu.memory_space<vmem>>, vector<40x64xf32>
    tpu.vector_store %arg10[%c0_7, %c0_8], %6 {strides = array<i32>} : memref<40x64xf32, #tpu.memory_space<vmem>>, vector<40x64xf32>,
    %c1_9 = arith.constant 1 : index
    %c0_10 = arith.constant 0 : index
    %8 = vector.load %arg9[%c1_9, %c0_10] : memref<40x64xf32, #tpu.memory_space<vmem>>, vector<32x64xf32>
    tpu.vector_store %arg9[%c1_9, %c0_10], %1 {strides = array<i32>} : memref<40x64xf32, #tpu.memory_space<vmem>>, vector<32x64xf32>,
    %c2 = arith.constant 2 : index
    %c0_11 = arith.constant 0 : index
    %9 = vector.load %arg10[%c2, %c0_11] : memref<40x64xf32, #tpu.memory_space<vmem>>, vector<32x64xf32>
    tpu.vector_store %arg10[%c2, %c0_11], %3 {strides = array<i32>} : memref<40x64xf32, #tpu.memory_space<vmem>>, vector<32x64xf32>,
    %c0_12 = arith.constant 0 : index
    %c0_13 = arith.constant 0 : index
    %10 = vector.load %arg10[%c0_12, %c0_13] : memref<40x64xf32, #tpu.memory_space<vmem>>, vector<32x64xf32>
    %c0_14 = arith.constant 0 : index
    %c0_15 = arith.constant 0 : index
    %c0_16 = arith.constant 0 : index
    %c0_17 = arith.constant 0 : index
    %11 = vector.load %arg2[%c0_14, %c0_15, %c0_16, %c0_17] : memref<4x7x64x64xf32, #tpu.memory_space<vmem>>, vector<1x1x64x64xf32>
    %12 = vector.shape_cast %11 : vector<1x1x64x64xf32> to vector<64x64xf32>
    %cst_18 = arith.constant dense<0.000000e+00> : vector<32x64xf32>
    %13 = tpu.matmul %10, %12, %cst_18 {dimension_numbers = #tpu.dot_dimension_numbers<[1], [0], [0], [1], [0, 0, 1, 1], [], []>, precision = #tpu.contract_precision<fp32>} : vector<32x64xf32>, vector<64x64xf32>, vector<32x64xf32> -> vector<32x64xf32>
    %c0_19 = arith.constant 0 : index
    %c0_20 = arith.constant 0 : index
    %14 = vector.load %arg9[%c0_19, %c0_20] : memref<40x64xf32, #tpu.memory_space<vmem>>, vector<32x64xf32>
    %c0_21 = arith.constant 0 : index
    %c1_22 = arith.constant 1 : index
    %c0_23 = arith.constant 0 : index
    %c0_24 = arith.constant 0 : index
    %15 = vector.load %arg2[%c0_21, %c1_22, %c0_23, %c0_24] : memref<4x7x64x64xf32, #tpu.memory_space<vmem>>, vector<1x1x64x64xf32>
    %16 = vector.shape_cast %15 : vector<1x1x64x64xf32> to vector<64x64xf32>
    %cst_25 = arith.constant dense<0.000000e+00> : vector<32x64xf32>
    %17 = tpu.matmul %14, %16, %cst_25 {dimension_numbers = #tpu.dot_dimension_numbers<[1], [0], [0], [1], [0, 0, 1, 1], [], []>, precision = #tpu.contract_precision<fp32>} : vector<32x64xf32>, vector<64x64xf32>, vector<32x64xf32> -> vector<32x64xf32>
    %18 = arith.addf %13, %17 : vector<32x64xf32>
    %c1_26 = arith.constant 1 : index
    %c0_27 = arith.constant 0 : index
    %19 = vector.load %arg10[%c1_26, %c0_27] : memref<40x64xf32, #tpu.memory_space<vmem>>, vector<32x64xf32>
    %c0_28 = arith.constant 0 : index
    %c2_29 = arith.constant 2 : index
    %c0_30 = arith.constant 0 : index
    %c0_31 = arith.constant 0 : index
    %20 = vector.load %arg2[%c0_28, %c2_29, %c0_30, %c0_31] : memref<4x7x64x64xf32, #tpu.memory_space<vmem>>, vector<1x1x64x64xf32>
    %21 = vector.shape_cast %20 : vector<1x1x64x64xf32> to vector<64x64xf32>
    %cst_32 = arith.constant dense<0.000000e+00> : vector<32x64xf32>
    %22 = tpu.matmul %19, %21, %cst_32 {dimension_numbers = #tpu.dot_dimension_numbers<[1], [0], [0], [1], [0, 0, 1, 1], [], []>, precision = #tpu.contract_precision<fp32>} : vector<32x64xf32>, vector<64x64xf32>, vector<32x64xf32> -> vector<32x64xf32>
    %23 = arith.addf %18, %22 : vector<32x64xf32>
    %c1_33 = arith.constant 1 : index
    %c0_34 = arith.constant 0 : index
    %24 = vector.load %arg9[%c1_33, %c0_34] : memref<40x64xf32, #tpu.memory_space<vmem>>, vector<32x64xf32>
    %c0_35 = arith.constant 0 : index
    %c3 = arith.constant 3 : index
    %c0_36 = arith.constant 0 : index
    %c0_37 = arith.constant 0 : index
    %25 = vector.load %arg2[%c0_35, %c3, %c0_36, %c0_37] : memref<4x7x64x64xf32, #tpu.memory_space<vmem>>, vector<1x1x64x64xf32>
    %26 = vector.shape_cast %25 : vector<1x1x64x64xf32> to vector<64x64xf32>
    %cst_38 = arith.constant dense<0.000000e+00> : vector<32x64xf32>
    %27 = tpu.matmul %24, %26, %cst_38 {dimension_numbers = #tpu.dot_dimension_numbers<[1], [0], [0], [1], [0, 0, 1, 1], [], []>, precision = #tpu.contract_precision<fp32>} : vector<32x64xf32>, vector<64x64xf32>, vector<32x64xf32> -> vector<32x64xf32>
    %28 = arith.addf %23, %27 : vector<32x64xf32>
    %c2_39 = arith.constant 2 : index
    %c0_40 = arith.constant 0 : index
    %29 = vector.load %arg10[%c2_39, %c0_40] : memref<40x64xf32, #tpu.memory_space<vmem>>, vector<32x64xf32>
    %c0_41 = arith.constant 0 : index
    %c4 = arith.constant 4 : index
    %c0_42 = arith.constant 0 : index
    %c0_43 = arith.constant 0 : index
    %30 = vector.load %arg2[%c0_41, %c4, %c0_42, %c0_43] : memref<4x7x64x64xf32, #tpu.memory_space<vmem>>, vector<1x1x64x64xf32>
    %31 = vector.shape_cast %30 : vector<1x1x64x64xf32> to vector<64x64xf32>
    %cst_44 = arith.constant dense<0.000000e+00> : vector<32x64xf32>
    %32 = tpu.matmul %29, %31, %cst_44 {dimension_numbers = #tpu.dot_dimension_numbers<[1], [0], [0], [1], [0, 0, 1, 1], [], []>, precision = #tpu.contract_precision<fp32>} : vector<32x64xf32>, vector<64x64xf32>, vector<32x64xf32> -> vector<32x64xf32>
    %33 = arith.addf %28, %32 : vector<32x64xf32>
    %c2_45 = arith.constant 2 : index
    %c0_46 = arith.constant 0 : index
    %34 = vector.load %arg9[%c2_45, %c0_46] : memref<40x64xf32, #tpu.memory_space<vmem>>, vector<32x64xf32>
    %c0_47 = arith.constant 0 : index
    %c5 = arith.constant 5 : index
    %c0_48 = arith.constant 0 : index
    %c0_49 = arith.constant 0 : index
    %35 = vector.load %arg2[%c0_47, %c5, %c0_48, %c0_49] : memref<4x7x64x64xf32, #tpu.memory_space<vmem>>, vector<1x1x64x64xf32>
    %36 = vector.shape_cast %35 : vector<1x1x64x64xf32> to vector<64x64xf32>
    %cst_50 = arith.constant dense<0.000000e+00> : vector<32x64xf32>
    %37 = tpu.matmul %34, %36, %cst_50 {dimension_numbers = #tpu.dot_dimension_numbers<[1], [0], [0], [1], [0, 0, 1, 1], [], []>, precision = #tpu.contract_precision<fp32>} : vector<32x64xf32>, vector<64x64xf32>, vector<32x64xf32> -> vector<32x64xf32>
    %38 = arith.addf %33, %37 : vector<32x64xf32>
    %c3_51 = arith.constant 3 : index
    %c0_52 = arith.constant 0 : index
    %39 = vector.load %arg10[%c3_51, %c0_52] : memref<40x64xf32, #tpu.memory_space<vmem>>, vector<32x64xf32>
    %c0_53 = arith.constant 0 : index
    %c6 = arith.constant 6 : index
    %c0_54 = arith.constant 0 : index
    %c0_55 = arith.constant 0 : index
    %40 = vector.load %arg2[%c0_53, %c6, %c0_54, %c0_55] : memref<4x7x64x64xf32, #tpu.memory_space<vmem>>, vector<1x1x64x64xf32>
    %41 = vector.shape_cast %40 : vector<1x1x64x64xf32> to vector<64x64xf32>
    %cst_56 = arith.constant dense<0.000000e+00> : vector<32x64xf32>
    %42 = tpu.matmul %39, %41, %cst_56 {dimension_numbers = #tpu.dot_dimension_numbers<[1], [0], [0], [1], [0, 0, 1, 1], [], []>, precision = #tpu.contract_precision<fp32>} : vector<32x64xf32>, vector<64x64xf32>, vector<32x64xf32> -> vector<32x64xf32>
    %43 = arith.addf %38, %42 : vector<32x64xf32>
    %cst_57 = arith.constant 0.000000e+00 : f32
    %44 = vector.broadcast %cst_57 : f32 to vector<32x64xf32>
    %45 = arith.maximumf %43, %44 : vector<32x64xf32>
    %c0_58 = arith.constant 0 : index
    %c0_59 = arith.constant 0 : index
    %c0_60 = arith.constant 0 : index
    %46 = vector.load %arg3[%c0_58, %c0_59, %c0_60] : memref<4x1x64xf32, #tpu.memory_space<vmem>>, vector<1x1x64xf32>
    %47 = vector.shape_cast %46 : vector<1x1x64xf32> to vector<1x64xf32>
    %48 = vector.broadcast %47 : vector<1x64xf32> to vector<32x64xf32>
    %49 = arith.mulf %45, %48 : vector<32x64xf32>
    %c0_61 = arith.constant 0 : index
    %c0_62 = arith.constant 0 : index
    %c0_63 = arith.constant 0 : index
    %50 = vector.load %arg4[%c0_61, %c0_62, %c0_63] : memref<4x1x64xf32, #tpu.memory_space<vmem>>, vector<1x1x64xf32>
    %51 = vector.shape_cast %50 : vector<1x1x64xf32> to vector<1x64xf32>
    %52 = vector.broadcast %51 : vector<1x64xf32> to vector<32x64xf32>
    %53 = arith.addf %49, %52 : vector<32x64xf32>
    %c0_64 = arith.constant 0 : index
    %c0_65 = arith.constant 0 : index
    %54 = vector.load %arg8[%c0_64, %c0_65] : memref<32x64xf32, #tpu.memory_space<vmem>>, vector<32x64xf32>
    tpu.vector_store %arg8[%c0_64, %c0_65], %53 {strides = array<i32>} : memref<32x64xf32, #tpu.memory_space<vmem>>, vector<32x64xf32>,
    %c0_66 = arith.constant 0 : index
    %c0_67 = arith.constant 0 : index
    %55 = tpu.strided_load %arg8[%c0_66, %c0_67] {strides = array<i32: 2, 1>} : memref<32x64xf32, #tpu.memory_space<vmem>>, vector<16x64xf32>
    %c1_68 = arith.constant 1 : index
    %c0_69 = arith.constant 0 : index
    %56 = tpu.strided_load %arg8[%c1_68, %c0_69] {strides = array<i32: 2, 1>} : memref<32x64xf32, #tpu.memory_space<vmem>>, vector<16x64xf32>
    %cst_70 = arith.constant 0.000000e+00 : f32
    %57 = vector.broadcast %cst_70 : f32 to vector<40x64xf32>
    %c0_71 = arith.constant 0 : index
    %c0_72 = arith.constant 0 : index
    %58 = vector.load %arg9[%c0_71, %c0_72] : memref<40x64xf32, #tpu.memory_space<vmem>>, vector<40x64xf32>
    tpu.vector_store %arg9[%c0_71, %c0_72], %57 {strides = array<i32>} : memref<40x64xf32, #tpu.memory_space<vmem>>, vector<40x64xf32>,
    %cst_73 = arith.constant 0.000000e+00 : f32
    %59 = vector.broadcast %cst_73 : f32 to vector<40x64xf32>
    %c0_74 = arith.constant 0 : index
    %c0_75 = arith.constant 0 : index
    %60 = vector.load %arg10[%c0_74, %c0_75] : memref<40x64xf32, #tpu.memory_space<vmem>>, vector<40x64xf32>
    tpu.vector_store %arg10[%c0_74, %c0_75], %59 {strides = array<i32>} : memref<40x64xf32, #tpu.memory_space<vmem>>, vector<40x64xf32>,
    %c1_76 = arith.constant 1 : index
    %c0_77 = arith.constant 0 : index
    %61 = vector.load %arg9[%c1_76, %c0_77] : memref<40x64xf32, #tpu.memory_space<vmem>>, vector<16x64xf32>
    tpu.vector_store %arg9[%c1_76, %c0_77], %55 {strides = array<i32>} : memref<40x64xf32, #tpu.memory_space<vmem>>, vector<16x64xf32>,
    %c2_78 = arith.constant 2 : index
    %c0_79 = arith.constant 0 : index
    %62 = vector.load %arg10[%c2_78, %c0_79] : memref<40x64xf32, #tpu.memory_space<vmem>>, vector<16x64xf32>
    tpu.vector_store %arg10[%c2_78, %c0_79], %56 {strides = array<i32>} : memref<40x64xf32, #tpu.memory_space<vmem>>, vector<16x64xf32>,
    %c0_80 = arith.constant 0 : index
    %c0_81 = arith.constant 0 : index
    %63 = vector.load %arg10[%c0_80, %c0_81] : memref<40x64xf32, #tpu.memory_space<vmem>>, vector<16x64xf32>
    %c1_82 = arith.constant 1 : index
    %c0_83 = arith.constant 0 : index
    %c0_84 = arith.constant 0 : index
    %c0_85 = arith.constant 0 : index
    %64 = vector.load %arg2[%c1_82, %c0_83, %c0_84, %c0_85] : memref<4x7x64x64xf32, #tpu.memory_space<vmem>>, vector<1x1x64x64xf32>
    %65 = vector.shape_cast %64 : vector<1x1x64x64xf32> to vector<64x64xf32>
    %cst_86 = arith.constant dense<0.000000e+00> : vector<16x64xf32>
    %66 = tpu.matmul %63, %65, %cst_86 {dimension_numbers = #tpu.dot_dimension_numbers<[1], [0], [0], [1], [0, 0, 1, 1], [], []>, precision = #tpu.contract_precision<fp32>} : vector<16x64xf32>, vector<64x64xf32>, vector<16x64xf32> -> vector<16x64xf32>
    %c0_87 = arith.constant 0 : index
    %c0_88 = arith.constant 0 : index
    %67 = vector.load %arg9[%c0_87, %c0_88] : memref<40x64xf32, #tpu.memory_space<vmem>>, vector<16x64xf32>
    %c1_89 = arith.constant 1 : index
    %c1_90 = arith.constant 1 : index
    %c0_91 = arith.constant 0 : index
    %c0_92 = arith.constant 0 : index
    %68 = vector.load %arg2[%c1_89, %c1_90, %c0_91, %c0_92] : memref<4x7x64x64xf32, #tpu.memory_space<vmem>>, vector<1x1x64x64xf32>
    %69 = vector.shape_cast %68 : vector<1x1x64x64xf32> to vector<64x64xf32>
    %cst_93 = arith.constant dense<0.000000e+00> : vector<16x64xf32>
    %70 = tpu.matmul %67, %69, %cst_93 {dimension_numbers = #tpu.dot_dimension_numbers<[1], [0], [0], [1], [0, 0, 1, 1], [], []>, precision = #tpu.contract_precision<fp32>} : vector<16x64xf32>, vector<64x64xf32>, vector<16x64xf32> -> vector<16x64xf32>
    %71 = arith.addf %66, %70 : vector<16x64xf32>
    %c1_94 = arith.constant 1 : index
    %c0_95 = arith.constant 0 : index
    %72 = vector.load %arg10[%c1_94, %c0_95] : memref<40x64xf32, #tpu.memory_space<vmem>>, vector<16x64xf32>
    %c1_96 = arith.constant 1 : index
    %c2_97 = arith.constant 2 : index
    %c0_98 = arith.constant 0 : index
    %c0_99 = arith.constant 0 : index
    %73 = vector.load %arg2[%c1_96, %c2_97, %c0_98, %c0_99] : memref<4x7x64x64xf32, #tpu.memory_space<vmem>>, vector<1x1x64x64xf32>
    %74 = vector.shape_cast %73 : vector<1x1x64x64xf32> to vector<64x64xf32>
    %cst_100 = arith.constant dense<0.000000e+00> : vector<16x64xf32>
    %75 = tpu.matmul %72, %74, %cst_100 {dimension_numbers = #tpu.dot_dimension_numbers<[1], [0], [0], [1], [0, 0, 1, 1], [], []>, precision = #tpu.contract_precision<fp32>} : vector<16x64xf32>, vector<64x64xf32>, vector<16x64xf32> -> vector<16x64xf32>
    %76 = arith.addf %71, %75 : vector<16x64xf32>
    %c1_101 = arith.constant 1 : index
    %c0_102 = arith.constant 0 : index
    %77 = vector.load %arg9[%c1_101, %c0_102] : memref<40x64xf32, #tpu.memory_space<vmem>>, vector<16x64xf32>
    %c1_103 = arith.constant 1 : index
    %c3_104 = arith.constant 3 : index
    %c0_105 = arith.constant 0 : index
    %c0_106 = arith.constant 0 : index
    %78 = vector.load %arg2[%c1_103, %c3_104, %c0_105, %c0_106] : memref<4x7x64x64xf32, #tpu.memory_space<vmem>>, vector<1x1x64x64xf32>
    %79 = vector.shape_cast %78 : vector<1x1x64x64xf32> to vector<64x64xf32>
    %cst_107 = arith.constant dense<0.000000e+00> : vector<16x64xf32>
    %80 = tpu.matmul %77, %79, %cst_107 {dimension_numbers = #tpu.dot_dimension_numbers<[1], [0], [0], [1], [0, 0, 1, 1], [], []>, precision = #tpu.contract_precision<fp32>} : vector<16x64xf32>, vector<64x64xf32>, vector<16x64xf32> -> vector<16x64xf32>
    %81 = arith.addf %76, %80 : vector<16x64xf32>
    %c2_108 = arith.constant 2 : index
    %c0_109 = arith.constant 0 : index
    %82 = vector.load %arg10[%c2_108, %c0_109] : memref<40x64xf32, #tpu.memory_space<vmem>>, vector<16x64xf32>
    %c1_110 = arith.constant 1 : index
    %c4_111 = arith.constant 4 : index
    %c0_112 = arith.constant 0 : index
    %c0_113 = arith.constant 0 : index
    %83 = vector.load %arg2[%c1_110, %c4_111, %c0_112, %c0_113] : memref<4x7x64x64xf32, #tpu.memory_space<vmem>>, vector<1x1x64x64xf32>
    %84 = vector.shape_cast %83 : vector<1x1x64x64xf32> to vector<64x64xf32>
    %cst_114 = arith.constant dense<0.000000e+00> : vector<16x64xf32>
    %85 = tpu.matmul %82, %84, %cst_114 {dimension_numbers = #tpu.dot_dimension_numbers<[1], [0], [0], [1], [0, 0, 1, 1], [], []>, precision = #tpu.contract_precision<fp32>} : vector<16x64xf32>, vector<64x64xf32>, vector<16x64xf32> -> vector<16x64xf32>
    %86 = arith.addf %81, %85 : vector<16x64xf32>
    %c2_115 = arith.constant 2 : index
    %c0_116 = arith.constant 0 : index
    %87 = vector.load %arg9[%c2_115, %c0_116] : memref<40x64xf32, #tpu.memory_space<vmem>>, vector<16x64xf32>
    %c1_117 = arith.constant 1 : index
    %c5_118 = arith.constant 5 : index
    %c0_119 = arith.constant 0 : index
    %c0_120 = arith.constant 0 : index
    %88 = vector.load %arg2[%c1_117, %c5_118, %c0_119, %c0_120] : memref<4x7x64x64xf32, #tpu.memory_space<vmem>>, vector<1x1x64x64xf32>
    %89 = vector.shape_cast %88 : vector<1x1x64x64xf32> to vector<64x64xf32>
    %cst_121 = arith.constant dense<0.000000e+00> : vector<16x64xf32>
    %90 = tpu.matmul %87, %89, %cst_121 {dimension_numbers = #tpu.dot_dimension_numbers<[1], [0], [0], [1], [0, 0, 1, 1], [], []>, precision = #tpu.contract_precision<fp32>} : vector<16x64xf32>, vector<64x64xf32>, vector<16x64xf32> -> vector<16x64xf32>
    %91 = arith.addf %86, %90 : vector<16x64xf32>
    %c3_122 = arith.constant 3 : index
    %c0_123 = arith.constant 0 : index
    %92 = vector.load %arg10[%c3_122, %c0_123] : memref<40x64xf32, #tpu.memory_space<vmem>>, vector<16x64xf32>
    %c1_124 = arith.constant 1 : index
    %c6_125 = arith.constant 6 : index
    %c0_126 = arith.constant 0 : index
    %c0_127 = arith.constant 0 : index
    %93 = vector.load %arg2[%c1_124, %c6_125, %c0_126, %c0_127] : memref<4x7x64x64xf32, #tpu.memory_space<vmem>>, vector<1x1x64x64xf32>
    %94 = vector.shape_cast %93 : vector<1x1x64x64xf32> to vector<64x64xf32>
    %cst_128 = arith.constant dense<0.000000e+00> : vector<16x64xf32>
    %95 = tpu.matmul %92, %94, %cst_128 {dimension_numbers = #tpu.dot_dimension_numbers<[1], [0], [0], [1], [0, 0, 1, 1], [], []>, precision = #tpu.contract_precision<fp32>} : vector<16x64xf32>, vector<64x64xf32>, vector<16x64xf32> -> vector<16x64xf32>
    %96 = arith.addf %91, %95 : vector<16x64xf32>
    %cst_129 = arith.constant 0.000000e+00 : f32
    %97 = vector.broadcast %cst_129 : f32 to vector<16x64xf32>
    %98 = arith.maximumf %96, %97 : vector<16x64xf32>
    %c1_130 = arith.constant 1 : index
    %c0_131 = arith.constant 0 : index
    %c0_132 = arith.constant 0 : index
    %99 = vector.load %arg3[%c1_130, %c0_131, %c0_132] : memref<4x1x64xf32, #tpu.memory_space<vmem>>, vector<1x1x64xf32>
    %100 = vector.shape_cast %99 : vector<1x1x64xf32> to vector<1x64xf32>
    %101 = vector.broadcast %100 : vector<1x64xf32> to vector<16x64xf32>
    %102 = arith.mulf %98, %101 : vector<16x64xf32>
    %c1_133 = arith.constant 1 : index
    %c0_134 = arith.constant 0 : index
    %c0_135 = arith.constant 0 : index
    %103 = vector.load %arg4[%c1_133, %c0_134, %c0_135] : memref<4x1x64xf32, #tpu.memory_space<vmem>>, vector<1x1x64xf32>
    %104 = vector.shape_cast %103 : vector<1x1x64xf32> to vector<1x64xf32>
    %105 = vector.broadcast %104 : vector<1x64xf32> to vector<16x64xf32>
    %106 = arith.addf %102, %105 : vector<16x64xf32>
    %c0_136 = arith.constant 0 : index
    %c0_137 = arith.constant 0 : index
    %107 = vector.load %arg8[%c0_136, %c0_137] : memref<32x64xf32, #tpu.memory_space<vmem>>, vector<16x64xf32>
    tpu.vector_store %arg8[%c0_136, %c0_137], %106 {strides = array<i32>} : memref<32x64xf32, #tpu.memory_space<vmem>>, vector<16x64xf32>,
    %c0_138 = arith.constant 0 : index
    %c0_139 = arith.constant 0 : index
    %108 = tpu.strided_load %arg8[%c0_138, %c0_139] {strides = array<i32: 2, 1>} : memref<32x64xf32, #tpu.memory_space<vmem>>, vector<8x64xf32>
    %c1_140 = arith.constant 1 : index
    %c0_141 = arith.constant 0 : index
    %109 = tpu.strided_load %arg8[%c1_140, %c0_141] {strides = array<i32: 2, 1>} : memref<32x64xf32, #tpu.memory_space<vmem>>, vector<8x64xf32>
    %cst_142 = arith.constant 0.000000e+00 : f32
    %110 = vector.broadcast %cst_142 : f32 to vector<40x64xf32>
    %c0_143 = arith.constant 0 : index
    %c0_144 = arith.constant 0 : index
    %111 = vector.load %arg9[%c0_143, %c0_144] : memref<40x64xf32, #tpu.memory_space<vmem>>, vector<40x64xf32>
    tpu.vector_store %arg9[%c0_143, %c0_144], %110 {strides = array<i32>} : memref<40x64xf32, #tpu.memory_space<vmem>>, vector<40x64xf32>,
    %cst_145 = arith.constant 0.000000e+00 : f32
    %112 = vector.broadcast %cst_145 : f32 to vector<40x64xf32>
    %c0_146 = arith.constant 0 : index
    %c0_147 = arith.constant 0 : index
    %113 = vector.load %arg10[%c0_146, %c0_147] : memref<40x64xf32, #tpu.memory_space<vmem>>, vector<40x64xf32>
    tpu.vector_store %arg10[%c0_146, %c0_147], %112 {strides = array<i32>} : memref<40x64xf32, #tpu.memory_space<vmem>>, vector<40x64xf32>,
    %c1_148 = arith.constant 1 : index
    %c0_149 = arith.constant 0 : index
    %114 = vector.load %arg9[%c1_148, %c0_149] : memref<40x64xf32, #tpu.memory_space<vmem>>, vector<8x64xf32>
    tpu.vector_store %arg9[%c1_148, %c0_149], %108 {strides = array<i32>} : memref<40x64xf32, #tpu.memory_space<vmem>>, vector<8x64xf32>,
    %c2_150 = arith.constant 2 : index
    %c0_151 = arith.constant 0 : index
    %115 = vector.load %arg10[%c2_150, %c0_151] : memref<40x64xf32, #tpu.memory_space<vmem>>, vector<8x64xf32>
    tpu.vector_store %arg10[%c2_150, %c0_151], %109 {strides = array<i32>} : memref<40x64xf32, #tpu.memory_space<vmem>>, vector<8x64xf32>,
    %c0_152 = arith.constant 0 : index
    %c0_153 = arith.constant 0 : index
    %116 = vector.load %arg10[%c0_152, %c0_153] : memref<40x64xf32, #tpu.memory_space<vmem>>, vector<8x64xf32>
    %c2_154 = arith.constant 2 : index
    %c0_155 = arith.constant 0 : index
    %c0_156 = arith.constant 0 : index
    %c0_157 = arith.constant 0 : index
    %117 = vector.load %arg2[%c2_154, %c0_155, %c0_156, %c0_157] : memref<4x7x64x64xf32, #tpu.memory_space<vmem>>, vector<1x1x64x64xf32>
    %118 = vector.shape_cast %117 : vector<1x1x64x64xf32> to vector<64x64xf32>
    %cst_158 = arith.constant dense<0.000000e+00> : vector<8x64xf32>
    %119 = tpu.matmul %116, %118, %cst_158 {dimension_numbers = #tpu.dot_dimension_numbers<[1], [0], [0], [1], [0, 0, 1, 1], [], []>, precision = #tpu.contract_precision<fp32>} : vector<8x64xf32>, vector<64x64xf32>, vector<8x64xf32> -> vector<8x64xf32>
    %c0_159 = arith.constant 0 : index
    %c0_160 = arith.constant 0 : index
    %120 = vector.load %arg9[%c0_159, %c0_160] : memref<40x64xf32, #tpu.memory_space<vmem>>, vector<8x64xf32>
    %c2_161 = arith.constant 2 : index
    %c1_162 = arith.constant 1 : index
    %c0_163 = arith.constant 0 : index
    %c0_164 = arith.constant 0 : index
    %121 = vector.load %arg2[%c2_161, %c1_162, %c0_163, %c0_164] : memref<4x7x64x64xf32, #tpu.memory_space<vmem>>, vector<1x1x64x64xf32>
    %122 = vector.shape_cast %121 : vector<1x1x64x64xf32> to vector<64x64xf32>
    %cst_165 = arith.constant dense<0.000000e+00> : vector<8x64xf32>
    %123 = tpu.matmul %120, %122, %cst_165 {dimension_numbers = #tpu.dot_dimension_numbers<[1], [0], [0], [1], [0, 0, 1, 1], [], []>, precision = #tpu.contract_precision<fp32>} : vector<8x64xf32>, vector<64x64xf32>, vector<8x64xf32> -> vector<8x64xf32>
    %124 = arith.addf %119, %123 : vector<8x64xf32>
    %c1_166 = arith.constant 1 : index
    %c0_167 = arith.constant 0 : index
    %125 = vector.load %arg10[%c1_166, %c0_167] : memref<40x64xf32, #tpu.memory_space<vmem>>, vector<8x64xf32>
    %c2_168 = arith.constant 2 : index
    %c2_169 = arith.constant 2 : index
    %c0_170 = arith.constant 0 : index
    %c0_171 = arith.constant 0 : index
    %126 = vector.load %arg2[%c2_168, %c2_169, %c0_170, %c0_171] : memref<4x7x64x64xf32, #tpu.memory_space<vmem>>, vector<1x1x64x64xf32>
    %127 = vector.shape_cast %126 : vector<1x1x64x64xf32> to vector<64x64xf32>
    %cst_172 = arith.constant dense<0.000000e+00> : vector<8x64xf32>
    %128 = tpu.matmul %125, %127, %cst_172 {dimension_numbers = #tpu.dot_dimension_numbers<[1], [0], [0], [1], [0, 0, 1, 1], [], []>, precision = #tpu.contract_precision<fp32>} : vector<8x64xf32>, vector<64x64xf32>, vector<8x64xf32> -> vector<8x64xf32>
    %129 = arith.addf %124, %128 : vector<8x64xf32>
    %c1_173 = arith.constant 1 : index
    %c0_174 = arith.constant 0 : index
    %130 = vector.load %arg9[%c1_173, %c0_174] : memref<40x64xf32, #tpu.memory_space<vmem>>, vector<8x64xf32>
    %c2_175 = arith.constant 2 : index
    %c3_176 = arith.constant 3 : index
    %c0_177 = arith.constant 0 : index
    %c0_178 = arith.constant 0 : index
    %131 = vector.load %arg2[%c2_175, %c3_176, %c0_177, %c0_178] : memref<4x7x64x64xf32, #tpu.memory_space<vmem>>, vector<1x1x64x64xf32>
    %132 = vector.shape_cast %131 : vector<1x1x64x64xf32> to vector<64x64xf32>
    %cst_179 = arith.constant dense<0.000000e+00> : vector<8x64xf32>
    %133 = tpu.matmul %130, %132, %cst_179 {dimension_numbers = #tpu.dot_dimension_numbers<[1], [0], [0], [1], [0, 0, 1, 1], [], []>, precision = #tpu.contract_precision<fp32>} : vector<8x64xf32>, vector<64x64xf32>, vector<8x64xf32> -> vector<8x64xf32>
    %134 = arith.addf %129, %133 : vector<8x64xf32>
    %c2_180 = arith.constant 2 : index
    %c0_181 = arith.constant 0 : index
    %135 = vector.load %arg10[%c2_180, %c0_181] : memref<40x64xf32, #tpu.memory_space<vmem>>, vector<8x64xf32>
    %c2_182 = arith.constant 2 : index
    %c4_183 = arith.constant 4 : index
    %c0_184 = arith.constant 0 : index
    %c0_185 = arith.constant 0 : index
    %136 = vector.load %arg2[%c2_182, %c4_183, %c0_184, %c0_185] : memref<4x7x64x64xf32, #tpu.memory_space<vmem>>, vector<1x1x64x64xf32>
    %137 = vector.shape_cast %136 : vector<1x1x64x64xf32> to vector<64x64xf32>
    %cst_186 = arith.constant dense<0.000000e+00> : vector<8x64xf32>
    %138 = tpu.matmul %135, %137, %cst_186 {dimension_numbers = #tpu.dot_dimension_numbers<[1], [0], [0], [1], [0, 0, 1, 1], [], []>, precision = #tpu.contract_precision<fp32>} : vector<8x64xf32>, vector<64x64xf32>, vector<8x64xf32> -> vector<8x64xf32>
    %139 = arith.addf %134, %138 : vector<8x64xf32>
    %c2_187 = arith.constant 2 : index
    %c0_188 = arith.constant 0 : index
    %140 = vector.load %arg9[%c2_187, %c0_188] : memref<40x64xf32, #tpu.memory_space<vmem>>, vector<8x64xf32>
    %c2_189 = arith.constant 2 : index
    %c5_190 = arith.constant 5 : index
    %c0_191 = arith.constant 0 : index
    %c0_192 = arith.constant 0 : index
    %141 = vector.load %arg2[%c2_189, %c5_190, %c0_191, %c0_192] : memref<4x7x64x64xf32, #tpu.memory_space<vmem>>, vector<1x1x64x64xf32>
    %142 = vector.shape_cast %141 : vector<1x1x64x64xf32> to vector<64x64xf32>
    %cst_193 = arith.constant dense<0.000000e+00> : vector<8x64xf32>
    %143 = tpu.matmul %140, %142, %cst_193 {dimension_numbers = #tpu.dot_dimension_numbers<[1], [0], [0], [1], [0, 0, 1, 1], [], []>, precision = #tpu.contract_precision<fp32>} : vector<8x64xf32>, vector<64x64xf32>, vector<8x64xf32> -> vector<8x64xf32>
    %144 = arith.addf %139, %143 : vector<8x64xf32>
    %c3_194 = arith.constant 3 : index
    %c0_195 = arith.constant 0 : index
    %145 = vector.load %arg10[%c3_194, %c0_195] : memref<40x64xf32, #tpu.memory_space<vmem>>, vector<8x64xf32>
    %c2_196 = arith.constant 2 : index
    %c6_197 = arith.constant 6 : index
    %c0_198 = arith.constant 0 : index
    %c0_199 = arith.constant 0 : index
    %146 = vector.load %arg2[%c2_196, %c6_197, %c0_198, %c0_199] : memref<4x7x64x64xf32, #tpu.memory_space<vmem>>, vector<1x1x64x64xf32>
    %147 = vector.shape_cast %146 : vector<1x1x64x64xf32> to vector<64x64xf32>
    %cst_200 = arith.constant dense<0.000000e+00> : vector<8x64xf32>
    %148 = tpu.matmul %145, %147, %cst_200 {dimension_numbers = #tpu.dot_dimension_numbers<[1], [0], [0], [1], [0, 0, 1, 1], [], []>, precision = #tpu.contract_precision<fp32>} : vector<8x64xf32>, vector<64x64xf32>, vector<8x64xf32> -> vector<8x64xf32>
    %149 = arith.addf %144, %148 : vector<8x64xf32>
    %cst_201 = arith.constant 0.000000e+00 : f32
    %150 = vector.broadcast %cst_201 : f32 to vector<8x64xf32>
    %151 = arith.maximumf %149, %150 : vector<8x64xf32>
    %c2_202 = arith.constant 2 : index
    %c0_203 = arith.constant 0 : index
    %c0_204 = arith.constant 0 : index
    %152 = vector.load %arg3[%c2_202, %c0_203, %c0_204] : memref<4x1x64xf32, #tpu.memory_space<vmem>>, vector<1x1x64xf32>
    %153 = vector.shape_cast %152 : vector<1x1x64xf32> to vector<1x64xf32>
    %154 = vector.broadcast %153 : vector<1x64xf32> to vector<8x64xf32>
    %155 = arith.mulf %151, %154 : vector<8x64xf32>
    %c2_205 = arith.constant 2 : index
    %c0_206 = arith.constant 0 : index
    %c0_207 = arith.constant 0 : index
    %156 = vector.load %arg4[%c2_205, %c0_206, %c0_207] : memref<4x1x64xf32, #tpu.memory_space<vmem>>, vector<1x1x64xf32>
    %157 = vector.shape_cast %156 : vector<1x1x64xf32> to vector<1x64xf32>
    %158 = vector.broadcast %157 : vector<1x64xf32> to vector<8x64xf32>
    %159 = arith.addf %155, %158 : vector<8x64xf32>
    %c0_208 = arith.constant 0 : index
    %c0_209 = arith.constant 0 : index
    %160 = vector.load %arg8[%c0_208, %c0_209] : memref<32x64xf32, #tpu.memory_space<vmem>>, vector<8x64xf32>
    tpu.vector_store %arg8[%c0_208, %c0_209], %159 {strides = array<i32>} : memref<32x64xf32, #tpu.memory_space<vmem>>, vector<8x64xf32>,
    %c0_210 = arith.constant 0 : index
    %c0_211 = arith.constant 0 : index
    %161 = tpu.strided_load %arg8[%c0_210, %c0_211] {strides = array<i32: 2, 1>} : memref<32x64xf32, #tpu.memory_space<vmem>>, vector<4x64xf32>
    %c1_212 = arith.constant 1 : index
    %c0_213 = arith.constant 0 : index
    %162 = tpu.strided_load %arg8[%c1_212, %c0_213] {strides = array<i32: 2, 1>} : memref<32x64xf32, #tpu.memory_space<vmem>>, vector<4x64xf32>
    %cst_214 = arith.constant 0.000000e+00 : f32
    %163 = vector.broadcast %cst_214 : f32 to vector<40x64xf32>
    %c0_215 = arith.constant 0 : index
    %c0_216 = arith.constant 0 : index
    %164 = vector.load %arg9[%c0_215, %c0_216] : memref<40x64xf32, #tpu.memory_space<vmem>>, vector<40x64xf32>
    tpu.vector_store %arg9[%c0_215, %c0_216], %163 {strides = array<i32>} : memref<40x64xf32, #tpu.memory_space<vmem>>, vector<40x64xf32>,
    %cst_217 = arith.constant 0.000000e+00 : f32
    %165 = vector.broadcast %cst_217 : f32 to vector<40x64xf32>
    %c0_218 = arith.constant 0 : index
    %c0_219 = arith.constant 0 : index
    %166 = vector.load %arg10[%c0_218, %c0_219] : memref<40x64xf32, #tpu.memory_space<vmem>>, vector<40x64xf32>
    tpu.vector_store %arg10[%c0_218, %c0_219], %165 {strides = array<i32>} : memref<40x64xf32, #tpu.memory_space<vmem>>, vector<40x64xf32>,
    %c1_220 = arith.constant 1 : index
    %c0_221 = arith.constant 0 : index
    %167 = vector.load %arg9[%c1_220, %c0_221] : memref<40x64xf32, #tpu.memory_space<vmem>>, vector<4x64xf32>
    tpu.vector_store %arg9[%c1_220, %c0_221], %161 {strides = array<i32>} : memref<40x64xf32, #tpu.memory_space<vmem>>, vector<4x64xf32>,
    %c2_222 = arith.constant 2 : index
    %c0_223 = arith.constant 0 : index
    %168 = vector.load %arg10[%c2_222, %c0_223] : memref<40x64xf32, #tpu.memory_space<vmem>>, vector<4x64xf32>
    tpu.vector_store %arg10[%c2_222, %c0_223], %162 {strides = array<i32>} : memref<40x64xf32, #tpu.memory_space<vmem>>, vector<4x64xf32>,
    %c0_224 = arith.constant 0 : index
    %c0_225 = arith.constant 0 : index
    %169 = vector.load %arg10[%c0_224, %c0_225] : memref<40x64xf32, #tpu.memory_space<vmem>>, vector<4x64xf32>
    %c3_226 = arith.constant 3 : index
    %c0_227 = arith.constant 0 : index
    %c0_228 = arith.constant 0 : index
    %c0_229 = arith.constant 0 : index
    %170 = vector.load %arg2[%c3_226, %c0_227, %c0_228, %c0_229] : memref<4x7x64x64xf32, #tpu.memory_space<vmem>>, vector<1x1x64x64xf32>
    %171 = vector.shape_cast %170 : vector<1x1x64x64xf32> to vector<64x64xf32>
    %cst_230 = arith.constant dense<0.000000e+00> : vector<4x64xf32>
    %172 = tpu.matmul %169, %171, %cst_230 {dimension_numbers = #tpu.dot_dimension_numbers<[1], [0], [0], [1], [0, 0, 1, 1], [], []>, precision = #tpu.contract_precision<fp32>} : vector<4x64xf32>, vector<64x64xf32>, vector<4x64xf32> -> vector<4x64xf32>
    %c0_231 = arith.constant 0 : index
    %c0_232 = arith.constant 0 : index
    %173 = vector.load %arg9[%c0_231, %c0_232] : memref<40x64xf32, #tpu.memory_space<vmem>>, vector<4x64xf32>
    %c3_233 = arith.constant 3 : index
    %c1_234 = arith.constant 1 : index
    %c0_235 = arith.constant 0 : index
    %c0_236 = arith.constant 0 : index
    %174 = vector.load %arg2[%c3_233, %c1_234, %c0_235, %c0_236] : memref<4x7x64x64xf32, #tpu.memory_space<vmem>>, vector<1x1x64x64xf32>
    %175 = vector.shape_cast %174 : vector<1x1x64x64xf32> to vector<64x64xf32>
    %cst_237 = arith.constant dense<0.000000e+00> : vector<4x64xf32>
    %176 = tpu.matmul %173, %175, %cst_237 {dimension_numbers = #tpu.dot_dimension_numbers<[1], [0], [0], [1], [0, 0, 1, 1], [], []>, precision = #tpu.contract_precision<fp32>} : vector<4x64xf32>, vector<64x64xf32>, vector<4x64xf32> -> vector<4x64xf32>
    %177 = arith.addf %172, %176 : vector<4x64xf32>
    %c1_238 = arith.constant 1 : index
    %c0_239 = arith.constant 0 : index
    %178 = vector.load %arg10[%c1_238, %c0_239] : memref<40x64xf32, #tpu.memory_space<vmem>>, vector<4x64xf32>
    %c3_240 = arith.constant 3 : index
    %c2_241 = arith.constant 2 : index
    %c0_242 = arith.constant 0 : index
    %c0_243 = arith.constant 0 : index
    %179 = vector.load %arg2[%c3_240, %c2_241, %c0_242, %c0_243] : memref<4x7x64x64xf32, #tpu.memory_space<vmem>>, vector<1x1x64x64xf32>
    %180 = vector.shape_cast %179 : vector<1x1x64x64xf32> to vector<64x64xf32>
    %cst_244 = arith.constant dense<0.000000e+00> : vector<4x64xf32>
    %181 = tpu.matmul %178, %180, %cst_244 {dimension_numbers = #tpu.dot_dimension_numbers<[1], [0], [0], [1], [0, 0, 1, 1], [], []>, precision = #tpu.contract_precision<fp32>} : vector<4x64xf32>, vector<64x64xf32>, vector<4x64xf32> -> vector<4x64xf32>
    %182 = arith.addf %177, %181 : vector<4x64xf32>
    %c1_245 = arith.constant 1 : index
    %c0_246 = arith.constant 0 : index
    %183 = vector.load %arg9[%c1_245, %c0_246] : memref<40x64xf32, #tpu.memory_space<vmem>>, vector<4x64xf32>
    %c3_247 = arith.constant 3 : index
    %c3_248 = arith.constant 3 : index
    %c0_249 = arith.constant 0 : index
    %c0_250 = arith.constant 0 : index
    %184 = vector.load %arg2[%c3_247, %c3_248, %c0_249, %c0_250] : memref<4x7x64x64xf32, #tpu.memory_space<vmem>>, vector<1x1x64x64xf32>
    %185 = vector.shape_cast %184 : vector<1x1x64x64xf32> to vector<64x64xf32>
    %cst_251 = arith.constant dense<0.000000e+00> : vector<4x64xf32>
    %186 = tpu.matmul %183, %185, %cst_251 {dimension_numbers = #tpu.dot_dimension_numbers<[1], [0], [0], [1], [0, 0, 1, 1], [], []>, precision = #tpu.contract_precision<fp32>} : vector<4x64xf32>, vector<64x64xf32>, vector<4x64xf32> -> vector<4x64xf32>
    %187 = arith.addf %182, %186 : vector<4x64xf32>
    %c2_252 = arith.constant 2 : index
    %c0_253 = arith.constant 0 : index
    %188 = vector.load %arg10[%c2_252, %c0_253] : memref<40x64xf32, #tpu.memory_space<vmem>>, vector<4x64xf32>
    %c3_254 = arith.constant 3 : index
    %c4_255 = arith.constant 4 : index
    %c0_256 = arith.constant 0 : index
    %c0_257 = arith.constant 0 : index
    %189 = vector.load %arg2[%c3_254, %c4_255, %c0_256, %c0_257] : memref<4x7x64x64xf32, #tpu.memory_space<vmem>>, vector<1x1x64x64xf32>
    %190 = vector.shape_cast %189 : vector<1x1x64x64xf32> to vector<64x64xf32>
    %cst_258 = arith.constant dense<0.000000e+00> : vector<4x64xf32>
    %191 = tpu.matmul %188, %190, %cst_258 {dimension_numbers = #tpu.dot_dimension_numbers<[1], [0], [0], [1], [0, 0, 1, 1], [], []>, precision = #tpu.contract_precision<fp32>} : vector<4x64xf32>, vector<64x64xf32>, vector<4x64xf32> -> vector<4x64xf32>
    %192 = arith.addf %187, %191 : vector<4x64xf32>
    %c2_259 = arith.constant 2 : index
    %c0_260 = arith.constant 0 : index
    %193 = vector.load %arg9[%c2_259, %c0_260] : memref<40x64xf32, #tpu.memory_space<vmem>>, vector<4x64xf32>
    %c3_261 = arith.constant 3 : index
    %c5_262 = arith.constant 5 : index
    %c0_263 = arith.constant 0 : index
    %c0_264 = arith.constant 0 : index
    %194 = vector.load %arg2[%c3_261, %c5_262, %c0_263, %c0_264] : memref<4x7x64x64xf32, #tpu.memory_space<vmem>>, vector<1x1x64x64xf32>
    %195 = vector.shape_cast %194 : vector<1x1x64x64xf32> to vector<64x64xf32>
    %cst_265 = arith.constant dense<0.000000e+00> : vector<4x64xf32>
    %196 = tpu.matmul %193, %195, %cst_265 {dimension_numbers = #tpu.dot_dimension_numbers<[1], [0], [0], [1], [0, 0, 1, 1], [], []>, precision = #tpu.contract_precision<fp32>} : vector<4x64xf32>, vector<64x64xf32>, vector<4x64xf32> -> vector<4x64xf32>
    %197 = arith.addf %192, %196 : vector<4x64xf32>
    %c3_266 = arith.constant 3 : index
    %c0_267 = arith.constant 0 : index
    %198 = vector.load %arg10[%c3_266, %c0_267] : memref<40x64xf32, #tpu.memory_space<vmem>>, vector<4x64xf32>
    %c3_268 = arith.constant 3 : index
    %c6_269 = arith.constant 6 : index
    %c0_270 = arith.constant 0 : index
    %c0_271 = arith.constant 0 : index
    %199 = vector.load %arg2[%c3_268, %c6_269, %c0_270, %c0_271] : memref<4x7x64x64xf32, #tpu.memory_space<vmem>>, vector<1x1x64x64xf32>
    %200 = vector.shape_cast %199 : vector<1x1x64x64xf32> to vector<64x64xf32>
    %cst_272 = arith.constant dense<0.000000e+00> : vector<4x64xf32>
    %201 = tpu.matmul %198, %200, %cst_272 {dimension_numbers = #tpu.dot_dimension_numbers<[1], [0], [0], [1], [0, 0, 1, 1], [], []>, precision = #tpu.contract_precision<fp32>} : vector<4x64xf32>, vector<64x64xf32>, vector<4x64xf32> -> vector<4x64xf32>
    %202 = arith.addf %197, %201 : vector<4x64xf32>
    %cst_273 = arith.constant 0.000000e+00 : f32
    %203 = vector.broadcast %cst_273 : f32 to vector<4x64xf32>
    %204 = arith.maximumf %202, %203 : vector<4x64xf32>
    %c3_274 = arith.constant 3 : index
    %c0_275 = arith.constant 0 : index
    %c0_276 = arith.constant 0 : index
    %205 = vector.load %arg3[%c3_274, %c0_275, %c0_276] : memref<4x1x64xf32, #tpu.memory_space<vmem>>, vector<1x1x64xf32>
    %206 = vector.shape_cast %205 : vector<1x1x64xf32> to vector<1x64xf32>
    %207 = vector.broadcast %206 : vector<1x64xf32> to vector<4x64xf32>
    %208 = arith.mulf %204, %207 : vector<4x64xf32>
    %c3_277 = arith.constant 3 : index
    %c0_278 = arith.constant 0 : index
    %c0_279 = arith.constant 0 : index
    %209 = vector.load %arg4[%c3_277, %c0_278, %c0_279] : memref<4x1x64xf32, #tpu.memory_space<vmem>>, vector<1x1x64xf32>
    %210 = vector.shape_cast %209 : vector<1x1x64xf32> to vector<1x64xf32>
    %211 = vector.broadcast %210 : vector<1x64xf32> to vector<4x64xf32>
    %212 = arith.addf %208, %211 : vector<4x64xf32>
    %cst_280 = arith.constant dense<0xFF800000> : vector<64xf32>
    %213 = vector.multi_reduction <maximumf>, %212, %cst_280 [0] : vector<4x64xf32> to vector<64xf32>
    %214 = vector.shape_cast %213 : vector<64xf32> to vector<1x64xf32>
    %c0_281 = arith.constant 0 : index
    %c0_282 = arith.constant 0 : index
    %215 = vector.load %arg5[%c0_281, %c0_282] : memref<64x10xf32, #tpu.memory_space<vmem>>, vector<64x10xf32>
    %cst_283 = arith.constant dense<0.000000e+00> : vector<1x10xf32>
    %216 = tpu.matmul %214, %215, %cst_283 {dimension_numbers = #tpu.dot_dimension_numbers<[1], [0], [0], [1], [0, 0, 1, 1], [], []>, precision = #tpu.contract_precision<fp32>} : vector<1x64xf32>, vector<64x10xf32>, vector<1x10xf32> -> vector<1x10xf32>
    %c0_284 = arith.constant 0 : index
    %c0_285 = arith.constant 0 : index
    %217 = vector.load %arg6[%c0_284, %c0_285] : memref<1x10xf32, #tpu.memory_space<vmem>>, vector<1x10xf32>
    %218 = arith.addf %216, %217 : vector<1x10xf32>
    %c0_286 = arith.constant 0 : index
    %c0_287 = arith.constant 0 : index
    %c0_288 = arith.constant 0 : index
    %219 = vector.load %arg7[%c0_286, %c0_287, %c0_288] : memref<1x1x10xf32, #tpu.memory_space<vmem>>, vector<1x1x10xf32>
    %220 = vector.shape_cast %219 : vector<1x1x10xf32> to vector<1x10xf32>
    %221 = vector.shape_cast %218 : vector<1x10xf32> to vector<1x1x10xf32>
    tpu.vector_store %arg7[%c0_286, %c0_287, %c0_288], %221 {strides = array<i32>} : memref<1x1x10xf32, #tpu.memory_space<vmem>>, vector<1x1x10xf32>,
    return
  }
  func.func @transform_0(%arg0: i32) -> (i32, i32, i32) {
    %c0_i32 = arith.constant 0 : i32
    %c0_i32_0 = arith.constant 0 : i32
    %c0_i32_1 = arith.constant 0 : i32
    return %arg0, %c0_i32, %c0_i32_0 : i32, i32, i32
  }
  func.func @transform_1(%arg0: i32) -> (i32, i32, i32, i32) {
    %c0_i32 = arith.constant 0 : i32
    %c0_i32_0 = arith.constant 0 : i32
    %c0_i32_1 = arith.constant 0 : i32
    %c0_i32_2 = arith.constant 0 : i32
    %c0_i32_3 = arith.constant 0 : i32
    return %c0_i32, %c0_i32_0, %c0_i32_1, %c0_i32_2 : i32, i32, i32, i32
  }
  func.func @transform_2(%arg0: i32) -> (i32, i32, i32) {
    %c0_i32 = arith.constant 0 : i32
    %c0_i32_0 = arith.constant 0 : i32
    %c0_i32_1 = arith.constant 0 : i32
    %c0_i32_2 = arith.constant 0 : i32
    return %c0_i32, %c0_i32_0, %c0_i32_1 : i32, i32, i32
  }
  func.func @transform_3(%arg0: i32) -> (i32, i32, i32) {
    %c0_i32 = arith.constant 0 : i32
    %c0_i32_0 = arith.constant 0 : i32
    %c0_i32_1 = arith.constant 0 : i32
    %c0_i32_2 = arith.constant 0 : i32
    return %c0_i32, %c0_i32_0, %c0_i32_1 : i32, i32, i32
  }
  func.func @transform_4(%arg0: i32) -> (i32, i32) {
    %c0_i32 = arith.constant 0 : i32
    %c0_i32_0 = arith.constant 0 : i32
    %c0_i32_1 = arith.constant 0 : i32
    return %c0_i32, %c0_i32_0 : i32, i32
  }
  func.func @transform_5(%arg0: i32) -> (i32, i32) {
    %c0_i32 = arith.constant 0 : i32
    %c0_i32_0 = arith.constant 0 : i32
    %c0_i32_1 = arith.constant 0 : i32
    return %c0_i32, %c0_i32_0 : i32, i32
  }
  func.func @transform_6(%arg0: i32) -> (i32, i32, i32) {
    %c0_i32 = arith.constant 0 : i32
    %c0_i32_0 = arith.constant 0 : i32
    %c0_i32_1 = arith.constant 0 : i32
    return %arg0, %c0_i32, %c0_i32_0 : i32, i32, i32
  }
}

</mosaic_0001>

<bundles_post_ra>
// kernel: conv1d_forward.1
= control target key start
LH: loop header
LB: loop body
LE: loop exit
PB: predicated region body
PF: predicated region fallthrough
CT: control target
= control target key end

     0   :  { %11 = vsyncpa [#allocation6], 0  ;;  %s30471_s0 = inlined_call_operand.vmem [shape: f32[2,64,64], index: 0, kind: input, shape index: {}]   ;;  %s30472_s1 = inlined_call_operand.hbm [shape: f32[4,7,64,64], index: 1, kind: input, shape index: {}]   ;;  %s30473_s2 = inlined_call_operand.vmem [shape: f32[4,1,64], index: 2, kind: input, shape index: {}]   ;;  %s30474_s3 = inlined_call_operand.vmem [shape: f32[4,1,64], index: 3, kind: input, shape index: {}]   ;;  %s30475_s4 = inlined_call_operand.vmem [shape: f32[64,10], index: 4, kind: input, shape index: {}]   ;;  %s30476_s5 = inlined_call_operand.vmem [shape: f32[1,10], index: 5, kind: input, shape index: {}]   ;;  %s30477_s6 = inlined_call_operand.hbm [shape: f32[2,1,10], index: 6, kind: output, shape index: {}]  }
   0x1   :  { %12 = vsyncpa [#allocation7], 0 }
   0x2   :  { %14 = vsyncpa [#allocation7 + $0x1], 0  ;;  %s26071_s21 = smov 0   ;;  %s26073_s22 = smov 0  }
   0x3   :  { %s26075_s23 = smov 0   ;;  %s26077_s24 = smov 0  }
   0x4 LB: > { %s26092_s25 = sadd.s32 4294967295, %s26027_s24   ;;  %s17834_s26 = sadd.s32 4294967294, %s26027_s24   ;;  %s26027_s24 = sphi %s26077_s24, %s30576_s24   ;;  %s26023_s23 = sphi %s26075_s23, %s30575_s23   ;;  %s26019_s22 = sphi %s26073_s22, %s30574_s22   ;;  %s26015_s21 = sphi %s26071_s21, %s30573_s21  }
   0x5   : > { %s26096_s27 = sadd.s32 1, %s26027_s24   ;;  %s158_s28 = sadd.s32 1, %s26023_s23 }
   0x6   : > { %s155_s29 = ssub.s32 %s26027_s24, %s26096_s27  ;;  %p168_p0 = scmp.ne.s32.totalorder %s26023_s23, %s26019_s22 }
   0x7   : > { %p156_p1 = scmp.eq.s32.totalorder %s155_s29, 0  ;;  %p169_p2 = scmp.eq.s32.totalorder %s26092_s25, 1 }
   0x8   : > { %p174_p3 = scmp.ne.s32.totalorder %s26019_s22, %s26015_s21  ;;  %p175_p4 = scmp.eq.s32.totalorder %s17834_s26, 1 }
   0x9   : > { %s26107_s30 = scalar_select %p156_p1, %s26023_s23, %s158_s28  }
   0xa   : > { %p26109_p5 = por %p169_p2, %p168_p0  ;;  %p26113_p6 = por %p175_p4, %p174_p3 }
   0xb   : > { %p17835_p7 = scmp.ge.s32.totalorder %s26027_s24, 1  ;;  %p182_p8 = scmp.lt.s32.totalorder %s26027_s24, 3 }
   0xc   : > { %s30521_s7 = scalar_select %p26109_p5, 1, 0 }
   0xd   : > { %s30522_s8 = scalar_select %p26113_p6, 1, 0 }
   0xe   : > { %p30478_p9 = scmp.eq.s32.totalorder %s26092_s25, 0  ;;  %p26120_p10 = pnand %p17835_p7, %p182_p8 }
   0xf   : > { %s26029_s10 = smov [#allocation5]   ;;  %s25933_s15 = scalar_lea.hbm %s30472_s1, 28672 }
  0x10   : > { %s30523_s9 = scalar_select %p26120_p10, 1, 0 }
  0x11   : > { %s194_s11 = sshll.u32 %s26029_s10, 4  ;;  %p25884_p11 = pneg %p26120_p10  ;;  %s195_s11 = int_to_ptr.vmem [resolvable:$true] %s194_s11 }
  0x12   : > { %p25934_p13 = scmp.ne.s32.totalorder %s30472_s1, %s25933_s15  ;;  %p25940_p3 = scmp.lt.u32.totalorder %s25933_s15, %s30472_s1 }
  0x13   : > { %p26128_p12 = pnand %p30478_p9, %p25884_p11 }
  0x15   : > { %p25935_p0 = pneg %p26128_p12 }
  0x17   : > { %p25936_p1 = pnand %p25935_p0, %p25934_p13 }
  0x19   : > { %p25937_p2 = pneg %p25936_p1 }
  0x1b   : > { %p25942_p4 = pnand %p25940_p3, %p25937_p2 }
  0x1d   : > { %25945 = shalt.err (!%p25942_p4)
}
  0x1e   : > { %s25946_s20 = scalar_lea.vmem %s195_s11, 28672  ;;  %p25954_p9 = scmp.lt.s32.totalorder %s195_s11, %s195_s11 }
  0x1f   : > { %p25947_p7 = scmp.ne.s32.totalorder %s195_s11, %s25946_s20  ;;  %p25955_p6 = scmp.lt.s32.totalorder %s25946_s20, %s25946_s20 }
  0x21   : > { %p25949_p8 = pnand %p25947_p7, %p25935_p0  ;;  %p25956_p5 = por %p25955_p6, %p25954_p9 }
  0x23   : > { %p25950_p11 = pneg %p25949_p8 }
  0x25   : > { %p25957_p10 = pnand %p25956_p5, %p25950_p11 }
  0x27   : > { %25960 = shalt.err (!%p25957_p10)
}
  0x28   : > { %s26030_s26 = smov 128   ;;  %s26031_s28 = smov 8  }
  0x29   : > { %25887 = dma.hbm_to_vmem [thread:$0]  (!%p26128_p12), %s30472_s1, 28672, %s195_s11, [#allocation6], %s26030_s26, %s26030_s26, %s26031_s28  }
  0x2a   : > { %p30525_p13 = scmp.ne.s32.totalorder %s30523_s9, 0 }
  0x2b   : > { %p30526_p1 = scmp.eq.s32.totalorder (!%p30525_p13), %s26092_s25, 0 }
  0x2c   : > { %230 = sbr.rel (%p30525_p13) target bundleno = 3944 (0xf68), region = 44 }
  0x33   : > { %26006 = dma.done.wait (%p30526_p1), [#allocation6], 28672   ;;  %p30527_p0 = pmov %p30526_p1 }
  0x34   : > { %p259_p5 = scmp.lt.s32.totalorder %s26092_s25, 1  ;;  %vm279_vm0 = vcmask 523264   ;;  %v30493_v0 = vmov 0.0   ;;  %v315_v1 = vld [vmem:[#allocation5 + $0x40] sm:$0xff]  ;;  %v316_v2 = vld [vmem:[#allocation5 + $0x48] sm:$0xff]  ;;  %v317_v3 = vld [vmem:[#allocation5 + $0x50] sm:$0xff] }
  0x35   : > { %26008 = vsyncadd (%p30527_p0), [#allocation6], 4294938624  ;;  %280 = vst.msk [vmem:[#allocation3] sm:$0xff] %vm279_vm0, %v30493_v0  ;;  %v336_v4 = vand.u32 4294901760, %v315_v1  ;;  %v339_v5 = vand.u32 4294901760, %v316_v2  ;;  %v318_v6 = vld [vmem:[#allocation5 + $0x58] sm:$0xff] }
  0x36   : > { %281 = vst.msk [vmem:[#allocation3 + $0x8] sm:$0xff] %vm279_vm0, %v30493_v0  ;;  %282 = vst.msk [vmem:[#allocation3 + $0x10] sm:$0xff] %vm279_vm0, %v30493_v0  ;;  %s260_s9 = scalar_select %p259_p5, %s26092_s25, 1  ;;  %v342_v7 = vand.u32 4294901760, %v317_v3  ;;  %v319_v8 = vld [vmem:[#allocation5 + $0x60] sm:$0xff]  ;;  %v320_v9 = vld [vmem:[#allocation5 + $0x68] sm:$0xff] }
  0x37   : > { %283 = vst.msk [vmem:[#allocation3 + $0x18] sm:$0xff] %vm279_vm0, %v30493_v0  ;;  %284 = vst.msk [vmem:[#allocation3 + $0x20] sm:$0xff] %vm279_vm0, %v30493_v0  ;;  %v345_v10 = vand.u32 4294901760, %v318_v6  ;;  %v348_v11 = vand.u32 4294901760, %v319_v8  ;;  %v26181_v12 = vpack.c.bf16 %v339_v5, %v336_v4  ;;  %v351_v13 = vand.u32 4294901760, %v320_v9  ;;  %v26183_v14 = vld [vmem:[#allocation5 + $0x70] sm:$0xff] }
  0x38   : > { %285 = vst.msk [vmem:[#allocation4] sm:$0xff] %vm279_vm0, %v30493_v0  ;;  %286 = vst.msk [vmem:[#allocation4 + $0x8] sm:$0xff] %vm279_vm0, %v30493_v0  ;;  %s17866_s11 = sshll.u32 %s260_s9, 6  ;;  %v26189_v18 = vld [vmem:[#allocation5 + $0x78] sm:$0xff]  ;;  %v354_v21 = vand.u32 4294901760, %v26183_v14  ;;  %v26206_v24 = vsub.f32 %v315_v1, %v336_v4  ;;  %v26208_v25 = vsub.f32 %v316_v2, %v339_v5  ;;  %v26217_v29 = vsub.f32 %v317_v3, %v342_v7  ;;  %s257_s17 = sand.u32 1, %s26019_s22  }
  0x39   : > { %287 = vst.msk [vmem:[#allocation4 + $0x10] sm:$0xff] %vm279_vm0, %v30493_v0  ;;  %288 = vst.msk [vmem:[#allocation4 + $0x18] sm:$0xff] %vm279_vm0, %v30493_v0  ;;  %s26179_s14 = scalar_lea.vmem %s30471_s0, %s17866_s11  ;;  %v26187_v17 = vpack.c.bf16 %v345_v10, %v342_v7  ;;  %23082 = vmatprep.subr.bf16.mxu0 %v26181_v12  ;;  %23034 = vmatprep.subr.bf16.mxu1 %v26181_v12  ;;  %v26203_v22 = vpack.c.bf16 %v351_v13, %v348_v11  ;;  %v357_v23 = vand.u32 4294901760, %v26189_v18  ;;  %vm26034_vm1 = vmmov 0   ;;  %s17863_s20 = sshll.u32 %s26092_s25, 4 }
  0x3a   : > { %289 = vst.msk [vmem:[#allocation4 + $0x20] sm:$0xff] %vm279_vm0, %v30493_v0  ;;  %v264_v15 = vld [vmem:[%s26179_s14] ss:$2 sm:$0xff]  ;;  %v17842_v16 = vld [vmem:[%s26179_s14 + $0x10] ss:$2 sm:$0xff]  ;;  %23084 = vmatpush3.bf16.msra.mxu0 %v26181_v12  ;;  %23036 = vmatpush3.bf16.msra.mxu1 %v26181_v12  ;;  %v30492_v33 = vand.u32 4294901760, %v26206_v24  ;;  %v26227_v36 = vsub.f32 %v318_v6, %v345_v10  ;;  %v26233_v39 = vsub.f32 %v319_v8, %v348_v11  ;;  %s30429_s9 = scalar_lea.hbm %s30477_s6, %s17863_s20 }
  0x3b   : > { %290 = vst.msk [vmem:[#allocation3 + $0x1] sm:$0xff] %vm279_vm0, %v264_v15  ;;  %291 = vst.msk [vmem:[#allocation3 + $0x9] sm:$0xff] %vm279_vm0, %v17842_v16  ;;  %v17843_v19 = vld [vmem:[%s26179_s14 + $0x20] ss:$2 sm:$0xff]  ;;  %v17844_v20 = vld [vmem:[%s26179_s14 + $0x30] ss:$2 sm:$0xff]  ;;  %23086 = vmatprep.subr.bf16.mxu0 %v26187_v17  ;;  %23038 = vmatprep.subr.bf16.mxu1 %v26187_v17  ;;  %v26223_v31 = vpack.c.bf16 %v357_v23, %v354_v21  ;;  %v26243_v47 = vsub.f32 %v320_v9, %v351_v13 }
  0x3c   : > { %292 = vst.msk [vmem:[#allocation3 + $0x11] sm:$0xff] %vm279_vm0, %v17843_v19  ;;  %293 = vst.msk [vmem:[#allocation3 + $0x19] sm:$0xff] %vm279_vm0, %v17844_v20  ;;  %v17845_v26 = vld [vmem:[%s26179_s14 + $0x1] ss:$2 sm:$0xff]  ;;  %v17846_v27 = vld [vmem:[%s26179_s14 + $0x11] ss:$2 sm:$0xff]  ;;  %v26274_v59 = vsub.f32 %v26183_v14, %v354_v21  ;;  %v26286_v63 = vsub.f32 %v26189_v18, %v357_v23 }
  0x3d   : > { %294 = vst.msk [vmem:[#allocation4 + $0x2] sm:$0xff] %vm279_vm0, %v17845_v26  ;;  %295 = vst.msk [vmem:[#allocation4 + $0xa] sm:$0xff] %vm279_vm0, %v17846_v27  ;;  %v17847_v28 = vld [vmem:[%s26179_s14 + $0x21] ss:$2 sm:$0xff]  ;;  %v17848_v30 = vld [vmem:[%s26179_s14 + $0x31] ss:$2 sm:$0xff] }
  0x3e   : > { %23088 = vmatpush3.bf16.msra.mxu0 %v26187_v17  ;;  %296 = vst.msk [vmem:[#allocation4 + $0x12] sm:$0xff] %vm279_vm0, %v17847_v28  ;;  %23040 = vmatpush3.bf16.msra.mxu1 %v26187_v17  ;;  %v30491_v34 = vand.u32 4294901760, %v26208_v25  ;;  %297 = vst.msk [vmem:[#allocation4 + $0x1a] sm:$0xff] %vm279_vm0, %v17848_v30  ;;  %v30488_v46 = vand.u32 4294901760, %v26217_v29  ;;  %v30487_v53 = vand.u32 4294901760, %v26227_v36  ;;  %v30486_v61 = vand.u32 4294901760, %v26233_v39 }
  0x3f   : > { %23090 = vmatprep.subr.bf16.mxu0 %v26203_v22  ;;  %23042 = vmatprep.subr.bf16.mxu1 %v26203_v22  ;;  %v30485_v62 = vand.u32 4294901760, %v26243_v47  ;;  %v30484_v3 = vand.u32 4294901760, %v26274_v59  ;;  %v30483_v4 = vand.u32 4294901760, %v26286_v63  ;;  %v302_v9 = vld [vmem:[#allocation5] sm:$0xff]  ;;  %v303_v10 = vld [vmem:[#allocation5 + $0x8] sm:$0xff]  ;;  %v304_v15 = vld [vmem:[#allocation5 + $0x10] sm:$0xff] }
  0x40   : > { %v23097_v51 = vpack.c.bf16 %v30491_v34, %v30492_v33  ;;  %v23101_v60 = vpack.c.bf16 %v30487_v53, %v30488_v46  ;;  %v1017_v13 = vand.u32 4294901760, %v303_v10  ;;  %v305_v16 = vld [vmem:[#allocation5 + $0x18] sm:$0xff]  ;;  %v1020_v26 = vand.u32 4294901760, %v304_v15  ;;  %s258_s26 = scalar_lea.vmem [#allocation8], %s257_s17  ;;  %s17755_s11 = scalar_lea.sflag [#allocation7], %s257_s17 }
  0x41   : > { %v23105_v2 = vpack.c.bf16 %v30485_v62, %v30486_v61  ;;  %v23109_v5 = vpack.c.bf16 %v30483_v4, %v30484_v3  ;;  %v1023_v27 = vand.u32 4294901760, %v305_v16  ;;  %vm13319_vm2 = vcmask 519168   ;;  %s17767_s28 = sshll.u32 %s258_s26, 4  ;;  %p30571_p9 = scmp.ne.s32.totalorder %s30521_s7, 0  ;;  %s30431_s28 = int_to_ptr.vmem [resolvable:$true] %s17767_s28 }
  0x42   : > { %v310_v32 = vld [vmem:[#allocation3] sm:$0xff]  ;;  %v311_v35 = vld [vmem:[#allocation3 + $0x8] sm:$0xff]  ;;  %23092 = vmatpush3.bf16.msra.mxu0 %v26203_v22  ;;  %23044 = vmatpush3.bf16.msra.mxu1 %v26203_v22  ;;  %v26323_v20 = vsub.f32 %v303_v10, %v1017_v13  ;;  %vm17752_vm3 = vcmask 73728   ;;  %s25961_s12 = scalar_lea.vmem %s30431_s28, 16  ;;  %s26035_s25 = smov [#allocation8]  }
  0x43   : > { %v324_v37 = vsel %vm279_vm0, %v310_v32, 0  ;;  %v327_v38 = vsel %vm279_vm0, %v311_v35, 0  ;;  %v312_v40 = vld [vmem:[#allocation3 + $0x10] sm:$0xff]  ;;  %v313_v41 = vld [vmem:[#allocation3 + $0x18] sm:$0xff]  ;;  %23094 = vmatprep.subr.bf16.mxu0 %v26223_v31  ;;  %23046 = vmatprep.subr.bf16.mxu1 %v26223_v31  ;;  %p25962_p6 = scmp.ne.s32.totalorder %s30431_s28, %s25961_s12  ;;  %s25965_s13 = sshll.u32 %s26035_s25, 4  ;;  %s25966_s13 = int_to_ptr.vmem [resolvable:$false] %s25965_s13 }
  0x44   : > { %v26235_v42 = vand.u32 4294901760, %v324_v37  ;;  %v26237_v43 = vand.u32 4294901760, %v327_v38  ;;  %v330_v44 = vsel %vm279_vm0, %v312_v40, 0  ;;  %v333_v45 = vsel %vm279_vm0, %v313_v41, 0  ;;  %v298_v6 = vld [vmem:[#allocation4] sm:$0xff]  ;;  %v299_v14 = vld [vmem:[#allocation4 + $0x8] sm:$0xff]  ;;  %p25968_p2 = scmp.lt.s32.totalorder %s30431_s28, %s25966_s13 }
  0x45   : > { %v26245_v48 = vand.u32 4294901760, %v330_v44  ;;  %v26247_v49 = vand.u32 4294901760, %v333_v45  ;;  %v1002_v7 = vsel %vm279_vm0, %v298_v6, 0  ;;  %v300_v18 = vld [vmem:[#allocation4 + $0x10] sm:$0xff]  ;;  %v1005_v21 = vsel %vm279_vm0, %v299_v14, 0  ;;  %v301_v30 = vld [vmem:[#allocation4 + $0x18] sm:$0xff]  ;;  %p25963_p10 = pnand %p25962_p6, %p30571_p9 }
  0x46   : > { %v26252_v50 = vsub.f32 %v324_v37, %v26235_v42  ;;  %v26259_v52 = vsub.f32 %v327_v38, %v26237_v43  ;;  %23096 = vmatpush3.bf16.msra.mxu0 %v26223_v31  ;;  %23048 = vmatpush3.bf16.msra.mxu1 %v26223_v31  ;;  %v26311_v8 = vand.u32 4294901760, %v1002_v7  ;;  %v1008_v28 = vsel %vm279_vm0, %v300_v18, 0  ;;  %v306_v32 = vld [vmem:[#allocation5 + $0x20] sm:$0xff]  ;;  %v307_v35 = vld [vmem:[#allocation5 + $0x28] sm:$0xff]  ;;  %v308_v37 = vld [vmem:[#allocation5 + $0x30] sm:$0xff]  ;;  %s25967_s14 = scalar_lea.vmem %s25966_s13, 32 }
  0x47   : > { %v26263_v54 = vsub.f32 %v330_v44, %v26245_v48  ;;  %v26269_v57 = vsub.f32 %v333_v45, %v26247_v49  ;;  %23098 = vmatprep.subr.bf16.mxu0 %v23097_v51  ;;  %v309_v38 = vld [vmem:[#allocation5 + $0x38] sm:$0xff]  ;;  %v26334_v41 = vand.u32 4294901760, %v1005_v21  ;;  %v26340_v45 = vsub.f32 %v304_v15, %v1020_v26  ;;  %p25964_p12 = pneg %p25963_p10  ;;  %p25969_p3 = scmp.lt.s32.totalorder %s25967_s14, %s25961_s12 }
  0x48   : > { %v30490_v55 = vand.u32 4294901760, %v26252_v50  ;;  %v30489_v56 = vand.u32 4294901760, %v26259_v52  ;;  %v26318_v11 = vsub.f32 %v1002_v7, %v26311_v8  ;;  %v1029_v6 = vand.u32 4294901760, %v307_v35 }
  0x49   : > { %v30482_v58 = vand.u32 4294901760, %v26263_v54  ;;  %v30481_v1 = vand.u32 4294901760, %v26269_v57  ;;  %v26348_v7 = vsub.f32 %v305_v16, %v1023_v27  ;;  %v1143_v16 = vand.u32 4294901760, %v26340_v45  ;;  %p25970_p4 = por %p25969_p3, %p25968_p2 }
  0x4a   : > { %19683 = vmatprep.mubr.f32.mxu0 %v30490_v55 }
  0x4b   : > { %19684 = vmatmul.mubr.f32.vlgmr.msra.gmra.mrb[0].mxu0 %v30489_v56  ;;  %p25971_p7 = pnand %p25970_p4, %p25964_p12 }
  0x4c   : > { %23100 = vmatpush3.bf16.msra.mxu0 %v23097_v51  ;;  %19686 = vmatprep.mubr.f32.mxu0 %v30482_v58  ;;  %v26342_v51 = vand.u32 4294901760, %v1008_v28 }
  0x4d   : > { %23102 = vmatprep.subr.bf16.mxu0 %v23101_v60 }
  0x4f   : > { %19687 = vmatmul.mubr.f32.gmra.mrb[2].mxu0 %v30481_v1 }
  0x50   : > { %23104 = vmatpush3.bf16.msra.mxu0 %v23101_v60  ;;  %19705 = vmatprep.mubr.f32.mxu0 %v26235_v42  ;;  %v1011_v60 = vsel %vm279_vm0, %v301_v30, 0  ;;  %v26374_v30 = vsub.f32 %v307_v35, %v1029_v6 }
  0x51   : > { %23106 = vmatprep.subr.bf16.mxu0 %v23105_v2  ;;  %v26360_v14 = vand.u32 4294901760, %v1011_v60 }
  0x54   : > { %23108 = vmatpush3.bf16.msra.mxu0 %v23105_v2  ;;  %v26346_v2 = vpack.c.bf16 %v1023_v27, %v1020_v26  ;;  %v26368_v26 = vsub.f32 %v1008_v28, %v26342_v51 }
  0x55   : > { %23110 = vmatprep.subr.bf16.mxu0 %v23109_v5 }
  0x58   : > { %23112 = vmatpush3.bf16.msra.mxu0 %v23109_v5  ;;  %v1026_v5 = vand.u32 4294901760, %v306_v32 }
  0x59   : > { %23114 = vmatprep.subr.bf16.mxu0 %v26181_v12 }
  0x5a   : > { %v26365_v18 = vsub.f32 %v306_v32, %v1026_v5  ;;  %v26371_v27 = vpack.c.bf16 %v1029_v6, %v1026_v5  ;;  %v26381_v32 = vsub.f32 %v1011_v60, %v26360_v14  ;;  %v1144_v5 = vsub.f32 %v26340_v45, %v1143_v16 }
  0x5b   : > { %19706 = vmatmul.mubr.f32.vlgmr.msra.gmra.mrb[0].mxu0 %v26237_v43  ;;  %v1108_v6 = vand.u32 4294901760, %v26368_v26  ;;  %v1164_v60 = vand.u32 4294901760, %v26374_v30 }
  0x5c   : > { %23116 = vmatpush3.bf16.msra.mxu0 %v26181_v12  ;;  %19708 = vmatprep.mubr.f32.mxu0 %v26245_v48  ;;  %v1014_v12 = vand.u32 4294901760, %v302_v9  ;;  %v1157_v35 = vand.u32 4294901760, %v26365_v18  ;;  %v30495_v3 = vand.u32 4294901760, %v26381_v32  ;;  %v1145_v61 = vand.u32 4294901760, %v1144_v5 }
  0x5d   : > { %23118 = vmatprep.subr.bf16.mxu0 %v26187_v17 }
  0x5e   : > { %v26321_v19 = vsub.f32 %v302_v9, %v1014_v12  ;;  %v26329_v23 = vpack.c.bf16 %v1017_v13, %v1014_v12  ;;  %v1032_v9 = vand.u32 4294901760, %v308_v37  ;;  %v26358_v13 = vsub.f32 %v1005_v21, %v26334_v41 }
  0x5f   : > { %19709 = vmatmul.mubr.f32.gmra.mrb[2].mxu0 %v26247_v49  ;;  %v1150_v21 = vand.u32 4294901760, %v26348_v7  ;;  %v1158_v53 = vsub.f32 %v26365_v18, %v1157_v35  ;;  %v1119_v5 = vsub.f32 %v26381_v32, %v30495_v3 }
  0x60   : > { %23120 = vmatpush3.bf16.msra.mxu0 %v26187_v17  ;;  %19727 = vmatprep.mubr.f32.mxu0 %v26235_v42  ;;  %v1088_v17 = vand.u32 4294901760, %v26318_v11  ;;  %v1129_v40 = vand.u32 4294901760, %v26321_v19  ;;  %v1098_v58 = vand.u32 4294901760, %v26358_v13  ;;  %v26394_v4 = vsub.f32 %v308_v37, %v1032_v9 }
  0x61   : > { %23122 = vmatprep.subr.bf16.mxu0 %v26203_v22  ;;  %v1109_v37 = vsub.f32 %v26368_v26, %v1108_v6  ;;  %v1159_v46 = vand.u32 4294901760, %v1158_v53 }
  0x62   : > { %v1089_v44 = vsub.f32 %v26318_v11, %v1088_v17  ;;  %v1130_v10 = vsub.f32 %v26321_v19, %v1129_v40 }
  0x63   : > { %v1110_v56 = vand.u32 4294901760, %v1109_v37  ;;  %v23161_v37 = vpack.c.bf16 %v26323_v20, %v26321_v19  ;;  %v26476_v19 = vld [vmem:[#allocation3 + $0x2] sm:$0xff] }
  0x64   : > { %23124 = vmatpush3.bf16.msra.mxu0 %v26203_v22  ;;  %v1136_v22 = vand.u32 4294901760, %v26323_v20  ;;  %v1090_v15 = vand.u32 4294901760, %v1089_v44  ;;  %v1131_v44 = vand.u32 4294901760, %v1130_v10  ;;  %v1151_v10 = vsub.f32 %v26348_v7, %v1150_v21 }
  0x65   : > { %23126 = vmatprep.subr.bf16.mxu0 %v26223_v31 }
  0x66   : > { %v1137_v12 = vsub.f32 %v26323_v20, %v1136_v22 }
  0x68   : > { %23128 = vmatpush3.bf16.msra.mxu0 %v26223_v31  ;;  %v1035_v31 = vand.u32 4294901760, %v309_v38  ;;  %v1138_v28 = vand.u32 4294901760, %v1137_v12  ;;  %v1099_v12 = vsub.f32 %v26358_v13, %v1098_v58 }
  0x69   : > { %23130 = vmatprep.subr.bf16.mxu0 %v26329_v23 }
  0x6a   : > { %v26376_v1 = vpack.c.bf16 %v1035_v31, %v1032_v9  ;;  %v23145_v62 = vpack.c.bf16 %v1138_v28, %v1131_v44  ;;  %v1165_v9 = vsub.f32 %v26374_v30, %v1164_v60  ;;  %v1100_v28 = vand.u32 4294901760, %v1099_v12 }
  0x6b   : > { %19728 = vmatmul.mubr.f32.vlgmr.msra.gmra.mrb[0].mxu0 %v26237_v43  ;;  %v1120_v12 = vand.u32 4294901760, %v1119_v5 }
  0x6c   : > { %23132 = vmatpush3.bf16.msra.mxu0 %v26329_v23  ;;  %19730 = vmatprep.mubr.f32.mxu0 %v26245_v48 }
  0x6d   : > { %23134 = vmatprep.subr.bf16.mxu0 %v26346_v2 }
  0x6f   : > { %19731 = vmatmul.mubr.f32.gmra.mrb[2].mxu0 %v26247_v49 }
  0x70   : > { %23136 = vmatpush3.bf16.msra.mxu0 %v26346_v2  ;;  %19749 = vmatprep.mubr.f32.mxu0 %v1090_v15  ;;  %v26396_v15 = vsub.f32 %v309_v38, %v1035_v31  ;;  %v1152_v38 = vand.u32 4294901760, %v1151_v10  ;;  %v1171_v31 = vand.u32 4294901760, %v26394_v4  ;;  %v1166_v10 = vand.u32 4294901760, %v1165_v9  ;;  %v1689_v9 = vld [vmem:[#allocation5 + $0xa8] sm:$0xff] }
  0x71   : > { %23138 = vmatprep.subr.bf16.mxu0 %v26371_v27 }
  0x72   : > { %v1178_v44 = vand.u32 4294901760, %v26396_v15  ;;  %v23149_v55 = vpack.c.bf16 %v1152_v38, %v1145_v61  ;;  %v1172_v34 = vsub.f32 %v26394_v4, %v1171_v31  ;;  %v23153_v0 = vpack.c.bf16 %v1166_v10, %v1159_v46  ;;  %v1682_v38 = vld [vmem:[#allocation4 + $0x19] sm:$0xff] }
  0x73   : > { %v23197_v46 = vpack.c.bf16 %v1150_v21, %v1143_v16  ;;  %v1680_v16 = vld [vmem:[#allocation4 + $0x9] sm:$0xff] }
  0x74   : > { %23140 = vmatpush3.bf16.msra.mxu0 %v26371_v27  ;;  %v1179_v33 = vsub.f32 %v26396_v15, %v1178_v44  ;;  %v1173_v3 = vand.u32 4294901760, %v1172_v34  ;;  %v23193_v34 = vpack.c.bf16 %v1136_v22, %v1129_v40  ;;  %v1684_v40 = vld [vmem:[#allocation5 + $0x80] sm:$0xff]  ;;  %v1685_v22 = vld [vmem:[#allocation5 + $0x88] sm:$0xff] }
  0x75   : > { %23142 = vmatprep.subr.bf16.mxu0 %v26376_v1 }
  0x76   : > { %v1180_v53 = vand.u32 4294901760, %v1179_v33  ;;  %v23169_v33 = vpack.c.bf16 %v26374_v30, %v26365_v18  ;;  %v1687_v18 = vld [vmem:[#allocation5 + $0x98] sm:$0xff]  ;;  %v1688_v30 = vld [vmem:[#allocation5 + $0xa0] sm:$0xff] }
  0x78   : > { %23144 = vmatpush3.bf16.msra.mxu0 %v26376_v1  ;;  %v23157_v61 = vpack.c.bf16 %v1180_v53, %v1173_v3  ;;  %v1679_v3 = vld [vmem:[#allocation4 + $0x1] sm:$0xff] }
  0x79   : > { %23146 = vmatprep.subr.bf16.mxu0 %v23145_v62  ;;  %v1693_v20 = vsel %vm279_vm0, %v1679_v3, 0 }
  0x7b   : > { %19750 = vmatmul.mubr.f32.vlgmr.msra.gmra.mrb[0].mxu0 %v1100_v28 }
  0x7c   : > { %23148 = vmatpush3.bf16.msra.mxu0 %v23145_v62  ;;  %19752 = vmatprep.mubr.f32.mxu0 %v1110_v56  ;;  %v23165_v56 = vpack.c.bf16 %v26348_v7, %v26340_v45  ;;  %v30528_v62 = vand.u32 4294901760, %v26381_v32  ;;  %v1708_v7 = vand.u32 4294901760, %v1685_v22 }
  0x7d   : > { %23150 = vmatprep.subr.bf16.mxu0 %v23149_v55 }
  0x7f   : > { %19753 = vmatmul.mubr.f32.gmra.mrb[2].mxu0 %v1120_v12 }
  0x80   : > { %23152 = vmatpush3.bf16.msra.mxu0 %v23149_v55  ;;  %19771 = vmatprep.mubr.f32.mxu0 %v26311_v8  ;;  %v23201_v55 = vpack.c.bf16 %v1164_v60, %v1157_v35  ;;  %v26503_v60 = vsub.f32 %v1685_v22, %v1708_v7 }
  0x81   : > { %23154 = vmatprep.subr.bf16.mxu0 %v23153_v0 }
  0x84   : > { %23156 = vmatpush3.bf16.msra.mxu0 %v23153_v0  ;;  %v23173_v0 = vpack.c.bf16 %v26396_v15, %v26394_v4  ;;  %v26485_v4 = vand.u32 4294901760, %v1693_v20 }
  0x85   : > { %23158 = vmatprep.subr.bf16.mxu0 %v23157_v61 }
  0x86   : > { %v26492_v45 = vsub.f32 %v1693_v20, %v26485_v4 }
  0x88   : > { %23160 = vmatpush3.bf16.msra.mxu0 %v23157_v61  ;;  %v1702_v61 = vsel %vm279_vm0, %v1682_v38, 0 }
  0x89   : > { %23162 = vmatprep.subr.bf16.mxu0 %v23161_v37 }
  0x8b   : > { %19772 = vmatmul.mubr.f32.vlgmr.msra.gmra.mrb[0].mxu0 %v26334_v41 }
  0x8c   : > { %23164 = vmatpush3.bf16.msra.mxu0 %v23161_v37  ;;  %19774 = vmatprep.mubr.f32.mxu0 %v26342_v51 }
  0x8d   : > { %23166 = vmatprep.subr.bf16.mxu0 %v23165_v56 }
  0x8f   : > { %19775 = vmatmul.mubr.f32.gmra.mrb[2].mxu0 %v26360_v14 }
  0x90   : > { %23168 = vmatpush3.bf16.msra.mxu0 %v23165_v56  ;;  %19793 = vmatprep.mubr.f32.mxu0 %v26318_v11  ;;  %v26474_v11 = vld [vmem:[#allocation3 + $0x1] sm:$0xff]  ;;  %v1720_v56 = vand.u32 4294901760, %v1689_v9 }
  0x91   : > { %23170 = vmatprep.subr.bf16.mxu0 %v23169_v33 }
  0x94   : > { %23172 = vmatpush3.bf16.msra.mxu0 %v23169_v33  ;;  %v1827_v33 = vand.u32 4294901760, %v26503_v60 }
  0x95   : > { %23174 = vmatprep.subr.bf16.mxu0 %v23173_v0 }
  0x98   : > { %23176 = vmatpush3.bf16.msra.mxu0 %v23173_v0 }
  0x99   : > { %23178 = vmatprep.subr.bf16.mxu0 %v26329_v23 }
  0x9b   : > { %19794 = vmatmul.mubr.f32.vlgmr.msra.gmra.mrb[0].mxu0 %v26358_v13  ;;  %v1686_v13 = vld [vmem:[#allocation5 + $0x90] sm:$0xff] }
  0x9c   : > { %23180 = vmatpush3.bf16.msra.mxu0 %v26329_v23  ;;  %19796 = vmatprep.mubr.f32.mxu0 %v26368_v26  ;;  %v1681_v26 = vld [vmem:[#allocation4 + $0x11] sm:$0xff]  ;;  %v1711_v21 = vand.u32 4294901760, %v1686_v13 }
  0x9d   : > { %23182 = vmatprep.subr.bf16.mxu0 %v26346_v2  ;;  %v1699_v15 = vsel %vm279_vm0, %v1681_v26, 0 }
  0x9e   : > { %v26508_v5 = vsub.f32 %v1686_v13, %v1711_v21  ;;  %v26515_v53 = vand.u32 4294901760, %v1699_v15 }
  0x9f   : > { %19797 = vmatmul.mubr.f32.gmra.mrb[2].mxu0 %v26381_v32  ;;  %v1779_v32 = vand.u32 4294901760, %v26492_v45 }
  0xa0   : > { %23184 = vmatpush3.bf16.msra.mxu0 %v26346_v2  ;;  %19815 = vmatprep.mubr.f32.mxu0 %v1088_v17  ;;  %v30529_v17 = vmov 0.0  }
  0xa1   : > { %23186 = vmatprep.subr.bf16.mxu0 %v26371_v27  ;;  %5191 = vst.msk [vmem:[#allocation3] sm:$0xff] %vm279_vm0, %v30529_v17  ;;  %v1780_v10 = vsub.f32 %v26492_v45, %v1779_v32 }
  0xa3   : > { %v1781_v3 = vand.u32 4294901760, %v1780_v10 }
  0xa4   : > { %23188 = vmatpush3.bf16.msra.mxu0 %v26371_v27 }
  0xa5   : > { %23190 = vmatprep.subr.bf16.mxu0 %v26376_v1 }
  0xa8   : > { %23192 = vmatpush3.bf16.msra.mxu0 %v26376_v1 }
  0xa9   : > { %23194 = vmatprep.subr.bf16.mxu0 %v23193_v34 }
  0xab   : > { %19816 = vmatmul.mubr.f32.vlgmr.msra.gmra.mrb[0].mxu0 %v1098_v58  ;;  %v23205_v58 = vpack.c.bf16 %v1178_v44, %v1171_v31  ;;  %v1690_v31 = vld [vmem:[#allocation5 + $0xb0] sm:$0xff]  ;;  %v1691_v44 = vld [vmem:[#allocation5 + $0xb8] sm:$0xff] }
  0xac   : > { %23196 = vmatpush3.bf16.msra.mxu0 %v23193_v34  ;;  %19818 = vmatprep.mubr.f32.mxu0 %v1108_v6  ;;  %v1714_v6 = vand.u32 4294901760, %v1687_v18  ;;  %v1726_v34 = vand.u32 4294901760, %v1691_v44 }
  0xad   : > { %23198 = vmatprep.subr.bf16.mxu0 %v23197_v46 }
  0xae   : > { %v26519_v37 = vpack.c.bf16 %v1714_v6, %v1711_v21  ;;  %v26522_v0 = vsub.f32 %v1687_v18, %v1714_v6  ;;  %v26570_v38 = vsub.f32 %v1691_v44, %v1726_v34 }
  0xaf   : > { %19819 = vmatmul.mubr.f32.gmra.mrb[2].mxu0 %v30528_v62 }
  0xb0   : > { %23200 = vmatpush3.bf16.msra.mxu0 %v23197_v46  ;;  %19837 = vmatprep.mubr.f32.mxu0 %v26311_v8 }
  0xb1   : > { %23202 = vmatprep.subr.bf16.mxu0 %v23201_v55 }
  0xb4   : > { %23204 = vmatpush3.bf16.msra.mxu0 %v23201_v55  ;;  %v1834_v55 = vand.u32 4294901760, %v26508_v5 }
  0xb5   : > { %23206 = vmatprep.subr.bf16.mxu0 %v23205_v58 }
  0xb8   : > { %23208 = vmatpush3.bf16.msra.mxu0 %v23205_v58  ;;  %v26531_v58 = vand.u32 4294901760, %v1702_v61 }
  0xb9   : > { %23210 = vmatprep.subr.bf16.mxu0 %v26329_v23 }
  0xba   : > { %v26558_v18 = vsub.f32 %v1702_v61, %v26531_v58 }
  0xbb   : > { %19838 = vmatmul.mubr.f32.vlgmr.msra.gmra.mrb[0].mxu0 %v26334_v41 }
  0xbc   : > { %23212 = vmatpush3.bf16.msra.mxu0 %v26329_v23  ;;  %19840 = vmatprep.mubr.f32.mxu0 %v26342_v51  ;;  %v1705_v23 = vand.u32 4294901760, %v1684_v40 }
  0xbd   : > { %23214 = vmatprep.subr.bf16.mxu0 %v26346_v2 }
  0xbe   : > { %v26501_v35 = vpack.c.bf16 %v1708_v7, %v1705_v23 }
  0xbf   : > { %19841 = vmatmul.mubr.f32.gmra.mrb[2].mxu0 %v26360_v14 }
  0xc0   : > { %23216 = vmatpush3.bf16.msra.mxu0 %v26346_v2  ;;  %19859 = vmatprep.mubr.f32.mxu0 %v26311_v8  ;;  %v26497_v2 = vsub.f32 %v1684_v40, %v1705_v23  ;;  %v1696_v8 = vsel %vm279_vm0, %v1680_v16, 0  ;;  %v26538_v40 = vsub.f32 %v1689_v9, %v1720_v56  ;;  %v1828_v23 = vsub.f32 %v26503_v60, %v1827_v33 }
  0xc1   : > { %23218 = vmatprep.subr.bf16.mxu0 %v26371_v27  ;;  %v26506_v28 = vand.u32 4294901760, %v1696_v8  ;;  %v1835_v16 = vsub.f32 %v26508_v5, %v1834_v55 }
  0xc2   : > { %v1820_v12 = vand.u32 4294901760, %v26497_v2 }
  0xc3   : > { %v26526_v46 = vsub.f32 %v1696_v8, %v26506_v28  ;;  %v1836_v10 = vand.u32 4294901760, %v1835_v16 }
  0xc4   : > { %23220 = vmatpush3.bf16.msra.mxu0 %v26371_v27  ;;  %v1717_v27 = vand.u32 4294901760, %v1688_v30  ;;  %v1821_v20 = vsub.f32 %v26497_v2, %v1820_v12 }
  0xc5   : > { %23222 = vmatprep.subr.bf16.mxu0 %v26376_v1  ;;  %v1789_v13 = vand.u32 4294901760, %v26526_v46 }
  0xc6   : > { %v26529_v62 = vsub.f32 %v1688_v30, %v1717_v27  ;;  %v26544_v22 = vpack.c.bf16 %v1720_v56, %v1717_v27  ;;  %v1822_v26 = vand.u32 4294901760, %v1821_v20  ;;  %v30496_v30 = vand.u32 4294901760, %v26538_v40 }
  0xc7   : > { %v1790_v9 = vsub.f32 %v26526_v46, %v1789_v13  ;;  %v30499_v27 = vand.u32 4294901760, %v26558_v18 }
  0xc8   : > { %23224 = vmatpush3.bf16.msra.mxu0 %v26376_v1  ;;  %v1723_v1 = vand.u32 4294901760, %v1690_v31  ;;  %v30497_v21 = vand.u32 4294901760, %v26529_v62 }
  0xc9   : > { %23226 = vmatprep.subr.bf16.mxu0 %v26501_v35  ;;  %v1791_v20 = vand.u32 4294901760, %v1790_v9 }
  0xca   : > { %v26550_v7 = vpack.c.bf16 %v1726_v34, %v1723_v1  ;;  %v1849_v61 = vsub.f32 %v26529_v62, %v30497_v21 }
  0xcb   : > { %19860 = vmatmul.mubr.f32.vlgmr.msra.gmra.mrb[0].mxu0 %v26334_v41  ;;  %v26541_v41 = vsub.f32 %v1699_v15, %v26515_v53  ;;  %v26568_v15 = vsub.f32 %v1690_v31, %v1723_v1  ;;  %v1856_v31 = vsub.f32 %v26538_v40, %v30496_v30 }
  0xcc   : > { %23228 = vmatpush3.bf16.msra.mxu0 %v26501_v35  ;;  %19862 = vmatprep.mubr.f32.mxu0 %v26342_v51  ;;  %v1841_v51 = vand.u32 4294901760, %v26522_v0  ;;  %v1850_v16 = vand.u32 4294901760, %v1849_v61 }
  0xcd   : > { %23230 = vmatprep.subr.bf16.mxu0 %v26519_v37  ;;  %v30498_v8 = vand.u32 4294901760, %v26541_v41  ;;  %v1862_v34 = vand.u32 4294901760, %v26568_v15 }
  0xce   : > { %v1842_v6 = vsub.f32 %v26522_v0, %v1841_v51 }
  0xcf   : > { %19863 = vmatmul.mubr.f32.gmra.mrb[2].mxu0 %v26360_v14  ;;  %v1829_v14 = vand.u32 4294901760, %v1828_v23  ;;  %v1800_v44 = vsub.f32 %v26541_v41, %v30498_v8  ;;  %v1810_v23 = vsub.f32 %v26558_v18, %v30499_v27  ;;  %v1857_v8 = vand.u32 4294901760, %v1856_v31 }
  0xd0   : > { %23232 = vmatpush3.bf16.msra.mxu0 %v26519_v37  ;;  %19881 = vmatprep.mubr.f32.mxu0 %v1781_v3  ;;  %v1843_v1 = vand.u32 4294901760, %v1842_v6  ;;  %v1869_v3 = vand.u32 4294901760, %v26570_v38  ;;  %v23257_v31 = vpack.c.bf16 %v26503_v60, %v26497_v2  ;;  %v30531_v2 = vand.u32 4294901760, %v26529_v62 }
  0xd1   : > { %23234 = vmatprep.subr.bf16.mxu0 %v26544_v22  ;;  %v23241_v56 = vpack.c.bf16 %v1829_v14, %v1822_v26  ;;  %v1801_v30 = vand.u32 4294901760, %v1800_v44  ;;  %v1863_v26 = vsub.f32 %v26568_v15, %v1862_v34  ;;  %v1811_v6 = vand.u32 4294901760, %v1810_v23  ;;  %v2377_v23 = vld [vmem:[#allocation3 + $0x19] sm:$0xff] }
  0xd2   : > { %v23245_v21 = vpack.c.bf16 %v1843_v1, %v1836_v10  ;;  %v1870_v14 = vsub.f32 %v26570_v38, %v1869_v3  ;;  %v23249_v9 = vpack.c.bf16 %v1857_v8, %v1850_v16  ;;  %v23269_v8 = vpack.c.bf16 %v26570_v38, %v26568_v15  ;;  %v2382_v15 = vld [vmem:[#allocation5 + $0xd8] sm:$0xff]  ;;  %v2376_v38 = vld [vmem:[#allocation3 + $0x11] sm:$0xff] }
  0xd3   : > { %v1864_v27 = vand.u32 4294901760, %v1863_v26  ;;  %v30532_v60 = vand.u32 4294901760, %v26538_v40  ;;  %v2383_v16 = vld [vmem:[#allocation5 + $0xe0] sm:$0xff]  ;;  %v2384_v26 = vld [vmem:[#allocation5 + $0xe8] sm:$0xff] }
  0xd4   : > { %23236 = vmatpush3.bf16.msra.mxu0 %v26544_v22  ;;  %v1871_v61 = vand.u32 4294901760, %v1870_v14  ;;  %v2385_v14 = vld [vmem:[#allocation5 + $0xf0] sm:$0xff] }
  0xd5   : > { %23238 = vmatprep.subr.bf16.mxu0 %v26550_v7 }
  0xd6   : > { %v23253_v10 = vpack.c.bf16 %v1871_v61, %v1864_v27  ;;  %v23289_v27 = vpack.c.bf16 %v1827_v33, %v1820_v12  ;;  %v23297_v12 = vpack.c.bf16 %v30532_v60, %v30531_v2  ;;  %v30533_v33 = vand.u32 4294901760, %v26558_v18 }
  0xd7   : > { %v2418_v2 = vand.u32 4294901760, %v2385_v14 }
  0xd8   : > { %23240 = vmatpush3.bf16.msra.mxu0 %v26550_v7 }
  0xd9   : > { %23242 = vmatprep.subr.bf16.mxu0 %v23241_v56 }
  0xdb   : > { %19882 = vmatmul.mubr.f32.vlgmr.msra.gmra.mrb[0].mxu0 %v1791_v20  ;;  %v2394_v20 = vsel %vm279_vm0, %v2376_v38, 0 }
  0xdc   : > { %23244 = vmatpush3.bf16.msra.mxu0 %v23241_v56  ;;  %19884 = vmatprep.mubr.f32.mxu0 %v1801_v30  ;;  %v23261_v30 = vpack.c.bf16 %v26522_v0, %v26508_v5  ;;  %v23301_v5 = vpack.c.bf16 %v1869_v3, %v1862_v34  ;;  %v26648_v0 = vld [vmem:[#allocation4 + $0x2] sm:$0xff]  ;;  %v2409_v3 = vand.u32 4294901760, %v2382_v15 }
  0xdd   : > { %23246 = vmatprep.subr.bf16.mxu0 %v23245_v21 }
  0xdf   : > { %19885 = vmatmul.mubr.f32.gmra.mrb[2].mxu0 %v1811_v6  ;;  %v2386_v6 = vld [vmem:[#allocation5 + $0xf8] sm:$0xff] }
  0xe0   : > { %23248 = vmatpush3.bf16.msra.mxu0 %v23245_v21  ;;  %19903 = vmatprep.mubr.f32.mxu0 %v26485_v4  ;;  %v23265_v21 = vpack.c.bf16 %v26538_v40, %v26529_v62  ;;  %v2379_v40 = vld [vmem:[#allocation5 + $0xc0] sm:$0xff]  ;;  %v2421_v60 = vand.u32 4294901760, %v2386_v6 }
  0xe1   : > { %23250 = vmatprep.subr.bf16.mxu0 %v23249_v9 }
  0xe4   : > { %23252 = vmatpush3.bf16.msra.mxu0 %v23249_v9 }
  0xe5   : > { %23254 = vmatprep.subr.bf16.mxu0 %v23253_v10 }
  0xe8   : > { %23256 = vmatpush3.bf16.msra.mxu0 %v23253_v10 }
  0xe9   : > { %23258 = vmatprep.subr.bf16.mxu0 %v23257_v31 }
  0xeb   : > { %19904 = vmatmul.mubr.f32.vlgmr.msra.gmra.mrb[0].mxu0 %v26506_v28 }
  0xec   : > { %23260 = vmatpush3.bf16.msra.mxu0 %v23257_v31  ;;  %19906 = vmatprep.mubr.f32.mxu0 %v26515_v53 }
  0xed   : > { %23262 = vmatprep.subr.bf16.mxu0 %v23261_v30 }
  0xef   : > { %19907 = vmatmul.mubr.f32.gmra.mrb[2].mxu0 %v26531_v58 }
  0xf0   : > { %23264 = vmatpush3.bf16.msra.mxu0 %v23261_v30  ;;  %19925 = vmatprep.mubr.f32.mxu0 %v26492_v45  ;;  %v23293_v45 = vpack.c.bf16 %v1841_v51, %v1834_v55  ;;  %v2388_v55 = vsel %vm279_vm0, %v26474_v11, 0  ;;  %v26691_v30 = vsub.f32 %v2382_v15, %v2409_v3 }
  0xf1   : > { %23266 = vmatprep.subr.bf16.mxu0 %v23265_v21  ;;  %v26660_v62 = vand.u32 4294901760, %v2388_v55 }
  0xf3   : > { %v26667_v11 = vsub.f32 %v2388_v55, %v26660_v62 }
  0xf4   : > { %23268 = vmatpush3.bf16.msra.mxu0 %v23265_v21  ;;  %v26693_v21 = vand.u32 4294901760, %v2394_v20 }
  0xf5   : > { %23270 = vmatprep.subr.bf16.mxu0 %v23269_v8 }
  0xf8   : > { %23272 = vmatpush3.bf16.msra.mxu0 %v23269_v8  ;;  %v2397_v8 = vsel %vm279_vm0, %v2377_v23, 0 }
  0xf9   : > { %23274 = vmatprep.subr.bf16.mxu0 %v26501_v35 }
  0xfb   : > { %19926 = vmatmul.mubr.f32.vlgmr.msra.gmra.mrb[0].mxu0 %v26526_v46  ;;  %v26650_v46 = vld [vmem:[#allocation4 + $0x3] sm:$0xff] }
  0xfc   : > { %23276 = vmatpush3.bf16.msra.mxu0 %v26501_v35  ;;  %19928 = vmatprep.mubr.f32.mxu0 %v26541_v41  ;;  %5196 = vst.msk [vmem:[#allocation4] sm:$0xff] %vm279_vm0, %v30529_v17 }
  0xfd   : > { %23278 = vmatprep.subr.bf16.mxu0 %v26519_v37 }
  0xff   : > { %19929 = vmatmul.mubr.f32.gmra.mrb[2].mxu0 %v26558_v18  ;;  %v2381_v18 = vld [vmem:[#allocation5 + $0xd0] sm:$0xff] }
 0x100   : > { %23280 = vmatpush3.bf16.msra.mxu0 %v26519_v37  ;;  %19947 = vmatprep.mubr.f32.mxu0 %v1779_v32  ;;  %v30530_v32 = vand.u32 4294901760, %v26541_v41  ;;  %v2380_v41 = vld [vmem:[#allocation5 + $0xc8] sm:$0xff]  ;;  %v2406_v34 = vand.u32 4294901760, %v2381_v18 }
 0x101   : > { %23282 = vmatprep.subr.bf16.mxu0 %v26544_v22  ;;  %v2403_v51 = vand.u32 4294901760, %v2380_v41 }
 0x102   : > { %v26685_v10 = vsub.f32 %v2381_v18, %v2406_v34  ;;  %v26725_v18 = vpack.c.bf16 %v2421_v60, %v2418_v2 }
 0x103   : > { %v26672_v56 = vsub.f32 %v2380_v41, %v2403_v51  ;;  %v26716_v41 = vsub.f32 %v2394_v20, %v26693_v21 }
 0x104   : > { %23284 = vmatpush3.bf16.msra.mxu0 %v26544_v22 }
 0x105   : > { %23286 = vmatprep.subr.bf16.mxu0 %v26550_v7 }
 0x108   : > { %23288 = vmatpush3.bf16.msra.mxu0 %v26550_v7 }
 0x109   : > { %23290 = vmatprep.subr.bf16.mxu0 %v23289_v27 }
 0x10b   : > { %19948 = vmatmul.mubr.f32.vlgmr.msra.gmra.mrb[0].mxu0 %v1789_v13  ;;  %v2375_v13 = vld [vmem:[#allocation3 + $0x9] sm:$0xff] }
 0x10c   : > { %23292 = vmatpush3.bf16.msra.mxu0 %v23289_v27  ;;  %19950 = vmatprep.mubr.f32.mxu0 %v30530_v32  ;;  %v26697_v27 = vpack.c.bf16 %v2409_v3, %v2406_v34  ;;  %v2415_v32 = vand.u32 4294901760, %v2384_v26 }
 0x10d   : > { %23294 = vmatprep.subr.bf16.mxu0 %v23293_v45 }
 0x10f   : > { %19951 = vmatmul.mubr.f32.gmra.mrb[2].mxu0 %v30533_v33 }
 0x110   : > { %23296 = vmatpush3.bf16.msra.mxu0 %v23293_v45  ;;  %19969 = vmatprep.mubr.f32.mxu0 %v26485_v4  ;;  %v2412_v45 = vand.u32 4294901760, %v2383_v16 }
 0x111   : > { %23298 = vmatprep.subr.bf16.mxu0 %v23297_v12 }
 0x114   : > { %23300 = vmatpush3.bf16.msra.mxu0 %v23297_v12 }
 0x115   : > { %23302 = vmatprep.subr.bf16.mxu0 %v23301_v5 }
 0x118   : > { %23304 = vmatpush3.bf16.msra.mxu0 %v23301_v5  ;;  %v26709_v5 = vand.u32 4294901760, %v2397_v8 }
 0x119   : > { %23306 = vmatprep.subr.bf16.mxu0 %v26501_v35 }
 0x11a   : > { %v26730_v38 = vsub.f32 %v2397_v8, %v26709_v5 }
 0x11b   : > { %19970 = vmatmul.mubr.f32.vlgmr.msra.gmra.mrb[0].mxu0 %v26506_v28 }
 0x11c   : > { %23308 = vmatpush3.bf16.msra.mxu0 %v26501_v35  ;;  %19972 = vmatprep.mubr.f32.mxu0 %v26515_v53  ;;  %v2400_v35 = vand.u32 4294901760, %v2379_v40  ;;  %v30503_v8 = vand.u32 4294901760, %v26730_v38 }
 0x11d   : > { %23310 = vmatprep.subr.bf16.mxu0 %v26519_v37 }
 0x11e   : > { %v26670_v44 = vsub.f32 %v2379_v40, %v2400_v35  ;;  %v26678_v1 = vpack.c.bf16 %v2403_v51, %v2400_v35  ;;  %v2536_v40 = vand.u32 4294901760, %v26691_v30  ;;  %v26719_v35 = vpack.c.bf16 %v2415_v32, %v2412_v45 }
 0x11f   : > { %19973 = vmatmul.mubr.f32.gmra.mrb[2].mxu0 %v26531_v58  ;;  %v26721_v51 = vsub.f32 %v2383_v16, %v2412_v45  ;;  %v26743_v16 = vsub.f32 %v2385_v14, %v2418_v2 }
 0x120   : > { %23312 = vmatpush3.bf16.msra.mxu0 %v26519_v37  ;;  %19991 = vmatprep.mubr.f32.mxu0 %v26485_v4  ;;  %v2474_v37 = vand.u32 4294901760, %v26667_v11  ;;  %v2391_v4 = vsel %vm279_vm0, %v2375_v13, 0  ;;  %v2515_v9 = vand.u32 4294901760, %v26670_v44  ;;  %v26723_v13 = vsub.f32 %v2384_v26, %v2415_v32 }
 0x121   : > { %23314 = vmatprep.subr.bf16.mxu0 %v26544_v22  ;;  %v26683_v61 = vand.u32 4294901760, %v2391_v4  ;;  %v2537_v3 = vsub.f32 %v26691_v30, %v2536_v40  ;;  %v30500_v20 = vand.u32 4294901760, %v26721_v51  ;;  %v26745_v26 = vsub.f32 %v2386_v6, %v2421_v60 }
 0x122   : > { %v2475_v31 = vsub.f32 %v26667_v11, %v2474_v37  ;;  %v30501_v23 = vand.u32 4294901760, %v26723_v13  ;;  %v2557_v2 = vand.u32 4294901760, %v26743_v16 }
 0x123   : > { %v26707_v33 = vsub.f32 %v2391_v4, %v26683_v61  ;;  %v2544_v14 = vsub.f32 %v26721_v51, %v30500_v20  ;;  %v2564_v60 = vand.u32 4294901760, %v26745_v26 }
 0x124   : > { %23316 = vmatpush3.bf16.msra.mxu0 %v26544_v22  ;;  %v2522_v22 = vand.u32 4294901760, %v26672_v56  ;;  %v2476_v55 = vand.u32 4294901760, %v2475_v31  ;;  %v2551_v6 = vsub.f32 %v26723_v13, %v30501_v23  ;;  %v2558_v23 = vsub.f32 %v26743_v16, %v2557_v2 }
 0x125   : > { %23318 = vmatprep.subr.bf16.mxu0 %v26550_v7  ;;  %v30504_v15 = vand.u32 4294901760, %v26707_v33 }
 0x126   : > { %v2523_v12 = vsub.f32 %v26672_v56, %v2522_v22  ;;  %v2552_v20 = vand.u32 4294901760, %v2551_v6 }
 0x127   : > { %v2485_v31 = vsub.f32 %v26707_v33, %v30504_v15  ;;  %v2559_v15 = vand.u32 4294901760, %v2558_v23  ;;  %v30535_v23 = vand.u32 4294901760, %v26716_v41 }
 0x128   : > { %23320 = vmatpush3.bf16.msra.mxu0 %v26550_v7  ;;  %v2516_v7 = vsub.f32 %v26670_v44, %v2515_v9  ;;  %v2524_v4 = vand.u32 4294901760, %v2523_v12 }
 0x129   : > { %23322 = vmatprep.subr.bf16.mxu0 %v26678_v1 }
 0x12b   : > { %19992 = vmatmul.mubr.f32.vlgmr.msra.gmra.mrb[0].mxu0 %v26506_v28  ;;  %v2529_v28 = vand.u32 4294901760, %v26685_v10 }
 0x12c   : > { %23324 = vmatpush3.bf16.msra.mxu0 %v26678_v1  ;;  %19994 = vmatprep.mubr.f32.mxu0 %v26515_v53  ;;  %v2517_v53 = vand.u32 4294901760, %v2516_v7  ;;  %v2538_v7 = vand.u32 4294901760, %v2537_v3  ;;  %v2545_v3 = vand.u32 4294901760, %v2544_v14  ;;  %v3071_v14 = vld [vmem:[#allocation4 + $0x12] sm:$0xff] }
 0x12d   : > { %23326 = vmatprep.subr.bf16.mxu0 %v26697_v27  ;;  %v2530_v34 = vsub.f32 %v26685_v10, %v2529_v28 }
 0x12e   : > { %v23337_v45 = vpack.c.bf16 %v2524_v4, %v2517_v53  ;;  %v2505_v53 = vsub.f32 %v26730_v38, %v30503_v8  ;;  %v23345_v8 = vpack.c.bf16 %v2552_v20, %v2545_v3  ;;  %v23385_v20 = vpack.c.bf16 %v2522_v22, %v2515_v9  ;;  %v3078_v3 = vld [vmem:[#allocation5 + $0x120] sm:$0xff] }
 0x12f   : > { %19995 = vmatmul.mubr.f32.gmra.mrb[2].mxu0 %v26531_v58  ;;  %v30502_v58 = vand.u32 4294901760, %v26716_v41  ;;  %v2531_v32 = vand.u32 4294901760, %v2530_v34  ;;  %v30538_v22 = vand.u32 4294901760, %v26730_v38 }
 0x130   : > { %23328 = vmatpush3.bf16.msra.mxu0 %v26697_v27  ;;  %20013 = vmatprep.mubr.f32.mxu0 %v2476_v55  ;;  %v2486_v55 = vand.u32 4294901760, %v2485_v31  ;;  %v2506_v31 = vand.u32 4294901760, %v2505_v53 }
 0x131   : > { %23330 = vmatprep.subr.bf16.mxu0 %v26719_v35  ;;  %v2495_v12 = vsub.f32 %v26716_v41, %v30502_v58  ;;  %v23341_v4 = vpack.c.bf16 %v2538_v7, %v2531_v32  ;;  %v2565_v58 = vsub.f32 %v26745_v26, %v2564_v60 }
 0x133   : > { %v2496_v34 = vand.u32 4294901760, %v2495_v12  ;;  %v2566_v32 = vand.u32 4294901760, %v2565_v58  ;;  %v23353_v12 = vpack.c.bf16 %v26672_v56, %v26670_v44  ;;  %v23361_v58 = vpack.c.bf16 %v26723_v13, %v26721_v51 }
 0x134   : > { %23332 = vmatpush3.bf16.msra.mxu0 %v26719_v35  ;;  %v30536_v44 = vand.u32 4294901760, %v26721_v51  ;;  %v30537_v56 = vand.u32 4294901760, %v26723_v13  ;;  %v3075_v51 = vld [vmem:[#allocation5 + $0x108] sm:$0xff] }
 0x135   : > { %23334 = vmatprep.subr.bf16.mxu0 %v26725_v18  ;;  %v23349_v7 = vpack.c.bf16 %v2566_v32, %v2559_v15  ;;  %v23365_v15 = vpack.c.bf16 %v26745_v26, %v26743_v16  ;;  %v3070_v16 = vld [vmem:[#allocation4 + $0xa] sm:$0xff]  ;;  %v3076_v26 = vld [vmem:[#allocation5 + $0x110] sm:$0xff] }
 0x136   : > { %v23393_v9 = vpack.c.bf16 %v30537_v56, %v30536_v44  ;;  %v3080_v32 = vld [vmem:[#allocation5 + $0x130] sm:$0xff]  ;;  %v3107_v44 = vand.u32 4294901760, %v3078_v3 }
 0x138   : > { %23336 = vmatpush3.bf16.msra.mxu0 %v26725_v18 }
 0x139   : > { %23338 = vmatprep.subr.bf16.mxu0 %v23337_v45 }
 0x13b   : > { %20014 = vmatmul.mubr.f32.vlgmr.msra.gmra.mrb[0].mxu0 %v2486_v55  ;;  %v3101_v55 = vand.u32 4294901760, %v3076_v26 }
 0x13c   : > { %23340 = vmatpush3.bf16.msra.mxu0 %v23337_v45  ;;  %20016 = vmatprep.mubr.f32.mxu0 %v2496_v34  ;;  %v23357_v45 = vpack.c.bf16 %v26691_v30, %v26685_v10  ;;  %v26819_v10 = vld [vmem:[#allocation3 + $0xa] sm:$0xff]  ;;  %v23397_v30 = vpack.c.bf16 %v2564_v60, %v2557_v2  ;;  %v3072_v34 = vld [vmem:[#allocation4 + $0x1a] sm:$0xff] }
 0x13d   : > { %23342 = vmatprep.subr.bf16.mxu0 %v23341_v4  ;;  %5192 = vst.msk [vmem:[#allocation3 + $0x8] sm:$0xff] %vm279_vm0, %v30529_v17 }
 0x13f   : > { %20017 = vmatmul.mubr.f32.gmra.mrb[2].mxu0 %v2506_v31  ;;  %v3079_v31 = vld [vmem:[#allocation5 + $0x128] sm:$0xff] }
 0x140   : > { %23344 = vmatpush3.bf16.msra.mxu0 %v23341_v4  ;;  %20035 = vmatprep.mubr.f32.mxu0 %v26660_v62  ;;  %v3089_v4 = vsel %vm279_vm0, %v3071_v14, 0  ;;  %v3110_v56 = vand.u32 4294901760, %v3079_v31 }
 0x141   : > { %23346 = vmatprep.subr.bf16.mxu0 %v23345_v8 }
 0x144   : > { %23348 = vmatpush3.bf16.msra.mxu0 %v23345_v8  ;;  %v3077_v8 = vld [vmem:[#allocation5 + $0x118] sm:$0xff] }
 0x145   : > { %23350 = vmatprep.subr.bf16.mxu0 %v23349_v7  ;;  %v3104_v53 = vand.u32 4294901760, %v3077_v8 }
 0x148   : > { %23352 = vmatpush3.bf16.msra.mxu0 %v23349_v7  ;;  %v3081_v7 = vld [vmem:[#allocation5 + $0x138] sm:$0xff] }
 0x149   : > { %23354 = vmatprep.subr.bf16.mxu0 %v23353_v12 }
 0x14b   : > { %20036 = vmatmul.mubr.f32.vlgmr.msra.gmra.mrb[0].mxu0 %v26683_v61 }
 0x14c   : > { %23356 = vmatpush3.bf16.msra.mxu0 %v23353_v12  ;;  %20038 = vmatprep.mubr.f32.mxu0 %v26693_v21 }
 0x14d   : > { %23358 = vmatprep.subr.bf16.mxu0 %v23357_v45 }
 0x14f   : > { %20039 = vmatmul.mubr.f32.gmra.mrb[2].mxu0 %v26709_v5 }
 0x150   : > { %23360 = vmatpush3.bf16.msra.mxu0 %v23357_v45  ;;  %20057 = vmatprep.mubr.f32.mxu0 %v26667_v11  ;;  %v23389_v11 = vpack.c.bf16 %v2536_v40, %v2529_v28  ;;  %v26831_v28 = vld [vmem:[#allocation3 + $0x12] sm:$0xff] }
 0x151   : > { %23362 = vmatprep.subr.bf16.mxu0 %v23361_v58  ;;  %5193 = vst.msk [vmem:[#allocation3 + $0x10] sm:$0xff] %vm279_vm0, %v30529_v17 }
 0x154   : > { %23364 = vmatpush3.bf16.msra.mxu0 %v23361_v58  ;;  %v26876_v58 = vsub.f32 %v3076_v26, %v3101_v55  ;;  %v26912_v26 = vsub.f32 %v3078_v3, %v3107_v44 }
 0x155   : > { %23366 = vmatprep.subr.bf16.mxu0 %v23365_v15 }
 0x156   : > { %v30507_v3 = vand.u32 4294901760, %v26912_v26 }
 0x158   : > { %23368 = vmatpush3.bf16.msra.mxu0 %v23365_v15 }
 0x159   : > { %23370 = vmatprep.subr.bf16.mxu0 %v26678_v1 }
 0x15b   : > { %20058 = vmatmul.mubr.f32.vlgmr.msra.gmra.mrb[0].mxu0 %v26707_v33 }
 0x15c   : > { %23372 = vmatpush3.bf16.msra.mxu0 %v26678_v1  ;;  %20060 = vmatprep.mubr.f32.mxu0 %v26716_v41  ;;  %v26839_v41 = vld [vmem:[#allocation3 + $0x1a] sm:$0xff] }
 0x15d   : > { %23374 = vmatprep.subr.bf16.mxu0 %v26697_v27  ;;  %5194 = vst.msk [vmem:[#allocation3 + $0x18] sm:$0xff] %vm279_vm0, %v30529_v17  ;;  %5195 = vst.msk [vmem:[#allocation3 + $0x20] sm:$0xff] %vm279_vm0, %v30529_v17 }
 0x15e   : > { %9423 = vst.msk [vmem:[#allocation3 + $0x18] sm:$0xff] %vm279_vm0, %v30529_v17  ;;  %9424 = vst.msk [vmem:[#allocation3 + $0x20] sm:$0xff] %vm279_vm0, %v30529_v17 }
 0x15f   : > { %20061 = vmatmul.mubr.f32.gmra.mrb[2].mxu0 %v26730_v38  ;;  %13312 = vst.msk [vmem:[#allocation3 + $0x18] sm:$0xff] %vm279_vm0, %v30529_v17  ;;  %13313 = vst.msk [vmem:[#allocation3 + $0x20] sm:$0xff] %vm279_vm0, %v30529_v17  ;;  %v3098_v38 = vand.u32 4294901760, %v3075_v51 }
 0x160   : > { %23376 = vmatpush3.bf16.msra.mxu0 %v26697_v27  ;;  %20079 = vmatprep.mubr.f32.mxu0 %v2474_v37  ;;  %v30534_v37 = vand.u32 4294901760, %v26707_v33  ;;  %v3083_v33 = vsel %vm279_vm0, %v26648_v0, 0  ;;  %v3074_v0 = vld [vmem:[#allocation5 + $0x100] sm:$0xff] }
 0x161   : > { %23378 = vmatprep.subr.bf16.mxu0 %v26719_v35  ;;  %v26835_v40 = vand.u32 4294901760, %v3083_v33  ;;  %v3095_v13 = vand.u32 4294901760, %v3074_v0  ;;  %v26863_v2 = vsub.f32 %v3075_v51, %v3098_v38 }
 0x163   : > { %v26861_v6 = vsub.f32 %v3074_v0, %v3095_v13  ;;  %v26869_v60 = vpack.c.bf16 %v3098_v38, %v3095_v13 }
 0x164   : > { %23380 = vmatpush3.bf16.msra.mxu0 %v26719_v35 }
 0x165   : > { %23382 = vmatprep.subr.bf16.mxu0 %v26725_v18  ;;  %v3210_v12 = vand.u32 4294901760, %v26861_v6 }
 0x168   : > { %23384 = vmatpush3.bf16.msra.mxu0 %v26725_v18 }
 0x169   : > { %23386 = vmatprep.subr.bf16.mxu0 %v23385_v20 }
 0x16b   : > { %20080 = vmatmul.mubr.f32.vlgmr.msra.gmra.mrb[0].mxu0 %v30534_v37  ;;  %v3092_v37 = vsel %vm279_vm0, %v3072_v34, 0 }
 0x16c   : > { %23388 = vmatpush3.bf16.msra.mxu0 %v23385_v20  ;;  %20082 = vmatprep.mubr.f32.mxu0 %v30535_v23  ;;  %v26882_v20 = vsub.f32 %v3077_v8, %v3104_v53  ;;  %v26888_v23 = vpack.c.bf16 %v3104_v53, %v3101_v55  ;;  %v26900_v0 = vand.u32 4294901760, %v3092_v37  ;;  %v26914_v8 = vsub.f32 %v3079_v31, %v3110_v56 }
 0x16d   : > { %23390 = vmatprep.subr.bf16.mxu0 %v23389_v11 }
 0x16e   : > { %v30505_v13 = vand.u32 4294901760, %v26882_v20  ;;  %v26921_v55 = vsub.f32 %v3092_v37, %v26900_v0  ;;  %v30508_v31 = vand.u32 4294901760, %v26914_v8 }
 0x16f   : > { %20083 = vmatmul.mubr.f32.gmra.mrb[2].mxu0 %v30538_v22  ;;  %v3116_v22 = vand.u32 4294901760, %v3081_v7 }
 0x170   : > { %23392 = vmatpush3.bf16.msra.mxu0 %v23389_v11  ;;  %20101 = vmatprep.mubr.f32.mxu0 %v26660_v62  ;;  %v26884_v11 = vand.u32 4294901760, %v3089_v4  ;;  %v3232_v34 = vsub.f32 %v26882_v20, %v30505_v13 }
 0x171   : > { %23394 = vmatprep.subr.bf16.mxu0 %v23393_v9  ;;  %v26936_v37 = vsub.f32 %v3081_v7, %v3116_v22  ;;  %v3246_v7 = vsub.f32 %v26914_v8, %v30508_v31 }
 0x172   : > { %v26907_v38 = vsub.f32 %v3089_v4, %v26884_v11 }
 0x174   : > { %23396 = vmatpush3.bf16.msra.mxu0 %v23393_v9  ;;  %v3113_v9 = vand.u32 4294901760, %v3080_v32 }
 0x175   : > { %23398 = vmatprep.subr.bf16.mxu0 %v23397_v30 }
 0x176   : > { %v26916_v14 = vpack.c.bf16 %v3116_v22, %v3113_v9  ;;  %v3259_v22 = vand.u32 4294901760, %v26936_v37 }
 0x178   : > { %23400 = vmatpush3.bf16.msra.mxu0 %v23397_v30 }
 0x179   : > { %23402 = vmatprep.subr.bf16.mxu0 %v26678_v1 }
 0x17b   : > { %20102 = vmatmul.mubr.f32.vlgmr.msra.gmra.mrb[0].mxu0 %v26683_v61 }
 0x17c   : > { %23404 = vmatpush3.bf16.msra.mxu0 %v26678_v1  ;;  %20104 = vmatprep.mubr.f32.mxu0 %v26693_v21  ;;  %v26858_v1 = vsub.f32 %v3083_v33, %v26835_v40 }
 0x17d   : > { %23406 = vmatprep.subr.bf16.mxu0 %v26697_v27 }
 0x17f   : > { %20105 = vmatmul.mubr.f32.gmra.mrb[2].mxu0 %v26709_v5 }
 0x180   : > { %23408 = vmatpush3.bf16.msra.mxu0 %v26697_v27  ;;  %20123 = vmatprep.mubr.f32.mxu0 %v26660_v62  ;;  %v3169_v27 = vand.u32 4294901760, %v26858_v1  ;;  %v3086_v62 = vsel %vm279_vm0, %v3070_v16, 0  ;;  %v26910_v16 = vpack.c.bf16 %v3110_v56, %v3107_v44  ;;  %v30510_v56 = vand.u32 4294901760, %v26921_v55 }
 0x181   : > { %23410 = vmatprep.subr.bf16.mxu0 %v26719_v35  ;;  %v26874_v45 = vand.u32 4294901760, %v3086_v62 }
 0x182   : > { %v3170_v15 = vsub.f32 %v26858_v1, %v3169_v27 }
 0x183   : > { %v26898_v33 = vsub.f32 %v3086_v62, %v26874_v45 }
 0x184   : > { %23412 = vmatpush3.bf16.msra.mxu0 %v26719_v35  ;;  %v3217_v35 = vand.u32 4294901760, %v26863_v2  ;;  %v3171_v51 = vand.u32 4294901760, %v3170_v15  ;;  %v26934_v15 = vsub.f32 %v3080_v32, %v3113_v9  ;;  %v3239_v32 = vsub.f32 %v26912_v26, %v30507_v3 }
 0x185   : > { %23414 = vmatprep.subr.bf16.mxu0 %v26725_v18  ;;  %v30509_v62 = vand.u32 4294901760, %v26898_v33  ;;  %v3247_v3 = vand.u32 4294901760, %v3246_v7  ;;  %v27030_v7 = vld [vmem:[#allocation4 + $0x1b] sm:$0xff] }
 0x186   : > { %v3218_v30 = vsub.f32 %v26863_v2, %v3217_v35  ;;  %v3252_v9 = vand.u32 4294901760, %v26934_v15  ;;  %5200 = vst.msk [vmem:[#allocation4 + $0x20] sm:$0xff] %vm279_vm0, %v30529_v17 }
 0x187   : > { %v3180_v44 = vsub.f32 %v26898_v33, %v30509_v62  ;;  %v3260_v62 = vsub.f32 %v26936_v37, %v3259_v22  ;;  %9429 = vst.msk [vmem:[#allocation4 + $0x20] sm:$0xff] %vm279_vm0, %v30529_v17 }
 0x188   : > { %23416 = vmatpush3.bf16.msra.mxu0 %v26725_v18  ;;  %v3211_v18 = vsub.f32 %v26861_v6, %v3210_v12  ;;  %v3219_v53 = vand.u32 4294901760, %v3218_v30  ;;  %v3253_v31 = vsub.f32 %v26934_v15, %v3252_v9  ;;  %13318 = vst.msk [vmem:[#allocation4 + $0x20] sm:$0xff] %vm279_vm0, %v30529_v17 }
 0x189   : > { %23418 = vmatprep.subr.bf16.mxu0 %v26869_v60 }
 0x18b   : > { %20124 = vmatmul.mubr.f32.vlgmr.msra.gmra.mrb[0].mxu0 %v26683_v61  ;;  %v30511_v61 = vand.u32 4294901760, %v26876_v58 }
 0x18c   : > { %23420 = vmatpush3.bf16.msra.mxu0 %v26869_v60  ;;  %20126 = vmatprep.mubr.f32.mxu0 %v26693_v21  ;;  %v3212_v21 = vand.u32 4294901760, %v3211_v18 }
 0x18d   : > { %23422 = vmatprep.subr.bf16.mxu0 %v26888_v23  ;;  %v3225_v4 = vsub.f32 %v26876_v58, %v30511_v61  ;;  %v3254_v61 = vand.u32 4294901760, %v3253_v31  ;;  %v30540_v31 = vand.u32 4294901760, %v26882_v20 }
 0x18e   : > { %v23433_v18 = vpack.c.bf16 %v3219_v53, %v3212_v21  ;;  %v3181_v21 = vand.u32 4294901760, %v3180_v44  ;;  %v3200_v53 = vsub.f32 %v26921_v55, %v30510_v56 }
 0x18f   : > { %20127 = vmatmul.mubr.f32.gmra.mrb[2].mxu0 %v26709_v5  ;;  %v30506_v5 = vand.u32 4294901760, %v26907_v38  ;;  %v3226_v30 = vand.u32 4294901760, %v3225_v4 }
 0x190   : > { %23424 = vmatpush3.bf16.msra.mxu0 %v26888_v23  ;;  %20145 = vmatprep.mubr.f32.mxu0 %v3171_v51  ;;  %v3233_v51 = vand.u32 4294901760, %v3232_v34  ;;  %v3201_v44 = vand.u32 4294901760, %v3200_v53 }
 0x191   : > { %23426 = vmatprep.subr.bf16.mxu0 %v26910_v16  ;;  %v3190_v13 = vsub.f32 %v26907_v38, %v30506_v5  ;;  %v3240_v5 = vand.u32 4294901760, %v3239_v32 }
 0x192   : > { %v23437_v4 = vpack.c.bf16 %v3233_v51, %v3226_v30  ;;  %v3261_v30 = vand.u32 4294901760, %v3260_v62  ;;  %v23449_v51 = vpack.c.bf16 %v26863_v2, %v26861_v6  ;;  %v23457_v62 = vpack.c.bf16 %v26914_v8, %v26912_v26 }
 0x193   : > { %v3191_v34 = vand.u32 4294901760, %v3190_v13  ;;  %v23441_v56 = vpack.c.bf16 %v3247_v3, %v3240_v5  ;;  %v23481_v5 = vpack.c.bf16 %v3217_v35, %v3210_v12  ;;  %v30539_v3 = vand.u32 4294901760, %v26876_v58 }
 0x194   : > { %23428 = vmatpush3.bf16.msra.mxu0 %v26910_v16  ;;  %v23445_v13 = vpack.c.bf16 %v3261_v30, %v3254_v61  ;;  %v23461_v61 = vpack.c.bf16 %v26936_v37, %v26934_v15  ;;  %v30543_v6 = vand.u32 4294901760, %v26912_v26  ;;  %v30544_v2 = vand.u32 4294901760, %v26914_v8  ;;  %v27022_v8 = vld [vmem:[#allocation4 + $0x13] sm:$0xff] }
 0x195   : > { %23430 = vmatprep.subr.bf16.mxu0 %v26916_v14  ;;  %v30545_v35 = vand.u32 4294901760, %v26921_v55  ;;  %v3778_v26 = vsel %vm279_vm0, %v26476_v19, 0  ;;  %v3771_v37 = vld [vmem:[#allocation5 + $0x150] sm:$0xff]  ;;  %v3772_v19 = vld [vmem:[#allocation5 + $0x158] sm:$0xff]  ;;  %5199 = vst.msk [vmem:[#allocation4 + $0x18] sm:$0xff] %vm279_vm0, %v30529_v17 }
 0x196   : > { %v23489_v12 = vpack.c.bf16 %v30544_v2, %v30543_v6  ;;  %v27026_v32 = vand.u32 4294901760, %v3778_v26  ;;  %9428 = vst.msk [vmem:[#allocation4 + $0x18] sm:$0xff] %vm279_vm0, %v30529_v17  ;;  %v3796_v53 = vand.u32 4294901760, %v3771_v37 }
 0x197   : > { %13317 = vst.msk [vmem:[#allocation4 + $0x18] sm:$0xff] %vm279_vm0, %v30529_v17 }
 0x198   : > { %23432 = vmatpush3.bf16.msra.mxu0 %v26916_v14  ;;  %v27056_v30 = vsub.f32 %v3778_v26, %v27026_v32 }
 0x199   : > { %23434 = vmatprep.subr.bf16.mxu0 %v23433_v18 }
 0x19b   : > { %20146 = vmatmul.mubr.f32.vlgmr.msra.gmra.mrb[0].mxu0 %v3181_v21 }
 0x19c   : > { %23436 = vmatpush3.bf16.msra.mxu0 %v23433_v18  ;;  %20148 = vmatprep.mubr.f32.mxu0 %v3191_v34  ;;  %v23453_v18 = vpack.c.bf16 %v26882_v20, %v26876_v58  ;;  %v27010_v58 = vld [vmem:[#allocation4 + $0xb] sm:$0xff]  ;;  %v23493_v20 = vpack.c.bf16 %v3259_v22, %v3252_v9 }
 0x19d   : > { %23438 = vmatprep.subr.bf16.mxu0 %v23437_v4  ;;  %5197 = vst.msk [vmem:[#allocation4 + $0x8] sm:$0xff] %vm279_vm0, %v30529_v17  ;;  %5198 = vst.msk [vmem:[#allocation4 + $0x10] sm:$0xff] %vm279_vm0, %v30529_v17  ;;  %v3773_v9 = vld [vmem:[#allocation5 + $0x160] sm:$0xff]  ;;  %v27033_v22 = vld [vmem:[#allocation5 + $0x168] sm:$0xff] }
 0x19e   : > { %v3802_v34 = vand.u32 4294901760, %v3773_v9 }
 0x19f   : > { %20149 = vmatmul.mubr.f32.gmra.mrb[2].mxu0 %v3201_v44  ;;  %v3805_v44 = vand.u32 4294901760, %v27033_v22 }
 0x1a0   : > { %23440 = vmatpush3.bf16.msra.mxu0 %v23437_v4  ;;  %20167 = vmatprep.mubr.f32.mxu0 %v26835_v40  ;;  %v3799_v4 = vand.u32 4294901760, %v3772_v19 }
 0x1a1   : > { %23442 = vmatprep.subr.bf16.mxu0 %v23441_v56 }
 0x1a4   : > { %23444 = vmatpush3.bf16.msra.mxu0 %v23441_v56  ;;  %v30542_v56 = vand.u32 4294901760, %v26907_v38 }
 0x1a5   : > { %23446 = vmatprep.subr.bf16.mxu0 %v23445_v13 }
 0x1a8   : > { %23448 = vmatpush3.bf16.msra.mxu0 %v23445_v13  ;;  %v27059_v13 = vld [vmem:[#allocation5 + $0x170] sm:$0xff] }
 0x1a9   : > { %23450 = vmatprep.subr.bf16.mxu0 %v23449_v51 }
 0x1ab   : > { %20168 = vmatmul.mubr.f32.vlgmr.msra.gmra.mrb[0].mxu0 %v26874_v45 }
 0x1ac   : > { %23452 = vmatpush3.bf16.msra.mxu0 %v23449_v51  ;;  %20170 = vmatprep.mubr.f32.mxu0 %v26884_v11  ;;  %v27061_v51 = vld [vmem:[#allocation5 + $0x178] sm:$0xff] }
 0x1ad   : > { %23454 = vmatprep.subr.bf16.mxu0 %v23453_v18 }
 0x1af   : > { %20171 = vmatmul.mubr.f32.gmra.mrb[2].mxu0 %v26900_v0 }
 0x1b0   : > { %23456 = vmatpush3.bf16.msra.mxu0 %v23453_v18  ;;  %20189 = vmatprep.mubr.f32.mxu0 %v26858_v1  ;;  %v23485_v1 = vpack.c.bf16 %v30540_v31, %v30539_v3  ;;  %v3808_v3 = vand.u32 4294901760, %v27059_v13  ;;  %v30520_v31 = vand.u32 4294901760, %v27056_v30 }
 0x1b1   : > { %23458 = vmatprep.subr.bf16.mxu0 %v23457_v62 }
 0x1b4   : > { %23460 = vmatpush3.bf16.msra.mxu0 %v23457_v62 }
 0x1b5   : > { %23462 = vmatprep.subr.bf16.mxu0 %v23461_v61 }
 0x1b8   : > { %23464 = vmatpush3.bf16.msra.mxu0 %v23461_v61  ;;  %v27070_v61 = vpack.c.bf16 %v3799_v4, %v3796_v53 }
 0x1b9   : > { %23466 = vmatprep.subr.bf16.mxu0 %v26869_v60 }
 0x1bb   : > { %20190 = vmatmul.mubr.f32.vlgmr.msra.gmra.mrb[0].mxu0 %v26898_v33 }
 0x1bc   : > { %23468 = vmatpush3.bf16.msra.mxu0 %v26869_v60  ;;  %20192 = vmatprep.mubr.f32.mxu0 %v26907_v38  ;;  %v3770_v38 = vld [vmem:[#allocation5 + $0x148] sm:$0xff] }
 0x1bd   : > { %23470 = vmatprep.subr.bf16.mxu0 %v26888_v23  ;;  %v3793_v15 = vand.u32 4294901760, %v3770_v38 }
 0x1bf   : > { %20193 = vmatmul.mubr.f32.gmra.mrb[2].mxu0 %v26921_v55  ;;  %v27041_v21 = vsub.f32 %v3770_v38, %v3793_v15 }
 0x1c0   : > { %23472 = vmatpush3.bf16.msra.mxu0 %v26888_v23  ;;  %20211 = vmatprep.mubr.f32.mxu0 %v3169_v27  ;;  %v30541_v27 = vand.u32 4294901760, %v26898_v33  ;;  %v3769_v33 = vld [vmem:[#allocation5 + $0x140] sm:$0xff] }
 0x1c1   : > { %23474 = vmatprep.subr.bf16.mxu0 %v26910_v16  ;;  %v3790_v55 = vand.u32 4294901760, %v3769_v33  ;;  %v30512_v62 = vand.u32 4294901760, %v27041_v21 }
 0x1c4   : > { %23476 = vmatpush3.bf16.msra.mxu0 %v26910_v16 }
 0x1c5   : > { %23478 = vmatprep.subr.bf16.mxu0 %v26916_v14 }
 0x1c8   : > { %23480 = vmatpush3.bf16.msra.mxu0 %v26916_v14 }
 0x1c9   : > { %23482 = vmatprep.subr.bf16.mxu0 %v23481_v5 }
 0x1cb   : > { %20212 = vmatmul.mubr.f32.vlgmr.msra.gmra.mrb[0].mxu0 %v30541_v27  ;;  %v3784_v27 = vsel %vm279_vm0, %v26831_v28, 0  ;;  %v27096_v28 = vsub.f32 %v3771_v37, %v3796_v53  ;;  %v3787_v37 = vsel %vm279_vm0, %v26839_v41, 0 }
 0x1cc   : > { %23484 = vmatpush3.bf16.msra.mxu0 %v23481_v5  ;;  %20214 = vmatprep.mubr.f32.mxu0 %v30542_v56  ;;  %v27072_v5 = vpack.c.bf16 %v3805_v44, %v3802_v34  ;;  %v30546_v56 = vand.u32 4294901760, %v26206_v24 }
 0x1cd   : > { %23486 = vmatprep.subr.bf16.mxu0 %v23485_v1  ;;  %v30515_v41 = vand.u32 4294901760, %v27096_v28 }
 0x1cf   : > { %20215 = vmatmul.mubr.f32.gmra.mrb[2].mxu0 %v30545_v35 }
 0x1d0   : > { %23488 = vmatpush3.bf16.msra.mxu0 %v23485_v1  ;;  %20233 = vmatprep.mubr.f32.mxu0 %v26835_v40  ;;  %v3811_v1 = vand.u32 4294901760, %v27061_v51 }
 0x1d1   : > { %23490 = vmatprep.subr.bf16.mxu0 %v23489_v12 }
 0x1d4   : > { %23492 = vmatpush3.bf16.msra.mxu0 %v23489_v12  ;;  %v3913_v12 = vsub.f32 %v27041_v21, %v30512_v62 }
 0x1d5   : > { %23494 = vmatprep.subr.bf16.mxu0 %v23493_v20 }
 0x1d8   : > { %23496 = vmatpush3.bf16.msra.mxu0 %v23493_v20  ;;  %v27098_v20 = vsub.f32 %v3772_v19, %v3799_v4  ;;  %v30549_v19 = vand.u32 4294901760, %v26259_v52 }
 0x1d9   : > { %23498 = vmatprep.subr.bf16.mxu0 %v26869_v60 }
 0x1da   : > { %v421_v53 = vsub.f32 %v26259_v52, %v30549_v19 }
 0x1db   : > { %20234 = vmatmul.mubr.f32.vlgmr.msra.gmra.mrb[0].mxu0 %v26874_v45 }
 0x1dc   : > { %23500 = vmatpush3.bf16.msra.mxu0 %v26869_v60  ;;  %20236 = vmatprep.mubr.f32.mxu0 %v26884_v11  ;;  %v27039_v60 = vsub.f32 %v3769_v33, %v3790_v55  ;;  %v30548_v33 = vand.u32 4294901760, %v26252_v50  ;;  %v422_v19 = vand.u32 4294901760, %v421_v53 }
 0x1dd   : > { %23502 = vmatprep.subr.bf16.mxu0 %v26888_v23 }
 0x1de   : > { %v30513_v18 = vand.u32 4294901760, %v27039_v60  ;;  %v411_v38 = vsub.f32 %v26252_v50, %v30548_v33 }
 0x1df   : > { %20237 = vmatmul.mubr.f32.gmra.mrb[2].mxu0 %v26900_v0 }
 0x1e0   : > { %23504 = vmatpush3.bf16.msra.mxu0 %v26888_v23  ;;  %20255 = vmatprep.mubr.f32.mxu0 %v26835_v40  ;;  %v27065_v23 = vpack.c.bf16 %v3793_v15, %v3790_v55  ;;  %v3781_v40 = vsel %vm279_vm0, %v26819_v10, 0  ;;  %v452_v10 = vsub.f32 %v26206_v24, %v30546_v56  ;;  %v27089_v2 = vsub.f32 %v27039_v60, %v30513_v18 }
 0x1e1   : > { %23506 = vmatprep.subr.bf16.mxu0 %v26910_v16  ;;  %v27094_v35 = vand.u32 4294901760, %v3781_v40  ;;  %v3865_v15 = vsub.f32 %v27056_v30, %v30520_v31  ;;  %v27107_v56 = vand.u32 4294901760, %v3784_v27  ;;  %v412_v4 = vand.u32 4294901760, %v411_v38 }
 0x1e2   : > { %v453_v26 = vand.u32 4294901760, %v452_v10  ;;  %v27125_v18 = vsub.f32 %v3773_v9, %v3802_v34  ;;  %v30514_v38 = vand.u32 4294901760, %v27098_v20  ;;  %v27136_v9 = vsub.f32 %v27033_v22, %v3805_v44 }
 0x1e3   : > { %v27122_v62 = vsub.f32 %v3781_v40, %v27094_v35  ;;  %19617 = vmatprep.mubr.f32.mxu1 %v412_v4  ;;  %v27133_v40 = vpack.c.bf16 %v3811_v1, %v3808_v3  ;;  %v27139_v34 = vsub.f32 %v3784_v27, %v27107_v56  ;;  %v30552_v4 = vand.u32 4294901760, %v26233_v39 }
 0x1e4   : > { %23508 = vmatpush3.bf16.msra.mxu0 %v26910_v16  ;;  %v30547_v16 = vand.u32 4294901760, %v26208_v25  ;;  %v3920_v44 = vsub.f32 %v27096_v28, %v30515_v41  ;;  %v30516_v27 = vand.u32 4294901760, %v27125_v18  ;;  %19618 = vmatmul.mubr.f32.vlgmr.msra.gmra.mrb[0].mxu1 %v422_v19  ;;  %v27165_v19 = vsub.f32 %v27059_v13, %v3808_v3 }
 0x1e5   : > { %23510 = vmatprep.subr.bf16.mxu0 %v26916_v14  ;;  %v30517_v22 = vand.u32 4294901760, %v27122_v62 }
 0x1e6   : > { %v459_v6 = vsub.f32 %v26208_v25, %v30547_v16  ;;  %v30550_v16 = vand.u32 4294901760, %v26217_v29  ;;  %v3921_v3 = vand.u32 4294901760, %v3920_v44 }
 0x1e7   : > { %v3875_v13 = vsub.f32 %v27122_v62, %v30517_v22 }
 0x1e8   : > { %v460_v55 = vand.u32 4294901760, %v459_v6  ;;  %23512 = vmatpush3.bf16.msra.mxu0 %v26916_v14  ;;  %v466_v14 = vsub.f32 %v26217_v29, %v30550_v16  ;;  %v30551_v6 = vand.u32 4294901760, %v26227_v36 }
 0x1e9   : > { %23514 = vmatprep.subr.bf16.mxu0 %v27065_v23  ;;  %v3876_v22 = vand.u32 4294901760, %v3875_v13 }
 0x1ea   : > { %v23049_v10 = vpack.c.bf16 %v460_v55, %v453_v26  ;;  %v473_v33 = vsub.f32 %v26227_v36, %v30551_v6  ;;  %v27129_v26 = vand.u32 4294901760, %v3787_v37  ;;  %v467_v55 = vand.u32 4294901760, %v466_v14 }
 0x1eb   : > { %20256 = vmatmul.mubr.f32.vlgmr.msra.gmra.mrb[0].mxu0 %v26874_v45  ;;  %v3866_v6 = vand.u32 4294901760, %v3865_v15  ;;  %v3907_v45 = vand.u32 4294901760, %v27089_v2  ;;  %v480_v14 = vsub.f32 %v26233_v39, %v30552_v4  ;;  %v3927_v2 = vsub.f32 %v27098_v20, %v30514_v38 }
 0x1ec   : > { %v474_v16 = vand.u32 4294901760, %v473_v33  ;;  %23516 = vmatpush3.bf16.msra.mxu0 %v27065_v23  ;;  %20258 = vmatprep.mubr.f32.mxu0 %v26884_v11  ;;  %v30553_v11 = vand.u32 4294901760, %v26243_v47  ;;  %v3914_v33 = vand.u32 4294901760, %v3913_v12  ;;  %v30518_v4 = vand.u32 4294901760, %v27136_v9 }
 0x1ed   : > { %23518 = vmatprep.subr.bf16.mxu0 %v27070_v61  ;;  %23050 = vmatprep.subr.bf16.mxu1 %v23049_v10  ;;  %v481_v12 = vand.u32 4294901760, %v480_v14 }
 0x1ee   : > { %v23053_v53 = vpack.c.bf16 %v474_v16, %v467_v55  ;;  %v487_v15 = vsub.f32 %v26243_v47, %v30553_v11  ;;  %v27159_v55 = vsub.f32 %v3787_v37, %v27129_v26  ;;  %23052 = vmatpush3.bf16.msra.mxu1 %v23049_v10  ;;  %v30519_v11 = vand.u32 4294901760, %v27139_v34 }
 0x1ef   : > { %20259 = vmatmul.mubr.f32.gmra.mrb[2].mxu0 %v26900_v0  ;;  %v27168_v0 = vsub.f32 %v27061_v51, %v3811_v1  ;;  %v30554_v10 = vand.u32 4294901760, %v26274_v59  ;;  %v23529_v38 = vpack.c.bf16 %v3914_v33, %v3907_v45  ;;  %v3934_v51 = vsub.f32 %v27125_v18, %v30516_v27 }
 0x1f0   : > { %v488_v16 = vand.u32 4294901760, %v487_v15  ;;  %23520 = vmatpush3.bf16.msra.mxu0 %v27070_v61  ;;  %20277 = vmatprep.mubr.f32.mxu0 %v3866_v6  ;;  %v30555_v6 = vand.u32 4294901760, %v26286_v63  ;;  %v3894_v1 = vand.u32 4294901760, %v27159_v55  ;;  %v3928_v45 = vand.u32 4294901760, %v3927_v2 }
 0x1f1   : > { %23522 = vmatprep.subr.bf16.mxu0 %v27072_v5  ;;  %23054 = vmatprep.subr.bf16.mxu1 %v23053_v53  ;;  %v494_v14 = vsub.f32 %v26274_v59, %v30554_v10  ;;  %v3941_v33 = vsub.f32 %v27136_v9, %v30518_v4  ;;  %v3885_v44 = vsub.f32 %v27139_v34, %v30519_v11  ;;  %v30559_v13 = vand.u32 4294901760, %v27168_v0 }
 0x1f2   : > { %v23057_v37 = vpack.c.bf16 %v488_v16, %v481_v12  ;;  %v501_v15 = vsub.f32 %v26286_v63, %v30555_v6  ;;  %23056 = vmatpush3.bf16.msra.mxu1 %v23053_v53  ;;  %v30556_v12 = vand.u32 4294901760, %v26263_v54  ;;  %v30557_v53 = vand.u32 4294901760, %v26269_v57 }
 0x1f3   : > { %v495_v10 = vand.u32 4294901760, %v494_v14  ;;  %v3895_v4 = vsub.f32 %v27159_v55, %v3894_v1  ;;  %v23533_v11 = vpack.c.bf16 %v3928_v45, %v3921_v3  ;;  %v3886_v31 = vand.u32 4294901760, %v3885_v44  ;;  %v4468_v44 = vld [vmem:[#allocation5 + $0x1a0] sm:$0xff] }
 0x1f4   : > { %v431_v16 = vsub.f32 %v26263_v54, %v30556_v12  ;;  %v502_v41 = vand.u32 4294901760, %v501_v15  ;;  %23524 = vmatpush3.bf16.msra.mxu0 %v27072_v5  ;;  %23058 = vmatprep.subr.bf16.mxu1 %v23057_v37  ;;  %v441_v6 = vsub.f32 %v26269_v57, %v30557_v53  ;;  %v3935_v53 = vand.u32 4294901760, %v3934_v51 }
 0x1f5   : > { %23526 = vmatprep.subr.bf16.mxu0 %v27133_v40  ;;  %v3942_v14 = vand.u32 4294901760, %v3941_v33  ;;  %v30558_v15 = vand.u32 4294901760, %v27165_v19  ;;  %v3896_v3 = vand.u32 4294901760, %v3895_v4  ;;  %v23069_v33 = vpack.c.bf16 %v26227_v36, %v26217_v29 }
 0x1f6   : > { %v432_v2 = vand.u32 4294901760, %v431_v16  ;;  %v23061_v12 = vpack.c.bf16 %v502_v41, %v495_v10  ;;  %v442_v27 = vand.u32 4294901760, %v441_v6  ;;  %23060 = vmatpush3.bf16.msra.mxu1 %v23057_v37  ;;  %v3955_v16 = vsub.f32 %v27168_v0, %v30559_v13  ;;  %v4469_v6 = vld [vmem:[#allocation5 + $0x1a8] sm:$0xff] }
 0x1f7   : > { %v3948_v41 = vsub.f32 %v27165_v19, %v30558_v15  ;;  %v23065_v37 = vpack.c.bf16 %v26208_v25, %v26206_v24  ;;  %v23537_v51 = vpack.c.bf16 %v3942_v14, %v3935_v53  ;;  %v23073_v24 = vpack.c.bf16 %v26243_v47, %v26233_v39  ;;  %v4470_v14 = vld [vmem:[#allocation5 + $0x1b0] sm:$0xff] }
 0x1f8   : > { %19620 = vmatprep.mubr.f32.mxu1 %v432_v2  ;;  %23528 = vmatpush3.bf16.msra.mxu0 %v27133_v40  ;;  %v3956_v45 = vand.u32 4294901760, %v3955_v16  ;;  %v23077_v29 = vpack.c.bf16 %v26286_v63, %v26274_v59  ;;  %v23545_v36 = vpack.c.bf16 %v27041_v21, %v27039_v60  ;;  %v23549_v39 = vpack.c.bf16 %v27098_v20, %v27096_v28 }
 0x1f9   : > { %23062 = vmatprep.subr.bf16.mxu1 %v23061_v12  ;;  %23530 = vmatprep.subr.bf16.mxu0 %v23529_v38  ;;  %v3949_v10 = vand.u32 4294901760, %v3948_v41  ;;  %v30560_v47 = vand.u32 4294901760, %v27056_v30  ;;  %v30565_v59 = vand.u32 4294901760, %v27122_v62  ;;  %v30566_v63 = vand.u32 4294901760, %v27139_v34 }
 0x1fa   : > { %19621 = vmatmul.mubr.f32.gmra.mrb[2].mxu1 %v442_v27  ;;  %v4467_v27 = vld [vmem:[#allocation5 + $0x198] sm:$0xff] }
 0x1fb   : > { %19639 = vmatprep.mubr.f32.mxu1 %v26235_v42  ;;  %20278 = vmatmul.mubr.f32.vlgmr.msra.gmra.mrb[0].mxu0 %v3876_v22  ;;  %v23541_v25 = vpack.c.bf16 %v3956_v45, %v3949_v10  ;;  %v23553_v42 = vpack.c.bf16 %v27136_v9, %v27125_v18  ;;  %v4466_v22 = vld [vmem:[#allocation5 + $0x190] sm:$0xff] }
 0x1fc   : > { %23064 = vmatpush3.bf16.msra.mxu1 %v23061_v12  ;;  %23532 = vmatpush3.bf16.msra.mxu0 %v23529_v38  ;;  %v4464_v38 = vld [vmem:[#allocation5 + $0x180] sm:$0xff] }
 0x1fd   : > { %20280 = vmatprep.mubr.f32.mxu0 %v3886_v31  ;;  %23534 = vmatprep.subr.bf16.mxu0 %v23533_v11  ;;  %v30570_v31 = vmov %v30559_v13  ;;  %v4482_v13 = vsel %vm279_vm0, %v27030_v7, 0 }
 0x1fe   : > { %23066 = vmatprep.subr.bf16.mxu1 %v23065_v37 }
 0x1ff   : > { %19640 = vmatmul.mubr.f32.vlgmr.msra.gmra.mrb[0].mxu1 %v26237_v43  ;;  %20281 = vmatmul.mubr.f32.gmra.mrb[2].mxu0 %v3896_v3  ;;  %v23557_v43 = vpack.c.bf16 %v27168_v0, %v27165_v19  ;;  %v4491_v19 = vand.u32 4294901760, %v4466_v22  ;;  %v4494_v0 = vand.u32 4294901760, %v4467_v27  ;;  %v4500_v3 = vand.u32 4294901760, %v4469_v6 }
 0x200   : > { %23068 = vmatpush3.bf16.msra.mxu1 %v23065_v37  ;;  %23536 = vmatpush3.bf16.msra.mxu0 %v23533_v11  ;;  %v4497_v37 = vand.u32 4294901760, %v4468_v44 }
 0x201   : > { %20299 = vmatprep.mubr.f32.mxu0 %v27026_v32  ;;  %23538 = vmatprep.subr.bf16.mxu0 %v23537_v51  ;;  %v27314_v41 = vsub.f32 %v4467_v27, %v4494_v0  ;;  %v27321_v16 = vpack.c.bf16 %v4494_v0, %v4491_v19 }
 0x202   : > { %23070 = vmatprep.subr.bf16.mxu1 %v23069_v33  ;;  %19642 = vmatprep.mubr.f32.mxu1 %v26245_v48  ;;  %v30561_v48 = vand.u32 4294901760, %v27039_v60  ;;  %v30567_v60 = vand.u32 4294901760, %v27125_v18  ;;  %v4473_v18 = vsel %vm279_vm0, %v26650_v46, 0 }
 0x203   : > { %19643 = vmatmul.mubr.f32.gmra.mrb[2].mxu1 %v26247_v49  ;;  %v30562_v49 = vand.u32 4294901760, %v27041_v21  ;;  %v30568_v21 = vand.u32 4294901760, %v27136_v9  ;;  %v4465_v9 = vld [vmem:[#allocation5 + $0x188] sm:$0xff] }
 0x204   : > { %23072 = vmatpush3.bf16.msra.mxu1 %v23069_v33  ;;  %23540 = vmatpush3.bf16.msra.mxu0 %v23537_v51  ;;  %v4503_v51 = vand.u32 4294901760, %v4470_v14  ;;  %v27333_v33 = vand.u32 4294901760, %v4482_v13 }
 0x205   : > { %23074 = vmatprep.subr.bf16.mxu1 %v23073_v24  ;;  %23542 = vmatprep.subr.bf16.mxu0 %v23541_v25 }
 0x206   : > { %19661 = vmatprep.mubr.f32.mxu1 %v26252_v50  ;;  %v23577_v50 = vpack.c.bf16 %v30562_v49, %v30561_v48  ;;  %v27354_v48 = vsub.f32 %v4482_v13, %v27333_v33 }
 0x208   : > { %23076 = vmatpush3.bf16.msra.mxu1 %v23073_v24  ;;  %23544 = vmatpush3.bf16.msra.mxu0 %v23541_v25  ;;  %v4621_v25 = vand.u32 4294901760, %v27314_v41 }
 0x209   : > { %23078 = vmatprep.subr.bf16.mxu1 %v23077_v29  ;;  %23546 = vmatprep.subr.bf16.mxu0 %v23545_v36 }
 0x20b   : > { %20300 = vmatmul.mubr.f32.vlgmr.msra.gmra.mrb[0].mxu0 %v27094_v35 }
 0x20c   : > { %23080 = vmatpush3.bf16.msra.mxu1 %v23077_v29  ;;  %23548 = vmatpush3.bf16.msra.mxu0 %v23545_v36  ;;  %v27343_v36 = vpack.c.bf16 %v4500_v3, %v4497_v37 }
 0x20d   : > { %20302 = vmatprep.mubr.f32.mxu0 %v27107_v56  ;;  %23550 = vmatprep.subr.bf16.mxu0 %v23549_v39 }
 0x20f   : > { %19662 = vmatmul.mubr.f32.vlgmr.msra.gmra.mrb[0].mxu1 %v26259_v52  ;;  %20303 = vmatmul.mubr.f32.gmra.mrb[2].mxu0 %v27129_v26  ;;  %v30563_v52 = vand.u32 4294901760, %v27096_v28 }
 0x210   : > { %19664 = vmatprep.mubr.f32.mxu1 %v26263_v54  ;;  %23552 = vmatpush3.bf16.msra.mxu0 %v23549_v39  ;;  %v30564_v54 = vand.u32 4294901760, %v27098_v20  ;;  %v27281_v20 = vand.u32 4294901760, %v4473_v18  ;;  %v27345_v39 = vsub.f32 %v4468_v44, %v4497_v37 }
 0x211   : > { %20321 = vmatprep.mubr.f32.mxu0 %v27056_v30  ;;  %23554 = vmatprep.subr.bf16.mxu0 %v23553_v42  ;;  %v23585_v30 = vpack.c.bf16 %v30568_v21, %v30567_v60  ;;  %v4589_v21 = vand.u32 4294901760, %v27354_v48 }
 0x212   : > { %v27288_v46 = vsub.f32 %v4473_v18, %v27281_v20 }
 0x213   : > { %19665 = vmatmul.mubr.f32.gmra.mrb[2].mxu1 %v26269_v57  ;;  %v23581_v57 = vpack.c.bf16 %v30564_v54, %v30563_v52  ;;  %v4622_v52 = vsub.f32 %v27314_v41, %v4621_v25  ;;  %v4628_v54 = vand.u32 4294901760, %v27345_v39 }
 0x214   : > { %23556 = vmatpush3.bf16.msra.mxu0 %v23553_v42  ;;  %v4559_v11 = vand.u32 4294901760, %v27288_v46  ;;  %v27347_v42 = vsub.f32 %v4469_v6, %v4500_v3 }
 0x215   : > { %23558 = vmatprep.subr.bf16.mxu0 %v23557_v43  ;;  %v4629_v18 = vsub.f32 %v27345_v39, %v4628_v54 }
 0x216   : > { %v4560_v53 = vsub.f32 %v27288_v46, %v4559_v11 }
 0x218   : > { %23560 = vmatpush3.bf16.msra.mxu0 %v23557_v43  ;;  %v4561_v24 = vand.u32 4294901760, %v4560_v53 }
 0x219   : > { %23562 = vmatprep.subr.bf16.mxu0 %v27065_v23 }
 0x21b   : > { %20322 = vmatmul.mubr.f32.vlgmr.msra.gmra.mrb[0].mxu0 %v27122_v62  ;;  %v30569_v62 = vmov %v30558_v15  ;;  %v4471_v15 = vld [vmem:[#allocation5 + $0x1b8] sm:$0xff] }
 0x21c   : > { %23564 = vmatpush3.bf16.msra.mxu0 %v27065_v23  ;;  %20324 = vmatprep.mubr.f32.mxu0 %v27139_v34  ;;  %v23589_v28 = vpack.c.bf16 %v30570_v31, %v30569_v62  ;;  %v4488_v34 = vand.u32 4294901760, %v4465_v9  ;;  %v4506_v10 = vand.u32 4294901760, %v4471_v15  ;;  %v4623_v31 = vand.u32 4294901760, %v4622_v52 }
 0x21d   : > { %23566 = vmatprep.subr.bf16.mxu0 %v27070_v61 }
 0x21e   : > { %v27293_v4 = vsub.f32 %v4465_v9, %v4488_v34  ;;  %v27349_v43 = vpack.c.bf16 %v4506_v10, %v4503_v51 }
 0x21f   : > { %20325 = vmatmul.mubr.f32.gmra.mrb[2].mxu0 %v27159_v55 }
 0x220   : > { %23568 = vmatpush3.bf16.msra.mxu0 %v27070_v61  ;;  %20343 = vmatprep.mubr.f32.mxu0 %v30560_v47  ;;  %v4607_v2 = vand.u32 4294901760, %v27293_v4 }
 0x221   : > { %23570 = vmatprep.subr.bf16.mxu0 %v27072_v5 }
 0x222   : > { %v4608_v45 = vsub.f32 %v27293_v4, %v4607_v2 }
 0x224   : > { %23572 = vmatpush3.bf16.msra.mxu0 %v27072_v5  ;;  %v4609_v49 = vand.u32 4294901760, %v4608_v45 }
 0x225   : > { %23574 = vmatprep.subr.bf16.mxu0 %v27133_v40 }
 0x228   : > { %23576 = vmatpush3.bf16.msra.mxu0 %v27133_v40 }
 0x229   : > { %23578 = vmatprep.subr.bf16.mxu0 %v23577_v50 }
 0x22b   : > { %20344 = vmatmul.mubr.f32.vlgmr.msra.gmra.mrb[0].mxu0 %v30565_v59  ;;  %v27367_v59 = vsub.f32 %v4470_v14, %v4503_v51  ;;  %v23649_v51 = vpack.c.bf16 %v27347_v42, %v27345_v39 }
 0x22c   : > { %23580 = vmatpush3.bf16.msra.mxu0 %v23577_v50  ;;  %20346 = vmatprep.mubr.f32.mxu0 %v30566_v63  ;;  %v27369_v63 = vsub.f32 %v4471_v15, %v4506_v10 }
 0x22d   : > { %23582 = vmatprep.subr.bf16.mxu0 %v23581_v57  ;;  %v4642_v9 = vand.u32 4294901760, %v27367_v59 }
 0x22e   : > { %v23653_v10 = vpack.c.bf16 %v27369_v63, %v27367_v59 }
 0x22f   : > { %20347 = vmatmul.mubr.f32.gmra.mrb[2].mxu0 %v3894_v1  ;;  %v4479_v1 = vsel %vm279_vm0, %v27022_v8, 0 }
 0x230   : > { %23584 = vmatpush3.bf16.msra.mxu0 %v23581_v57  ;;  %20365 = vmatprep.mubr.f32.mxu0 %v27026_v32  ;;  %v27316_v8 = vand.u32 4294901760, %v4479_v1  ;;  %v4635_v57 = vand.u32 4294901760, %v27347_v42 }
 0x231   : > { %23586 = vmatprep.subr.bf16.mxu0 %v23585_v30 }
 0x232   : > { %v27340_v29 = vsub.f32 %v4479_v1, %v27316_v8  ;;  %v4643_v1 = vsub.f32 %v27367_v59, %v4642_v9 }
 0x234   : > { %23588 = vmatpush3.bf16.msra.mxu0 %v23585_v30  ;;  %v4644_v15 = vand.u32 4294901760, %v4643_v1 }
 0x235   : > { %23590 = vmatprep.subr.bf16.mxu0 %v23589_v28 }
 0x238   : > { %23592 = vmatpush3.bf16.msra.mxu0 %v23589_v28 }
 0x239   : > { %23594 = vmatprep.subr.bf16.mxu0 %v27065_v23 }
 0x23b   : > { %20366 = vmatmul.mubr.f32.vlgmr.msra.gmra.mrb[0].mxu0 %v27094_v35 }
 0x23c   : > { %23596 = vmatpush3.bf16.msra.mxu0 %v27065_v23  ;;  %20368 = vmatprep.mubr.f32.mxu0 %v27107_v56  ;;  %v4485_v23 = vand.u32 4294901760, %v4464_v38 }
 0x23d   : > { %23598 = vmatprep.subr.bf16.mxu0 %v27070_v61 }
 0x23e   : > { %v27291_v55 = vsub.f32 %v4464_v38, %v4485_v23  ;;  %v4636_v38 = vsub.f32 %v27347_v42, %v4635_v57 }
 0x23f   : > { %20369 = vmatmul.mubr.f32.gmra.mrb[2].mxu0 %v27129_v26 }
 0x240   : > { %23600 = vmatpush3.bf16.msra.mxu0 %v27070_v61  ;;  %20387 = vmatprep.mubr.f32.mxu0 %v27026_v32  ;;  %v4476_v32 = vsel %vm279_vm0, %v27010_v58, 0  ;;  %v27300_v61 = vpack.c.bf16 %v4488_v34, %v4485_v23  ;;  %v27308_v58 = vsub.f32 %v4466_v22, %v4491_v19  ;;  %v4649_v23 = vand.u32 4294901760, %v27369_v63 }
 0x241   : > { %23602 = vmatprep.subr.bf16.mxu0 %v27072_v5  ;;  %v27306_v12 = vand.u32 4294901760, %v4476_v32  ;;  %v4590_v22 = vsub.f32 %v27354_v48, %v4589_v21  ;;  %v4630_v19 = vand.u32 4294901760, %v4629_v18  ;;  %v4637_v0 = vand.u32 4294901760, %v4636_v38 }
 0x242   : > { %v4650_v44 = vsub.f32 %v27369_v63, %v4649_v23  ;;  %v23641_v37 = vpack.c.bf16 %v27293_v4, %v27291_v55  ;;  %v23645_v3 = vpack.c.bf16 %v27314_v41, %v27308_v58  ;;  %v23685_v4 = vpack.c.bf16 %v4649_v23, %v4642_v9 }
 0x243   : > { %v27331_v7 = vsub.f32 %v4476_v32, %v27306_v12  ;;  %v4591_v6 = vand.u32 4294901760, %v4590_v22  ;;  %v23633_v14 = vpack.c.bf16 %v4637_v0, %v4630_v19 }
 0x244   : > { %23604 = vmatpush3.bf16.msra.mxu0 %v27072_v5  ;;  %v4600_v5 = vand.u32 4294901760, %v27291_v55  ;;  %v4651_v53 = vand.u32 4294901760, %v4650_v44 }
 0x245   : > { %23606 = vmatprep.subr.bf16.mxu0 %v27133_v40  ;;  %v4569_v47 = vand.u32 4294901760, %v27331_v7 }
 0x246   : > { %v23637_v13 = vpack.c.bf16 %v4651_v53, %v4644_v15 }
 0x247   : > { %v4570_v60 = vsub.f32 %v27331_v7, %v4569_v47 }
 0x248   : > { %23608 = vmatpush3.bf16.msra.mxu0 %v27133_v40  ;;  %v4601_v40 = vsub.f32 %v27291_v55, %v4600_v5  ;;  %v23681_v55 = vpack.c.bf16 %v4635_v57, %v4628_v54 }
 0x249   : > { %23610 = vmatprep.subr.bf16.mxu0 %v27300_v61  ;;  %v4571_v34 = vand.u32 4294901760, %v4570_v60 }
 0x24b   : > { %20388 = vmatmul.mubr.f32.vlgmr.msra.gmra.mrb[0].mxu0 %v27094_v35  ;;  %v4614_v35 = vand.u32 4294901760, %v27308_v58 }
 0x24c   : > { %23612 = vmatpush3.bf16.msra.mxu0 %v27300_v61  ;;  %20390 = vmatprep.mubr.f32.mxu0 %v27107_v56  ;;  %v4602_v56 = vand.u32 4294901760, %v4601_v40  ;;  %v23673_v40 = vpack.c.bf16 %v4607_v2, %v4600_v5  ;;  %v5219_v2 = vld [vmem:[#allocation5 + $0x200] sm:$0xff] }
 0x24d   : > { %23614 = vmatprep.subr.bf16.mxu0 %v27321_v16  ;;  %v4615_v50 = vsub.f32 %v27308_v58, %v4614_v35  ;;  %v5220_v58 = vld [vmem:[#allocation5 + $0x208] sm:$0xff]  ;;  %v5234_v41 = vand.u32 4294901760, %v5219_v2 }
 0x24e   : > { %v23625_v30 = vpack.c.bf16 %v4609_v49, %v4602_v56 }
 0x24f   : > { %20391 = vmatmul.mubr.f32.gmra.mrb[2].mxu0 %v27129_v26  ;;  %v4579_v26 = vand.u32 4294901760, %v27340_v29  ;;  %v4616_v62 = vand.u32 4294901760, %v4615_v50  ;;  %v5328_v49 = vsub.f32 %v5219_v2, %v5234_v41 }
 0x250   : > { %23616 = vmatpush3.bf16.msra.mxu0 %v27321_v16  ;;  %20409 = vmatprep.mubr.f32.mxu0 %v4561_v24  ;;  %v5223_v24 = vld [vmem:[#allocation5 + $0x220] sm:$0xff] }
 0x251   : > { %23618 = vmatprep.subr.bf16.mxu0 %v27343_v36  ;;  %v4580_v28 = vsub.f32 %v27340_v29, %v4579_v26  ;;  %v23629_v27 = vpack.c.bf16 %v4623_v31, %v4616_v62  ;;  %v5329_v52 = vand.u32 4294901760, %v5328_v49 }
 0x253   : > { %v4581_v32 = vand.u32 4294901760, %v4580_v28  ;;  %v5330_v54 = vsub.f32 %v5328_v49, %v5329_v52 }
 0x254   : > { %23620 = vmatpush3.bf16.msra.mxu0 %v27343_v36 }
 0x255   : > { %23622 = vmatprep.subr.bf16.mxu0 %v27349_v43  ;;  %v5331_v60 = vand.u32 4294901760, %v5330_v54 }
 0x258   : > { %23624 = vmatpush3.bf16.msra.mxu0 %v27349_v43 }
 0x259   : > { %23626 = vmatprep.subr.bf16.mxu0 %v23625_v30 }
 0x25b   : > { %20410 = vmatmul.mubr.f32.vlgmr.msra.gmra.mrb[0].mxu0 %v4571_v34 }
 0x25c   : > { %23628 = vmatpush3.bf16.msra.mxu0 %v23625_v30  ;;  %20412 = vmatprep.mubr.f32.mxu0 %v4581_v32 }
 0x25d   : > { %23630 = vmatprep.subr.bf16.mxu0 %v23629_v27 }
 0x25f   : > { %20413 = vmatmul.mubr.f32.gmra.mrb[2].mxu0 %v4591_v6 }
 0x260   : > { %23632 = vmatpush3.bf16.msra.mxu0 %v23629_v27  ;;  %20431 = vmatprep.mubr.f32.mxu0 %v27281_v20 }
 0x261   : > { %23634 = vmatprep.subr.bf16.mxu0 %v23633_v14 }
 0x264   : > { %23636 = vmatpush3.bf16.msra.mxu0 %v23633_v14 }
 0x265   : > { %23638 = vmatprep.subr.bf16.mxu0 %v23637_v13 }
 0x268   : > { %23640 = vmatpush3.bf16.msra.mxu0 %v23637_v13 }
 0x269   : > { %23642 = vmatprep.subr.bf16.mxu0 %v23641_v37 }
 0x26b   : > { %20432 = vmatmul.mubr.f32.vlgmr.msra.gmra.mrb[0].mxu0 %v27306_v12 }
 0x26c   : > { %23644 = vmatpush3.bf16.msra.mxu0 %v23641_v37  ;;  %20434 = vmatprep.mubr.f32.mxu0 %v27316_v8 }
 0x26d   : > { %23646 = vmatprep.subr.bf16.mxu0 %v23645_v3 }
 0x26f   : > { %20435 = vmatmul.mubr.f32.gmra.mrb[2].mxu0 %v27333_v33 }
 0x270   : > { %23648 = vmatpush3.bf16.msra.mxu0 %v23645_v3  ;;  %20453 = vmatprep.mubr.f32.mxu0 %v27288_v46  ;;  %v23677_v46 = vpack.c.bf16 %v4621_v25, %v4614_v35  ;;  %v5246_v25 = vand.u32 4294901760, %v5223_v24 }
 0x271   : > { %23650 = vmatprep.subr.bf16.mxu0 %v23649_v51 }
 0x272   : > { %v5356_v38 = vsub.f32 %v5223_v24, %v5246_v25 }
 0x274   : > { %23652 = vmatpush3.bf16.msra.mxu0 %v23649_v51  ;;  %v5357_v22 = vand.u32 4294901760, %v5356_v38 }
 0x275   : > { %23654 = vmatprep.subr.bf16.mxu0 %v23653_v10 }
 0x276   : > { %v5358_v19 = vsub.f32 %v5356_v38, %v5357_v22 }
 0x278   : > { %23656 = vmatpush3.bf16.msra.mxu0 %v23653_v10  ;;  %v5359_v6 = vand.u32 4294901760, %v5358_v19 }
 0x279   : > { %23658 = vmatprep.subr.bf16.mxu0 %v27300_v61 }
 0x27b   : > { %20454 = vmatmul.mubr.f32.vlgmr.msra.gmra.mrb[0].mxu0 %v27331_v7  ;;  %v5221_v7 = vld [vmem:[#allocation5 + $0x210] sm:$0xff] }
 0x27c   : > { %23660 = vmatpush3.bf16.msra.mxu0 %v27300_v61  ;;  %20456 = vmatprep.mubr.f32.mxu0 %v27340_v29  ;;  %v5225_v29 = vld [vmem:[#allocation5 + $0x230] sm:$0xff] }
 0x27d   : > { %23662 = vmatprep.subr.bf16.mxu0 %v27321_v16  ;;  %v5252_v56 = vand.u32 4294901760, %v5225_v29 }
 0x27f   : > { %20457 = vmatmul.mubr.f32.gmra.mrb[2].mxu0 %v27354_v48  ;;  %v5370_v1 = vsub.f32 %v5225_v29, %v5252_v56  ;;  %v17850_v29 = vld [vmem:[%s30474_s3] ss:$0 sm:$0xff] }
 0x280   : > { %23664 = vmatpush3.bf16.msra.mxu0 %v27321_v16  ;;  %20475 = vmatprep.mubr.f32.mxu0 %v4559_v11 }
 0x281   : > { %23666 = vmatprep.subr.bf16.mxu0 %v27343_v36  ;;  %v5371_v15 = vand.u32 4294901760, %v5370_v1 }
 0x283   : > { %v5372_v37 = vsub.f32 %v5370_v1, %v5371_v15 }
 0x284   : > { %23668 = vmatpush3.bf16.msra.mxu0 %v27343_v36 }
 0x285   : > { %23670 = vmatprep.subr.bf16.mxu0 %v27349_v43  ;;  %v5373_v51 = vand.u32 4294901760, %v5372_v37 }
 0x288   : > { %23672 = vmatpush3.bf16.msra.mxu0 %v27349_v43 }
 0x289   : > { %23674 = vmatprep.subr.bf16.mxu0 %v23673_v40 }
 0x28b   : > { %20476 = vmatmul.mubr.f32.vlgmr.msra.gmra.mrb[0].mxu0 %v4569_v47 }
 0x28c   : > { %23676 = vmatpush3.bf16.msra.mxu0 %v23673_v40  ;;  %20478 = vmatprep.mubr.f32.mxu0 %v4579_v26 }
 0x28d   : > { %23678 = vmatprep.subr.bf16.mxu0 %v23677_v46 }
 0x28f   : > { %20479 = vmatmul.mubr.f32.gmra.mrb[2].mxu0 %v4589_v21 }
 0x290   : > { %23680 = vmatpush3.bf16.msra.mxu0 %v23677_v46  ;;  %20497 = vmatprep.mubr.f32.mxu0 %v27281_v20 }
 0x291   : > { %23682 = vmatprep.subr.bf16.mxu0 %v23681_v55 }
 0x294   : > { %23684 = vmatpush3.bf16.msra.mxu0 %v23681_v55 }
 0x295   : > { %23686 = vmatprep.subr.bf16.mxu0 %v23685_v4 }
 0x298   : > { %23688 = vmatpush3.bf16.msra.mxu0 %v23685_v4 }
 0x299   : > { %23690 = vmatprep.subr.bf16.mxu0 %v27300_v61 }
 0x29b   : > { %20498 = vmatmul.mubr.f32.vlgmr.msra.gmra.mrb[0].mxu0 %v27306_v12 }
 0x29c   : > { %23692 = vmatpush3.bf16.msra.mxu0 %v27300_v61  ;;  %20500 = vmatprep.mubr.f32.mxu0 %v27316_v8 }
 0x29d   : > { %23694 = vmatprep.subr.bf16.mxu0 %v27321_v16 }
 0x29f   : > { %20501 = vmatmul.mubr.f32.gmra.mrb[2].mxu0 %v27333_v33 }
 0x2a0   : > { %23696 = vmatpush3.bf16.msra.mxu0 %v27321_v16  ;;  %20519 = vmatprep.mubr.f32.mxu0 %v27281_v20  ;;  %v5237_v16 = vand.u32 4294901760, %v5220_v58 }
 0x2a1   : > { %23698 = vmatprep.subr.bf16.mxu0 %v27343_v36 }
 0x2a2   : > { %v27470_v45 = vpack.c.bf16 %v5237_v16, %v5234_v41  ;;  %v5335_v50 = vsub.f32 %v5220_v58, %v5237_v16 }
 0x2a4   : > { %23700 = vmatpush3.bf16.msra.mxu0 %v27343_v36  ;;  %v5226_v36 = vld [vmem:[#allocation5 + $0x238] sm:$0xff]  ;;  %23706 = vmatprep.subr.bf16.mxu1 %v27470_v45  ;;  %v5336_v26 = vand.u32 4294901760, %v5335_v50  ;;  %v27495_v46 = vpack.c.bf16 %v5335_v50, %v5328_v49 }
 0x2a5   : > { %23702 = vmatprep.subr.bf16.mxu0 %v27349_v43  ;;  %23708 = vmatpush3.bf16.msra.mxu1 %v27470_v45  ;;  %v5255_v47 = vand.u32 4294901760, %v5226_v36 }
 0x2a6   : > { %v5337_v57 = vsub.f32 %v5335_v50, %v5336_v26  ;;  %v27503_v58 = vpack.c.bf16 %v5336_v26, %v5329_v52 }
 0x2a7   : > { %v27481_v48 = vpack.c.bf16 %v5255_v47, %v5252_v56  ;;  %v5377_v44 = vsub.f32 %v5226_v36, %v5255_v47 }
 0x2a8   : > { %23704 = vmatpush3.bf16.msra.mxu0 %v27349_v43  ;;  %v5338_v21 = vand.u32 4294901760, %v5337_v57 }
 0x2a9   : > { %v5378_v53 = vand.u32 4294901760, %v5377_v44  ;;  %v27501_v2 = vpack.c.bf16 %v5377_v44, %v5370_v1 }
 0x2aa   : > { %v27486_v31 = vpack.c.bf16 %v5338_v21, %v5331_v60 }
 0x2ab   : > { %20520 = vmatmul.mubr.f32.vlgmr.msra.gmra.mrb[0].mxu0 %v27306_v12  ;;  %v5222_v12 = vld [vmem:[#allocation5 + $0x218] sm:$0xff]  ;;  %v5379_v3 = vsub.f32 %v5377_v44, %v5378_v53 }
 0x2ac   : > { %20522 = vmatprep.mubr.f32.mxu0 %v27316_v8  ;;  %v5240_v8 = vand.u32 4294901760, %v5221_v7  ;;  %v5243_v35 = vand.u32 4294901760, %v5222_v12 }
 0x2ad   : > { %v5380_v10 = vand.u32 4294901760, %v5379_v3 }
 0x2ae   : > { %v27474_v42 = vpack.c.bf16 %v5243_v35, %v5240_v8  ;;  %v5342_v59 = vsub.f32 %v5221_v7, %v5240_v8  ;;  %v5349_v63 = vsub.f32 %v5222_v12, %v5243_v35  ;;  %v27509_v7 = vpack.c.bf16 %v5378_v53, %v5371_v15  ;;  %v17849_v35 = vld [vmem:[%s30473_s2] ss:$0 sm:$0xff] }
 0x2af   : > { %20523 = vmatmul.mubr.f32.gmra.mrb[2].mxu0 %v27333_v33  ;;  %v5224_v33 = vld [vmem:[#allocation5 + $0x228] sm:$0xff]  ;;  %v27493_v40 = vpack.c.bf16 %v5380_v10, %v5373_v51 }
 0x2b0   : > { %v5249_v39 = vand.u32 4294901760, %v5224_v33  ;;  %23710 = vmatprep.subr.bf16.mxu1 %v27474_v42  ;;  %v5343_v30 = vand.u32 4294901760, %v5342_v59  ;;  %v5350_v62 = vand.u32 4294901760, %v5349_v63  ;;  %v27497_v55 = vpack.c.bf16 %v5349_v63, %v5342_v59  ;;  %21339 = vmatprep.mubr.msk.f32.mxu0 %vm26034_vm1, %v30529_v17 }
 0x2b1   : > { %23712 = vmatpush3.bf16.msra.mxu1 %v27474_v42 }
 0x2b2   : > { %v27476_v43 = vpack.c.bf16 %v5249_v39, %v5246_v25  ;;  %v5344_v28 = vsub.f32 %v5342_v59, %v5343_v30  ;;  %v5351_v18 = vsub.f32 %v5349_v63, %v5350_v62  ;;  %v5363_v9 = vsub.f32 %v5224_v33, %v5249_v39 }
 0x2b3   : > { %v27505_v41 = vpack.c.bf16 %v5350_v62, %v5343_v30 }
 0x2b4   : > { %23714 = vmatprep.subr.bf16.mxu1 %v27476_v43  ;;  %v5345_v23 = vand.u32 4294901760, %v5344_v28  ;;  %v5352_v34 = vand.u32 4294901760, %v5351_v18  ;;  %v5364_v27 = vand.u32 4294901760, %v5363_v9  ;;  %v27499_v4 = vpack.c.bf16 %v5363_v9, %v5356_v38 }
 0x2b5   : > { %23716 = vmatpush3.bf16.msra.mxu1 %v27476_v43 }
 0x2b6   : > { %23718 = vmatprep.subr.bf16.mxu1 %v27481_v48  ;;  %v27489_v32 = vpack.c.bf16 %v5352_v34, %v5345_v23  ;;  %v5365_v0 = vsub.f32 %v5363_v9, %v5364_v27  ;;  %v27507_v16 = vpack.c.bf16 %v5364_v27, %v5357_v22 }
 0x2b8   : > { %v5366_v14 = vand.u32 4294901760, %v5365_v0 }
 0x2b9   : > { %23720 = vmatpush3.bf16.msra.mxu1 %v27481_v48 }
 0x2ba   : > { %23722 = vmatprep.subr.bf16.mxu1 %v27486_v31  ;;  %v27491_v13 = vpack.c.bf16 %v5366_v14, %v5359_v6 }
 0x2e2   : > { %v27462_v11 = vpop.f32.mrb[0].mxu1 }
 0x2e3   : > { %v27464_v61 = vpop.f32.mrb[1].mxu1 }
 0x2e6   : > { %v27466_v5 = vpop.f32.mrb[2].mxu1 }
 0x2e7   : > { %v27468_v20 = vpop.f32.mrb[3].mxu1 }
 0x37e   : > { %v20521_v12 = vpop.f32.mrb[0].mxu0 }
 0x37f   : > { %v25457_v24 = vadd.f32 %v20521_v12, %v27462_v11  ;;  %v5128_v8 = vpop.f32.mrb[1].mxu0 }
 0x380   : > { %v25458_v33 = vadd.f32 %v5128_v8, %v27464_v61 }
 0x381   : > { %v5155_v25 = vmax.f32 %v25457_v24, 0.0 }
 0x382   : > { %v5154_v36 = vmax.f32 %v25458_v33, 0.0  ;;  %v20524_v39 = vpop.f32.mrb[2].mxu0 }
 0x383   : > { %v5166_v56 = vmul.f32 %v17849_v35, %v5155_v25  ;;  %v25459_v47 = vadd.f32 %v20524_v39, %v27466_v5  ;;  %v5140_v49 = vpop.f32.mrb[3].mxu0  ;;  %v5213_v39 = vld [vmem:[#allocation5 + $0x1e8] sm:$0xff] }
 0x384   : > { %v5165_v50 = vmul.f32 %v17849_v35, %v5154_v36  ;;  %v25460_v11 = vadd.f32 %v5140_v49, %v27468_v20  ;;  %v5212_v36 = vld [vmem:[#allocation5 + $0x1e0] sm:$0xff]  ;;  %v5215_v49 = vld [vmem:[#allocation5 + $0x1f8] sm:$0xff] }
 0x385   : > { %v5177_v52 = vadd.f32 %v17850_v29, %v5166_v56  ;;  %v5157_v26 = vmax.f32 %v25459_v47, 0.0 }
 0x386   : > { %v5176_v54 = vadd.f32 %v17850_v29, %v5165_v50  ;;  %v5156_v57 = vmax.f32 %v25460_v11, 0.0 }
 0x387   : > { %5181 = vst.msk [vmem:[#allocation2 + $0x8] sm:$0xff] %vm279_vm0, %v5177_v52  ;;  %v5168_v61 = vmul.f32 %v17849_v35, %v5157_v26 }
 0x388   : > { %5180 = vst.msk [vmem:[#allocation2] sm:$0xff] %vm279_vm0, %v5176_v54  ;;  %v5167_v59 = vmul.f32 %v17849_v35, %v5156_v57  ;;  %v5832_v54 = vand.u32 4294901760, %v5212_v36  ;;  %v5835_v57 = vand.u32 4294901760, %v5213_v39 }
 0x389   : > { %v5179_v63 = vadd.f32 %v17850_v29, %v5168_v61 }
 0x38a   : > { %v5178_v60 = vadd.f32 %v17850_v29, %v5167_v59 }
 0x38b   : > { %5183 = vst.msk [vmem:[#allocation2 + $0x18] sm:$0xff] %vm279_vm0, %v5179_v63  ;;  %v5841_v63 = vand.u32 4294901760, %v5215_v49 }
 0x38c   : > { %5182 = vst.msk [vmem:[#allocation2 + $0x10] sm:$0xff] %vm279_vm0, %v5178_v60 }
 0x38f   : > { %v5184_v5 = vld [vmem:[#allocation2] ss:$2 sm:$0xff]  ;;  %v5188_v21 = vld [vmem:[#allocation2 + $0x1] ss:$2 sm:$0xff] }
 0x390   : > { %5201 = vst.msk [vmem:[#allocation3 + $0x1] sm:$0xff] %vm279_vm0, %v5184_v5  ;;  %5203 = vst.msk [vmem:[#allocation4 + $0x2] sm:$0xff] %vm279_vm0, %v5188_v21 }
 0x393   : > { %v5186_v20 = vld [vmem:[#allocation2 + $0x10] ss:$2 sm:$0xff]  ;;  %v5190_v30 = vld [vmem:[#allocation2 + $0x11] ss:$2 sm:$0xff] }
 0x394   : > { %5202 = vst.msk [vmem:[#allocation3 + $0x9] sm:$0xff] %vm279_vm0, %v5186_v20  ;;  %5204 = vst.msk [vmem:[#allocation4 + $0xa] sm:$0xff] %vm279_vm0, %v5190_v30  ;;  %v27661_v30 = vsub.f32 %v5212_v36, %v5832_v54 }
 0x397   : > { %v5216_v62 = vld [vmem:[#allocation3] sm:$0xff]  ;;  %v27533_v23 = vld [vmem:[#allocation4] sm:$0xff] }
 0x398   : > { %v5228_v28 = vsel %vm279_vm0, %v5216_v62, 0  ;;  %v27535_v34 = vld [vmem:[#allocation4 + $0x1] sm:$0xff]  ;;  %v27537_v22 = vld [vmem:[#allocation3 + $0x1] sm:$0xff]  ;;  %v27664_v62 = vpack.c.bf16 %v5835_v57, %v5832_v54 }
 0x399   : > { %v27530_v18 = vand.u32 4294901760, %v5228_v28  ;;  %v27542_v0 = vld [vmem:[#allocation4 + $0x2] sm:$0xff] }
 0x39b   : > { %v5307_v38 = vsub.f32 %v5228_v28, %v27530_v18  ;;  %v5217_v9 = vld [vmem:[#allocation3 + $0x8] sm:$0xff]  ;;  %v27540_v19 = vld [vmem:[#allocation4 + $0x8] sm:$0xff] }
 0x39c   : > { %v5231_v27 = vsel %vm279_vm0, %v5217_v9, 0  ;;  %v27544_v1 = vld [vmem:[#allocation3 + $0x2] sm:$0xff]  ;;  %v27552_v15 = vld [vmem:[#allocation3 + $0xa] sm:$0xff]  ;;  %v27558_v3 = vld [vmem:[#allocation4 + $0xa] sm:$0xff]  ;;  %v5817_v56 = vsel %vm279_vm0, %v27540_v19, 0 }
 0x39d   : > { %v5308_v44 = vand.u32 4294901760, %v5307_v38  ;;  %v27546_v6 = vand.u32 4294901760, %v5231_v27  ;;  %v27548_v14 = vld [vmem:[#allocation3 + $0x9] sm:$0xff]  ;;  %9420 = vst.msk [vmem:[#allocation3] sm:$0xff] %vm279_vm0, %v30529_v17  ;;  %v27556_v37 = vld [vmem:[#allocation4 + $0x9] sm:$0xff]  ;;  %v27649_v61 = vand.u32 4294901760, %v5817_v56 }
 0x39e   : > { %v27554_v53 = vld [vmem:[#allocation4 + $0x3] sm:$0xff]  ;;  %9421 = vst.msk [vmem:[#allocation3 + $0x8] sm:$0xff] %vm279_vm0, %v30529_v17  ;;  %9422 = vst.msk [vmem:[#allocation3 + $0x10] sm:$0xff] %vm279_vm0, %v30529_v17  ;;  %v27566_v51 = vld [vmem:[#allocation4 + $0xb] sm:$0xff] }
 0x39f   : > { %9425 = vst.msk [vmem:[#allocation4] sm:$0xff] %vm279_vm0, %v30529_v17  ;;  %v5309_v10 = vsub.f32 %v5307_v38, %v5308_v44  ;;  %v5317_v12 = vsub.f32 %v5231_v27, %v27546_v6  ;;  %13311 = vst.msk [vmem:[#allocation3 + $0x10] sm:$0xff] %vm279_vm0, %v30529_v17  ;;  %v27667_v28 = vsub.f32 %v5817_v56, %v27649_v61 }
 0x3a0   : > { %9427 = vst.msk [vmem:[#allocation4 + $0x10] sm:$0xff] %vm279_vm0, %v30529_v17  ;;  %9426 = vst.msk [vmem:[#allocation4 + $0x8] sm:$0xff] %vm279_vm0, %v30529_v17 }
 0x3a1   : > { %13316 = vst.msk [vmem:[#allocation4 + $0x10] sm:$0xff] %vm279_vm0, %v30529_v17  ;;  %v5310_v24 = vand.u32 4294901760, %v5309_v10  ;;  %v5318_v8 = vand.u32 4294901760, %v5317_v12 }
 0x3a3   : > { %20541 = vmatprep.mubr.f32.mxu1 %v5310_v24  ;;  %v5319_v35 = vsub.f32 %v5317_v12, %v5318_v8  ;;  %v27686_v24 = vsub.f32 %v5215_v49, %v5841_v63 }
 0x3a5   : > { %v5320_v33 = vand.u32 4294901760, %v5319_v35 }
 0x3a7   : > { %20542 = vmatmul.mubr.f32.vlgmr.msra.gmra.mrb[4].mxu1 %v5320_v33 }
 0x3a8   : > { %23724 = vmatpush3.bf16.msra.mxu1 %v27486_v31  ;;  %20560 = vmatprep.mubr.f32.mxu1 %v27530_v18  ;;  %v5814_v31 = vsel %vm279_vm0, %v27533_v23, 0 }
 0x3a9   : > { %23726 = vmatprep.subr.bf16.mxu1 %v27489_v32 }
 0x3ac   : > { %23728 = vmatpush3.bf16.msra.mxu1 %v27489_v32  ;;  %v27614_v32 = vand.u32 4294901760, %v5814_v31 }
 0x3ad   : > { %23730 = vmatprep.subr.bf16.mxu1 %v27491_v13 }
 0x3b0   : > { %23732 = vmatpush3.bf16.msra.mxu1 %v27491_v13  ;;  %v5208_v13 = vld [vmem:[#allocation5 + $0x1c0] sm:$0xff] }
 0x3b1   : > { %23734 = vmatprep.subr.bf16.mxu1 %v27493_v40 }
 0x3b4   : > { %23736 = vmatpush3.bf16.msra.mxu1 %v27493_v40  ;;  %v5209_v40 = vld [vmem:[#allocation5 + $0x1c8] sm:$0xff] }
 0x3b5   : > { %23738 = vmatprep.subr.bf16.mxu1 %v27495_v46 }
 0x3b7   : > { %20561 = vmatmul.mubr.f32.vlgmr.msra.gmra.mrb[4].mxu1 %v27546_v6 }
 0x3b8   : > { %23740 = vmatpush3.bf16.msra.mxu1 %v27495_v46  ;;  %20579 = vmatprep.mubr.f32.mxu1 %v5307_v38  ;;  %v27621_v46 = vsub.f32 %v5814_v31, %v27614_v32 }
 0x3b9   : > { %23742 = vmatprep.subr.bf16.mxu1 %v27497_v55 }
 0x3bc   : > { %23744 = vmatpush3.bf16.msra.mxu1 %v27497_v55  ;;  %v5820_v55 = vand.u32 4294901760, %v5208_v13 }
 0x3bd   : > { %23746 = vmatprep.subr.bf16.mxu1 %v27499_v4 }
 0x3c0   : > { %23748 = vmatpush3.bf16.msra.mxu1 %v27499_v4  ;;  %v5823_v4 = vand.u32 4294901760, %v5209_v40 }
 0x3c1   : > { %23750 = vmatprep.subr.bf16.mxu1 %v27501_v2 }
 0x3c4   : > { %23752 = vmatpush3.bf16.msra.mxu1 %v27501_v2  ;;  %v5894_v2 = vand.u32 4294901760, %v27621_v46 }
 0x3c5   : > { %23754 = vmatprep.subr.bf16.mxu1 %v27470_v45 }
 0x3c6   : > { %v5895_v29 = vsub.f32 %v27621_v46, %v5894_v2 }
 0x3c7   : > { %20580 = vmatmul.mubr.f32.vlgmr.msra.gmra.mrb[4].mxu1 %v5317_v12 }
 0x3c8   : > { %23756 = vmatpush3.bf16.msra.mxu1 %v27470_v45  ;;  %20598 = vmatprep.mubr.f32.mxu1 %v5308_v44  ;;  %v5896_v59 = vand.u32 4294901760, %v5895_v29  ;;  %v5943_v44 = vand.u32 4294901760, %v27661_v30 }
 0x3c9   : > { %23758 = vmatprep.subr.bf16.mxu1 %v27474_v42 }
 0x3ca   : > { %v5944_v31 = vsub.f32 %v27661_v30, %v5943_v44 }
 0x3cc   : > { %23760 = vmatpush3.bf16.msra.mxu1 %v27474_v42 }
 0x3cd   : > { %23762 = vmatprep.subr.bf16.mxu1 %v27476_v43 }
 0x3d0   : > { %23764 = vmatpush3.bf16.msra.mxu1 %v27476_v43 }
 0x3d1   : > { %23766 = vmatprep.subr.bf16.mxu1 %v27481_v48 }
 0x3d4   : > { %23768 = vmatpush3.bf16.msra.mxu1 %v27481_v48 }
 0x3d5   : > { %23770 = vmatprep.subr.bf16.mxu1 %v27503_v58 }
 0x3d7   : > { %20599 = vmatmul.mubr.f32.vlgmr.msra.gmra.mrb[4].mxu1 %v5318_v8 }
 0x3d8   : > { %23772 = vmatpush3.bf16.msra.mxu1 %v27503_v58  ;;  %20617 = vmatprep.mubr.f32.mxu1 %v27530_v18  ;;  %v5210_v58 = vld [vmem:[#allocation5 + $0x1d0] sm:$0xff] }
 0x3d9   : > { %23774 = vmatprep.subr.bf16.mxu1 %v27505_v41  ;;  %v5826_v25 = vand.u32 4294901760, %v5210_v58 }
 0x3db   : > { %v27642_v11 = vsub.f32 %v5210_v58, %v5826_v25 }
 0x3dc   : > { %23776 = vmatpush3.bf16.msra.mxu1 %v27505_v41  ;;  %v5211_v41 = vld [vmem:[#allocation5 + $0x1d8] sm:$0xff] }
 0x3dd   : > { %23778 = vmatprep.subr.bf16.mxu1 %v27507_v16  ;;  %v5929_v21 = vand.u32 4294901760, %v27642_v11 }
 0x3df   : > { %v5930_v27 = vsub.f32 %v27642_v11, %v5929_v21 }
 0x3e0   : > { %23780 = vmatpush3.bf16.msra.mxu1 %v27507_v16  ;;  %v27629_v16 = vsub.f32 %v5209_v40, %v5823_v4 }
 0x3e1   : > { %23782 = vmatprep.subr.bf16.mxu1 %v27509_v7  ;;  %v5931_v35 = vand.u32 4294901760, %v5930_v27  ;;  %v6407_v27 = vld [vmem:[#allocation5 + $0x268] sm:$0xff] }
 0x3e2   : > { %v5922_v50 = vand.u32 4294901760, %v27629_v16 }
 0x3e4   : > { %23784 = vmatpush3.bf16.msra.mxu1 %v27509_v7  ;;  %v27632_v7 = vpack.c.bf16 %v5823_v4, %v5820_v55  ;;  %v5923_v5 = vsub.f32 %v27629_v16, %v5922_v50  ;;  %v5964_v4 = vand.u32 4294901760, %v27686_v24 }
 0x3e5   : > { %23786 = vmatprep.subr.bf16.mxu1 %v27470_v45 }
 0x3e6   : > { %v5924_v23 = vand.u32 4294901760, %v5923_v5  ;;  %v5965_v36 = vsub.f32 %v27686_v24, %v5964_v4 }
 0x3e7   : > { %20618 = vmatmul.mubr.f32.vlgmr.msra.gmra.mrb[4].mxu1 %v27546_v6 }
 0x3e8   : > { %23788 = vmatpush3.bf16.msra.mxu1 %v27470_v45  ;;  %20636 = vmatprep.mubr.f32.mxu1 %v27530_v18  ;;  %v27626_v45 = vsub.f32 %v5208_v13, %v5820_v55  ;;  %v27669_v18 = vsub.f32 %v5213_v39, %v5835_v57 }
 0x3e9   : > { %23790 = vmatprep.subr.bf16.mxu1 %v27474_v42 }
 0x3ea   : > { %v5915_v47 = vand.u32 4294901760, %v27626_v45  ;;  %v5950_v10 = vand.u32 4294901760, %v27669_v18  ;;  %v23833_v54 = vpack.c.bf16 %v27629_v16, %v27626_v45  ;;  %v6411_v16 = vsel %vm279_vm0, %v27535_v34, 0 }
 0x3ec   : > { %23792 = vmatpush3.bf16.msra.mxu1 %v27474_v42  ;;  %v5829_v42 = vand.u32 4294901760, %v5211_v41  ;;  %v5916_v60 = vsub.f32 %v27626_v45, %v5915_v47  ;;  %v5951_v40 = vsub.f32 %v27669_v18, %v5950_v10 }
 0x3ed   : > { %23794 = vmatprep.subr.bf16.mxu1 %v27476_v43 }
 0x3ee   : > { %v27644_v52 = vsub.f32 %v5211_v41, %v5829_v42  ;;  %v27647_v26 = vpack.c.bf16 %v5829_v42, %v5826_v25  ;;  %v5917_v9 = vand.u32 4294901760, %v5916_v60  ;;  %v5945_v41 = vand.u32 4294901760, %v5944_v31 }
 0x3ef   : > { %v5952_v42 = vand.u32 4294901760, %v5951_v40 }
 0x3f0   : > { %23796 = vmatpush3.bf16.msra.mxu1 %v27476_v43  ;;  %v5214_v43 = vld [vmem:[#allocation5 + $0x1f0] sm:$0xff]  ;;  %v5936_v20 = vand.u32 4294901760, %v27644_v52  ;;  %v23817_v8 = vpack.c.bf16 %v5924_v23, %v5917_v9  ;;  %v23837_v57 = vpack.c.bf16 %v27644_v52, %v27642_v11  ;;  %v6403_v11 = vld [vmem:[#allocation5 + $0x248] sm:$0xff]  ;;  %v6406_v23 = vld [vmem:[#allocation5 + $0x260] sm:$0xff] }
 0x3f1   : > { %23798 = vmatprep.subr.bf16.mxu1 %v27481_v48  ;;  %v23825_v39 = vpack.c.bf16 %v5952_v42, %v5945_v41  ;;  %v6420_v60 = vand.u32 4294901760, %v6403_v11 }
 0x3f2   : > { %v5937_v19 = vsub.f32 %v27644_v52, %v5936_v20 }
 0x3f4   : > { %23800 = vmatpush3.bf16.msra.mxu1 %v27481_v48  ;;  %v5838_v48 = vand.u32 4294901760, %v5214_v43  ;;  %v5938_v33 = vand.u32 4294901760, %v5937_v19  ;;  %v6409_v19 = vld [vmem:[#allocation5 + $0x278] sm:$0xff] }
 0x3f5   : > { %23802 = vmatprep.subr.bf16.mxu1 %v27632_v7  ;;  %v6438_v31 = vand.u32 4294901760, %v6409_v19 }
 0x3f6   : > { %v27671_v38 = vpack.c.bf16 %v5841_v63, %v5838_v48  ;;  %v27684_v12 = vsub.f32 %v5214_v43, %v5838_v48  ;;  %v23821_v58 = vpack.c.bf16 %v5938_v33, %v5931_v35  ;;  %v5966_v43 = vand.u32 4294901760, %v5965_v36 }
 0x3f7   : > { %20637 = vmatmul.mubr.f32.vlgmr.msra.gmra.mrb[4].mxu1 %v27546_v6  ;;  %v5904_v6 = vand.u32 4294901760, %v27667_v28  ;;  %v23865_v63 = vpack.c.bf16 %v5922_v50, %v5915_v47  ;;  %v27740_v47 = vand.u32 4294901760, %v6411_v16  ;;  %v6402_v50 = vld [vmem:[#allocation5 + $0x240] sm:$0xff]  ;;  %v6432_v35 = vand.u32 4294901760, %v6407_v27 }
 0x3f8   : > { %23804 = vmatpush3.bf16.msra.mxu1 %v27632_v7  ;;  %20655 = vmatprep.mubr.f32.mxu1 %v5896_v59  ;;  %v5957_v55 = vand.u32 4294901760, %v27684_v12  ;;  %v23841_v59 = vpack.c.bf16 %v27669_v18, %v27661_v30  ;;  %v23845_v48 = vpack.c.bf16 %v27686_v24, %v27684_v12  ;;  %v6417_v34 = vand.u32 4294901760, %v6402_v50 }
 0x3f9   : > { %23806 = vmatprep.subr.bf16.mxu1 %v27647_v26  ;;  %v5905_v13 = vsub.f32 %v27667_v28, %v5904_v6  ;;  %v27747_v52 = vsub.f32 %v6411_v16, %v27740_v47  ;;  %v27757_v30 = vsub.f32 %v6403_v11, %v6420_v60 }
 0x3fa   : > { %v5958_v29 = vsub.f32 %v27684_v12, %v5957_v55  ;;  %v23877_v45 = vpack.c.bf16 %v5964_v4, %v5957_v55 }
 0x3fb   : > { %v5906_v25 = vand.u32 4294901760, %v5905_v13  ;;  %v6491_v5 = vand.u32 4294901760, %v27747_v52 }
 0x3fc   : > { %23808 = vmatpush3.bf16.msra.mxu1 %v27647_v26  ;;  %v5959_v56 = vand.u32 4294901760, %v5958_v29 }
 0x3fd   : > { %23810 = vmatprep.subr.bf16.mxu1 %v27664_v62  ;;  %v6492_v9 = vsub.f32 %v27747_v52, %v6491_v5 }
 0x3fe   : > { %v23829_v49 = vpack.c.bf16 %v5966_v43, %v5959_v56 }
 0x3ff   : > { %v6493_v33 = vand.u32 4294901760, %v6492_v9 }
 0x400   : > { %23812 = vmatpush3.bf16.msra.mxu1 %v27664_v62 }
 0x401   : > { %23814 = vmatprep.subr.bf16.mxu1 %v27671_v38 }
 0x404   : > { %23816 = vmatpush3.bf16.msra.mxu1 %v27671_v38 }
 0x405   : > { %23818 = vmatprep.subr.bf16.mxu1 %v23817_v8 }
 0x407   : > { %20656 = vmatmul.mubr.f32.vlgmr.msra.gmra.mrb[4].mxu1 %v5906_v25  ;;  %v27795_v25 = vsub.f32 %v6407_v27, %v6432_v35 }
 0x408   : > { %23820 = vmatpush3.bf16.msra.mxu1 %v23817_v8  ;;  %20674 = vmatprep.mubr.f32.mxu1 %v27614_v32  ;;  %v6429_v8 = vand.u32 4294901760, %v6406_v23 }
 0x409   : > { %23822 = vmatprep.subr.bf16.mxu1 %v23821_v58 }
 0x40a   : > { %v27793_v41 = vsub.f32 %v6406_v23, %v6429_v8 }
 0x40c   : > { %23824 = vmatpush3.bf16.msra.mxu1 %v23821_v58  ;;  %v27791_v58 = vpack.c.bf16 %v6432_v35, %v6429_v8  ;;  %v23937_v8 = vpack.c.bf16 %v27795_v25, %v27793_v41 }
 0x40d   : > { %23826 = vmatprep.subr.bf16.mxu1 %v23825_v39 }
 0x410   : > { %23828 = vmatpush3.bf16.msra.mxu1 %v23825_v39 }
 0x411   : > { %23830 = vmatprep.subr.bf16.mxu1 %v23829_v49 }
 0x414   : > { %23832 = vmatpush3.bf16.msra.mxu1 %v23829_v49  ;;  %v6540_v49 = vand.u32 4294901760, %v27793_v41 }
 0x415   : > { %23834 = vmatprep.subr.bf16.mxu1 %v23833_v54 }
 0x417   : > { %20675 = vmatmul.mubr.f32.vlgmr.msra.gmra.mrb[4].mxu1 %v27649_v61 }
 0x418   : > { %23836 = vmatpush3.bf16.msra.mxu1 %v23833_v54  ;;  %20693 = vmatprep.mubr.f32.mxu1 %v27621_v46  ;;  %v23869_v46 = vpack.c.bf16 %v5936_v20, %v5929_v21  ;;  %v6404_v21 = vld [vmem:[#allocation5 + $0x250] sm:$0xff]  ;;  %v6405_v20 = vld [vmem:[#allocation5 + $0x258] sm:$0xff]  ;;  %v6547_v54 = vand.u32 4294901760, %v27795_v25 }
 0x419   : > { %23838 = vmatprep.subr.bf16.mxu1 %v23837_v57  ;;  %v6426_v18 = vand.u32 4294901760, %v6405_v20 }
 0x41a   : > { %v6548_v16 = vsub.f32 %v27795_v25, %v6547_v54  ;;  %v7005_v25 = vld [vmem:[#allocation5 + $0x2a0] sm:$0xff] }
 0x41b   : > { %v27772_v12 = vsub.f32 %v6405_v20, %v6426_v18 }
 0x41c   : > { %23840 = vmatpush3.bf16.msra.mxu1 %v23837_v57  ;;  %v6549_v20 = vand.u32 4294901760, %v6548_v16 }
 0x41d   : > { %23842 = vmatprep.subr.bf16.mxu1 %v23841_v59 }
 0x420   : > { %23844 = vmatpush3.bf16.msra.mxu1 %v23841_v59  ;;  %v27812_v59 = vsub.f32 %v6409_v19, %v6438_v31 }
 0x421   : > { %23846 = vmatprep.subr.bf16.mxu1 %v23845_v48 }
 0x422   : > { %v6561_v11 = vand.u32 4294901760, %v27812_v59 }
 0x424   : > { %23848 = vmatpush3.bf16.msra.mxu1 %v23845_v48 }
 0x425   : > { %23850 = vmatprep.subr.bf16.mxu1 %v27632_v7 }
 0x427   : > { %20694 = vmatmul.mubr.f32.vlgmr.msra.gmra.mrb[4].mxu1 %v27667_v28  ;;  %v6423_v28 = vand.u32 4294901760, %v6404_v21 }
 0x428   : > { %23852 = vmatpush3.bf16.msra.mxu1 %v27632_v7  ;;  %20712 = vmatprep.mubr.f32.mxu1 %v5894_v2  ;;  %v23873_v2 = vpack.c.bf16 %v5950_v10, %v5943_v44 }
 0x429   : > { %23854 = vmatprep.subr.bf16.mxu1 %v27647_v26  ;;  %v27770_v10 = vsub.f32 %v6404_v21, %v6423_v28  ;;  %v27775_v24 = vpack.c.bf16 %v6426_v18, %v6423_v28  ;;  %v6562_v28 = vsub.f32 %v27812_v59, %v6561_v11 }
 0x42b   : > { %v6526_v4 = vand.u32 4294901760, %v27770_v10  ;;  %v6563_v23 = vand.u32 4294901760, %v6562_v28  ;;  %v23933_v19 = vpack.c.bf16 %v27772_v12, %v27770_v10 }
 0x42c   : > { %23856 = vmatpush3.bf16.msra.mxu1 %v27647_v26 }
 0x42d   : > { %23858 = vmatprep.subr.bf16.mxu1 %v27664_v62  ;;  %v6527_v56 = vsub.f32 %v27770_v10, %v6526_v4  ;;  %v7002_v10 = vld [vmem:[#allocation5 + $0x288] sm:$0xff] }
 0x430   : > { %23860 = vmatpush3.bf16.msra.mxu1 %v27664_v62 }
 0x431   : > { %23862 = vmatprep.subr.bf16.mxu1 %v27671_v38 }
 0x434   : > { %23864 = vmatpush3.bf16.msra.mxu1 %v27671_v38 }
 0x435   : > { %23866 = vmatprep.subr.bf16.mxu1 %v23865_v63 }
 0x437   : > { %20713 = vmatmul.mubr.f32.vlgmr.msra.gmra.mrb[4].mxu1 %v5904_v6  ;;  %v6519_v6 = vand.u32 4294901760, %v27757_v30 }
 0x438   : > { %23868 = vmatpush3.bf16.msra.mxu1 %v23865_v63  ;;  %20731 = vmatprep.mubr.f32.mxu1 %v27614_v32 }
 0x439   : > { %23870 = vmatprep.subr.bf16.mxu1 %v23869_v46  ;;  %v6520_v55 = vsub.f32 %v27757_v30, %v6519_v6 }
 0x43b   : > { %v6521_v39 = vand.u32 4294901760, %v6520_v55 }
 0x43c   : > { %23872 = vmatpush3.bf16.msra.mxu1 %v23869_v46  ;;  %v6528_v46 = vand.u32 4294901760, %v6527_v56 }
 0x43d   : > { %23874 = vmatprep.subr.bf16.mxu1 %v23873_v2 }
 0x440   : > { %23876 = vmatpush3.bf16.msra.mxu1 %v23873_v2 }
 0x441   : > { %23878 = vmatprep.subr.bf16.mxu1 %v23877_v45 }
 0x444   : > { %23880 = vmatpush3.bf16.msra.mxu1 %v23877_v45  ;;  %v6541_v45 = vsub.f32 %v27793_v41, %v6540_v49 }
 0x445   : > { %23882 = vmatprep.subr.bf16.mxu1 %v27632_v7 }
 0x446   : > { %v6542_v21 = vand.u32 4294901760, %v6541_v45 }
 0x447   : > { %20732 = vmatmul.mubr.f32.vlgmr.msra.gmra.mrb[4].mxu1 %v27649_v61 }
 0x448   : > { %23884 = vmatpush3.bf16.msra.mxu1 %v27632_v7  ;;  %20750 = vmatprep.mubr.f32.mxu1 %v27614_v32  ;;  %v6414_v32 = vsel %vm279_vm0, %v27556_v37, 0  ;;  %v27755_v7 = vsub.f32 %v6402_v50, %v6417_v34  ;;  %v6408_v37 = vld [vmem:[#allocation5 + $0x270] sm:$0xff]  ;;  %v23921_v18 = vpack.c.bf16 %v6549_v20, %v6542_v21 }
 0x449   : > { %23886 = vmatprep.subr.bf16.mxu1 %v27647_v26 }
 0x44a   : > { %v6512_v44 = vand.u32 4294901760, %v27755_v7 }
 0x44c   : > { %23888 = vmatpush3.bf16.msra.mxu1 %v27647_v26  ;;  %v27760_v26 = vpack.c.bf16 %v6420_v60, %v6417_v34  ;;  %v6513_v40 = vsub.f32 %v27755_v7, %v6512_v44 }
 0x44d   : > { %23890 = vmatprep.subr.bf16.mxu1 %v27664_v62 }
 0x44e   : > { %v6514_v36 = vand.u32 4294901760, %v6513_v40  ;;  %v7004_v40 = vld [vmem:[#allocation5 + $0x298] sm:$0xff] }
 0x450   : > { %23892 = vmatpush3.bf16.msra.mxu1 %v27664_v62  ;;  %v27765_v62 = vand.u32 4294901760, %v6414_v32  ;;  %v23913_v63 = vpack.c.bf16 %v6521_v39, %v6514_v36  ;;  %v7008_v36 = vld [vmem:[#allocation5 + $0x2b8] sm:$0xff] }
 0x451   : > { %23894 = vmatprep.subr.bf16.mxu1 %v27671_v38 }
 0x452   : > { %v27779_v13 = vsub.f32 %v6414_v32, %v27765_v62 }
 0x454   : > { %23896 = vmatpush3.bf16.msra.mxu1 %v27671_v38  ;;  %v6435_v38 = vand.u32 4294901760, %v6408_v37  ;;  %v6501_v29 = vand.u32 4294901760, %v27779_v13 }
 0x455   : > { %23898 = vmatprep.subr.bf16.mxu1 %v27760_v26 }
 0x456   : > { %v27797_v42 = vpack.c.bf16 %v6438_v31, %v6435_v38  ;;  %v27810_v57 = vsub.f32 %v6408_v37, %v6435_v38  ;;  %v6502_v48 = vsub.f32 %v27779_v13, %v6501_v29  ;;  %v23929_v37 = vpack.c.bf16 %v27757_v30, %v27755_v7 }
 0x457   : > { %20751 = vmatmul.mubr.f32.vlgmr.msra.gmra.mrb[4].mxu1 %v27649_v61  ;;  %v6533_v61 = vand.u32 4294901760, %v27772_v12  ;;  %v7010_v30 = vsel %vm279_vm0, %v27537_v22, 0  ;;  %v7019_v38 = vand.u32 4294901760, %v7002_v10 }
 0x458   : > { %23900 = vmatpush3.bf16.msra.mxu1 %v27760_v26  ;;  %20769 = vmatprep.mubr.f32.mxu1 %v6493_v33  ;;  %v6554_v50 = vand.u32 4294901760, %v27810_v57  ;;  %v6503_v34 = vand.u32 4294901760, %v6502_v48  ;;  %v23941_v35 = vpack.c.bf16 %v27812_v59, %v27810_v57  ;;  %v23961_v33 = vpack.c.bf16 %v6519_v6, %v6512_v44  ;;  %v7001_v6 = vld [vmem:[#allocation5 + $0x280] sm:$0xff] }
 0x459   : > { %23902 = vmatprep.subr.bf16.mxu1 %v27775_v24  ;;  %v6534_v43 = vsub.f32 %v27772_v12, %v6533_v61  ;;  %v27870_v44 = vand.u32 4294901760, %v7010_v30  ;;  %v7016_v22 = vand.u32 4294901760, %v7001_v6  ;;  %v27887_v55 = vsub.f32 %v7002_v10, %v7019_v38 }
 0x45a   : > { %v6555_v32 = vsub.f32 %v27810_v57, %v6554_v50  ;;  %v23973_v7 = vpack.c.bf16 %v6561_v11, %v6554_v50  ;;  %v7028_v57 = vand.u32 4294901760, %v7005_v25 }
 0x45b   : > { %v6535_v2 = vand.u32 4294901760, %v6534_v43  ;;  %v27877_v12 = vsub.f32 %v7010_v30, %v27870_v44  ;;  %v7118_v56 = vand.u32 4294901760, %v27887_v55 }
 0x45c   : > { %23904 = vmatpush3.bf16.msra.mxu1 %v27775_v24  ;;  %v6556_v9 = vand.u32 4294901760, %v6555_v32  ;;  %v27923_v11 = vsub.f32 %v7005_v25, %v7028_v57 }
 0x45d   : > { %23906 = vmatprep.subr.bf16.mxu1 %v27791_v58  ;;  %v23917_v60 = vpack.c.bf16 %v6535_v2, %v6528_v46  ;;  %v7090_v31 = vand.u32 4294901760, %v27877_v12  ;;  %v7119_v45 = vsub.f32 %v27887_v55, %v7118_v56 }
 0x45e   : > { %v23925_v27 = vpack.c.bf16 %v6563_v23, %v6556_v9  ;;  %v7139_v9 = vand.u32 4294901760, %v27923_v11 }
 0x45f   : > { %v7091_v41 = vsub.f32 %v27877_v12, %v7090_v31  ;;  %v7120_v32 = vand.u32 4294901760, %v7119_v45 }
 0x460   : > { %23908 = vmatpush3.bf16.msra.mxu1 %v27791_v58 }
 0x461   : > { %23910 = vmatprep.subr.bf16.mxu1 %v27797_v42  ;;  %v7092_v48 = vand.u32 4294901760, %v7091_v41 }
 0x464   : > { %23912 = vmatpush3.bf16.msra.mxu1 %v27797_v42 }
 0x465   : > { %23914 = vmatprep.subr.bf16.mxu1 %v23913_v63 }
 0x467   : > { %20770 = vmatmul.mubr.f32.vlgmr.msra.gmra.mrb[4].mxu1 %v6503_v34 }
 0x468   : > { %23916 = vmatpush3.bf16.msra.mxu1 %v23913_v63  ;;  %20788 = vmatprep.mubr.f32.mxu1 %v27740_v47  ;;  %v7037_v63 = vand.u32 4294901760, %v7008_v36 }
 0x469   : > { %23918 = vmatprep.subr.bf16.mxu1 %v23917_v60 }
 0x46c   : > { %23920 = vmatpush3.bf16.msra.mxu1 %v23917_v60 }
 0x46d   : > { %23922 = vmatprep.subr.bf16.mxu1 %v23921_v18 }
 0x470   : > { %23924 = vmatpush3.bf16.msra.mxu1 %v23921_v18 }
 0x471   : > { %23926 = vmatprep.subr.bf16.mxu1 %v23925_v27 }
 0x474   : > { %23928 = vmatpush3.bf16.msra.mxu1 %v23925_v27 }
 0x475   : > { %23930 = vmatprep.subr.bf16.mxu1 %v23929_v37 }
 0x477   : > { %20789 = vmatmul.mubr.f32.vlgmr.msra.gmra.mrb[4].mxu1 %v27765_v62 }
 0x478   : > { %23932 = vmatpush3.bf16.msra.mxu1 %v23929_v37  ;;  %20807 = vmatprep.mubr.f32.mxu1 %v27747_v52  ;;  %v23965_v52 = vpack.c.bf16 %v6533_v61, %v6526_v4  ;;  %v7025_v61 = vand.u32 4294901760, %v7004_v40  ;;  %v27942_v37 = vsub.f32 %v7008_v36, %v7037_v63 }
 0x479   : > { %23934 = vmatprep.subr.bf16.mxu1 %v23933_v19 }
 0x47a   : > { %v7160_v30 = vand.u32 4294901760, %v27942_v37 }
 0x47c   : > { %23936 = vmatpush3.bf16.msra.mxu1 %v23933_v19 }
 0x47d   : > { %23938 = vmatprep.subr.bf16.mxu1 %v23937_v8 }
 0x480   : > { %23940 = vmatpush3.bf16.msra.mxu1 %v23937_v8 }
 0x481   : > { %23942 = vmatprep.subr.bf16.mxu1 %v23941_v35 }
 0x484   : > { %23944 = vmatpush3.bf16.msra.mxu1 %v23941_v35 }
 0x485   : > { %23946 = vmatprep.subr.bf16.mxu1 %v27760_v26 }
 0x487   : > { %20808 = vmatmul.mubr.f32.vlgmr.msra.gmra.mrb[4].mxu1 %v27779_v13  ;;  %v7003_v13 = vld [vmem:[#allocation5 + $0x290] sm:$0xff] }
 0x488   : > { %23948 = vmatpush3.bf16.msra.mxu1 %v27760_v26  ;;  %20826 = vmatprep.mubr.f32.mxu1 %v6491_v5  ;;  %v23969_v5 = vpack.c.bf16 %v6547_v54, %v6540_v49  ;;  %v7022_v4 = vand.u32 4294901760, %v7003_v13  ;;  %v27902_v49 = vsub.f32 %v7004_v40, %v7025_v61  ;;  %v7161_v40 = vsub.f32 %v27942_v37, %v7160_v30 }
 0x489   : > { %23950 = vmatprep.subr.bf16.mxu1 %v27775_v24 }
 0x48a   : > { %v27900_v43 = vsub.f32 %v7003_v13, %v7022_v4  ;;  %v27905_v54 = vpack.c.bf16 %v7025_v61, %v7022_v4  ;;  %v7162_v61 = vand.u32 4294901760, %v7161_v40 }
 0x48c   : > { %23952 = vmatpush3.bf16.msra.mxu1 %v27775_v24  ;;  %v7125_v16 = vand.u32 4294901760, %v27900_v43 }
 0x48d   : > { %23954 = vmatprep.subr.bf16.mxu1 %v27791_v58 }
 0x48e   : > { %v7126_v28 = vsub.f32 %v27900_v43, %v7125_v16 }
 0x490   : > { %23956 = vmatpush3.bf16.msra.mxu1 %v27791_v58  ;;  %v7127_v35 = vand.u32 4294901760, %v7126_v28 }
 0x491   : > { %23958 = vmatprep.subr.bf16.mxu1 %v27797_v42 }
 0x494   : > { %23960 = vmatpush3.bf16.msra.mxu1 %v27797_v42 }
 0x495   : > { %23962 = vmatprep.subr.bf16.mxu1 %v23961_v33 }
 0x497   : > { %20827 = vmatmul.mubr.f32.vlgmr.msra.gmra.mrb[4].mxu1 %v6501_v29  ;;  %v7006_v29 = vld [vmem:[#allocation5 + $0x2a8] sm:$0xff] }
 0x498   : > { %23964 = vmatpush3.bf16.msra.mxu1 %v23961_v33  ;;  %20845 = vmatprep.mubr.f32.mxu1 %v27740_v47  ;;  %v7031_v59 = vand.u32 4294901760, %v7006_v29 }
 0x499   : > { %23966 = vmatprep.subr.bf16.mxu1 %v23965_v52 }
 0x49a   : > { %v27921_v50 = vpack.c.bf16 %v7031_v59, %v7028_v57  ;;  %v27925_v34 = vsub.f32 %v7006_v29, %v7031_v59  ;;  %v24029_v29 = vpack.c.bf16 %v27902_v49, %v27900_v43  ;;  %v7601_v43 = vld [vmem:[#allocation5 + $0x2c8] sm:$0xff] }
 0x49b   : > { %v7618_v59 = vand.u32 4294901760, %v7601_v43 }
 0x49c   : > { %23968 = vmatpush3.bf16.msra.mxu1 %v23965_v52  ;;  %v7146_v23 = vand.u32 4294901760, %v27925_v34  ;;  %v7140_v52 = vsub.f32 %v27923_v11, %v7139_v9 }
 0x49d   : > { %23970 = vmatprep.subr.bf16.mxu1 %v23969_v5 }
 0x4a0   : > { %23972 = vmatpush3.bf16.msra.mxu1 %v23969_v5  ;;  %v7147_v5 = vsub.f32 %v27925_v34, %v7146_v23 }
 0x4a1   : > { %23974 = vmatprep.subr.bf16.mxu1 %v23973_v7 }
 0x4a4   : > { %23976 = vmatpush3.bf16.msra.mxu1 %v23973_v7 }
 0x4a5   : > { %23978 = vmatprep.subr.bf16.mxu1 %v27760_v26 }
 0x4a7   : > { %20846 = vmatmul.mubr.f32.vlgmr.msra.gmra.mrb[4].mxu1 %v27765_v62 }
 0x4a8   : > { %23980 = vmatpush3.bf16.msra.mxu1 %v27760_v26  ;;  %20864 = vmatprep.mubr.f32.mxu1 %v27740_v47  ;;  %v7013_v47 = vsel %vm279_vm0, %v27548_v14, 0  ;;  %v27885_v26 = vsub.f32 %v7001_v6, %v7016_v22  ;;  %v7007_v14 = vld [vmem:[#allocation5 + $0x2b0] sm:$0xff] }
 0x4a9   : > { %23982 = vmatprep.subr.bf16.mxu1 %v27775_v24 }
 0x4aa   : > { %v7111_v39 = vand.u32 4294901760, %v27885_v26  ;;  %v24025_v25 = vpack.c.bf16 %v27887_v55, %v27885_v26  ;;  %v7609_v55 = vsel %vm279_vm0, %v27542_v0, 0 }
 0x4ac   : > { %23984 = vmatpush3.bf16.msra.mxu1 %v27775_v24  ;;  %v27890_v24 = vpack.c.bf16 %v7019_v38, %v7016_v22  ;;  %v7112_v2 = vsub.f32 %v27885_v26, %v7111_v39  ;;  %v7141_v22 = vand.u32 4294901760, %v7140_v52  ;;  %v7148_v38 = vand.u32 4294901760, %v7147_v5 }
 0x4ad   : > { %23986 = vmatprep.subr.bf16.mxu1 %v27791_v58  ;;  %v24057_v57 = vpack.c.bf16 %v7118_v56, %v7111_v39  ;;  %v28000_v39 = vand.u32 4294901760, %v7609_v55  ;;  %v7600_v56 = vld [vmem:[#allocation5 + $0x2c0] sm:$0xff] }
 0x4ae   : > { %v7113_v20 = vand.u32 4294901760, %v7112_v2  ;;  %v7615_v0 = vand.u32 4294901760, %v7600_v56 }
 0x4b0   : > { %23988 = vmatpush3.bf16.msra.mxu1 %v27791_v58  ;;  %v27895_v58 = vand.u32 4294901760, %v7013_v47  ;;  %v24009_v8 = vpack.c.bf16 %v7120_v32, %v7113_v20 }
 0x4b1   : > { %23990 = vmatprep.subr.bf16.mxu1 %v27797_v42 }
 0x4b2   : > { %v27909_v46 = vsub.f32 %v7013_v47, %v27895_v58  ;;  %v24017_v47 = vpack.c.bf16 %v7148_v38, %v7141_v22 }
 0x4b4   : > { %23992 = vmatpush3.bf16.msra.mxu1 %v27797_v42  ;;  %v7034_v42 = vand.u32 4294901760, %v7007_v14  ;;  %v7100_v21 = vand.u32 4294901760, %v27909_v46 }
 0x4b5   : > { %23994 = vmatprep.subr.bf16.mxu1 %v27890_v24 }
 0x4b6   : > { %v27927_v60 = vpack.c.bf16 %v7037_v63, %v7034_v42  ;;  %v27940_v27 = vsub.f32 %v7007_v14, %v7034_v42  ;;  %v7101_v19 = vsub.f32 %v27909_v46, %v7100_v21  ;;  %v24033_v14 = vpack.c.bf16 %v27925_v34, %v27923_v11  ;;  %v7602_v42 = vld [vmem:[#allocation5 + $0x2d0] sm:$0xff]  ;;  %v7603_v63 = vld [vmem:[#allocation5 + $0x2d8] sm:$0xff]  ;;  %v7605_v11 = vld [vmem:[#allocation5 + $0x2e8] sm:$0xff] }
 0x4b7   : > { %20865 = vmatmul.mubr.f32.vlgmr.msra.gmra.mrb[4].mxu1 %v27765_v62  ;;  %v7132_v62 = vand.u32 4294901760, %v27902_v49  ;;  %v7621_v2 = vand.u32 4294901760, %v7602_v42  ;;  %v7624_v45 = vand.u32 4294901760, %v7603_v63  ;;  %v7607_v34 = vld [vmem:[#allocation5 + $0x2f8] sm:$0xff] }
 0x4b8   : > { %23996 = vmatpush3.bf16.msra.mxu1 %v27890_v24  ;;  %20883 = vmatprep.mubr.f32.mxu1 %v7092_v48  ;;  %v7153_v7 = vand.u32 4294901760, %v27940_v27  ;;  %v7102_v6 = vand.u32 4294901760, %v7101_v19  ;;  %v24037_v36 = vpack.c.bf16 %v27942_v37, %v27940_v27  ;;  %v7636_v37 = vand.u32 4294901760, %v7607_v34 }
 0x4b9   : > { %23998 = vmatprep.subr.bf16.mxu1 %v27905_v54  ;;  %v7133_v18 = vsub.f32 %v27902_v49, %v7132_v62  ;;  %v28007_v49 = vsub.f32 %v7609_v55, %v28000_v39  ;;  %v28030_v32 = vsub.f32 %v7602_v42, %v7621_v2  ;;  %v28032_v28 = vsub.f32 %v7603_v63, %v7624_v45 }
 0x4ba   : > { %v7154_v13 = vsub.f32 %v27940_v27, %v7153_v7  ;;  %v24069_v26 = vpack.c.bf16 %v7160_v30, %v7153_v7 }
 0x4bb   : > { %v7134_v33 = vand.u32 4294901760, %v7133_v18  ;;  %v7689_v48 = vand.u32 4294901760, %v28007_v49  ;;  %v28035_v18 = vpack.c.bf16 %v7624_v45, %v7621_v2 }
 0x4bc   : > { %24000 = vmatpush3.bf16.msra.mxu1 %v27905_v54  ;;  %v7155_v4 = vand.u32 4294901760, %v7154_v13 }
 0x4bd   : > { %24002 = vmatprep.subr.bf16.mxu1 %v27921_v50  ;;  %v24013_v10 = vpack.c.bf16 %v7134_v33, %v7127_v35  ;;  %v7724_v33 = vand.u32 4294901760, %v28030_v32 }
 0x4be   : > { %v24021_v41 = vpack.c.bf16 %v7162_v61, %v7155_v4  ;;  %v28072_v61 = vsub.f32 %v7607_v34, %v7636_v37 }
 0x4bf   : > { %v7725_v38 = vsub.f32 %v28030_v32, %v7724_v33 }
 0x4c0   : > { %24004 = vmatpush3.bf16.msra.mxu1 %v27921_v50 }
 0x4c1   : > { %24006 = vmatprep.subr.bf16.mxu1 %v27927_v60 }
 0x4c4   : > { %24008 = vmatpush3.bf16.msra.mxu1 %v27927_v60 }
 0x4c5   : > { %24010 = vmatprep.subr.bf16.mxu1 %v24009_v8 }
 0x4c7   : > { %20884 = vmatmul.mubr.f32.vlgmr.msra.gmra.mrb[4].mxu1 %v7102_v6 }
 0x4c8   : > { %24012 = vmatpush3.bf16.msra.mxu1 %v24009_v8  ;;  %20902 = vmatprep.mubr.f32.mxu1 %v27870_v44 }
 0x4c9   : > { %24014 = vmatprep.subr.bf16.mxu1 %v24013_v10 }
 0x4cc   : > { %24016 = vmatpush3.bf16.msra.mxu1 %v24013_v10 }
 0x4cd   : > { %24018 = vmatprep.subr.bf16.mxu1 %v24017_v47 }
 0x4d0   : > { %24020 = vmatpush3.bf16.msra.mxu1 %v24017_v47 }
 0x4d1   : > { %24022 = vmatprep.subr.bf16.mxu1 %v24021_v41 }
 0x4d4   : > { %24024 = vmatpush3.bf16.msra.mxu1 %v24021_v41 }
 0x4d5   : > { %24026 = vmatprep.subr.bf16.mxu1 %v24025_v25 }
 0x4d7   : > { %20903 = vmatmul.mubr.f32.vlgmr.msra.gmra.mrb[4].mxu1 %v27895_v58 }
 0x4d8   : > { %24028 = vmatpush3.bf16.msra.mxu1 %v24025_v25  ;;  %20921 = vmatprep.mubr.f32.mxu1 %v27877_v12  ;;  %v24061_v12 = vpack.c.bf16 %v7132_v62, %v7125_v16  ;;  %v7690_v16 = vsub.f32 %v28007_v49, %v7689_v48  ;;  %v7604_v62 = vld [vmem:[#allocation5 + $0x2e0] sm:$0xff] }
 0x4d9   : > { %24030 = vmatprep.subr.bf16.mxu1 %v24029_v29 }
 0x4da   : > { %v7691_v27 = vand.u32 4294901760, %v7690_v16  ;;  %v24125_v16 = vpack.c.bf16 %v28032_v28, %v28030_v32 }
 0x4dc   : > { %24032 = vmatpush3.bf16.msra.mxu1 %v24029_v29  ;;  %v7726_v29 = vand.u32 4294901760, %v7725_v38 }
 0x4dd   : > { %24034 = vmatprep.subr.bf16.mxu1 %v24033_v14 }
 0x4e0   : > { %24036 = vmatpush3.bf16.msra.mxu1 %v24033_v14 }
 0x4e1   : > { %24038 = vmatprep.subr.bf16.mxu1 %v24037_v36 }
 0x4e4   : > { %24040 = vmatpush3.bf16.msra.mxu1 %v24037_v36 }
 0x4e5   : > { %24042 = vmatprep.subr.bf16.mxu1 %v27890_v24 }
 0x4e7   : > { %20922 = vmatmul.mubr.f32.vlgmr.msra.gmra.mrb[4].mxu1 %v27909_v46  ;;  %v28017_v46 = vsub.f32 %v7601_v43, %v7618_v59 }
 0x4e8   : > { %24044 = vmatpush3.bf16.msra.mxu1 %v27890_v24  ;;  %20940 = vmatprep.mubr.f32.mxu1 %v7090_v31  ;;  %v24065_v31 = vpack.c.bf16 %v7146_v23, %v7139_v9  ;;  %v7627_v9 = vand.u32 4294901760, %v7604_v62  ;;  %v7630_v23 = vand.u32 4294901760, %v7605_v11 }
 0x4e9   : > { %24046 = vmatprep.subr.bf16.mxu1 %v27905_v54  ;;  %v7717_v20 = vand.u32 4294901760, %v28017_v46 }
 0x4ea   : > { %v28051_v52 = vpack.c.bf16 %v7630_v23, %v7627_v9  ;;  %v28053_v5 = vsub.f32 %v7604_v62, %v7627_v9  ;;  %v28055_v7 = vsub.f32 %v7605_v11, %v7630_v23  ;;  %v8201_v23 = vld [vmem:[#allocation5 + $0x310] sm:$0xff] }
 0x4eb   : > { %v7718_v35 = vsub.f32 %v28017_v46, %v7717_v20 }
 0x4ec   : > { %24048 = vmatpush3.bf16.msra.mxu1 %v27905_v54  ;;  %v7738_v40 = vand.u32 4294901760, %v28053_v5  ;;  %v7745_v47 = vand.u32 4294901760, %v28055_v7  ;;  %v24129_v62 = vpack.c.bf16 %v28055_v7, %v28053_v5 }
 0x4ed   : > { %24050 = vmatprep.subr.bf16.mxu1 %v27921_v50  ;;  %v7719_v22 = vand.u32 4294901760, %v7718_v35  ;;  %v8203_v35 = vld [vmem:[#allocation5 + $0x320] sm:$0xff] }
 0x4ee   : > { %v7739_v36 = vsub.f32 %v28053_v5, %v7738_v40  ;;  %v8226_v38 = vand.u32 4294901760, %v8203_v35 }
 0x4f0   : > { %24052 = vmatpush3.bf16.msra.mxu1 %v27921_v50 }
 0x4f1   : > { %24054 = vmatprep.subr.bf16.mxu1 %v27927_v60 }
 0x4f4   : > { %24056 = vmatpush3.bf16.msra.mxu1 %v27927_v60 }
 0x4f5   : > { %24058 = vmatprep.subr.bf16.mxu1 %v24057_v57 }
 0x4f7   : > { %20941 = vmatmul.mubr.f32.vlgmr.msra.gmra.mrb[4].mxu1 %v7100_v21 }
 0x4f8   : > { %24060 = vmatpush3.bf16.msra.mxu1 %v24057_v57  ;;  %20959 = vmatprep.mubr.f32.mxu1 %v27870_v44  ;;  %v7746_v57 = vsub.f32 %v28055_v7, %v7745_v47 }
 0x4f9   : > { %24062 = vmatprep.subr.bf16.mxu1 %v24061_v12 }
 0x4fa   : > { %v7747_v43 = vand.u32 4294901760, %v7746_v57 }
 0x4fc   : > { %24064 = vmatpush3.bf16.msra.mxu1 %v24061_v12 }
 0x4fd   : > { %24066 = vmatprep.subr.bf16.mxu1 %v24065_v31 }
 0x500   : > { %24068 = vmatpush3.bf16.msra.mxu1 %v24065_v31  ;;  %v7759_v31 = vand.u32 4294901760, %v28072_v61 }
 0x501   : > { %24070 = vmatprep.subr.bf16.mxu1 %v24069_v26 }
 0x504   : > { %24072 = vmatpush3.bf16.msra.mxu1 %v24069_v26 }
 0x505   : > { %24074 = vmatprep.subr.bf16.mxu1 %v27890_v24 }
 0x507   : > { %20960 = vmatmul.mubr.f32.vlgmr.msra.gmra.mrb[4].mxu1 %v27895_v58 }
 0x508   : > { %24076 = vmatpush3.bf16.msra.mxu1 %v27890_v24  ;;  %20978 = vmatprep.mubr.f32.mxu1 %v27870_v44  ;;  %v7612_v44 = vsel %vm279_vm0, %v27558_v3, 0  ;;  %v28015_v24 = vsub.f32 %v7600_v56, %v7615_v0  ;;  %v7606_v3 = vld [vmem:[#allocation5 + $0x2f0] sm:$0xff]  ;;  %v7740_v56 = vand.u32 4294901760, %v7739_v36 }
 0x509   : > { %24078 = vmatprep.subr.bf16.mxu1 %v27905_v54 }
 0x50a   : > { %v7710_v21 = vand.u32 4294901760, %v28015_v24  ;;  %v24113_v42 = vpack.c.bf16 %v7747_v43, %v7740_v56  ;;  %v24121_v45 = vpack.c.bf16 %v28017_v46, %v28015_v24  ;;  %v8208_v46 = vsel %vm279_vm0, %v27544_v1, 0 }
 0x50b   : > { %v28130_v34 = vand.u32 4294901760, %v8208_v46 }
 0x50c   : > { %24080 = vmatpush3.bf16.msra.mxu1 %v27905_v54  ;;  %v28020_v54 = vpack.c.bf16 %v7618_v59, %v7615_v0  ;;  %v7711_v8 = vsub.f32 %v28015_v24, %v7710_v21  ;;  %v7760_v59 = vsub.f32 %v28072_v61, %v7759_v31 }
 0x50d   : > { %24082 = vmatprep.subr.bf16.mxu1 %v27921_v50  ;;  %v28137_v32 = vsub.f32 %v8208_v46, %v28130_v34 }
 0x50e   : > { %v7712_v10 = vand.u32 4294901760, %v7711_v8 }
 0x50f   : > { %v8288_v9 = vand.u32 4294901760, %v28137_v32 }
 0x510   : > { %24084 = vmatpush3.bf16.msra.mxu1 %v27921_v50  ;;  %v28025_v50 = vand.u32 4294901760, %v7612_v44  ;;  %v24105_v25 = vpack.c.bf16 %v7719_v22, %v7712_v10 }
 0x511   : > { %24086 = vmatprep.subr.bf16.mxu1 %v27927_v60  ;;  %v8289_v8 = vsub.f32 %v28137_v32, %v8288_v9 }
 0x512   : > { %v28039_v19 = vsub.f32 %v7612_v44, %v28025_v50  ;;  %v7761_v44 = vand.u32 4294901760, %v7760_v59 }
 0x514   : > { %24088 = vmatpush3.bf16.msra.mxu1 %v27927_v60  ;;  %v7633_v60 = vand.u32 4294901760, %v7606_v3  ;;  %v7699_v6 = vand.u32 4294901760, %v28039_v19 }
 0x515   : > { %24090 = vmatprep.subr.bf16.mxu1 %v28020_v54 }
 0x516   : > { %v28057_v30 = vpack.c.bf16 %v7636_v37, %v7633_v60  ;;  %v28070_v4 = vsub.f32 %v7606_v3, %v7633_v60  ;;  %v7700_v41 = vsub.f32 %v28039_v19, %v7699_v6  ;;  %v24153_v3 = vpack.c.bf16 %v7717_v20, %v7710_v21  ;;  %v8199_v21 = vld [vmem:[#allocation5 + $0x300] sm:$0xff]  ;;  %v8200_v20 = vld [vmem:[#allocation5 + $0x308] sm:$0xff] }
 0x517   : > { %20979 = vmatmul.mubr.f32.vlgmr.msra.gmra.mrb[4].mxu1 %v27895_v58  ;;  %v7731_v58 = vand.u32 4294901760, %v28032_v28  ;;  %v8214_v1 = vand.u32 4294901760, %v8199_v21  ;;  %v8220_v37 = vand.u32 4294901760, %v8201_v23 }
 0x518   : > { %24092 = vmatpush3.bf16.msra.mxu1 %v28020_v54  ;;  %20997 = vmatprep.mubr.f32.mxu1 %v7691_v27  ;;  %v7752_v12 = vand.u32 4294901760, %v28070_v4  ;;  %v7701_v26 = vand.u32 4294901760, %v7700_v41  ;;  %v24133_v11 = vpack.c.bf16 %v28072_v61, %v28070_v4  ;;  %v8202_v27 = vld [vmem:[#allocation5 + $0x318] sm:$0xff] }
 0x519   : > { %24094 = vmatprep.subr.bf16.mxu1 %v28035_v18  ;;  %v7732_v13 = vsub.f32 %v28032_v28, %v7731_v58  ;;  %v8217_v28 = vand.u32 4294901760, %v8200_v20 }
 0x51a   : > { %v7753_v0 = vsub.f32 %v28070_v4, %v7752_v12  ;;  %v24165_v24 = vpack.c.bf16 %v7759_v31, %v7752_v12 }
 0x51b   : > { %v7733_v14 = vand.u32 4294901760, %v7732_v13  ;;  %v28147_v60 = vsub.f32 %v8200_v20, %v8217_v28 }
 0x51c   : > { %24096 = vmatpush3.bf16.msra.mxu1 %v28035_v18  ;;  %v7754_v63 = vand.u32 4294901760, %v7753_v0 }
 0x51d   : > { %24098 = vmatprep.subr.bf16.mxu1 %v28051_v52  ;;  %v24109_v55 = vpack.c.bf16 %v7733_v14, %v7726_v29  ;;  %v8316_v7 = vand.u32 4294901760, %v28147_v60  ;;  %v28183_v14 = vsub.f32 %v8203_v35, %v8226_v38 }
 0x51e   : > { %v24117_v2 = vpack.c.bf16 %v7761_v44, %v7754_v63 }
 0x51f   : > { %v8317_v41 = vsub.f32 %v28147_v60, %v8316_v7  ;;  %v8337_v43 = vand.u32 4294901760, %v28183_v14 }
 0x520   : > { %24100 = vmatpush3.bf16.msra.mxu1 %v28051_v52 }
 0x521   : > { %24102 = vmatprep.subr.bf16.mxu1 %v28057_v30 }
 0x524   : > { %24104 = vmatpush3.bf16.msra.mxu1 %v28057_v30 }
 0x525   : > { %24106 = vmatprep.subr.bf16.mxu1 %v24105_v25 }
 0x527   : > { %20998 = vmatmul.mubr.f32.vlgmr.msra.gmra.mrb[4].mxu1 %v7701_v26  ;;  %v8318_v26 = vand.u32 4294901760, %v8317_v41 }
 0x528   : > { %24108 = vmatpush3.bf16.msra.mxu1 %v24105_v25  ;;  %21016 = vmatprep.mubr.f32.mxu1 %v28000_v39 }
 0x529   : > { %24110 = vmatprep.subr.bf16.mxu1 %v24109_v55 }
 0x52c   : > { %24112 = vmatpush3.bf16.msra.mxu1 %v24109_v55 }
 0x52d   : > { %24114 = vmatprep.subr.bf16.mxu1 %v24113_v42 }
 0x530   : > { %24116 = vmatpush3.bf16.msra.mxu1 %v24113_v42 }
 0x531   : > { %24118 = vmatprep.subr.bf16.mxu1 %v24117_v2 }
 0x534   : > { %24120 = vmatpush3.bf16.msra.mxu1 %v24117_v2 }
 0x535   : > { %24122 = vmatprep.subr.bf16.mxu1 %v24121_v45 }
 0x537   : > { %21017 = vmatmul.mubr.f32.vlgmr.msra.gmra.mrb[4].mxu1 %v28025_v50 }
 0x538   : > { %24124 = vmatpush3.bf16.msra.mxu1 %v24121_v45  ;;  %21035 = vmatprep.mubr.f32.mxu1 %v28007_v49  ;;  %v24157_v49 = vpack.c.bf16 %v7731_v58, %v7724_v33  ;;  %v8204_v33 = vld [vmem:[#allocation5 + $0x328] sm:$0xff] }
 0x539   : > { %24126 = vmatprep.subr.bf16.mxu1 %v24125_v16  ;;  %v8229_v13 = vand.u32 4294901760, %v8204_v33 }
 0x53b   : > { %v28181_v29 = vpack.c.bf16 %v8229_v13, %v8226_v38  ;;  %v28185_v36 = vsub.f32 %v8204_v33, %v8229_v13  ;;  %v8801_v38 = vld [vmem:[#allocation5 + $0x358] sm:$0xff] }
 0x53c   : > { %24128 = vmatpush3.bf16.msra.mxu1 %v24125_v16  ;;  %v8338_v16 = vsub.f32 %v28183_v14, %v8337_v43 }
 0x53d   : > { %24130 = vmatprep.subr.bf16.mxu1 %v24129_v62  ;;  %v8344_v0 = vand.u32 4294901760, %v28185_v36 }
 0x540   : > { %24132 = vmatpush3.bf16.msra.mxu1 %v24129_v62  ;;  %v8345_v62 = vsub.f32 %v28185_v36, %v8344_v0 }
 0x541   : > { %24134 = vmatprep.subr.bf16.mxu1 %v24133_v11 }
 0x542   : > { %v8346_v46 = vand.u32 4294901760, %v8345_v62 }
 0x544   : > { %24136 = vmatpush3.bf16.msra.mxu1 %v24133_v11 }
 0x545   : > { %24138 = vmatprep.subr.bf16.mxu1 %v28020_v54 }
 0x547   : > { %21036 = vmatmul.mubr.f32.vlgmr.msra.gmra.mrb[4].mxu1 %v28039_v19  ;;  %v8223_v19 = vand.u32 4294901760, %v8202_v27 }
 0x548   : > { %24140 = vmatpush3.bf16.msra.mxu1 %v28020_v54  ;;  %21054 = vmatprep.mubr.f32.mxu1 %v7689_v48  ;;  %v24161_v48 = vpack.c.bf16 %v7745_v47, %v7738_v40  ;;  %v8290_v40 = vand.u32 4294901760, %v8289_v8 }
 0x549   : > { %24142 = vmatprep.subr.bf16.mxu1 %v28035_v18  ;;  %v28162_v10 = vsub.f32 %v8202_v27, %v8223_v19  ;;  %v28165_v22 = vpack.c.bf16 %v8223_v19, %v8220_v37  ;;  %v24225_v19 = vpack.c.bf16 %v28185_v36, %v28183_v14 }
 0x54c   : > { %24144 = vmatpush3.bf16.msra.mxu1 %v28035_v18 }
 0x54d   : > { %24146 = vmatprep.subr.bf16.mxu1 %v28051_v52 }
 0x550   : > { %24148 = vmatpush3.bf16.msra.mxu1 %v28051_v52 }
 0x551   : > { %24150 = vmatprep.subr.bf16.mxu1 %v28057_v30 }
 0x554   : > { %24152 = vmatpush3.bf16.msra.mxu1 %v28057_v30 }
 0x555   : > { %24154 = vmatprep.subr.bf16.mxu1 %v24153_v3 }
 0x557   : > { %21055 = vmatmul.mubr.f32.vlgmr.msra.gmra.mrb[4].mxu1 %v7699_v6  ;;  %v28160_v6 = vsub.f32 %v8201_v23, %v8220_v37 }
 0x558   : > { %24156 = vmatpush3.bf16.msra.mxu1 %v24153_v3  ;;  %21073 = vmatprep.mubr.f32.mxu1 %v28000_v39 }
 0x559   : > { %24158 = vmatprep.subr.bf16.mxu1 %v24157_v49  ;;  %v8323_v25 = vand.u32 4294901760, %v28160_v6  ;;  %v24221_v37 = vpack.c.bf16 %v28162_v10, %v28160_v6 }
 0x55b   : > { %v8324_v55 = vsub.f32 %v28160_v6, %v8323_v25 }
 0x55c   : > { %24160 = vmatpush3.bf16.msra.mxu1 %v24157_v49 }
 0x55d   : > { %24162 = vmatprep.subr.bf16.mxu1 %v24161_v48  ;;  %v8325_v2 = vand.u32 4294901760, %v8324_v55 }
 0x560   : > { %24164 = vmatpush3.bf16.msra.mxu1 %v24161_v48 }
 0x561   : > { %24166 = vmatprep.subr.bf16.mxu1 %v24165_v24 }
 0x564   : > { %24168 = vmatpush3.bf16.msra.mxu1 %v24165_v24  ;;  %v8339_v24 = vand.u32 4294901760, %v8338_v16 }
 0x565   : > { %24170 = vmatprep.subr.bf16.mxu1 %v28020_v54 }
 0x567   : > { %21074 = vmatmul.mubr.f32.vlgmr.msra.gmra.mrb[4].mxu1 %v28025_v50 }
 0x568   : > { %24172 = vmatpush3.bf16.msra.mxu1 %v28020_v54  ;;  %21092 = vmatprep.mubr.f32.mxu1 %v28000_v39  ;;  %v8211_v39 = vsel %vm279_vm0, %v27552_v15, 0  ;;  %v28145_v54 = vsub.f32 %v8199_v21, %v8214_v1  ;;  %v8205_v15 = vld [vmem:[#allocation5 + $0x330] sm:$0xff] }
 0x569   : > { %24174 = vmatprep.subr.bf16.mxu1 %v28035_v18  ;;  %v28155_v58 = vand.u32 4294901760, %v8211_v39 }
 0x56a   : > { %v8309_v5 = vand.u32 4294901760, %v28145_v54 }
 0x56b   : > { %v28169_v4 = vsub.f32 %v8211_v39, %v28155_v58  ;;  %v24217_v39 = vpack.c.bf16 %v28147_v60, %v28145_v54  ;;  %v8807_v60 = vsel %vm279_vm0, %v27554_v53, 0 }
 0x56c   : > { %24176 = vmatpush3.bf16.msra.mxu1 %v28035_v18  ;;  %v28150_v18 = vpack.c.bf16 %v8217_v28, %v8214_v1  ;;  %v8310_v61 = vsub.f32 %v28145_v54, %v8309_v5  ;;  %v24209_v1 = vpack.c.bf16 %v8346_v46, %v8339_v24  ;;  %v24249_v35 = vpack.c.bf16 %v8316_v7, %v8309_v5 }
 0x56d   : > { %24178 = vmatprep.subr.bf16.mxu1 %v28051_v52  ;;  %v8298_v12 = vand.u32 4294901760, %v28169_v4  ;;  %v28260_v33 = vand.u32 4294901760, %v8807_v60 }
 0x56e   : > { %v8311_v31 = vand.u32 4294901760, %v8310_v61  ;;  %v8803_v61 = vld [vmem:[#allocation5 + $0x368] sm:$0xff] }
 0x56f   : > { %v8299_v63 = vsub.f32 %v28169_v4, %v8298_v12  ;;  %v28267_v5 = vsub.f32 %v8807_v60, %v28260_v33 }
 0x570   : > { %24180 = vmatpush3.bf16.msra.mxu1 %v28051_v52  ;;  %v8206_v52 = vld [vmem:[#allocation5 + $0x338] sm:$0xff]  ;;  %v24201_v44 = vpack.c.bf16 %v8318_v26, %v8311_v31  ;;  %v8828_v26 = vand.u32 4294901760, %v8803_v61 }
 0x571   : > { %24182 = vmatprep.subr.bf16.mxu1 %v28057_v30  ;;  %v8235_v47 = vand.u32 4294901760, %v8206_v52  ;;  %v8300_v49 = vand.u32 4294901760, %v8299_v63  ;;  %v8887_v6 = vand.u32 4294901760, %v28267_v5 }
 0x573   : > { %v28202_v42 = vsub.f32 %v8206_v52, %v8235_v47  ;;  %v8799_v52 = vld [vmem:[#allocation5 + $0x348] sm:$0xff] }
 0x574   : > { %24184 = vmatpush3.bf16.msra.mxu1 %v28057_v30  ;;  %v8232_v30 = vand.u32 4294901760, %v8205_v15  ;;  %v8816_v7 = vand.u32 4294901760, %v8799_v52 }
 0x575   : > { %24186 = vmatprep.subr.bf16.mxu1 %v28150_v18  ;;  %v8358_v3 = vand.u32 4294901760, %v28202_v42 }
 0x576   : > { %v28187_v57 = vpack.c.bf16 %v8235_v47, %v8232_v30  ;;  %v28200_v59 = vsub.f32 %v8205_v15, %v8232_v30  ;;  %v8798_v15 = vld [vmem:[#allocation5 + $0x340] sm:$0xff]  ;;  %v28277_v13 = vsub.f32 %v8799_v52, %v8816_v7  ;;  %v8822_v30 = vand.u32 4294901760, %v8801_v38 }
 0x577   : > { %21093 = vmatmul.mubr.f32.vlgmr.msra.gmra.mrb[4].mxu1 %v28025_v50  ;;  %v8330_v50 = vand.u32 4294901760, %v28162_v10  ;;  %v8359_v20 = vsub.f32 %v28202_v42, %v8358_v3  ;;  %v8813_v53 = vand.u32 4294901760, %v8798_v15  ;;  %v8888_v47 = vsub.f32 %v28267_v5, %v8887_v6 }
 0x578   : > { %24188 = vmatpush3.bf16.msra.mxu1 %v28150_v18  ;;  %21111 = vmatprep.mubr.f32.mxu1 %v8290_v40  ;;  %v8351_v11 = vand.u32 4294901760, %v28200_v59  ;;  %v24229_v8 = vpack.c.bf16 %v28202_v42, %v28200_v59  ;;  %v28292_v36 = vsub.f32 %v8801_v38, %v8822_v30 }
 0x579   : > { %24190 = vmatprep.subr.bf16.mxu1 %v28165_v22  ;;  %v8331_v56 = vsub.f32 %v28162_v10, %v8330_v50  ;;  %v8360_v23 = vand.u32 4294901760, %v8359_v20  ;;  %v8800_v10 = vld [vmem:[#allocation5 + $0x350] sm:$0xff]  ;;  %v8889_v55 = vand.u32 4294901760, %v8888_v47  ;;  %v9445_v47 = vld [vmem:[#allocation5 + $0x3c8] sm:$0xff] }
 0x57a   : > { %v8352_v21 = vsub.f32 %v28200_v59, %v8351_v11  ;;  %v24261_v54 = vpack.c.bf16 %v8358_v3, %v8351_v11  ;;  %v8819_v40 = vand.u32 4294901760, %v8800_v10 }
 0x57b   : > { %v8332_v45 = vand.u32 4294901760, %v8331_v56 }
 0x57c   : > { %24192 = vmatpush3.bf16.msra.mxu1 %v28165_v22  ;;  %v8353_v28 = vand.u32 4294901760, %v8352_v21  ;;  %v28290_v14 = vsub.f32 %v8800_v10, %v8819_v40 }
 0x57d   : > { %24194 = vmatprep.subr.bf16.mxu1 %v28181_v29  ;;  %v24205_v48 = vpack.c.bf16 %v8332_v45, %v8325_v2  ;;  %v28315_v2 = vsub.f32 %v8803_v61, %v8828_v26  ;;  %v9459_v61 = vand.u32 4294901760, %v9445_v47 }
 0x57e   : > { %v24213_v27 = vpack.c.bf16 %v8360_v23, %v8353_v28  ;;  %v8922_v42 = vand.u32 4294901760, %v28290_v14  ;;  %v24317_v38 = vpack.c.bf16 %v28292_v36, %v28290_v14 }
 0x57f   : > { %v8943_v24 = vand.u32 4294901760, %v28315_v2 }
 0x580   : > { %24196 = vmatpush3.bf16.msra.mxu1 %v28181_v29  ;;  %v8923_v3 = vsub.f32 %v28290_v14, %v8922_v42 }
 0x581   : > { %24198 = vmatprep.subr.bf16.mxu1 %v28187_v57 }
 0x582   : > { %v8924_v28 = vand.u32 4294901760, %v8923_v3 }
 0x584   : > { %24200 = vmatpush3.bf16.msra.mxu1 %v28187_v57 }
 0x585   : > { %24202 = vmatprep.subr.bf16.mxu1 %v24201_v44 }
 0x587   : > { %21112 = vmatmul.mubr.f32.vlgmr.msra.gmra.mrb[4].mxu1 %v8300_v49 }
 0x588   : > { %24204 = vmatpush3.bf16.msra.mxu1 %v24201_v44  ;;  %21130 = vmatprep.mubr.f32.mxu1 %v28130_v34 }
 0x589   : > { %24206 = vmatprep.subr.bf16.mxu1 %v24205_v48 }
 0x58c   : > { %24208 = vmatpush3.bf16.msra.mxu1 %v24205_v48 }
 0x58d   : > { %24210 = vmatprep.subr.bf16.mxu1 %v24209_v1 }
 0x590   : > { %24212 = vmatpush3.bf16.msra.mxu1 %v24209_v1 }
 0x591   : > { %24214 = vmatprep.subr.bf16.mxu1 %v24213_v27 }
 0x594   : > { %24216 = vmatpush3.bf16.msra.mxu1 %v24213_v27 }
 0x595   : > { %24218 = vmatprep.subr.bf16.mxu1 %v24217_v39 }
 0x597   : > { %21131 = vmatmul.mubr.f32.vlgmr.msra.gmra.mrb[4].mxu1 %v28155_v58 }
 0x598   : > { %24220 = vmatpush3.bf16.msra.mxu1 %v24217_v39  ;;  %21149 = vmatprep.mubr.f32.mxu1 %v28137_v32  ;;  %v24253_v32 = vpack.c.bf16 %v8330_v50, %v8323_v25  ;;  %v8805_v25 = vld [vmem:[#allocation5 + $0x378] sm:$0xff]  ;;  %v8944_v39 = vsub.f32 %v28315_v2, %v8943_v24 }
 0x599   : > { %24222 = vmatprep.subr.bf16.mxu1 %v24221_v37  ;;  %v8834_v56 = vand.u32 4294901760, %v8805_v25 }
 0x59b   : > { %v28332_v21 = vsub.f32 %v8805_v25, %v8834_v56 }
 0x59c   : > { %24224 = vmatpush3.bf16.msra.mxu1 %v24221_v37 }
 0x59d   : > { %24226 = vmatprep.subr.bf16.mxu1 %v24225_v19 }
 0x5a0   : > { %24228 = vmatpush3.bf16.msra.mxu1 %v24225_v19  ;;  %v8957_v19 = vand.u32 4294901760, %v28332_v21 }
 0x5a1   : > { %24230 = vmatprep.subr.bf16.mxu1 %v24229_v8 }
 0x5a2   : > { %v8958_v60 = vsub.f32 %v28332_v21, %v8957_v19 }
 0x5a4   : > { %24232 = vmatpush3.bf16.msra.mxu1 %v24229_v8 }
 0x5a5   : > { %24234 = vmatprep.subr.bf16.mxu1 %v28150_v18 }
 0x5a7   : > { %21150 = vmatmul.mubr.f32.vlgmr.msra.gmra.mrb[4].mxu1 %v28169_v4  ;;  %v8802_v4 = vld [vmem:[#allocation5 + $0x360] sm:$0xff] }
 0x5a8   : > { %24236 = vmatpush3.bf16.msra.mxu1 %v28150_v18  ;;  %21168 = vmatprep.mubr.f32.mxu1 %v8288_v9  ;;  %v24257_v9 = vpack.c.bf16 %v8344_v0, %v8337_v43  ;;  %v8825_v31 = vand.u32 4294901760, %v8802_v4 }
 0x5a9   : > { %24238 = vmatprep.subr.bf16.mxu1 %v28165_v22 }
 0x5aa   : > { %v28311_v63 = vpack.c.bf16 %v8828_v26, %v8825_v31  ;;  %v28313_v44 = vsub.f32 %v8802_v4, %v8825_v31  ;;  %v9446_v4 = vld [vmem:[#allocation5 + $0x3d0] sm:$0xff]  ;;  %v9451_v31 = vld [vmem:[#allocation5 + $0x3f8] sm:$0xff] }
 0x5ab   : > { %v9462_v25 = vand.u32 4294901760, %v9446_v4 }
 0x5ac   : > { %24240 = vmatpush3.bf16.msra.mxu1 %v28165_v22  ;;  %v8936_v48 = vand.u32 4294901760, %v28313_v44 }
 0x5ad   : > { %24242 = vmatprep.subr.bf16.mxu1 %v28181_v29 }
 0x5ae   : > { %v8937_v27 = vsub.f32 %v28313_v44, %v8936_v48 }
 0x5b0   : > { %24244 = vmatpush3.bf16.msra.mxu1 %v28181_v29 }
 0x5b1   : > { %24246 = vmatprep.subr.bf16.mxu1 %v28187_v57 }
 0x5b4   : > { %24248 = vmatpush3.bf16.msra.mxu1 %v28187_v57 }
 0x5b5   : > { %24250 = vmatprep.subr.bf16.mxu1 %v24249_v35 }
 0x5b7   : > { %21169 = vmatmul.mubr.f32.vlgmr.msra.gmra.mrb[4].mxu1 %v8298_v12  ;;  %v28295_v12 = vpack.c.bf16 %v8822_v30, %v8819_v40 }
 0x5b8   : > { %24252 = vmatpush3.bf16.msra.mxu1 %v24249_v35  ;;  %21187 = vmatprep.mubr.f32.mxu1 %v28130_v34 }
 0x5b9   : > { %24254 = vmatprep.subr.bf16.mxu1 %v24253_v32 }
 0x5bc   : > { %24256 = vmatpush3.bf16.msra.mxu1 %v24253_v32  ;;  %v8938_v32 = vand.u32 4294901760, %v8937_v27 }
 0x5bd   : > { %24258 = vmatprep.subr.bf16.mxu1 %v24257_v9 }
 0x5c0   : > { %24260 = vmatpush3.bf16.msra.mxu1 %v24257_v9  ;;  %v8945_v9 = vand.u32 4294901760, %v8944_v39 }
 0x5c1   : > { %24262 = vmatprep.subr.bf16.mxu1 %v24261_v54 }
 0x5c4   : > { %24264 = vmatpush3.bf16.msra.mxu1 %v24261_v54 }
 0x5c5   : > { %24266 = vmatprep.subr.bf16.mxu1 %v28150_v18 }
 0x5c7   : > { %21188 = vmatmul.mubr.f32.vlgmr.msra.gmra.mrb[4].mxu1 %v28155_v58 }
 0x5c8   : > { %24268 = vmatpush3.bf16.msra.mxu1 %v28150_v18  ;;  %21206 = vmatprep.mubr.f32.mxu1 %v28130_v34  ;;  %v8810_v34 = vsel %vm279_vm0, %v27566_v51, 0  ;;  %v28275_v18 = vsub.f32 %v8798_v15, %v8813_v53  ;;  %v8804_v51 = vld [vmem:[#allocation5 + $0x370] sm:$0xff]  ;;  %v24305_v15 = vpack.c.bf16 %v8945_v9, %v8938_v32 }
 0x5c9   : > { %24270 = vmatprep.subr.bf16.mxu1 %v28165_v22  ;;  %v28285_v41 = vand.u32 4294901760, %v8810_v34 }
 0x5ca   : > { %v8908_v50 = vand.u32 4294901760, %v28275_v18  ;;  %v24313_v10 = vpack.c.bf16 %v28277_v13, %v28275_v18 }
 0x5cb   : > { %v28299_v43 = vsub.f32 %v8810_v34, %v28285_v41  ;;  %v24321_v34 = vpack.c.bf16 %v28315_v2, %v28313_v44 }
 0x5cc   : > { %24272 = vmatpush3.bf16.msra.mxu1 %v28165_v22  ;;  %v28280_v22 = vpack.c.bf16 %v8816_v7, %v8813_v53  ;;  %v8909_v0 = vsub.f32 %v28275_v18, %v8908_v50  ;;  %v8959_v53 = vand.u32 4294901760, %v8958_v60 }
 0x5cd   : > { %24274 = vmatprep.subr.bf16.mxu1 %v28181_v29  ;;  %v8897_v16 = vand.u32 4294901760, %v28299_v43 }
 0x5ce   : > { %v8910_v62 = vand.u32 4294901760, %v8909_v0 }
 0x5cf   : > { %v8898_v20 = vsub.f32 %v28299_v43, %v8897_v16 }
 0x5d0   : > { %24276 = vmatpush3.bf16.msra.mxu1 %v28181_v29  ;;  %v8915_v29 = vand.u32 4294901760, %v28277_v13 }
 0x5d1   : > { %24278 = vmatprep.subr.bf16.mxu1 %v28187_v57  ;;  %v8899_v8 = vand.u32 4294901760, %v8898_v20 }
 0x5d2   : > { %v8916_v59 = vsub.f32 %v28277_v13, %v8915_v29  ;;  %v24345_v30 = vpack.c.bf16 %v8915_v29, %v8908_v50  ;;  %v9444_v13 = vld [vmem:[#allocation5 + $0x3c0] sm:$0xff]  ;;  %v9449_v29 = vld [vmem:[#allocation5 + $0x3e8] sm:$0xff] }
 0x5d3   : > { %v9448_v50 = vld [vmem:[#allocation5 + $0x3e0] sm:$0xff] }
 0x5d4   : > { %24280 = vmatpush3.bf16.msra.mxu1 %v28187_v57  ;;  %v8831_v57 = vand.u32 4294901760, %v8804_v51  ;;  %v8917_v11 = vand.u32 4294901760, %v8916_v59 }
 0x5d5   : > { %24282 = vmatprep.subr.bf16.mxu1 %v28280_v22 }
 0x5d6   : > { %v28317_v45 = vpack.c.bf16 %v8834_v56, %v8831_v57  ;;  %v28330_v46 = vsub.f32 %v8804_v51, %v8831_v57  ;;  %v24297_v1 = vpack.c.bf16 %v8917_v11, %v8910_v62  ;;  %v9447_v51 = vld [vmem:[#allocation5 + $0x3d8] sm:$0xff]  ;;  %v28408_v57 = vsub.f32 %v9445_v47, %v9459_v61 }
 0x5d7   : > { %21207 = vmatmul.mubr.f32.vlgmr.msra.gmra.mrb[4].mxu1 %v28155_v58  ;;  %v8929_v58 = vand.u32 4294901760, %v28292_v36  ;;  %v9465_v14 = vand.u32 4294901760, %v9447_v51  ;;  %v28410_v56 = vsub.f32 %v9446_v4, %v9462_v25 }
 0x5d8   : > { %24284 = vmatpush3.bf16.msra.mxu1 %v28280_v22  ;;  %21225 = vmatprep.mubr.f32.mxu1 %v8889_v55  ;;  %v8950_v37 = vand.u32 4294901760, %v28330_v46  ;;  %v24325_v40 = vpack.c.bf16 %v28332_v21, %v28330_v46  ;;  %v9548_v11 = vand.u32 4294901760, %v28408_v57 }
 0x5d9   : > { %24286 = vmatprep.subr.bf16.mxu1 %v28295_v12  ;;  %v8930_v49 = vsub.f32 %v28292_v36, %v8929_v58  ;;  %v9468_v36 = vand.u32 4294901760, %v9448_v50  ;;  %v28417_v59 = vpack.c.bf16 %v9465_v14, %v9462_v25  ;;  %v17854_v25 = vld [vmem:[%s30474_s3 + $0x1] ss:$0 sm:$0xff] }
 0x5da   : > { %v8951_v54 = vsub.f32 %v28330_v46, %v8950_v37  ;;  %v24357_v18 = vpack.c.bf16 %v8957_v19, %v8950_v37 }
 0x5db   : > { %v8931_v23 = vand.u32 4294901760, %v8930_v49  ;;  %v28414_v0 = vsub.f32 %v9448_v50, %v9468_v36  ;;  %v9549_v49 = vsub.f32 %v28408_v57, %v9548_v11 }
 0x5dc   : > { %24288 = vmatpush3.bf16.msra.mxu1 %v28295_v12  ;;  %v8952_v52 = vand.u32 4294901760, %v8951_v54 }
 0x5dd   : > { %24290 = vmatprep.subr.bf16.mxu1 %v28311_v63  ;;  %v24301_v35 = vpack.c.bf16 %v8931_v23, %v8924_v28  ;;  %v9550_v21 = vand.u32 4294901760, %v9549_v49  ;;  %v9569_v39 = vand.u32 4294901760, %v28414_v0  ;;  %v9434_v49 = vld [vmem:[#allocation5 + $0x380] sm:$0xff] }
 0x5de   : > { %v24309_v7 = vpack.c.bf16 %v8959_v53, %v8952_v52 }
 0x5e0   : > { %24292 = vmatpush3.bf16.msra.mxu1 %v28311_v63 }
 0x5e1   : > { %24294 = vmatprep.subr.bf16.mxu1 %v28317_v45 }
 0x5e4   : > { %24296 = vmatpush3.bf16.msra.mxu1 %v28317_v45 }
 0x5e5   : > { %24298 = vmatprep.subr.bf16.mxu1 %v24297_v1 }
 0x5e7   : > { %21226 = vmatmul.mubr.f32.vlgmr.msra.gmra.mrb[4].mxu1 %v8899_v8  ;;  %v9570_v8 = vsub.f32 %v28414_v0, %v9569_v39 }
 0x5e8   : > { %24300 = vmatpush3.bf16.msra.mxu1 %v24297_v1  ;;  %21244 = vmatprep.mubr.f32.mxu1 %v28260_v33 }
 0x5e9   : > { %24302 = vmatprep.subr.bf16.mxu1 %v24301_v35  ;;  %v9571_v32 = vand.u32 4294901760, %v9570_v8 }
 0x5ec   : > { %24304 = vmatpush3.bf16.msra.mxu1 %v24301_v35 }
 0x5ed   : > { %24306 = vmatprep.subr.bf16.mxu1 %v24305_v15 }
 0x5f0   : > { %24308 = vmatpush3.bf16.msra.mxu1 %v24305_v15 }
 0x5f1   : > { %24310 = vmatprep.subr.bf16.mxu1 %v24309_v7 }
 0x5f4   : > { %24312 = vmatpush3.bf16.msra.mxu1 %v24309_v7 }
 0x5f5   : > { %24314 = vmatprep.subr.bf16.mxu1 %v24313_v10 }
 0x5f7   : > { %21245 = vmatmul.mubr.f32.vlgmr.msra.gmra.mrb[4].mxu1 %v28285_v41 }
 0x5f8   : > { %24316 = vmatpush3.bf16.msra.mxu1 %v24313_v10  ;;  %21263 = vmatprep.mubr.f32.mxu1 %v28267_v5  ;;  %v24349_v5 = vpack.c.bf16 %v8929_v58, %v8922_v42 }
 0x5f9   : > { %24318 = vmatprep.subr.bf16.mxu1 %v24317_v38 }
 0x5fc   : > { %24320 = vmatpush3.bf16.msra.mxu1 %v24317_v38 }
 0x5fd   : > { %24322 = vmatprep.subr.bf16.mxu1 %v24321_v34 }
 0x600   : > { %24324 = vmatpush3.bf16.msra.mxu1 %v24321_v34 }
 0x601   : > { %24326 = vmatprep.subr.bf16.mxu1 %v24325_v40 }
 0x604   : > { %24328 = vmatpush3.bf16.msra.mxu1 %v24325_v40 }
 0x605   : > { %24330 = vmatprep.subr.bf16.mxu1 %v28280_v22 }
 0x607   : > { %21264 = vmatmul.mubr.f32.vlgmr.msra.gmra.mrb[4].mxu1 %v28299_v43  ;;  %v28412_v43 = vsub.f32 %v9447_v51, %v9465_v14 }
 0x608   : > { %24332 = vmatpush3.bf16.msra.mxu1 %v28280_v22  ;;  %21282 = vmatprep.mubr.f32.mxu1 %v8887_v6  ;;  %v24353_v6 = vpack.c.bf16 %v8943_v24, %v8936_v48  ;;  %v9555_v48 = vand.u32 4294901760, %v28410_v56 }
 0x609   : > { %24334 = vmatprep.subr.bf16.mxu1 %v28295_v12  ;;  %v9562_v24 = vand.u32 4294901760, %v28412_v43  ;;  %v24405_v40 = vpack.c.bf16 %v28412_v43, %v28410_v56 }
 0x60a   : > { %v9556_v20 = vsub.f32 %v28410_v56, %v9555_v48 }
 0x60b   : > { %v9563_v1 = vsub.f32 %v28412_v43, %v9562_v24 }
 0x60c   : > { %24336 = vmatpush3.bf16.msra.mxu1 %v28295_v12  ;;  %v9557_v23 = vand.u32 4294901760, %v9556_v20  ;;  %v9437_v20 = vld [vmem:[#allocation5 + $0x398] sm:$0xff] }
 0x60d   : > { %24338 = vmatprep.subr.bf16.mxu1 %v28311_v63  ;;  %v9564_v27 = vand.u32 4294901760, %v9563_v1 }
 0x60f   : > { %v24393_v19 = vpack.c.bf16 %v9564_v27, %v9557_v23  ;;  %v10005_v27 = vand.u32 4294901760, %v9437_v20 }
 0x610   : > { %24340 = vmatpush3.bf16.msra.mxu1 %v28311_v63 }
 0x611   : > { %24342 = vmatprep.subr.bf16.mxu1 %v28317_v45  ;;  %v28559_v8 = vsub.f32 %v9437_v20, %v10005_v27 }
 0x614   : > { %24344 = vmatpush3.bf16.msra.mxu1 %v28317_v45 }
 0x615   : > { %24346 = vmatprep.subr.bf16.mxu1 %v24345_v30 }
 0x617   : > { %21283 = vmatmul.mubr.f32.vlgmr.msra.gmra.mrb[4].mxu1 %v8897_v16 }
 0x618   : > { %24348 = vmatpush3.bf16.msra.mxu1 %v24345_v30  ;;  %21301 = vmatprep.mubr.f32.mxu1 %v28260_v33 }
 0x619   : > { %24350 = vmatprep.subr.bf16.mxu1 %v24349_v5 }
 0x61c   : > { %24352 = vmatpush3.bf16.msra.mxu1 %v24349_v5 }
 0x61d   : > { %24354 = vmatprep.subr.bf16.mxu1 %v24353_v6 }
 0x620   : > { %24356 = vmatpush3.bf16.msra.mxu1 %v24353_v6 }
 0x621   : > { %24358 = vmatprep.subr.bf16.mxu1 %v24357_v18 }
 0x624   : > { %24360 = vmatpush3.bf16.msra.mxu1 %v24357_v18  ;;  %v28462_v18 = vpack.c.bf16 %v9562_v24, %v9555_v48  ;;  %v9435_v48 = vld [vmem:[#allocation5 + $0x388] sm:$0xff]  ;;  %v9996_v24 = vand.u32 4294901760, %v9434_v49 }
 0x625   : > { %24362 = vmatprep.subr.bf16.mxu1 %v28280_v22 }
 0x626   : > { %v28546_v1 = vsub.f32 %v9434_v49, %v9996_v24 }
 0x627   : > { %21302 = vmatmul.mubr.f32.vlgmr.msra.gmra.mrb[4].mxu1 %v28285_v41 }
 0x628   : > { %24364 = vmatpush3.bf16.msra.mxu1 %v28280_v22  ;;  %21320 = vmatprep.mubr.f32.mxu1 %v28260_v33  ;;  %v26033_v22 = vmov 0.0|0.0   ;;  %v9456_v33 = vand.u32 4294901760, %v9444_v13 }
 0x629   : > { %24366 = vmatprep.subr.bf16.mxu1 %v28295_v12  ;;  %24377 = vmatprep.subr.bf16.mxu0 %v26033_v22 }
 0x62a   : > { %v28404_v26 = vpack.c.bf16 %v9459_v61, %v9456_v33  ;;  %v28406_v55 = vsub.f32 %v9444_v13, %v9456_v33  ;;  %v17852_v33 = vld [vmem:[%s30473_s2 + $0x1] ss:$0 sm:$0xff] }
 0x62c   : > { %24368 = vmatpush3.bf16.msra.mxu1 %v28295_v12  ;;  %v9471_v12 = vand.u32 4294901760, %v9449_v29  ;;  %24379 = vmatpush3.bf16.msra.mxu0 %v28404_v26  ;;  %v9541_v62 = vand.u32 4294901760, %v28406_v55  ;;  %v24402_v34 = vpack.c.bf16 %v28408_v57, %v28406_v55 }
 0x62d   : > { %24370 = vmatprep.subr.bf16.mxu1 %v28311_v63  ;;  %24380 = vmatprep.subr.bf16.mxu0 %v26033_v22 }
 0x62e   : > { %v28419_v42 = vsub.f32 %v9449_v29, %v9471_v12  ;;  %v9542_v3 = vsub.f32 %v28406_v55, %v9541_v62  ;;  %v28460_v6 = vpack.c.bf16 %v9548_v11, %v9541_v62 }
 0x630   : > { %24372 = vmatpush3.bf16.msra.mxu1 %v28311_v63  ;;  %v9477_v63 = vand.u32 4294901760, %v9451_v31  ;;  %24382 = vmatpush3.bf16.msra.mxu0 %v28417_v59  ;;  %v9543_v46 = vand.u32 4294901760, %v9542_v3  ;;  %v9576_v37 = vand.u32 4294901760, %v28419_v42  ;;  %v24408_v30 = vpack.c.bf16 %v28419_v42, %v28414_v0 }
 0x631   : > { %24374 = vmatprep.subr.bf16.mxu1 %v28317_v45  ;;  %24383 = vmatprep.subr.bf16.mxu0 %v26033_v22 }
 0x632   : > { %v28424_v2 = vsub.f32 %v9451_v31, %v9477_v63  ;;  %v24390_v28 = vpack.c.bf16 %v9550_v21, %v9543_v46  ;;  %v9577_v35 = vsub.f32 %v28419_v42, %v9576_v37  ;;  %v28464_v13 = vpack.c.bf16 %v9576_v37, %v9569_v39  ;;  %v9436_v21 = vld [vmem:[#allocation5 + $0x390] sm:$0xff]  ;;  %v9439_v39 = vld [vmem:[#allocation5 + $0x3a8] sm:$0xff] }
 0x633   : > { %v9999_v46 = vand.u32 4294901760, %v9435_v48  ;;  %v10002_v23 = vand.u32 4294901760, %v9436_v21 }
 0x634   : > { %24376 = vmatpush3.bf16.msra.mxu1 %v28317_v45  ;;  %v28427_v45 = vpack.c.bf16 %v9471_v12, %v9468_v36  ;;  %v9590_v54 = vand.u32 4294901760, %v28424_v2  ;;  %v9578_v60 = vand.u32 4294901760, %v9577_v35  ;;  %v9440_v35 = vld [vmem:[#allocation5 + $0x3b0] sm:$0xff] }
 0x635   : > { %24881 = vmatprep.subr.bf16.mxu1 %v26033_v22 }
 0x636   : > { %24385 = vmatpush3.bf16.msra.mxu0 %v28427_v45  ;;  %v9591_v52 = vsub.f32 %v28424_v2, %v9590_v54  ;;  %v24396_v53 = vpack.c.bf16 %v9578_v60, %v9571_v32  ;;  %v9441_v32 = vld [vmem:[#allocation5 + $0x3b8] sm:$0xff] }
 0x637   : > { %21321 = vmatmul.mubr.f32.vlgmr.msra.gmra.mrb[4].mxu1 %v28285_v41  ;;  %v9450_v41 = vld [vmem:[#allocation5 + $0x3f0] sm:$0xff]  ;;  %24386 = vmatprep.subr.bf16.mxu0 %v26033_v22 }
 0x638   : > { %22137 = vmatprep.mubr.msk.f32.mxu1 %vm26034_vm1, %v30529_v17  ;;  %v9474_v58 = vand.u32 4294901760, %v9450_v41  ;;  %v9592_v10 = vand.u32 4294901760, %v9591_v52 }
 0x63a   : > { %v28422_v44 = vsub.f32 %v9450_v41, %v9474_v58  ;;  %v28431_v16 = vpack.c.bf16 %v9477_v63, %v9474_v58 }
 0x63c   : > { %24388 = vmatpush3.bf16.msra.mxu0 %v28431_v16  ;;  %v9583_v9 = vand.u32 4294901760, %v28422_v44  ;;  %v24411_v5 = vpack.c.bf16 %v28424_v2, %v28422_v44 }
 0x63d   : > { %24389 = vmatprep.subr.bf16.mxu0 %v26033_v22 }
 0x63e   : > { %v9584_v15 = vsub.f32 %v28422_v44, %v9583_v9  ;;  %v28466_v47 = vpack.c.bf16 %v9590_v54, %v9583_v9  ;;  %v28564_v54 = vpack.c.bf16 %v10005_v27, %v10002_v23 }
 0x640   : > { %v9585_v7 = vand.u32 4294901760, %v9584_v15  ;;  %v10011_v15 = vand.u32 4294901760, %v9439_v39 }
 0x642   : > { %v24399_v38 = vpack.c.bf16 %v9592_v10, %v9585_v7  ;;  %v10017_v7 = vand.u32 4294901760, %v9441_v32 }
 0x70a   : > { %v21322_v4 = vpop.f32.mrb[4].mxu1 }
 0x70b   : > { %v9395_v61 = vmax.f32 %v21322_v4, 0.0  ;;  %v9382_v51 = vpop.f32.mrb[5].mxu1 }
 0x70c   : > { %v9394_v50 = vmax.f32 %v9382_v51, 0.0 }
 0x70d   : > { %v9405_v29 = vmul.f32 %v17852_v33, %v9395_v61 }
 0x70e   : > { %v9404_v14 = vmul.f32 %v17852_v33, %v9394_v50 }
 0x70f   : > { %v9415_v36 = vadd.f32 %v17854_v25, %v9405_v29 }
 0x710   : > { %v9414_v12 = vadd.f32 %v17854_v25, %v9404_v14  ;;  %v28600_v25 = vsub.f32 %v9441_v32, %v10017_v7 }
 0x711   : > { %9417 = vst.msk [vmem:[#allocation2 + $0x8] sm:$0xff] %vm279_vm0, %v9415_v36 }
 0x712   : > { %9416 = vst.msk [vmem:[#allocation2] sm:$0xff] %vm279_vm0, %v9414_v12 }
 0x719   : > { %v9418_v41 = vld [vmem:[#allocation2] ss:$2 sm:$0xff]  ;;  %v9419_v31 = vld [vmem:[#allocation2 + $0x1] ss:$2 sm:$0xff] }
 0x71a   : > { %9430 = vst.msk [vmem:[#allocation3 + $0x1] sm:$0xff] %vm279_vm0, %v9418_v41  ;;  %9431 = vst.msk [vmem:[#allocation4 + $0x2] sm:$0xff] %vm279_vm0, %v9419_v31 }
 0x721   : > { %v9442_v55 = vld [vmem:[#allocation3] sm:$0xff]  ;;  %v28479_v56 = vld [vmem:[#allocation4] sm:$0xff] }
 0x722   : > { %v9453_v57 = vsel %vm279_vm0, %v9442_v55, 0  ;;  %v28481_v43 = vld [vmem:[#allocation3 + $0x1] sm:$0xff]  ;;  %v28487_v58 = vld [vmem:[#allocation4 + $0x1] sm:$0xff] }
 0x723   : > { %v28483_v0 = vld [vmem:[#allocation3 + $0x2] sm:$0xff]  ;;  %v28485_v42 = vand.u32 4294901760, %v9453_v57  ;;  %v28489_v63 = vld [vmem:[#allocation4 + $0x2] sm:$0xff] }
 0x724   : > { %13309 = vst.msk [vmem:[#allocation3] sm:$0xff] %vm279_vm0, %v30529_v17  ;;  %13310 = vst.msk [vmem:[#allocation3 + $0x8] sm:$0xff] %vm279_vm0, %v30529_v17  ;;  %v28495_v44 = vld [vmem:[#allocation4 + $0x3] sm:$0xff] }
 0x725   : > { %13315 = vst.msk [vmem:[#allocation4 + $0x8] sm:$0xff] %vm279_vm0, %v30529_v17  ;;  %13314 = vst.msk [vmem:[#allocation4] sm:$0xff] %vm279_vm0, %v30529_v17  ;;  %v9529_v2 = vsub.f32 %v9453_v57, %v28485_v42 }
 0x727   : > { %v9530_v62 = vand.u32 4294901760, %v9529_v2 }
 0x729   : > { %v9531_v11 = vsub.f32 %v9529_v2, %v9530_v62 }
 0x72b   : > { %v9532_v3 = vand.u32 4294901760, %v9531_v11 }
 0x72d   : > { %21340 = vmatmul.mubr.f32.vlgmr.msra.gmra.mrb[4].mxu0 %v9532_v3 }
 0x72e   : > { %24391 = vmatpush3.bf16.msra.mxu0 %v24390_v28  ;;  %21358 = vmatprep.mubr.msk.f32.mxu0 %vm26034_vm1, %v30529_v17  ;;  %v28548_v28 = vsub.f32 %v9435_v48, %v9999_v46 }
 0x72f   : > { %24392 = vmatprep.subr.bf16.mxu0 %v26033_v22 }
 0x730   : > { %v10088_v9 = vand.u32 4294901760, %v28548_v28  ;;  %v24474_v20 = vpack.c.bf16 %v28548_v28, %v28546_v1 }
 0x732   : > { %24394 = vmatpush3.bf16.msra.mxu0 %v24393_v19  ;;  %v28557_v19 = vsub.f32 %v9436_v21, %v10002_v23 }
 0x733   : > { %24395 = vmatprep.subr.bf16.mxu0 %v26033_v22 }
 0x736   : > { %24397 = vmatpush3.bf16.msra.mxu0 %v24396_v53  ;;  %v10014_v53 = vand.u32 4294901760, %v9440_v35 }
 0x737   : > { %24398 = vmatprep.subr.bf16.mxu0 %v26033_v22 }
 0x738   : > { %v28598_v51 = vsub.f32 %v9440_v35, %v10014_v53 }
 0x73a   : > { %24400 = vmatpush3.bf16.msra.mxu0 %v24399_v38  ;;  %v10089_v38 = vsub.f32 %v28548_v28, %v10088_v9  ;;  %v10123_v57 = vand.u32 4294901760, %v28598_v51  ;;  %v24483_v27 = vpack.c.bf16 %v28600_v25, %v28598_v51 }
 0x73b   : > { %24401 = vmatprep.subr.bf16.mxu0 %v26033_v22 }
 0x73c   : > { %v10090_v4 = vand.u32 4294901760, %v10089_v38  ;;  %v10124_v3 = vsub.f32 %v28598_v51, %v10123_v57 }
 0x73d   : > { %21359 = vmatmul.mubr.f32.vlgmr.msra.gmra.mrb[4].mxu0 %v28485_v42 }
 0x73e   : > { %24403 = vmatpush3.bf16.msra.mxu0 %v24402_v34  ;;  %21377 = vmatprep.mubr.msk.f32.mxu0 %vm26034_vm1, %v30529_v17  ;;  %v10095_v34 = vand.u32 4294901760, %v28557_v19 }
 0x73f   : > { %24404 = vmatprep.subr.bf16.mxu0 %v26033_v22 }
 0x740   : > { %v10096_v33 = vsub.f32 %v28557_v19, %v10095_v34 }
 0x742   : > { %24406 = vmatpush3.bf16.msra.mxu0 %v24405_v40  ;;  %v10102_v40 = vand.u32 4294901760, %v28559_v8  ;;  %v10097_v12 = vand.u32 4294901760, %v10096_v33 }
 0x743   : > { %24407 = vmatprep.subr.bf16.mxu0 %v26033_v22 }
 0x744   : > { %v10103_v61 = vsub.f32 %v28559_v8, %v10102_v40 }
 0x746   : > { %24409 = vmatpush3.bf16.msra.mxu0 %v24408_v30  ;;  %v10104_v41 = vand.u32 4294901760, %v10103_v61 }
 0x747   : > { %24410 = vmatprep.subr.bf16.mxu0 %v26033_v22 }
 0x74a   : > { %24412 = vmatpush3.bf16.msra.mxu0 %v24411_v5 }
 0x74b   : > { %24413 = vmatprep.subr.bf16.mxu0 %v26033_v22 }
 0x74d   : > { %21378 = vmatmul.mubr.f32.vlgmr.msra.gmra.mrb[4].mxu0 %v9529_v2  ;;  %v24465_v2 = vpack.c.bf16 %v10104_v41, %v10097_v12 }
 0x74e   : > { %24415 = vmatpush3.bf16.msra.mxu0 %v28404_v26  ;;  %21396 = vmatprep.mubr.msk.f32.mxu0 %vm26034_vm1, %v30529_v17 }
 0x74f   : > { %24416 = vmatprep.subr.bf16.mxu0 %v26033_v22 }
 0x752   : > { %24418 = vmatpush3.bf16.msra.mxu0 %v28417_v59 }
 0x753   : > { %24419 = vmatprep.subr.bf16.mxu0 %v26033_v22 }
 0x756   : > { %24421 = vmatpush3.bf16.msra.mxu0 %v28427_v45 }
 0x757   : > { %24422 = vmatprep.subr.bf16.mxu0 %v26033_v22 }
 0x75a   : > { %24424 = vmatpush3.bf16.msra.mxu0 %v28431_v16 }
 0x75b   : > { %24425 = vmatprep.subr.bf16.mxu0 %v26033_v22 }
 0x75d   : > { %21397 = vmatmul.mubr.f32.vlgmr.msra.gmra.mrb[4].mxu0 %v9530_v62 }
 0x75e   : > { %24427 = vmatpush3.bf16.msra.mxu0 %v28460_v6  ;;  %21415 = vmatprep.mubr.msk.f32.mxu0 %vm26034_vm1, %v30529_v17  ;;  %v28585_v6 = vsub.f32 %v9439_v39, %v10011_v15  ;;  %v24501_v39 = vpack.c.bf16 %v10102_v40, %v10095_v34  ;;  %v10540_v40 = vld [vmem:[#allocation5 + $0x430] sm:$0xff] }
 0x75f   : > { %24428 = vmatprep.subr.bf16.mxu0 %v26033_v22 }
 0x760   : > { %v10116_v29 = vand.u32 4294901760, %v28585_v6 }
 0x762   : > { %24430 = vmatpush3.bf16.msra.mxu0 %v28462_v18  ;;  %v10117_v55 = vsub.f32 %v28585_v6, %v10116_v29 }
 0x763   : > { %24431 = vmatprep.subr.bf16.mxu0 %v26033_v22 }
 0x764   : > { %v10118_v11 = vand.u32 4294901760, %v10117_v55 }
 0x766   : > { %24433 = vmatpush3.bf16.msra.mxu0 %v28464_v13  ;;  %v28589_v13 = vpack.c.bf16 %v10017_v7, %v10014_v53  ;;  %v10538_v7 = vld [vmem:[#allocation5 + $0x420] sm:$0xff] }
 0x767   : > { %24434 = vmatprep.subr.bf16.mxu0 %v26033_v22 }
 0x76a   : > { %24436 = vmatpush3.bf16.msra.mxu0 %v28466_v47 }
 0x76b   : > { %24437 = vmatprep.subr.bf16.mxu0 %v26033_v22 }
 0x76d   : > { %21416 = vmatmul.mubr.f32.vlgmr.msra.gmra.mrb[4].mxu0 %v28485_v42 }
 0x76e   : > { %24439 = vmatpush3.bf16.msra.mxu0 %v28404_v26  ;;  %21434 = vmatprep.mubr.msk.f32.mxu0 %vm26034_vm1, %v30529_v17  ;;  %v9993_v26 = vsel %vm279_vm0, %v28479_v56, 0  ;;  %v10130_v56 = vand.u32 4294901760, %v28600_v25 }
 0x76f   : > { %24440 = vmatprep.subr.bf16.mxu0 %v26033_v22  ;;  %v28554_v37 = vand.u32 4294901760, %v9993_v26 }
 0x770   : > { %v10131_v49 = vsub.f32 %v28600_v25, %v10130_v56  ;;  %v24507_v28 = vpack.c.bf16 %v10130_v56, %v10123_v57 }
 0x771   : > { %v28570_v52 = vsub.f32 %v9993_v26, %v28554_v37  ;;  %v24477_v26 = vpack.c.bf16 %v28559_v8, %v28557_v19  ;;  %v10534_v19 = vld [vmem:[#allocation5 + $0x400] sm:$0xff]  ;;  %v10535_v8 = vld [vmem:[#allocation5 + $0x408] sm:$0xff] }
 0x772   : > { %24442 = vmatpush3.bf16.msra.mxu0 %v28417_v59  ;;  %v28551_v59 = vpack.c.bf16 %v9999_v46, %v9996_v24  ;;  %v10125_v24 = vand.u32 4294901760, %v10124_v3  ;;  %v10132_v46 = vand.u32 4294901760, %v10131_v49  ;;  %v10546_v35 = vand.u32 4294901760, %v10534_v19 }
 0x773   : > { %24443 = vmatprep.subr.bf16.mxu0 %v26033_v22  ;;  %v10070_v18 = vand.u32 4294901760, %v28570_v52  ;;  %v10549_v32 = vand.u32 4294901760, %v10535_v8 }
 0x774   : > { %v24471_v21 = vpack.c.bf16 %v10132_v46, %v10125_v24 }
 0x775   : > { %v10071_v14 = vsub.f32 %v28570_v52, %v10070_v18 }
 0x776   : > { %24445 = vmatpush3.bf16.msra.mxu0 %v28427_v45  ;;  %v9438_v45 = vld [vmem:[#allocation5 + $0x3a0] sm:$0xff] }
 0x777   : > { %24446 = vmatprep.subr.bf16.mxu0 %v26033_v22  ;;  %v10008_v60 = vand.u32 4294901760, %v9438_v45 }
 0x779   : > { %v28581_v30 = vpack.c.bf16 %v10011_v15, %v10008_v60  ;;  %v28583_v5 = vsub.f32 %v9438_v45, %v10008_v60  ;;  %v28683_v60 = vsub.f32 %v10534_v19, %v10546_v35  ;;  %v28685_v15 = vsub.f32 %v10535_v8, %v10549_v32 }
 0x77a   : > { %24448 = vmatpush3.bf16.msra.mxu0 %v28431_v16  ;;  %v10081_v16 = vand.u32 4294901760, %v28546_v1 }
 0x77b   : > { %24449 = vmatprep.subr.bf16.mxu0 %v26033_v22  ;;  %v10109_v50 = vand.u32 4294901760, %v28583_v5  ;;  %v24480_v23 = vpack.c.bf16 %v28585_v6, %v28583_v5  ;;  %v10638_v6 = vand.u32 4294901760, %v28685_v15 }
 0x77c   : > { %v10082_v10 = vsub.f32 %v28546_v1, %v10081_v16  ;;  %v24498_v45 = vpack.c.bf16 %v10088_v9, %v10081_v16  ;;  %v10536_v16 = vld [vmem:[#allocation5 + $0x410] sm:$0xff]  ;;  %v10537_v9 = vld [vmem:[#allocation5 + $0x418] sm:$0xff] }
 0x77d   : > { %21435 = vmatmul.mubr.f32.vlgmr.msra.gmra.mrb[4].mxu0 %v28485_v42  ;;  %v10110_v31 = vsub.f32 %v28583_v5, %v10109_v50  ;;  %v10072_v42 = vand.u32 4294901760, %v10071_v14  ;;  %v24504_v1 = vpack.c.bf16 %v10116_v29, %v10109_v50  ;;  %v10555_v53 = vand.u32 4294901760, %v10537_v9 }
 0x77e   : > { %24451 = vmatpush3.bf16.msra.mxu0 %v28551_v59  ;;  %21453 = vmatprep.mubr.msk.f32.mxu0 %vm26034_vm1, %v30529_v17  ;;  %v10083_v47 = vand.u32 4294901760, %v10082_v10  ;;  %v10539_v10 = vld [vmem:[#allocation5 + $0x428] sm:$0xff]  ;;  %v10631_v5 = vand.u32 4294901760, %v28683_v60  ;;  %v10639_v51 = vsub.f32 %v28685_v15, %v10638_v6 }
 0x77f   : > { %24452 = vmatprep.subr.bf16.mxu0 %v26033_v22  ;;  %v10111_v62 = vand.u32 4294901760, %v10110_v31 }
 0x780   : > { %v24462_v36 = vpack.c.bf16 %v10090_v4, %v10083_v47  ;;  %v10561_v47 = vand.u32 4294901760, %v10539_v10  ;;  %v10564_v4 = vand.u32 4294901760, %v10540_v40  ;;  %v10632_v61 = vsub.f32 %v28683_v60, %v10631_v5 }
 0x781   : > { %v24468_v48 = vpack.c.bf16 %v10118_v11, %v10111_v62  ;;  %v10640_v55 = vand.u32 4294901760, %v10639_v51 }
 0x782   : > { %24454 = vmatpush3.bf16.msra.mxu0 %v28564_v54  ;;  %v10633_v31 = vand.u32 4294901760, %v10632_v61 }
 0x783   : > { %24455 = vmatprep.subr.bf16.mxu0 %v26033_v22 }
 0x784   : > { %v24534_v49 = vpack.c.bf16 %v10640_v55, %v10633_v31 }
 0x786   : > { %24457 = vmatpush3.bf16.msra.mxu0 %v28581_v30 }
 0x787   : > { %24458 = vmatprep.subr.bf16.mxu0 %v26033_v22 }
 0x78a   : > { %24460 = vmatpush3.bf16.msra.mxu0 %v28589_v13 }
 0x78b   : > { %24461 = vmatprep.subr.bf16.mxu0 %v26033_v22 }
 0x78d   : > { %21454 = vmatmul.mubr.f32.vlgmr.msra.gmra.mrb[4].mxu0 %v10072_v42  ;;  %v28735_v42 = vsub.f32 %v10540_v40, %v10564_v4 }
 0x78e   : > { %24463 = vmatpush3.bf16.msra.mxu0 %v24462_v36  ;;  %21472 = vmatprep.mubr.msk.f32.mxu0 %vm26034_vm1, %v30529_v17  ;;  %v28722_v36 = vsub.f32 %v10539_v10, %v10561_v47  ;;  %v11085_v10 = vld [vmem:[#allocation5 + $0x440] sm:$0xff] }
 0x78f   : > { %24464 = vmatprep.subr.bf16.mxu0 %v26033_v22 }
 0x790   : > { %v10666_v11 = vand.u32 4294901760, %v28722_v36 }
 0x792   : > { %24466 = vmatpush3.bf16.msra.mxu0 %v24465_v2 }
 0x793   : > { %24467 = vmatprep.subr.bf16.mxu0 %v26033_v22 }
 0x796   : > { %24469 = vmatpush3.bf16.msra.mxu0 %v24468_v48 }
 0x797   : > { %24470 = vmatprep.subr.bf16.mxu0 %v26033_v22 }
 0x79a   : > { %24472 = vmatpush3.bf16.msra.mxu0 %v24471_v21  ;;  %v10667_v21 = vsub.f32 %v28722_v36, %v10666_v11 }
 0x79b   : > { %24473 = vmatprep.subr.bf16.mxu0 %v26033_v22 }
 0x79d   : > { %21473 = vmatmul.mubr.f32.vlgmr.msra.gmra.mrb[4].mxu0 %v28554_v37 }
 0x79e   : > { %24475 = vmatpush3.bf16.msra.mxu0 %v24474_v20  ;;  %21491 = vmatprep.mubr.msk.f32.mxu0 %vm26034_vm1, %v30529_v17  ;;  %v10673_v20 = vand.u32 4294901760, %v28735_v42 }
 0x79f   : > { %24476 = vmatprep.subr.bf16.mxu0 %v26033_v22 }
 0x7a2   : > { %24478 = vmatpush3.bf16.msra.mxu0 %v24477_v26 }
 0x7a3   : > { %24479 = vmatprep.subr.bf16.mxu0 %v26033_v22 }
 0x7a6   : > { %24481 = vmatpush3.bf16.msra.mxu0 %v24480_v23 }
 0x7a7   : > { %24482 = vmatprep.subr.bf16.mxu0 %v26033_v22 }
 0x7aa   : > { %24484 = vmatpush3.bf16.msra.mxu0 %v24483_v27 }
 0x7ab   : > { %24485 = vmatprep.subr.bf16.mxu0 %v26033_v22 }
 0x7ad   : > { %21492 = vmatmul.mubr.f32.vlgmr.msra.gmra.mrb[4].mxu0 %v28570_v52  ;;  %v10552_v52 = vand.u32 4294901760, %v10536_v16 }
 0x7ae   : > { %24487 = vmatpush3.bf16.msra.mxu0 %v28551_v59  ;;  %21510 = vmatprep.mubr.msk.f32.mxu0 %vm26034_vm1, %v30529_v17 }
 0x7af   : > { %24488 = vmatprep.subr.bf16.mxu0 %v26033_v22  ;;  %v28694_v34 = vsub.f32 %v10536_v16, %v10552_v52  ;;  %v24546_v16 = vpack.c.bf16 %v28685_v15, %v28683_v60 }
 0x7b1   : > { %v10645_v25 = vand.u32 4294901760, %v28694_v34 }
 0x7b2   : > { %24490 = vmatpush3.bf16.msra.mxu0 %v28564_v54 }
 0x7b3   : > { %24491 = vmatprep.subr.bf16.mxu0 %v26033_v22  ;;  %v10646_v57 = vsub.f32 %v28694_v34, %v10645_v25 }
 0x7b5   : > { %v10647_v48 = vand.u32 4294901760, %v10646_v57 }
 0x7b6   : > { %24493 = vmatpush3.bf16.msra.mxu0 %v28581_v30 }
 0x7b7   : > { %24494 = vmatprep.subr.bf16.mxu0 %v26033_v22 }
 0x7ba   : > { %24496 = vmatpush3.bf16.msra.mxu0 %v28589_v13 }
 0x7bb   : > { %24497 = vmatprep.subr.bf16.mxu0 %v26033_v22 }
 0x7bd   : > { %21511 = vmatmul.mubr.f32.vlgmr.msra.gmra.mrb[4].mxu0 %v10070_v18  ;;  %v28701_v18 = vpack.c.bf16 %v10555_v53, %v10552_v52 }
 0x7be   : > { %24499 = vmatpush3.bf16.msra.mxu0 %v24498_v45  ;;  %21529 = vmatprep.mubr.msk.f32.mxu0 %vm26034_vm1, %v30529_v17 }
 0x7bf   : > { %24500 = vmatprep.subr.bf16.mxu0 %v26033_v22 }
 0x7c2   : > { %24502 = vmatpush3.bf16.msra.mxu0 %v24501_v39  ;;  %v10668_v39 = vand.u32 4294901760, %v10667_v21 }
 0x7c3   : > { %24503 = vmatprep.subr.bf16.mxu0 %v26033_v22 }
 0x7c6   : > { %24505 = vmatpush3.bf16.msra.mxu0 %v24504_v1  ;;  %v10674_v1 = vsub.f32 %v28735_v42, %v10673_v20 }
 0x7c7   : > { %24506 = vmatprep.subr.bf16.mxu0 %v26033_v22 }
 0x7c8   : > { %v10675_v8 = vand.u32 4294901760, %v10674_v1 }
 0x7ca   : > { %24508 = vmatpush3.bf16.msra.mxu0 %v24507_v28 }
 0x7cb   : > { %24509 = vmatprep.subr.bf16.mxu0 %v26033_v22 }
 0x7cd   : > { %21530 = vmatmul.mubr.f32.vlgmr.msra.gmra.mrb[4].mxu0 %v28554_v37 }
 0x7ce   : > { %24511 = vmatpush3.bf16.msra.mxu0 %v28551_v59  ;;  %21548 = vmatprep.mubr.msk.f32.mxu0 %vm26034_vm1, %v30529_v17  ;;  %v10543_v59 = vsel %vm279_vm0, %v28487_v58, 0  ;;  %v28696_v58 = vsub.f32 %v10537_v9, %v10555_v53  ;;  %v24570_v53 = vpack.c.bf16 %v10638_v6, %v10631_v5  ;;  %v11088_v5 = vld [vmem:[#allocation5 + $0x458] sm:$0xff] }
 0x7cf   : > { %24512 = vmatprep.subr.bf16.mxu0 %v26033_v22  ;;  %v28691_v38 = vand.u32 4294901760, %v10543_v59 }
 0x7d0   : > { %v10652_v50 = vand.u32 4294901760, %v28696_v58  ;;  %v24549_v9 = vpack.c.bf16 %v28696_v58, %v28694_v34  ;;  %v11086_v34 = vld [vmem:[#allocation5 + $0x448] sm:$0xff] }
 0x7d1   : > { %v11100_v40 = vand.u32 4294901760, %v11086_v34 }
 0x7d2   : > { %24514 = vmatpush3.bf16.msra.mxu0 %v28564_v54  ;;  %v28688_v54 = vpack.c.bf16 %v10549_v32, %v10546_v35  ;;  %v10653_v56 = vsub.f32 %v28696_v58, %v10652_v50  ;;  %v11097_v58 = vand.u32 4294901760, %v11085_v10 }
 0x7d3   : > { %24515 = vmatprep.subr.bf16.mxu0 %v26033_v22 }
 0x7d4   : > { %v10654_v24 = vand.u32 4294901760, %v10653_v56  ;;  %v28820_v6 = vsub.f32 %v11085_v10, %v11097_v58 }
 0x7d6   : > { %24517 = vmatpush3.bf16.msra.mxu0 %v28581_v30  ;;  %v10541_v30 = vld [vmem:[#allocation5 + $0x438] sm:$0xff]  ;;  %v24537_v27 = vpack.c.bf16 %v10654_v24, %v10647_v48 }
 0x7d7   : > { %24518 = vmatprep.subr.bf16.mxu0 %v26033_v22  ;;  %v10567_v33 = vand.u32 4294901760, %v10541_v30 }
 0x7d9   : > { %v28726_v41 = vpack.c.bf16 %v10567_v33, %v10564_v4  ;;  %v28737_v2 = vsub.f32 %v10541_v30, %v10567_v33  ;;  %v11087_v30 = vld [vmem:[#allocation5 + $0x450] sm:$0xff]  ;;  %v11089_v4 = vld [vmem:[#allocation5 + $0x460] sm:$0xff]  ;;  %v11090_v33 = vld [vmem:[#allocation5 + $0x468] sm:$0xff] }
 0x7da   : > { %24520 = vmatpush3.bf16.msra.mxu0 %v28589_v13  ;;  %v10558_v13 = vand.u32 4294901760, %v10538_v7 }
 0x7db   : > { %24521 = vmatprep.subr.bf16.mxu0 %v26033_v22  ;;  %v10680_v26 = vand.u32 4294901760, %v28737_v2  ;;  %v24555_v52 = vpack.c.bf16 %v28737_v2, %v28735_v42 }
 0x7dc   : > { %v28718_v29 = vpack.c.bf16 %v10561_v47, %v10558_v13  ;;  %v28720_v14 = vsub.f32 %v10538_v7, %v10558_v13  ;;  %v24573_v7 = vpack.c.bf16 %v10652_v50, %v10645_v25  ;;  %v28822_v13 = vsub.f32 %v11086_v34, %v11100_v40  ;;  %v11091_v25 = vld [vmem:[#allocation5 + $0x470] sm:$0xff]  ;;  %v11092_v50 = vld [vmem:[#allocation5 + $0x478] sm:$0xff] }
 0x7dd   : > { %21549 = vmatmul.mubr.f32.vlgmr.msra.gmra.mrb[4].mxu0 %v28554_v37  ;;  %v28707_v37 = vsub.f32 %v10543_v59, %v28691_v38  ;;  %v10681_v28 = vsub.f32 %v28737_v2, %v10680_v26  ;;  %v24579_v15 = vpack.c.bf16 %v10680_v26, %v10673_v20  ;;  %v11103_v47 = vand.u32 4294901760, %v11087_v30 }
 0x7de   : > { %24523 = vmatpush3.bf16.msra.mxu0 %v28688_v54  ;;  %21567 = vmatprep.mubr.msk.f32.mxu0 %vm26034_vm1, %v30529_v17  ;;  %v10659_v62 = vand.u32 4294901760, %v28720_v14  ;;  %v24552_v59 = vpack.c.bf16 %v28722_v36, %v28720_v14  ;;  %v11115_v31 = vand.u32 4294901760, %v11091_v25  ;;  %v11118_v55 = vand.u32 4294901760, %v11092_v50 }
 0x7df   : > { %24524 = vmatprep.subr.bf16.mxu0 %v26033_v22  ;;  %v10620_v12 = vand.u32 4294901760, %v28707_v37  ;;  %v10682_v35 = vand.u32 4294901760, %v10681_v28  ;;  %v28831_v51 = vsub.f32 %v11087_v30, %v11103_v47 }
 0x7e0   : > { %v10660_v46 = vsub.f32 %v28720_v14, %v10659_v62  ;;  %v24576_v60 = vpack.c.bf16 %v10666_v11, %v10659_v62  ;;  %v11189_v14 = vand.u32 4294901760, %v28822_v13  ;;  %v28863_v48 = vpack.c.bf16 %v11118_v55, %v11115_v31 }
 0x7e1   : > { %v10621_v3 = vsub.f32 %v28707_v37, %v10620_v12  ;;  %v24543_v32 = vpack.c.bf16 %v10682_v35, %v10675_v8  ;;  %v11196_v42 = vand.u32 4294901760, %v28831_v51  ;;  %v28872_v26 = vsub.f32 %v11091_v25, %v11115_v31  ;;  %v11638_v25 = vld [vmem:[#allocation5 + $0x490] sm:$0xff]  ;;  %v11641_v31 = vld [vmem:[#allocation5 + $0x4a8] sm:$0xff] }
 0x7e2   : > { %24526 = vmatpush3.bf16.msra.mxu0 %v28701_v18  ;;  %v10661_v45 = vand.u32 4294901760, %v10660_v46  ;;  %v11190_v56 = vsub.f32 %v28822_v13, %v11189_v14 }
 0x7e3   : > { %24527 = vmatprep.subr.bf16.mxu0 %v26033_v22  ;;  %v10622_v23 = vand.u32 4294901760, %v10621_v3  ;;  %v11197_v21 = vsub.f32 %v28831_v51, %v11196_v42 }
 0x7e4   : > { %v24540_v19 = vpack.c.bf16 %v10668_v39, %v10661_v45  ;;  %v11191_v46 = vand.u32 4294901760, %v11190_v56  ;;  %v11642_v56 = vld [vmem:[#allocation5 + $0x4b0] sm:$0xff] }
 0x7e5   : > { %v11198_v28 = vand.u32 4294901760, %v11197_v21 }
 0x7e6   : > { %24529 = vmatpush3.bf16.msra.mxu0 %v28718_v29 }
 0x7e7   : > { %24530 = vmatprep.subr.bf16.mxu0 %v26033_v22 }
 0x7ea   : > { %24532 = vmatpush3.bf16.msra.mxu0 %v28726_v41 }
 0x7eb   : > { %24533 = vmatprep.subr.bf16.mxu0 %v26033_v22 }
 0x7ed   : > { %21568 = vmatmul.mubr.f32.vlgmr.msra.gmra.mrb[4].mxu0 %v10622_v23  ;;  %v28874_v23 = vsub.f32 %v11092_v50, %v11118_v55  ;;  %v11639_v50 = vld [vmem:[#allocation5 + $0x498] sm:$0xff] }
 0x7ee   : > { %24535 = vmatpush3.bf16.msra.mxu0 %v24534_v49  ;;  %21586 = vmatprep.mubr.msk.f32.mxu0 %vm26034_vm1, %v30529_v17 }
 0x7ef   : > { %24536 = vmatprep.subr.bf16.mxu0 %v26033_v22 }
 0x7f2   : > { %24538 = vmatpush3.bf16.msra.mxu0 %v24537_v27 }
 0x7f3   : > { %24539 = vmatprep.subr.bf16.mxu0 %v26033_v22 }
 0x7f6   : > { %24541 = vmatpush3.bf16.msra.mxu0 %v24540_v19 }
 0x7f7   : > { %24542 = vmatprep.subr.bf16.mxu0 %v26033_v22 }
 0x7fa   : > { %24544 = vmatpush3.bf16.msra.mxu0 %v24543_v32  ;;  %v11224_v32 = vand.u32 4294901760, %v28872_v26 }
 0x7fb   : > { %24545 = vmatprep.subr.bf16.mxu0 %v26033_v22 }
 0x7fd   : > { %21587 = vmatmul.mubr.f32.vlgmr.msra.gmra.mrb[4].mxu0 %v28691_v38 }
 0x7fe   : > { %24547 = vmatpush3.bf16.msra.mxu0 %v24546_v16  ;;  %21605 = vmatprep.mubr.msk.f32.mxu0 %vm26034_vm1, %v30529_v17  ;;  %v11231_v16 = vand.u32 4294901760, %v28874_v23 }
 0x7ff   : > { %24548 = vmatprep.subr.bf16.mxu0 %v26033_v22 }
 0x802   : > { %24550 = vmatpush3.bf16.msra.mxu0 %v24549_v9 }
 0x803   : > { %24551 = vmatprep.subr.bf16.mxu0 %v26033_v22 }
 0x806   : > { %24553 = vmatpush3.bf16.msra.mxu0 %v24552_v59 }
 0x807   : > { %24554 = vmatprep.subr.bf16.mxu0 %v26033_v22 }
 0x80a   : > { %24556 = vmatpush3.bf16.msra.mxu0 %v24555_v52 }
 0x80b   : > { %24557 = vmatprep.subr.bf16.mxu0 %v26033_v22 }
 0x80d   : > { %21606 = vmatmul.mubr.f32.vlgmr.msra.gmra.mrb[4].mxu0 %v28707_v37  ;;  %v11106_v37 = vand.u32 4294901760, %v11088_v5 }
 0x80e   : > { %24559 = vmatpush3.bf16.msra.mxu0 %v28688_v54  ;;  %21624 = vmatprep.mubr.msk.f32.mxu0 %vm26034_vm1, %v30529_v17 }
 0x80f   : > { %24560 = vmatprep.subr.bf16.mxu0 %v26033_v22  ;;  %v28838_v36 = vpack.c.bf16 %v11106_v37, %v11103_v47 }
 0x812   : > { %24562 = vmatpush3.bf16.msra.mxu0 %v28701_v18 }
 0x813   : > { %24563 = vmatprep.subr.bf16.mxu0 %v26033_v22 }
 0x816   : > { %24565 = vmatpush3.bf16.msra.mxu0 %v28718_v29 }
 0x817   : > { %24566 = vmatprep.subr.bf16.mxu0 %v26033_v22 }
 0x81a   : > { %24568 = vmatpush3.bf16.msra.mxu0 %v28726_v41 }
 0x81b   : > { %24569 = vmatprep.subr.bf16.mxu0 %v26033_v22 }
 0x81d   : > { %21625 = vmatmul.mubr.f32.vlgmr.msra.gmra.mrb[4].mxu0 %v10620_v12  ;;  %v11109_v12 = vand.u32 4294901760, %v11089_v4 }
 0x81e   : > { %24571 = vmatpush3.bf16.msra.mxu0 %v24570_v53  ;;  %21643 = vmatprep.mubr.msk.f32.mxu0 %vm26034_vm1, %v30529_v17 }
 0x81f   : > { %24572 = vmatprep.subr.bf16.mxu0 %v26033_v22  ;;  %v28857_v11 = vsub.f32 %v11089_v4, %v11109_v12  ;;  %v11636_v4 = vld [vmem:[#allocation5 + $0x480] sm:$0xff] }
 0x821   : > { %v11210_v27 = vand.u32 4294901760, %v28857_v11 }
 0x822   : > { %24574 = vmatpush3.bf16.msra.mxu0 %v24573_v7  ;;  %v11225_v7 = vsub.f32 %v28872_v26, %v11224_v32 }
 0x823   : > { %24575 = vmatprep.subr.bf16.mxu0 %v26033_v22  ;;  %v11211_v8 = vsub.f32 %v28857_v11, %v11210_v27 }
 0x824   : > { %v11226_v10 = vand.u32 4294901760, %v11225_v7 }
 0x825   : > { %v11212_v52 = vand.u32 4294901760, %v11211_v8 }
 0x826   : > { %24577 = vmatpush3.bf16.msra.mxu0 %v24576_v60  ;;  %v11232_v60 = vsub.f32 %v28874_v23, %v11231_v16 }
 0x827   : > { %24578 = vmatprep.subr.bf16.mxu0 %v26033_v22 }
 0x828   : > { %v11233_v34 = vand.u32 4294901760, %v11232_v60 }
 0x82a   : > { %24580 = vmatpush3.bf16.msra.mxu0 %v24579_v15 }
 0x82b   : > { %24581 = vmatprep.subr.bf16.mxu0 %v26033_v22 }
 0x82d   : > { %21644 = vmatmul.mubr.f32.vlgmr.msra.gmra.mrb[4].mxu0 %v28691_v38 }
 0x82e   : > { %24583 = vmatpush3.bf16.msra.mxu0 %v28688_v54  ;;  %21662 = vmatprep.mubr.msk.f32.mxu0 %vm26034_vm1, %v30529_v17  ;;  %v11094_v54 = vsel %vm279_vm0, %v28481_v43, 0  ;;  %v28833_v43 = vsub.f32 %v11088_v5, %v11106_v37 }
 0x82f   : > { %24584 = vmatprep.subr.bf16.mxu0 %v26033_v22  ;;  %v28828_v61 = vand.u32 4294901760, %v11094_v54 }
 0x830   : > { %v11203_v2 = vand.u32 4294901760, %v28833_v43  ;;  %v24621_v30 = vpack.c.bf16 %v28833_v43, %v28831_v51  ;;  %v11648_v51 = vand.u32 4294901760, %v11636_v4 }
 0x832   : > { %24586 = vmatpush3.bf16.msra.mxu0 %v28701_v18  ;;  %v28825_v18 = vpack.c.bf16 %v11100_v40, %v11097_v58  ;;  %v11204_v20 = vsub.f32 %v28833_v43, %v11203_v2  ;;  %v24615_v58 = vpack.c.bf16 %v11233_v34, %v11226_v10  ;;  %v24618_v40 = vpack.c.bf16 %v28822_v13, %v28820_v6 }
 0x833   : > { %24587 = vmatprep.subr.bf16.mxu0 %v26033_v22  ;;  %v24645_v37 = vpack.c.bf16 %v11203_v2, %v11196_v42  ;;  %v24651_v13 = vpack.c.bf16 %v11231_v16, %v11224_v32  ;;  %v11643_v42 = vld [vmem:[#allocation5 + $0x4b8] sm:$0xff] }
 0x834   : > { %v11205_v19 = vand.u32 4294901760, %v11204_v20 }
 0x836   : > { %24589 = vmatpush3.bf16.msra.mxu0 %v28718_v29  ;;  %v11182_v29 = vand.u32 4294901760, %v28820_v6  ;;  %v24609_v59 = vpack.c.bf16 %v11205_v19, %v11198_v28 }
 0x837   : > { %24590 = vmatprep.subr.bf16.mxu0 %v26033_v22 }
 0x838   : > { %v11183_v57 = vsub.f32 %v28820_v6, %v11182_v29  ;;  %v24642_v47 = vpack.c.bf16 %v11189_v14, %v11182_v29  ;;  %v28957_v29 = vsub.f32 %v11636_v4, %v11648_v51 }
 0x83a   : > { %24592 = vmatpush3.bf16.msra.mxu0 %v28726_v41  ;;  %v11112_v41 = vand.u32 4294901760, %v11090_v33  ;;  %v11184_v24 = vand.u32 4294901760, %v11183_v57  ;;  %v11733_v2 = vand.u32 4294901760, %v28957_v29 }
 0x83b   : > { %24593 = vmatprep.subr.bf16.mxu0 %v26033_v22 }
 0x83c   : > { %v28855_v62 = vpack.c.bf16 %v11112_v41, %v11109_v12  ;;  %v28859_v3 = vsub.f32 %v11090_v33, %v11112_v41  ;;  %v24606_v1 = vpack.c.bf16 %v11191_v46, %v11184_v24  ;;  %v11637_v33 = vld [vmem:[#allocation5 + $0x488] sm:$0xff]  ;;  %v11654_v12 = vand.u32 4294901760, %v11638_v25 }
 0x83d   : > { %21663 = vmatmul.mubr.f32.vlgmr.msra.gmra.mrb[4].mxu0 %v28691_v38  ;;  %v28844_v38 = vsub.f32 %v11094_v54, %v28828_v61  ;;  %v24627_v54 = vpack.c.bf16 %v28874_v23, %v28872_v26  ;;  %v11651_v43 = vand.u32 4294901760, %v11637_v33  ;;  %v11657_v41 = vand.u32 4294901760, %v11639_v50 }
 0x83e   : > { %24595 = vmatpush3.bf16.msra.mxu0 %v28825_v18  ;;  %21681 = vmatprep.mubr.msk.f32.mxu0 %vm26034_vm1, %v30529_v17  ;;  %v11217_v45 = vand.u32 4294901760, %v28859_v3  ;;  %v24624_v5 = vpack.c.bf16 %v28859_v3, %v28857_v11  ;;  %v28968_v57 = vsub.f32 %v11638_v25, %v11654_v12  ;;  %v11669_v24 = vand.u32 4294901760, %v11643_v42 }
 0x83f   : > { %24596 = vmatprep.subr.bf16.mxu0 %v26033_v22  ;;  %v11171_v49 = vand.u32 4294901760, %v28844_v38  ;;  %v28959_v14 = vsub.f32 %v11637_v33, %v11651_v43  ;;  %v28975_v11 = vpack.c.bf16 %v11657_v41, %v11654_v12  ;;  %v11734_v46 = vsub.f32 %v28957_v29, %v11733_v2 }
 0x840   : > { %v11218_v35 = vsub.f32 %v28859_v3, %v11217_v45  ;;  %v24648_v6 = vpack.c.bf16 %v11217_v45, %v11210_v27  ;;  %v11747_v20 = vand.u32 4294901760, %v28968_v57  ;;  %v29011_v16 = vsub.f32 %v11643_v42, %v11669_v24 }
 0x841   : > { %v11172_v39 = vsub.f32 %v28844_v38, %v11171_v49  ;;  %v11735_v28 = vand.u32 4294901760, %v11734_v46  ;;  %v12193_v46 = vld [vmem:[#allocation5 + $0x4f0] sm:$0xff] }
 0x842   : > { %24598 = vmatpush3.bf16.msra.mxu0 %v28838_v36  ;;  %v11219_v53 = vand.u32 4294901760, %v11218_v35  ;;  %v11748_v8 = vsub.f32 %v28968_v57, %v11747_v20 }
 0x843   : > { %24599 = vmatprep.subr.bf16.mxu0 %v26033_v22  ;;  %v11173_v9 = vand.u32 4294901760, %v11172_v39 }
 0x844   : > { %v24612_v15 = vpack.c.bf16 %v11219_v53, %v11212_v52  ;;  %v11749_v7 = vand.u32 4294901760, %v11748_v8 }
 0x846   : > { %24601 = vmatpush3.bf16.msra.mxu0 %v28855_v62 }
 0x847   : > { %24602 = vmatprep.subr.bf16.mxu0 %v26033_v22 }
 0x84a   : > { %24604 = vmatpush3.bf16.msra.mxu0 %v28863_v48 }
 0x84b   : > { %24605 = vmatprep.subr.bf16.mxu0 %v26033_v22 }
 0x84d   : > { %21682 = vmatmul.mubr.f32.vlgmr.msra.gmra.mrb[4].mxu0 %v11173_v9 }
 0x84e   : > { %24607 = vmatpush3.bf16.msra.mxu0 %v24606_v1  ;;  %21700 = vmatprep.mubr.msk.f32.mxu0 %vm26034_vm1, %v30529_v17 }
 0x84f   : > { %24608 = vmatprep.subr.bf16.mxu0 %v26033_v22 }
 0x852   : > { %24610 = vmatpush3.bf16.msra.mxu0 %v24609_v59 }
 0x853   : > { %24611 = vmatprep.subr.bf16.mxu0 %v26033_v22 }
 0x856   : > { %24613 = vmatpush3.bf16.msra.mxu0 %v24612_v15 }
 0x857   : > { %24614 = vmatprep.subr.bf16.mxu0 %v26033_v22 }
 0x85a   : > { %24616 = vmatpush3.bf16.msra.mxu0 %v24615_v58  ;;  %v11782_v58 = vand.u32 4294901760, %v29011_v16 }
 0x85b   : > { %24617 = vmatprep.subr.bf16.mxu0 %v26033_v22 }
 0x85d   : > { %21701 = vmatmul.mubr.f32.vlgmr.msra.gmra.mrb[4].mxu0 %v28828_v61 }
 0x85e   : > { %24619 = vmatpush3.bf16.msra.mxu0 %v24618_v40  ;;  %21719 = vmatprep.mubr.msk.f32.mxu0 %vm26034_vm1, %v30529_v17 }
 0x85f   : > { %24620 = vmatprep.subr.bf16.mxu0 %v26033_v22 }
 0x862   : > { %24622 = vmatpush3.bf16.msra.mxu0 %v24621_v30 }
 0x863   : > { %24623 = vmatprep.subr.bf16.mxu0 %v26033_v22 }
 0x866   : > { %24625 = vmatpush3.bf16.msra.mxu0 %v24624_v5 }
 0x867   : > { %24626 = vmatprep.subr.bf16.mxu0 %v26033_v22 }
 0x86a   : > { %24628 = vmatpush3.bf16.msra.mxu0 %v24627_v54 }
 0x86b   : > { %24629 = vmatprep.subr.bf16.mxu0 %v26033_v22 }
 0x86d   : > { %21720 = vmatmul.mubr.f32.vlgmr.msra.gmra.mrb[4].mxu0 %v28844_v38  ;;  %v11640_v38 = vld [vmem:[#allocation5 + $0x4a0] sm:$0xff] }
 0x86e   : > { %24631 = vmatpush3.bf16.msra.mxu0 %v28825_v18  ;;  %21738 = vmatprep.mubr.msk.f32.mxu0 %vm26034_vm1, %v30529_v17  ;;  %v11660_v3 = vand.u32 4294901760, %v11640_v38 }
 0x86f   : > { %24632 = vmatprep.subr.bf16.mxu0 %v26033_v22 }
 0x870   : > { %v28994_v27 = vsub.f32 %v11640_v38, %v11660_v3  ;;  %v12188_v38 = vld [vmem:[#allocation5 + $0x4c8] sm:$0xff] }
 0x872   : > { %24634 = vmatpush3.bf16.msra.mxu0 %v28838_v36  ;;  %v11761_v9 = vand.u32 4294901760, %v28994_v27 }
 0x873   : > { %24635 = vmatprep.subr.bf16.mxu0 %v26033_v22 }
 0x874   : > { %v11762_v15 = vsub.f32 %v28994_v27, %v11761_v9 }
 0x876   : > { %24637 = vmatpush3.bf16.msra.mxu0 %v28855_v62  ;;  %v11763_v5 = vand.u32 4294901760, %v11762_v15 }
 0x877   : > { %24638 = vmatprep.subr.bf16.mxu0 %v26033_v22 }
 0x87a   : > { %24640 = vmatpush3.bf16.msra.mxu0 %v28863_v48 }
 0x87b   : > { %24641 = vmatprep.subr.bf16.mxu0 %v26033_v22 }
 0x87d   : > { %21739 = vmatmul.mubr.f32.vlgmr.msra.gmra.mrb[4].mxu0 %v11171_v49  ;;  %v11663_v49 = vand.u32 4294901760, %v11641_v31 }
 0x87e   : > { %24643 = vmatpush3.bf16.msra.mxu0 %v24642_v47  ;;  %21757 = vmatprep.mubr.msk.f32.mxu0 %vm26034_vm1, %v30529_v17 }
 0x87f   : > { %24644 = vmatprep.subr.bf16.mxu0 %v26033_v22  ;;  %v28992_v23 = vpack.c.bf16 %v11663_v49, %v11660_v3  ;;  %v28996_v45 = vsub.f32 %v11641_v31, %v11663_v49  ;;  %v12191_v49 = vld [vmem:[#allocation5 + $0x4e0] sm:$0xff] }
 0x881   : > { %v11768_v59 = vand.u32 4294901760, %v28996_v45  ;;  %v24696_v25 = vpack.c.bf16 %v28996_v45, %v28994_v27  ;;  %v12211_v27 = vand.u32 4294901760, %v12191_v49 }
 0x882   : > { %24646 = vmatpush3.bf16.msra.mxu0 %v24645_v37  ;;  %v11783_v37 = vsub.f32 %v29011_v16, %v11782_v58 }
 0x883   : > { %24647 = vmatprep.subr.bf16.mxu0 %v26033_v22  ;;  %v11769_v10 = vsub.f32 %v28996_v45, %v11768_v59 }
 0x884   : > { %v11784_v4 = vand.u32 4294901760, %v11783_v37 }
 0x885   : > { %v11770_v54 = vand.u32 4294901760, %v11769_v10 }
 0x886   : > { %24649 = vmatpush3.bf16.msra.mxu0 %v24648_v6 }
 0x887   : > { %24650 = vmatprep.subr.bf16.mxu0 %v26033_v22  ;;  %v24684_v6 = vpack.c.bf16 %v11770_v54, %v11763_v5 }
 0x88a   : > { %24652 = vmatpush3.bf16.msra.mxu0 %v24651_v13 }
 0x88b   : > { %24653 = vmatprep.subr.bf16.mxu0 %v26033_v22 }
 0x88d   : > { %21758 = vmatmul.mubr.f32.vlgmr.msra.gmra.mrb[4].mxu0 %v28828_v61 }
 0x88e   : > { %24655 = vmatpush3.bf16.msra.mxu0 %v28825_v18  ;;  %21776 = vmatprep.mubr.msk.f32.mxu0 %vm26034_vm1, %v30529_v17  ;;  %v11645_v18 = vsel %vm279_vm0, %v28489_v63, 0  ;;  %v28970_v63 = vsub.f32 %v11639_v50, %v11657_v41  ;;  %v12187_v41 = vld [vmem:[#allocation5 + $0x4c0] sm:$0xff] }
 0x88f   : > { %24656 = vmatprep.subr.bf16.mxu0 %v26033_v22  ;;  %v28965_v55 = vand.u32 4294901760, %v11645_v18  ;;  %v12199_v31 = vand.u32 4294901760, %v12187_v41 }
 0x890   : > { %v11754_v26 = vand.u32 4294901760, %v28970_v63 }
 0x891   : > { %v29094_v42 = vsub.f32 %v12187_v41, %v12199_v31 }
 0x892   : > { %24658 = vmatpush3.bf16.msra.mxu0 %v28838_v36  ;;  %v28962_v36 = vpack.c.bf16 %v11651_v43, %v11648_v51  ;;  %v11755_v35 = vsub.f32 %v28970_v63, %v11754_v26  ;;  %v24690_v51 = vpack.c.bf16 %v28959_v14, %v28957_v29  ;;  %v24693_v43 = vpack.c.bf16 %v28970_v63, %v28968_v57  ;;  %v12189_v63 = vld [vmem:[#allocation5 + $0x4d0] sm:$0xff] }
 0x893   : > { %24659 = vmatprep.subr.bf16.mxu0 %v26033_v22  ;;  %v24717_v12 = vpack.c.bf16 %v11754_v26, %v11747_v20  ;;  %v24720_v29 = vpack.c.bf16 %v11768_v59, %v11761_v9  ;;  %v12202_v57 = vand.u32 4294901760, %v12188_v38  ;;  %v12284_v20 = vand.u32 4294901760, %v29094_v42 }
 0x894   : > { %v11756_v60 = vand.u32 4294901760, %v11755_v35 }
 0x896   : > { %24661 = vmatpush3.bf16.msra.mxu0 %v28855_v62  ;;  %v11740_v62 = vand.u32 4294901760, %v28959_v14  ;;  %v24681_v30 = vpack.c.bf16 %v11756_v60, %v11749_v7 }
 0x897   : > { %24662 = vmatprep.subr.bf16.mxu0 %v26033_v22 }
 0x898   : > { %v11741_v21 = vsub.f32 %v28959_v14, %v11740_v62 }
 0x89a   : > { %24664 = vmatpush3.bf16.msra.mxu0 %v28863_v48  ;;  %v11666_v48 = vand.u32 4294901760, %v11642_v56  ;;  %v11742_v19 = vand.u32 4294901760, %v11741_v21  ;;  %v12194_v21 = vld [vmem:[#allocation5 + $0x4f8] sm:$0xff] }
 0x89b   : > { %24665 = vmatprep.subr.bf16.mxu0 %v26033_v22 }
 0x89c   : > { %v29000_v1 = vpack.c.bf16 %v11669_v24, %v11666_v48  ;;  %v29009_v32 = vsub.f32 %v11642_v56, %v11666_v48  ;;  %v24678_v53 = vpack.c.bf16 %v11742_v19, %v11735_v28  ;;  %v12190_v56 = vld [vmem:[#allocation5 + $0x4d8] sm:$0xff]  ;;  %v12285_v28 = vsub.f32 %v29094_v42, %v12284_v20 }
 0x89d   : > { %21777 = vmatmul.mubr.f32.vlgmr.msra.gmra.mrb[4].mxu0 %v28828_v61  ;;  %v28981_v61 = vsub.f32 %v11645_v18, %v28965_v55  ;;  %v24714_v18 = vpack.c.bf16 %v11740_v62, %v11733_v2  ;;  %v29096_v2 = vsub.f32 %v12188_v38, %v12202_v57  ;;  %v29099_v62 = vpack.c.bf16 %v12202_v57, %v12199_v31 }
 0x89e   : > { %24667 = vmatpush3.bf16.msra.mxu0 %v28962_v36  ;;  %21795 = vmatprep.mubr.msk.f32.mxu0 %vm26034_vm1, %v30529_v17  ;;  %v11775_v34 = vand.u32 4294901760, %v29009_v32  ;;  %v24699_v50 = vpack.c.bf16 %v29011_v16, %v29009_v32  ;;  %v12208_v3 = vand.u32 4294901760, %v12190_v56  ;;  %v29131_v16 = vsub.f32 %v12191_v49, %v12211_v27 }
 0x89f   : > { %24668 = vmatprep.subr.bf16.mxu0 %v26033_v22  ;;  %v11722_v39 = vand.u32 4294901760, %v28981_v61  ;;  %v12291_v26 = vand.u32 4294901760, %v29096_v2  ;;  %v24762_v38 = vpack.c.bf16 %v29096_v2, %v29094_v42 }
 0x8a0   : > { %v11776_v47 = vsub.f32 %v29009_v32, %v11775_v34  ;;  %v24723_v14 = vpack.c.bf16 %v11782_v58, %v11775_v34  ;;  %v12312_v58 = vand.u32 4294901760, %v29131_v16 }
 0x8a1   : > { %v11723_v52 = vsub.f32 %v28981_v61, %v11722_v39  ;;  %v12292_v19 = vsub.f32 %v29096_v2, %v12291_v26 }
 0x8a2   : > { %24670 = vmatpush3.bf16.msra.mxu0 %v28975_v11  ;;  %v11777_v13 = vand.u32 4294901760, %v11776_v47  ;;  %v12313_v37 = vsub.f32 %v29131_v16, %v12312_v58 }
 0x8a3   : > { %24671 = vmatprep.subr.bf16.mxu0 %v26033_v22  ;;  %v11724_v40 = vand.u32 4294901760, %v11723_v52  ;;  %v12293_v7 = vand.u32 4294901760, %v12292_v19 }
 0x8a4   : > { %v24687_v33 = vpack.c.bf16 %v11784_v4, %v11777_v13 }
 0x8a6   : > { %24673 = vmatpush3.bf16.msra.mxu0 %v28992_v23 }
 0x8a7   : > { %24674 = vmatprep.subr.bf16.mxu0 %v26033_v22 }
 0x8aa   : > { %24676 = vmatpush3.bf16.msra.mxu0 %v29000_v1 }
 0x8ab   : > { %24677 = vmatprep.subr.bf16.mxu0 %v26033_v22 }
 0x8ad   : > { %21796 = vmatmul.mubr.f32.vlgmr.msra.gmra.mrb[4].mxu0 %v11724_v40 }
 0x8ae   : > { %24679 = vmatpush3.bf16.msra.mxu0 %v24678_v53  ;;  %21814 = vmatprep.mubr.msk.f32.mxu0 %vm26034_vm1, %v30529_v17  ;;  %v12286_v53 = vand.u32 4294901760, %v12285_v28  ;;  %v12745_v28 = vld [vmem:[#allocation5 + $0x538] sm:$0xff] }
 0x8af   : > { %24680 = vmatprep.subr.bf16.mxu0 %v26033_v22 }
 0x8b0   : > { %v24750_v5 = vpack.c.bf16 %v12293_v7, %v12286_v53 }
 0x8b2   : > { %24682 = vmatpush3.bf16.msra.mxu0 %v24681_v30 }
 0x8b3   : > { %24683 = vmatprep.subr.bf16.mxu0 %v26033_v22 }
 0x8b6   : > { %24685 = vmatpush3.bf16.msra.mxu0 %v24684_v6 }
 0x8b7   : > { %24686 = vmatprep.subr.bf16.mxu0 %v26033_v22 }
 0x8ba   : > { %24688 = vmatpush3.bf16.msra.mxu0 %v24687_v33 }
 0x8bb   : > { %24689 = vmatprep.subr.bf16.mxu0 %v26033_v22 }
 0x8bd   : > { %21815 = vmatmul.mubr.f32.vlgmr.msra.gmra.mrb[4].mxu0 %v28965_v55 }
 0x8be   : > { %24691 = vmatpush3.bf16.msra.mxu0 %v24690_v51  ;;  %21833 = vmatprep.mubr.msk.f32.mxu0 %vm26034_vm1, %v30529_v17 }
 0x8bf   : > { %24692 = vmatprep.subr.bf16.mxu0 %v26033_v22 }
 0x8c2   : > { %24694 = vmatpush3.bf16.msra.mxu0 %v24693_v43  ;;  %v12314_v43 = vand.u32 4294901760, %v12313_v37 }
 0x8c3   : > { %24695 = vmatprep.subr.bf16.mxu0 %v26033_v22 }
 0x8c6   : > { %24697 = vmatpush3.bf16.msra.mxu0 %v24696_v25 }
 0x8c7   : > { %24698 = vmatprep.subr.bf16.mxu0 %v26033_v22 }
 0x8ca   : > { %24700 = vmatpush3.bf16.msra.mxu0 %v24699_v50 }
 0x8cb   : > { %24701 = vmatprep.subr.bf16.mxu0 %v26033_v22 }
 0x8cd   : > { %21834 = vmatmul.mubr.f32.vlgmr.msra.gmra.mrb[4].mxu0 %v28981_v61  ;;  %v12192_v61 = vld [vmem:[#allocation5 + $0x4e8] sm:$0xff] }
 0x8ce   : > { %24703 = vmatpush3.bf16.msra.mxu0 %v28962_v36  ;;  %21852 = vmatprep.mubr.msk.f32.mxu0 %vm26034_vm1, %v30529_v17  ;;  %v12214_v45 = vand.u32 4294901760, %v12192_v61 }
 0x8cf   : > { %24704 = vmatprep.subr.bf16.mxu0 %v26033_v22 }
 0x8d0   : > { %v29129_v32 = vpack.c.bf16 %v12214_v45, %v12211_v27  ;;  %v29133_v9 = vsub.f32 %v12192_v61, %v12214_v45  ;;  %v12742_v27 = vld [vmem:[#allocation5 + $0x520] sm:$0xff]  ;;  %v12743_v45 = vld [vmem:[#allocation5 + $0x528] sm:$0xff] }
 0x8d2   : > { %24706 = vmatpush3.bf16.msra.mxu0 %v28975_v11  ;;  %v12319_v40 = vand.u32 4294901760, %v29133_v9  ;;  %v24768_v57 = vpack.c.bf16 %v29133_v9, %v29131_v16  ;;  %v12765_v16 = vand.u32 4294901760, %v12743_v45 }
 0x8d3   : > { %24707 = vmatprep.subr.bf16.mxu0 %v26033_v22 }
 0x8d4   : > { %v12320_v6 = vsub.f32 %v29133_v9, %v12319_v40  ;;  %v24792_v42 = vpack.c.bf16 %v12319_v40, %v12312_v58 }
 0x8d6   : > { %24709 = vmatpush3.bf16.msra.mxu0 %v28992_v23  ;;  %v12321_v25 = vand.u32 4294901760, %v12320_v6 }
 0x8d7   : > { %24710 = vmatprep.subr.bf16.mxu0 %v26033_v22 }
 0x8da   : > { %24712 = vmatpush3.bf16.msra.mxu0 %v29000_v1 }
 0x8db   : > { %24713 = vmatprep.subr.bf16.mxu0 %v26033_v22 }
 0x8dd   : > { %21853 = vmatmul.mubr.f32.vlgmr.msra.gmra.mrb[4].mxu0 %v11722_v39  ;;  %v12217_v39 = vand.u32 4294901760, %v12193_v46 }
 0x8de   : > { %24715 = vmatpush3.bf16.msra.mxu0 %v24714_v18  ;;  %21871 = vmatprep.mubr.msk.f32.mxu0 %vm26034_vm1, %v30529_v17 }
 0x8df   : > { %24716 = vmatprep.subr.bf16.mxu0 %v26033_v22  ;;  %v29146_v10 = vsub.f32 %v12193_v46, %v12217_v39 }
 0x8e1   : > { %v12326_v13 = vand.u32 4294901760, %v29146_v10 }
 0x8e2   : > { %24718 = vmatpush3.bf16.msra.mxu0 %v24717_v12  ;;  %v24756_v12 = vpack.c.bf16 %v12321_v25, %v12314_v43 }
 0x8e3   : > { %24719 = vmatprep.subr.bf16.mxu0 %v26033_v22  ;;  %v12327_v50 = vsub.f32 %v29146_v10, %v12326_v13 }
 0x8e6   : > { %24721 = vmatpush3.bf16.msra.mxu0 %v24720_v29  ;;  %v12328_v29 = vand.u32 4294901760, %v12327_v50 }
 0x8e7   : > { %24722 = vmatprep.subr.bf16.mxu0 %v26033_v22 }
 0x8ea   : > { %24724 = vmatpush3.bf16.msra.mxu0 %v24723_v14 }
 0x8eb   : > { %24725 = vmatprep.subr.bf16.mxu0 %v26033_v22 }
 0x8ed   : > { %21872 = vmatmul.mubr.f32.vlgmr.msra.gmra.mrb[4].mxu0 %v28965_v55 }
 0x8ee   : > { %24727 = vmatpush3.bf16.msra.mxu0 %v28962_v36  ;;  %21890 = vmatprep.mubr.msk.f32.mxu0 %vm26034_vm1, %v30529_v17  ;;  %v12196_v36 = vsel %vm279_vm0, %v28483_v0, 0  ;;  %v29107_v0 = vsub.f32 %v12190_v56, %v12208_v3  ;;  %v24786_v56 = vpack.c.bf16 %v12291_v26, %v12284_v20 }
 0x8ef   : > { %24728 = vmatprep.subr.bf16.mxu0 %v26033_v22  ;;  %v29102_v48 = vand.u32 4294901760, %v12196_v36 }
 0x8f0   : > { %v12305_v35 = vand.u32 4294901760, %v29107_v0 }
 0x8f2   : > { %24730 = vmatpush3.bf16.msra.mxu0 %v28975_v11  ;;  %v12205_v11 = vand.u32 4294901760, %v12189_v63  ;;  %v12306_v15 = vsub.f32 %v29107_v0, %v12305_v35 }
 0x8f3   : > { %24731 = vmatprep.subr.bf16.mxu0 %v26033_v22 }
 0x8f4   : > { %v29105_v24 = vsub.f32 %v12189_v63, %v12205_v11  ;;  %v12307_v47 = vand.u32 4294901760, %v12306_v15 }
 0x8f6   : > { %24733 = vmatpush3.bf16.msra.mxu0 %v28992_v23  ;;  %v29112_v23 = vpack.c.bf16 %v12208_v3, %v12205_v11  ;;  %v12298_v8 = vand.u32 4294901760, %v29105_v24  ;;  %v24765_v31 = vpack.c.bf16 %v29107_v0, %v29105_v24  ;;  %v12738_v11 = vld [vmem:[#allocation5 + $0x500] sm:$0xff]  ;;  %v12739_v3 = vld [vmem:[#allocation5 + $0x508] sm:$0xff]  ;;  %v12741_v0 = vld [vmem:[#allocation5 + $0x518] sm:$0xff] }
 0x8f7   : > { %24734 = vmatprep.subr.bf16.mxu0 %v26033_v22  ;;  %v12750_v49 = vand.u32 4294901760, %v12738_v11  ;;  %v12753_v61 = vand.u32 4294901760, %v12739_v3 }
 0x8f8   : > { %v12299_v60 = vsub.f32 %v29105_v24, %v12298_v8  ;;  %v12740_v24 = vld [vmem:[#allocation5 + $0x510] sm:$0xff] }
 0x8f9   : > { %v29231_v46 = vsub.f32 %v12738_v11, %v12750_v49  ;;  %v29236_v20 = vpack.c.bf16 %v12753_v61, %v12750_v49  ;;  %v12756_v26 = vand.u32 4294901760, %v12740_v24 }
 0x8fa   : > { %24736 = vmatpush3.bf16.msra.mxu0 %v29000_v1  ;;  %v12220_v1 = vand.u32 4294901760, %v12194_v21  ;;  %v12300_v54 = vand.u32 4294901760, %v12299_v60 }
 0x8fb   : > { %24737 = vmatprep.subr.bf16.mxu0 %v26033_v22  ;;  %v12835_v19 = vand.u32 4294901760, %v29231_v46 }
 0x8fc   : > { %v29137_v52 = vpack.c.bf16 %v12220_v1, %v12217_v39  ;;  %v29148_v34 = vsub.f32 %v12194_v21, %v12220_v1  ;;  %v24753_v51 = vpack.c.bf16 %v12307_v47, %v12300_v54  ;;  %v29233_v21 = vsub.f32 %v12739_v3, %v12753_v61  ;;  %v12744_v1 = vld [vmem:[#allocation5 + $0x530] sm:$0xff] }
 0x8fd   : > { %21891 = vmatmul.mubr.f32.vlgmr.msra.gmra.mrb[4].mxu0 %v28965_v55  ;;  %v29118_v55 = vsub.f32 %v12196_v36, %v29102_v48  ;;  %v24789_v36 = vpack.c.bf16 %v12305_v35, %v12298_v8  ;;  %v29242_v39 = vsub.f32 %v12740_v24, %v12756_v26  ;;  %v12768_v9 = vand.u32 4294901760, %v12744_v1 }
 0x8fe   : > { %24739 = vmatpush3.bf16.msra.mxu0 %v29099_v62  ;;  %21909 = vmatprep.mubr.msk.f32.mxu0 %vm26034_vm1, %v30529_v17  ;;  %v12333_v4 = vand.u32 4294901760, %v29148_v34  ;;  %v24771_v63 = vpack.c.bf16 %v29148_v34, %v29146_v10  ;;  %v12842_v8 = vand.u32 4294901760, %v29233_v21  ;;  %v24834_v11 = vpack.c.bf16 %v29233_v21, %v29231_v46 }
 0x8ff   : > { %24740 = vmatprep.subr.bf16.mxu0 %v26033_v22  ;;  %v12273_v59 = vand.u32 4294901760, %v29118_v55  ;;  %v12849_v7 = vand.u32 4294901760, %v29242_v39  ;;  %v29283_v37 = vsub.f32 %v12744_v1, %v12768_v9  ;;  %v13339_v1 = vld [vmem:[#allocation5 + $0x5a8] sm:$0xff] }
 0x900   : > { %v12334_v18 = vsub.f32 %v29148_v34, %v12333_v4  ;;  %v24795_v2 = vpack.c.bf16 %v12333_v4, %v12326_v13  ;;  %v12843_v53 = vsub.f32 %v29233_v21, %v12842_v8  ;;  %v29270_v34 = vsub.f32 %v12743_v45, %v12765_v16  ;;  %v13334_v21 = vld [vmem:[#allocation5 + $0x580] sm:$0xff]  ;;  %v13337_v45 = vld [vmem:[#allocation5 + $0x598] sm:$0xff] }
 0x901   : > { %v12274_v30 = vsub.f32 %v29118_v55, %v12273_v59  ;;  %v12850_v54 = vsub.f32 %v29242_v39, %v12849_v7  ;;  %v24858_v24 = vpack.c.bf16 %v12842_v8, %v12835_v19  ;;  %v13361_v8 = vand.u32 4294901760, %v13339_v1 }
 0x902   : > { %24742 = vmatpush3.bf16.msra.mxu0 %v29112_v23  ;;  %v12335_v14 = vand.u32 4294901760, %v12334_v18  ;;  %v12870_v4 = vand.u32 4294901760, %v29270_v34 }
 0x903   : > { %24743 = vmatprep.subr.bf16.mxu0 %v26033_v22  ;;  %v12275_v33 = vand.u32 4294901760, %v12274_v30  ;;  %v12851_v43 = vand.u32 4294901760, %v12850_v54 }
 0x904   : > { %v24759_v41 = vpack.c.bf16 %v12335_v14, %v12328_v29  ;;  %v12871_v18 = vsub.f32 %v29270_v34, %v12870_v4 }
 0x906   : > { %24745 = vmatpush3.bf16.msra.mxu0 %v29129_v32 }
 0x907   : > { %24746 = vmatprep.subr.bf16.mxu0 %v26033_v22 }
 0x90a   : > { %24748 = vmatpush3.bf16.msra.mxu0 %v29137_v52 }
 0x90b   : > { %24749 = vmatprep.subr.bf16.mxu0 %v26033_v22 }
 0x90d   : > { %21910 = vmatmul.mubr.f32.vlgmr.msra.gmra.mrb[4].mxu0 %v12275_v33 }
 0x90e   : > { %24751 = vmatpush3.bf16.msra.mxu0 %v24750_v5  ;;  %21928 = vmatprep.mubr.msk.f32.mxu0 %vm26034_vm1, %v30529_v17  ;;  %v12844_v5 = vand.u32 4294901760, %v12843_v53 }
 0x90f   : > { %24752 = vmatprep.subr.bf16.mxu0 %v26033_v22 }
 0x912   : > { %24754 = vmatpush3.bf16.msra.mxu0 %v24753_v51 }
 0x913   : > { %24755 = vmatprep.subr.bf16.mxu0 %v26033_v22 }
 0x916   : > { %24757 = vmatpush3.bf16.msra.mxu0 %v24756_v12  ;;  %v12877_v12 = vand.u32 4294901760, %v29283_v37 }
 0x917   : > { %24758 = vmatprep.subr.bf16.mxu0 %v26033_v22 }
 0x91a   : > { %24760 = vmatpush3.bf16.msra.mxu0 %v24759_v41 }
 0x91b   : > { %24761 = vmatprep.subr.bf16.mxu0 %v26033_v22 }
 0x91d   : > { %21929 = vmatmul.mubr.f32.vlgmr.msra.gmra.mrb[4].mxu0 %v29102_v48 }
 0x91e   : > { %24763 = vmatpush3.bf16.msra.mxu0 %v24762_v38  ;;  %21947 = vmatprep.mubr.msk.f32.mxu0 %vm26034_vm1, %v30529_v17 }
 0x91f   : > { %24764 = vmatprep.subr.bf16.mxu0 %v26033_v22 }
 0x922   : > { %24766 = vmatpush3.bf16.msra.mxu0 %v24765_v31  ;;  %v12872_v31 = vand.u32 4294901760, %v12871_v18 }
 0x923   : > { %24767 = vmatprep.subr.bf16.mxu0 %v26033_v22 }
 0x926   : > { %24769 = vmatpush3.bf16.msra.mxu0 %v24768_v57  ;;  %v12878_v57 = vsub.f32 %v29283_v37, %v12877_v12 }
 0x927   : > { %24770 = vmatprep.subr.bf16.mxu0 %v26033_v22 }
 0x92a   : > { %24772 = vmatpush3.bf16.msra.mxu0 %v24771_v63 }
 0x92b   : > { %24773 = vmatprep.subr.bf16.mxu0 %v26033_v22 }
 0x92d   : > { %21948 = vmatmul.mubr.f32.vlgmr.msra.gmra.mrb[4].mxu0 %v29118_v55 }
 0x92e   : > { %24775 = vmatpush3.bf16.msra.mxu0 %v29099_v62  ;;  %21966 = vmatprep.mubr.msk.f32.mxu0 %vm26034_vm1, %v30529_v17 }
 0x92f   : > { %24776 = vmatprep.subr.bf16.mxu0 %v26033_v22 }
 0x932   : > { %24778 = vmatpush3.bf16.msra.mxu0 %v29112_v23 }
 0x933   : > { %24779 = vmatprep.subr.bf16.mxu0 %v26033_v22 }
 0x936   : > { %24781 = vmatpush3.bf16.msra.mxu0 %v29129_v32 }
 0x937   : > { %24782 = vmatprep.subr.bf16.mxu0 %v26033_v22 }
 0x93a   : > { %24784 = vmatpush3.bf16.msra.mxu0 %v29137_v52 }
 0x93b   : > { %24785 = vmatprep.subr.bf16.mxu0 %v26033_v22 }
 0x93d   : > { %21967 = vmatmul.mubr.f32.vlgmr.msra.gmra.mrb[4].mxu0 %v12273_v59  ;;  %v12771_v59 = vand.u32 4294901760, %v12745_v28 }
 0x93e   : > { %24787 = vmatpush3.bf16.msra.mxu0 %v24786_v56  ;;  %21985 = vmatprep.mubr.msk.f32.mxu0 %vm26034_vm1, %v30529_v17 }
 0x93f   : > { %24788 = vmatprep.subr.bf16.mxu0 %v26033_v22  ;;  %v29274_v40 = vpack.c.bf16 %v12771_v59, %v12768_v9  ;;  %v29285_v6 = vsub.f32 %v12745_v28, %v12771_v59  ;;  %v13355_v28 = vand.u32 4294901760, %v13337_v45 }
 0x941   : > { %v12884_v29 = vand.u32 4294901760, %v29285_v6  ;;  %v24843_v61 = vpack.c.bf16 %v29285_v6, %v29283_v37  ;;  %v29379_v59 = vsub.f32 %v13337_v45, %v13355_v28 }
 0x942   : > { %24790 = vmatpush3.bf16.msra.mxu0 %v24789_v36  ;;  %v12879_v36 = vand.u32 4294901760, %v12878_v57 }
 0x943   : > { %24791 = vmatprep.subr.bf16.mxu0 %v26033_v22  ;;  %v12885_v63 = vsub.f32 %v29285_v6, %v12884_v29  ;;  %v13452_v6 = vand.u32 4294901760, %v29379_v59 }
 0x946   : > { %24793 = vmatpush3.bf16.msra.mxu0 %v24792_v42  ;;  %v12886_v42 = vand.u32 4294901760, %v12885_v63 }
 0x947   : > { %24794 = vmatprep.subr.bf16.mxu0 %v26033_v22 }
 0x94a   : > { %24796 = vmatpush3.bf16.msra.mxu0 %v24795_v2  ;;  %v24831_v2 = vpack.c.bf16 %v12886_v42, %v12879_v36 }
 0x94b   : > { %24797 = vmatprep.subr.bf16.mxu0 %v26033_v22 }
 0x94d   : > { %21986 = vmatmul.mubr.f32.vlgmr.msra.gmra.mrb[4].mxu0 %v29102_v48 }
 0x94e   : > { %24799 = vmatpush3.bf16.msra.mxu0 %v29099_v62  ;;  %22004 = vmatprep.mubr.msk.f32.mxu0 %vm26034_vm1, %v30529_v17  ;;  %v12747_v62 = vsel %vm279_vm0, %v28495_v44, 0 }
 0x94f   : > { %24800 = vmatprep.subr.bf16.mxu0 %v26033_v22  ;;  %v29239_v55 = vand.u32 4294901760, %v12747_v62 }
 0x952   : > { %24802 = vmatpush3.bf16.msra.mxu0 %v29112_v23  ;;  %v12759_v23 = vand.u32 4294901760, %v12741_v0 }
 0x953   : > { %24803 = vmatprep.subr.bf16.mxu0 %v26033_v22 }
 0x954   : > { %v29244_v44 = vsub.f32 %v12741_v0, %v12759_v23  ;;  %v29249_v35 = vpack.c.bf16 %v12759_v23, %v12756_v26  ;;  %v13336_v26 = vld [vmem:[#allocation5 + $0x590] sm:$0xff]  ;;  %v13346_v23 = vand.u32 4294901760, %v13334_v21 }
 0x956   : > { %24805 = vmatpush3.bf16.msra.mxu0 %v29129_v32  ;;  %v12762_v32 = vand.u32 4294901760, %v12742_v27  ;;  %v12856_v60 = vand.u32 4294901760, %v29244_v44  ;;  %v24837_v3 = vpack.c.bf16 %v29244_v44, %v29242_v39  ;;  %v13352_v39 = vand.u32 4294901760, %v13336_v26 }
 0x957   : > { %24806 = vmatprep.subr.bf16.mxu0 %v26033_v22 }
 0x958   : > { %v29266_v15 = vpack.c.bf16 %v12765_v16, %v12762_v32  ;;  %v29268_v10 = vsub.f32 %v12742_v27, %v12762_v32  ;;  %v12857_v47 = vsub.f32 %v29244_v44, %v12856_v60  ;;  %v24861_v0 = vpack.c.bf16 %v12856_v60, %v12849_v7  ;;  %v13338_v44 = vld [vmem:[#allocation5 + $0x5a0] sm:$0xff]  ;;  %v13341_v32 = vld [vmem:[#allocation5 + $0x5b8] sm:$0xff] }
 0x959   : > { %v29377_v9 = vsub.f32 %v13336_v26, %v13352_v39  ;;  %v29384_v53 = vpack.c.bf16 %v13355_v28, %v13352_v39  ;;  %v29386_v7 = vsub.f32 %v13339_v1, %v13361_v8  ;;  %v17858_v39 = vld [vmem:[%s30474_s3 + $0x2] ss:$0 sm:$0xff] }
 0x95a   : > { %24808 = vmatpush3.bf16.msra.mxu0 %v29137_v52  ;;  %v12836_v52 = vsub.f32 %v29231_v46, %v12835_v19  ;;  %v12863_v13 = vand.u32 4294901760, %v29268_v10  ;;  %v12858_v25 = vand.u32 4294901760, %v12857_v47  ;;  %v24840_v49 = vpack.c.bf16 %v29270_v34, %v29268_v10 }
 0x95b   : > { %24809 = vmatprep.subr.bf16.mxu0 %v26033_v22  ;;  %v24867_v46 = vpack.c.bf16 %v12884_v29, %v12877_v12  ;;  %v13358_v19 = vand.u32 4294901760, %v13338_v44  ;;  %v13445_v37 = vand.u32 4294901760, %v29377_v9  ;;  %v13466_v12 = vand.u32 4294901760, %v29386_v7 }
 0x95c   : > { %v12837_v30 = vand.u32 4294901760, %v12836_v52  ;;  %v12864_v50 = vsub.f32 %v29268_v10, %v12863_v13  ;;  %v24825_v41 = vpack.c.bf16 %v12858_v25, %v12851_v43 }
 0x95d   : > { %22005 = vmatmul.mubr.f32.vlgmr.msra.gmra.mrb[4].mxu0 %v29102_v48  ;;  %v29255_v48 = vsub.f32 %v12747_v62, %v29239_v55  ;;  %v24864_v62 = vpack.c.bf16 %v12870_v4, %v12863_v13  ;;  %v29381_v52 = vsub.f32 %v13338_v44, %v13358_v19 }
 0x95e   : > { %24811 = vmatpush3.bf16.msra.mxu0 %v29236_v20  ;;  %22023 = vmatprep.mubr.msk.f32.mxu0 %vm26034_vm1, %v30529_v17  ;;  %v24822_v51 = vpack.c.bf16 %v12844_v5, %v12837_v30  ;;  %v12865_v38 = vand.u32 4294901760, %v12864_v50 }
 0x95f   : > { %24812 = vmatprep.subr.bf16.mxu0 %v26033_v22  ;;  %v12824_v58 = vand.u32 4294901760, %v29255_v48  ;;  %v13459_v18 = vand.u32 4294901760, %v29381_v52 }
 0x960   : > { %v24828_v56 = vpack.c.bf16 %v12872_v31, %v12865_v38 }
 0x961   : > { %v12825_v33 = vsub.f32 %v29255_v48, %v12824_v58 }
 0x962   : > { %24814 = vmatpush3.bf16.msra.mxu0 %v29249_v35 }
 0x963   : > { %24815 = vmatprep.subr.bf16.mxu0 %v26033_v22  ;;  %v12826_v14 = vand.u32 4294901760, %v12825_v33  ;;  %v13446_v33 = vsub.f32 %v29377_v9, %v13445_v37 }
 0x965   : > { %v13447_v25 = vand.u32 4294901760, %v13446_v33 }
 0x966   : > { %24817 = vmatpush3.bf16.msra.mxu0 %v29266_v15 }
 0x967   : > { %24818 = vmatprep.subr.bf16.mxu0 %v26033_v22 }
 0x96a   : > { %24820 = vmatpush3.bf16.msra.mxu0 %v29274_v40 }
 0x96b   : > { %24821 = vmatprep.subr.bf16.mxu0 %v26033_v22 }
 0x96d   : > { %22024 = vmatmul.mubr.f32.vlgmr.msra.gmra.mrb[4].mxu0 %v12826_v14  ;;  %v13460_v14 = vsub.f32 %v29381_v52, %v13459_v18 }
 0x96e   : > { %24823 = vmatpush3.bf16.msra.mxu0 %v24822_v51  ;;  %22042 = vmatprep.mubr.msk.f32.mxu0 %vm26034_vm1, %v30529_v17  ;;  %v13453_v51 = vsub.f32 %v29379_v59, %v13452_v6 }
 0x96f   : > { %24824 = vmatprep.subr.bf16.mxu0 %v26033_v22  ;;  %v13461_v38 = vand.u32 4294901760, %v13460_v14 }
 0x970   : > { %v13454_v50 = vand.u32 4294901760, %v13453_v51  ;;  %v13330_v51 = vld [vmem:[#allocation5 + $0x570] sm:$0xff] }
 0x971   : > { %v13904_v14 = vand.u32 4294901760, %v13330_v51 }
 0x972   : > { %24826 = vmatpush3.bf16.msra.mxu0 %v24825_v41  ;;  %v24897_v29 = vpack.c.bf16 %v13454_v50, %v13447_v25  ;;  %v13467_v41 = vsub.f32 %v29386_v7, %v13466_v12 }
 0x973   : > { %24827 = vmatprep.subr.bf16.mxu0 %v26033_v22 }
 0x974   : > { %v13468_v63 = vand.u32 4294901760, %v13467_v41 }
 0x976   : > { %24829 = vmatpush3.bf16.msra.mxu0 %v24828_v56  ;;  %v24900_v42 = vpack.c.bf16 %v13468_v63, %v13461_v38 }
 0x977   : > { %24830 = vmatprep.subr.bf16.mxu0 %v26033_v22 }
 0x97a   : > { %24832 = vmatpush3.bf16.msra.mxu0 %v24831_v2 }
 0x97b   : > { %24833 = vmatprep.subr.bf16.mxu0 %v26033_v22 }
 0x97d   : > { %22043 = vmatmul.mubr.f32.vlgmr.msra.gmra.mrb[4].mxu0 %v29239_v55 }
 0x97e   : > { %24835 = vmatpush3.bf16.msra.mxu0 %v24834_v11  ;;  %22061 = vmatprep.mubr.msk.f32.mxu0 %vm26034_vm1, %v30529_v17 }
 0x97f   : > { %24836 = vmatprep.subr.bf16.mxu0 %v26033_v22 }
 0x982   : > { %24838 = vmatpush3.bf16.msra.mxu0 %v24837_v3 }
 0x983   : > { %24839 = vmatprep.subr.bf16.mxu0 %v26033_v22 }
 0x986   : > { %24841 = vmatpush3.bf16.msra.mxu0 %v24840_v49 }
 0x987   : > { %24842 = vmatprep.subr.bf16.mxu0 %v26033_v22 }
 0x98a   : > { %24844 = vmatpush3.bf16.msra.mxu0 %v24843_v61  ;;  %v24909_v61 = vpack.c.bf16 %v29379_v59, %v29377_v9 }
 0x98b   : > { %24845 = vmatprep.subr.bf16.mxu0 %v26033_v22 }
 0x98d   : > { %22062 = vmatmul.mubr.f32.vlgmr.msra.gmra.mrb[4].mxu0 %v29255_v48 }
 0x98e   : > { %24847 = vmatpush3.bf16.msra.mxu0 %v29236_v20  ;;  %22080 = vmatprep.mubr.msk.f32.mxu0 %vm26034_vm1, %v30529_v17 }
 0x98f   : > { %24848 = vmatprep.subr.bf16.mxu0 %v26033_v22 }
 0x992   : > { %24850 = vmatpush3.bf16.msra.mxu0 %v29249_v35 }
 0x993   : > { %24851 = vmatprep.subr.bf16.mxu0 %v26033_v22 }
 0x996   : > { %24853 = vmatpush3.bf16.msra.mxu0 %v29266_v15 }
 0x997   : > { %24854 = vmatprep.subr.bf16.mxu0 %v26033_v22 }
 0x99a   : > { %24856 = vmatpush3.bf16.msra.mxu0 %v29274_v40 }
 0x99b   : > { %24857 = vmatprep.subr.bf16.mxu0 %v26033_v22 }
 0x99d   : > { %22081 = vmatmul.mubr.f32.vlgmr.msra.gmra.mrb[4].mxu0 %v12824_v58  ;;  %v29394_v58 = vpack.c.bf16 %v13361_v8, %v13358_v19 }
 0x99e   : > { %24859 = vmatpush3.bf16.msra.mxu0 %v24858_v24  ;;  %22099 = vmatprep.mubr.msk.f32.mxu0 %vm26034_vm1, %v30529_v17  ;;  %v24912_v24 = vpack.c.bf16 %v29386_v7, %v29381_v52  ;;  %v13324_v52 = vld [vmem:[#allocation5 + $0x540] sm:$0xff]  ;;  %v13325_v7 = vld [vmem:[#allocation5 + $0x548] sm:$0xff] }
 0x99f   : > { %24860 = vmatprep.subr.bf16.mxu0 %v26033_v22 }
 0x9a2   : > { %24862 = vmatpush3.bf16.msra.mxu0 %v24861_v0 }
 0x9a3   : > { %24863 = vmatprep.subr.bf16.mxu0 %v26033_v22 }
 0x9a6   : > { %24865 = vmatpush3.bf16.msra.mxu0 %v24864_v62 }
 0x9a7   : > { %24866 = vmatprep.subr.bf16.mxu0 %v26033_v22 }
 0x9aa   : > { %24868 = vmatpush3.bf16.msra.mxu0 %v24867_v46  ;;  %v24933_v46 = vpack.c.bf16 %v13452_v6, %v13445_v37  ;;  %v13329_v6 = vld [vmem:[#allocation5 + $0x568] sm:$0xff] }
 0x9ab   : > { %24869 = vmatprep.subr.bf16.mxu0 %v26033_v22 }
 0x9ad   : > { %22100 = vmatmul.mubr.f32.vlgmr.msra.gmra.mrb[4].mxu0 %v29239_v55 }
 0x9ae   : > { %24871 = vmatpush3.bf16.msra.mxu0 %v29236_v20  ;;  %22118 = vmatprep.mubr.msk.f32.mxu0 %vm26034_vm1, %v30529_v17  ;;  %v13335_v20 = vld [vmem:[#allocation5 + $0x588] sm:$0xff] }
 0x9af   : > { %24872 = vmatprep.subr.bf16.mxu0 %v26033_v22  ;;  %v13349_v27 = vand.u32 4294901760, %v13335_v20 }
 0x9b1   : > { %v29371_v16 = vpack.c.bf16 %v13349_v27, %v13346_v23  ;;  %v29375_v48 = vsub.f32 %v13335_v20, %v13349_v27 }
 0x9b2   : > { %24874 = vmatpush3.bf16.msra.mxu0 %v29249_v35  ;;  %v13340_v35 = vld [vmem:[#allocation5 + $0x5b0] sm:$0xff] }
 0x9b3   : > { %24875 = vmatprep.subr.bf16.mxu0 %v26033_v22  ;;  %24883 = vmatpush3.bf16.msra.mxu1 %v29371_v16  ;;  %v13364_v60 = vand.u32 4294901760, %v13340_v35  ;;  %v13438_v5 = vand.u32 4294901760, %v29375_v48 }
 0x9b4   : > { %24884 = vmatprep.subr.bf16.mxu1 %v26033_v22 }
 0x9b5   : > { %v29389_v10 = vsub.f32 %v13340_v35, %v13364_v60  ;;  %v13439_v47 = vsub.f32 %v29375_v48, %v13438_v5 }
 0x9b6   : > { %24877 = vmatpush3.bf16.msra.mxu0 %v29266_v15  ;;  %v13367_v15 = vand.u32 4294901760, %v13341_v32 }
 0x9b7   : > { %24878 = vmatprep.subr.bf16.mxu0 %v26033_v22  ;;  %24886 = vmatpush3.bf16.msra.mxu1 %v29384_v53  ;;  %v13440_v4 = vand.u32 4294901760, %v13439_v47  ;;  %v13473_v31 = vand.u32 4294901760, %v29389_v10 }
 0x9b8   : > { %v29391_v34 = vsub.f32 %v13341_v32, %v13367_v15  ;;  %24887 = vmatprep.subr.bf16.mxu1 %v26033_v22 }
 0x9b9   : > { %v13474_v56 = vsub.f32 %v29389_v10, %v13473_v31 }
 0x9ba   : > { %24880 = vmatpush3.bf16.msra.mxu0 %v29274_v40  ;;  %v29398_v40 = vpack.c.bf16 %v13367_v15, %v13364_v60  ;;  %v13480_v57 = vand.u32 4294901760, %v29391_v34  ;;  %v24915_v0 = vpack.c.bf16 %v29391_v34, %v29389_v10  ;;  %v13886_v15 = vand.u32 4294901760, %v13324_v52 }
 0x9bb   : > { %25385 = vmatprep.subr.bf16.mxu0 %v26033_v22  ;;  %24889 = vmatpush3.bf16.msra.mxu1 %v29394_v58  ;;  %v13475_v2 = vand.u32 4294901760, %v13474_v56  ;;  %v13889_v10 = vand.u32 4294901760, %v13325_v7 }
 0x9bc   : > { %24890 = vmatprep.subr.bf16.mxu1 %v26033_v22  ;;  %v13481_v36 = vsub.f32 %v29391_v34, %v13480_v57  ;;  %v24939_v20 = vpack.c.bf16 %v13480_v57, %v13473_v31  ;;  %v13326_v34 = vld [vmem:[#allocation5 + $0x550] sm:$0xff] }
 0x9bd   : > { %22119 = vmatmul.mubr.f32.vlgmr.msra.gmra.mrb[4].mxu0 %v29239_v55  ;;  %v29373_v55 = vsub.f32 %v13334_v21, %v13346_v23  ;;  %v24936_v21 = vpack.c.bf16 %v13466_v12, %v13459_v18  ;;  %v17856_v23 = vld [vmem:[%s30473_s2 + $0x2] ss:$0 sm:$0xff]  ;;  %v13892_v47 = vand.u32 4294901760, %v13326_v34  ;;  %v13901_v12 = vand.u32 4294901760, %v13329_v6 }
 0x9be   : > { %22935 = vmatprep.mubr.msk.f32.mxu0 %vm26034_vm1, %v30529_v17  ;;  %v13482_v11 = vand.u32 4294901760, %v13481_v36 }
 0x9bf   : > { %24892 = vmatpush3.bf16.msra.mxu1 %v29398_v40  ;;  %v13431_v30 = vand.u32 4294901760, %v29373_v55  ;;  %v24906_v49 = vpack.c.bf16 %v29375_v48, %v29373_v55 }
 0x9c0   : > { %24893 = vmatprep.subr.bf16.mxu1 %v26033_v22  ;;  %v24903_v3 = vpack.c.bf16 %v13482_v11, %v13475_v2 }
 0x9c1   : > { %v13432_v54 = vsub.f32 %v29373_v55, %v13431_v30  ;;  %v24930_v62 = vpack.c.bf16 %v13438_v5, %v13431_v30  ;;  %v29479_v5 = vsub.f32 %v13324_v52, %v13886_v15 }
 0x9c3   : > { %v13433_v13 = vand.u32 4294901760, %v13432_v54  ;;  %v29481_v54 = vsub.f32 %v13325_v7, %v13889_v10 }
 0x9c5   : > { %v24894_v43 = vpack.c.bf16 %v13440_v4, %v13433_v13  ;;  %v29490_v4 = vsub.f32 %v13326_v34, %v13892_v47  ;;  %v13978_v25 = vand.u32 4294901760, %v29481_v54  ;;  %v24978_v7 = vpack.c.bf16 %v29481_v54, %v29479_v5 }
 0x9c7   : > { %v13979_v31 = vsub.f32 %v29481_v54, %v13978_v25  ;;  %v13985_v57 = vand.u32 4294901760, %v29490_v4  ;;  %v14424_v54 = vld [vmem:[#allocation5 + $0x5c0] sm:$0xff] }
 0xa90   : > { %v13282_v26 = vpop.f32.mrb[4].mxu0 }
 0xa91   : > { %v13287_v27 = vmax.f32 %v13282_v26, 0.0  ;;  %v22120_v45 = vpop.f32.mrb[5].mxu0 }
 0xa93   : > { %v13296_v44 = vmul.f32 %v17856_v23, %v13287_v27 }
 0xa95   : > { %v13305_v1 = vadd.f32 %v17858_v39, %v13296_v44 }
 0xa97   : > { %13306 = vst.msk [vmem:[#allocation2] sm:$0xff] %vm279_vm0, %v13305_v1 }
 0xa9e   : > { %v13308_v28 = vld [vmem:[#allocation2 + $0x1] ss:$2 sm:$0xf]  ;;  %v13307_v19 = vld [vmem:[#allocation2] ss:$2 sm:$0xf] }
 0xa9f   : > { %13320 = vst.msk [vmem:[#allocation3 + $0x1] sm:$0xf] %vm13319_vm2, %v13307_v19  ;;  %13321 = vst.msk [vmem:[#allocation4 + $0x2] sm:$0xf] %vm13319_vm2, %v13308_v28 }
 0xaa6   : > { %v13332_v8 = vld [vmem:[#allocation3] sm:$0xf]  ;;  %v13322_v60 = vld [vmem:[#allocation4] sm:$0xf] }
 0xaa7   : > { %v13343_v35 = vsel %vm279_vm0, %v13332_v8, 0  ;;  %v13883_v30 = vsel %vm279_vm0, %v13322_v60, 0 }
 0xaa8   : > { %v29437_v32 = vand.u32 4294901760, %v13343_v35  ;;  %v29487_v13 = vand.u32 4294901760, %v13883_v30 }
 0xaaa   : > { %v13419_v55 = vsub.f32 %v13343_v35, %v29437_v32 }
 0xaac   : > { %v13420_v48 = vand.u32 4294901760, %v13419_v55 }
 0xaae   : > { %v13421_v9 = vsub.f32 %v13419_v55, %v13420_v48 }
 0xab0   : > { %v13422_v59 = vand.u32 4294901760, %v13421_v9 }
 0xab2   : > { %22138 = vmatmul.mubr.f32.vlgmr.msra.gmra.mrb[6].mxu1 %v13422_v59 }
 0xab3   : > { %24895 = vmatpush3.bf16.msra.mxu1 %v24894_v43  ;;  %22156 = vmatprep.mubr.msk.f32.mxu1 %vm26034_vm1, %v30529_v17  ;;  %v13331_v43 = vld [vmem:[#allocation5 + $0x578] sm:$0xff] }
 0xab4   : > { %24896 = vmatprep.subr.bf16.mxu1 %v26033_v22  ;;  %v13907_v41 = vand.u32 4294901760, %v13331_v43 }
 0xab6   : > { %v29522_v11 = vpack.c.bf16 %v13907_v41, %v13904_v14 }
 0xab7   : > { %24898 = vmatpush3.bf16.msra.mxu1 %v24897_v29  ;;  %v29503_v29 = vsub.f32 %v13883_v30, %v29487_v13 }
 0xab8   : > { %24899 = vmatprep.subr.bf16.mxu1 %v26033_v22 }
 0xab9   : > { %v13960_v2 = vand.u32 4294901760, %v29503_v29 }
 0xabb   : > { %24901 = vmatpush3.bf16.msra.mxu1 %v24900_v42  ;;  %v29518_v42 = vsub.f32 %v13329_v6, %v13901_v12 }
 0xabc   : > { %24902 = vmatprep.subr.bf16.mxu1 %v26033_v22 }
 0xabf   : > { %24904 = vmatpush3.bf16.msra.mxu1 %v24903_v3 }
 0xac0   : > { %24905 = vmatprep.subr.bf16.mxu1 %v26033_v22 }
 0xac2   : > { %22157 = vmatmul.mubr.f32.vlgmr.msra.gmra.mrb[6].mxu1 %v29437_v32 }
 0xac3   : > { %24907 = vmatpush3.bf16.msra.mxu1 %v24906_v49  ;;  %22175 = vmatprep.mubr.msk.f32.mxu1 %vm26034_vm1, %v30529_v17  ;;  %v13980_v49 = vand.u32 4294901760, %v13979_v31  ;;  %v14431_v31 = vld [vmem:[#allocation5 + $0x5f8] sm:$0xff] }
 0xac4   : > { %24908 = vmatprep.subr.bf16.mxu1 %v26033_v22 }
 0xac7   : > { %24910 = vmatpush3.bf16.msra.mxu1 %v24909_v61  ;;  %v13986_v61 = vsub.f32 %v29490_v4, %v13985_v57 }
 0xac8   : > { %24911 = vmatprep.subr.bf16.mxu1 %v26033_v22 }
 0xac9   : > { %v13987_v23 = vand.u32 4294901760, %v13986_v61 }
 0xacb   : > { %24913 = vmatpush3.bf16.msra.mxu1 %v24912_v24 }
 0xacc   : > { %24914 = vmatprep.subr.bf16.mxu1 %v26033_v22 }
 0xacf   : > { %24916 = vmatpush3.bf16.msra.mxu1 %v24915_v0  ;;  %v29531_v0 = vsub.f32 %v13330_v51, %v13904_v14 }
 0xad0   : > { %24917 = vmatprep.subr.bf16.mxu1 %v26033_v22 }
 0xad1   : > { %v14013_v44 = vand.u32 4294901760, %v29531_v0 }
 0xad2   : > { %22176 = vmatmul.mubr.f32.vlgmr.msra.gmra.mrb[6].mxu1 %v13419_v55 }
 0xad3   : > { %24919 = vmatpush3.bf16.msra.mxu1 %v29371_v16  ;;  %22194 = vmatprep.mubr.msk.f32.mxu1 %vm26034_vm1, %v30529_v17 }
 0xad4   : > { %24920 = vmatprep.subr.bf16.mxu1 %v26033_v22 }
 0xad7   : > { %24922 = vmatpush3.bf16.msra.mxu1 %v29384_v53 }
 0xad8   : > { %24923 = vmatprep.subr.bf16.mxu1 %v26033_v22 }
 0xadb   : > { %24925 = vmatpush3.bf16.msra.mxu1 %v29394_v58 }
 0xadc   : > { %24926 = vmatprep.subr.bf16.mxu1 %v26033_v22 }
 0xadf   : > { %24928 = vmatpush3.bf16.msra.mxu1 %v29398_v40 }
 0xae0   : > { %24929 = vmatprep.subr.bf16.mxu1 %v26033_v22 }
 0xae2   : > { %22195 = vmatmul.mubr.f32.vlgmr.msra.gmra.mrb[6].mxu1 %v13420_v48 }
 0xae3   : > { %24931 = vmatpush3.bf16.msra.mxu1 %v24930_v62  ;;  %22213 = vmatprep.mubr.msk.f32.mxu1 %vm26034_vm1, %v30529_v17  ;;  %v29533_v62 = vsub.f32 %v13331_v43, %v13907_v41 }
 0xae4   : > { %24932 = vmatprep.subr.bf16.mxu1 %v26033_v22 }
 0xae5   : > { %v14020_v1 = vand.u32 4294901760, %v29533_v62 }
 0xae7   : > { %24934 = vmatpush3.bf16.msra.mxu1 %v24933_v46  ;;  %v14021_v55 = vsub.f32 %v29533_v62, %v14020_v1 }
 0xae8   : > { %24935 = vmatprep.subr.bf16.mxu1 %v26033_v22 }
 0xae9   : > { %v14022_v59 = vand.u32 4294901760, %v14021_v55 }
 0xaeb   : > { %24937 = vmatpush3.bf16.msra.mxu1 %v24936_v21  ;;  %v14006_v21 = vand.u32 4294901760, %v29518_v42 }
 0xaec   : > { %24938 = vmatprep.subr.bf16.mxu1 %v26033_v22 }
 0xaed   : > { %v14007_v39 = vsub.f32 %v29518_v42, %v14006_v21 }
 0xaef   : > { %24940 = vmatpush3.bf16.msra.mxu1 %v24939_v20  ;;  %v13961_v20 = vsub.f32 %v29503_v29, %v13960_v2  ;;  %v14008_v35 = vand.u32 4294901760, %v14007_v39 }
 0xaf0   : > { %24941 = vmatprep.subr.bf16.mxu1 %v26033_v22 }
 0xaf1   : > { %v13962_v28 = vand.u32 4294901760, %v13961_v20 }
 0xaf2   : > { %22214 = vmatmul.mubr.f32.vlgmr.msra.gmra.mrb[6].mxu1 %v29437_v32 }
 0xaf3   : > { %24943 = vmatpush3.bf16.msra.mxu1 %v29371_v16  ;;  %22232 = vmatprep.mubr.msk.f32.mxu1 %vm26034_vm1, %v30529_v17  ;;  %v13327_v16 = vld [vmem:[#allocation5 + $0x558] sm:$0xff] }
 0xaf4   : > { %24944 = vmatprep.subr.bf16.mxu1 %v26033_v22  ;;  %v13895_v37 = vand.u32 4294901760, %v13327_v16 }
 0xaf6   : > { %v29492_v33 = vsub.f32 %v13327_v16, %v13895_v37  ;;  %v29497_v50 = vpack.c.bf16 %v13895_v37, %v13892_v47  ;;  %v14425_v47 = vld [vmem:[#allocation5 + $0x5c8] sm:$0xff]  ;;  %v14422_v37 = vld [vmem:[#allocation4 + $0x1] sm:$0xf] }
 0xaf7   : > { %24946 = vmatpush3.bf16.msra.mxu1 %v29384_v53  ;;  %v29484_v53 = vpack.c.bf16 %v13889_v10, %v13886_v15  ;;  %v24987_v10 = vpack.c.bf16 %v29533_v62, %v29531_v0  ;;  %v14439_v6 = vand.u32 4294901760, %v14425_v47 }
 0xaf8   : > { %24947 = vmatprep.subr.bf16.mxu1 %v26033_v22  ;;  %v13992_v63 = vand.u32 4294901760, %v29492_v33  ;;  %v24981_v60 = vpack.c.bf16 %v29492_v33, %v29490_v4  ;;  %v14426_v4 = vld [vmem:[#allocation5 + $0x5d0] sm:$0xff] }
 0xaf9   : > { %v29617_v43 = vsub.f32 %v14425_v47, %v14439_v6 }
 0xafa   : > { %v13993_v24 = vsub.f32 %v29492_v33, %v13992_v63  ;;  %v25005_v16 = vpack.c.bf16 %v13992_v63, %v13985_v57  ;;  %v14433_v33 = vsel %vm279_vm0, %v14422_v37, 0 }
 0xafb   : > { %24949 = vmatpush3.bf16.msra.mxu1 %v29394_v58  ;;  %v13328_v58 = vld [vmem:[#allocation5 + $0x560] sm:$0xff]  ;;  %v14528_v63 = vand.u32 4294901760, %v29617_v43 }
 0xafc   : > { %24950 = vmatprep.subr.bf16.mxu1 %v26033_v22  ;;  %v13898_v18 = vand.u32 4294901760, %v13328_v58  ;;  %v13994_v27 = vand.u32 4294901760, %v13993_v24 }
 0xafe   : > { %v29514_v56 = vpack.c.bf16 %v13901_v12, %v13898_v18  ;;  %v29516_v36 = vsub.f32 %v13328_v58, %v13898_v18  ;;  %v24969_v19 = vpack.c.bf16 %v13994_v27, %v13987_v23  ;;  %v14436_v58 = vand.u32 4294901760, %v14424_v54  ;;  %v14428_v18 = vld [vmem:[#allocation5 + $0x5e0] sm:$0xff]  ;;  %v14429_v12 = vld [vmem:[#allocation5 + $0x5e8] sm:$0xff] }
 0xaff   : > { %24952 = vmatpush3.bf16.msra.mxu1 %v29398_v40  ;;  %v13971_v40 = vand.u32 4294901760, %v29479_v5 }
 0xb00   : > { %24953 = vmatprep.subr.bf16.mxu1 %v26033_v22  ;;  %v13999_v46 = vand.u32 4294901760, %v29516_v36  ;;  %v24984_v15 = vpack.c.bf16 %v29518_v42, %v29516_v36  ;;  %v29615_v51 = vsub.f32 %v14424_v54, %v14436_v58  ;;  %v14451_v42 = vand.u32 4294901760, %v14429_v12 }
 0xb01   : > { %v13972_v38 = vsub.f32 %v29479_v5, %v13971_v40  ;;  %v25002_v34 = vpack.c.bf16 %v13978_v25, %v13971_v40  ;;  %v25011_v5 = vpack.c.bf16 %v14020_v1, %v14013_v44  ;;  %v29620_v40 = vpack.c.bf16 %v14439_v6, %v14436_v58 }
 0xb02   : > { %22233 = vmatmul.mubr.f32.vlgmr.msra.gmra.mrb[6].mxu1 %v29437_v32  ;;  %v14000_v45 = vsub.f32 %v29516_v36, %v13999_v46  ;;  %v14014_v32 = vsub.f32 %v29531_v0, %v14013_v44  ;;  %v25008_v30 = vpack.c.bf16 %v14006_v21, %v13999_v46  ;;  %v14442_v25 = vand.u32 4294901760, %v14426_v4 }
 0xb03   : > { %24955 = vmatpush3.bf16.msra.mxu1 %v29484_v53  ;;  %22251 = vmatprep.mubr.msk.f32.mxu1 %vm26034_vm1, %v30529_v17  ;;  %v13973_v3 = vand.u32 4294901760, %v13972_v38  ;;  %v14430_v38 = vld [vmem:[#allocation5 + $0x5f0] sm:$0xff]  ;;  %v14521_v57 = vand.u32 4294901760, %v29615_v51  ;;  %v14448_v36 = vand.u32 4294901760, %v14428_v18  ;;  %v29654_v46 = vsub.f32 %v14429_v12, %v14451_v42 }
 0xb04   : > { %24956 = vmatprep.subr.bf16.mxu1 %v26033_v22  ;;  %v14001_v8 = vand.u32 4294901760, %v14000_v45  ;;  %v14015_v9 = vand.u32 4294901760, %v14014_v32  ;;  %v29626_v14 = vsub.f32 %v14426_v4, %v14442_v25  ;;  %v25050_v47 = vpack.c.bf16 %v29617_v43, %v29615_v51 }
 0xb05   : > { %v24966_v26 = vpack.c.bf16 %v13980_v49, %v13973_v3  ;;  %v14522_v3 = vsub.f32 %v29615_v51, %v14521_v57  ;;  %v14529_v49 = vsub.f32 %v29617_v43, %v14528_v63  ;;  %v29650_v0 = vpack.c.bf16 %v14451_v42, %v14448_v36  ;;  %v14975_v43 = vld [vmem:[#allocation5 + $0x600] sm:$0xff]  ;;  %v14980_v42 = vld [vmem:[#allocation5 + $0x628] sm:$0xff] }
 0xb06   : > { %v24972_v48 = vpack.c.bf16 %v14008_v35, %v14001_v8  ;;  %v24975_v52 = vpack.c.bf16 %v14022_v59, %v14015_v9  ;;  %v14535_v61 = vand.u32 4294901760, %v29626_v14  ;;  %v29652_v62 = vsub.f32 %v14428_v18, %v14448_v36  ;;  %v14979_v36 = vld [vmem:[#allocation5 + $0x620] sm:$0xff] }
 0xb07   : > { %24958 = vmatpush3.bf16.msra.mxu1 %v29497_v50  ;;  %v14530_v23 = vand.u32 4294901760, %v14529_v49  ;;  %v25074_v4 = vpack.c.bf16 %v14528_v63, %v14521_v57  ;;  %v14987_v18 = vand.u32 4294901760, %v14975_v43  ;;  %v14982_v49 = vld [vmem:[#allocation5 + $0x638] sm:$0xff] }
 0xb08   : > { %24959 = vmatprep.subr.bf16.mxu1 %v26033_v22  ;;  %v14536_v27 = vsub.f32 %v29626_v14, %v14535_v61  ;;  %v14549_v1 = vand.u32 4294901760, %v29652_v62  ;;  %v25056_v58 = vpack.c.bf16 %v29654_v46, %v29652_v62 }
 0xb0a   : > { %v14537_v35 = vand.u32 4294901760, %v14536_v27  ;;  %v14550_v55 = vsub.f32 %v29652_v62, %v14549_v1  ;;  %v14999_v62 = vand.u32 4294901760, %v14979_v36 }
 0xb0b   : > { %24961 = vmatpush3.bf16.msra.mxu1 %v29514_v56 }
 0xb0c   : > { %24962 = vmatprep.subr.bf16.mxu1 %v26033_v22 }
 0xb0f   : > { %24964 = vmatpush3.bf16.msra.mxu1 %v29522_v11 }
 0xb10   : > { %24965 = vmatprep.subr.bf16.mxu1 %v26033_v22 }
 0xb12   : > { %22252 = vmatmul.mubr.f32.vlgmr.msra.gmra.mrb[6].mxu1 %v13962_v28  ;;  %v14556_v28 = vand.u32 4294901760, %v29654_v46 }
 0xb13   : > { %24967 = vmatpush3.bf16.msra.mxu1 %v24966_v26  ;;  %22270 = vmatprep.mubr.msk.f32.mxu1 %vm26034_vm1, %v30529_v17  ;;  %v14523_v26 = vand.u32 4294901760, %v14522_v3  ;;  %v14981_v3 = vld [vmem:[#allocation5 + $0x630] sm:$0xff] }
 0xb14   : > { %24968 = vmatprep.subr.bf16.mxu1 %v26033_v22 }
 0xb15   : > { %v25038_v8 = vpack.c.bf16 %v14530_v23, %v14523_v26 }
 0xb17   : > { %24970 = vmatpush3.bf16.msra.mxu1 %v24969_v19 }
 0xb18   : > { %24971 = vmatprep.subr.bf16.mxu1 %v26033_v22 }
 0xb1b   : > { %24973 = vmatpush3.bf16.msra.mxu1 %v24972_v48  ;;  %v14557_v48 = vsub.f32 %v29654_v46, %v14556_v28  ;;  %v15002_v46 = vand.u32 4294901760, %v14980_v42 }
 0xb1c   : > { %24974 = vmatprep.subr.bf16.mxu1 %v26033_v22 }
 0xb1f   : > { %24976 = vmatpush3.bf16.msra.mxu1 %v24975_v52 }
 0xb20   : > { %24977 = vmatprep.subr.bf16.mxu1 %v26033_v22 }
 0xb22   : > { %22271 = vmatmul.mubr.f32.vlgmr.msra.gmra.mrb[6].mxu1 %v29487_v13 }
 0xb23   : > { %24979 = vmatpush3.bf16.msra.mxu1 %v24978_v7  ;;  %22289 = vmatprep.mubr.msk.f32.mxu1 %vm26034_vm1, %v30529_v17 }
 0xb24   : > { %24980 = vmatprep.subr.bf16.mxu1 %v26033_v22 }
 0xb27   : > { %24982 = vmatpush3.bf16.msra.mxu1 %v24981_v60  ;;  %v14551_v60 = vand.u32 4294901760, %v14550_v55 }
 0xb28   : > { %24983 = vmatprep.subr.bf16.mxu1 %v26033_v22 }
 0xb2b   : > { %24985 = vmatpush3.bf16.msra.mxu1 %v24984_v15  ;;  %v14558_v15 = vand.u32 4294901760, %v14557_v48 }
 0xb2c   : > { %24986 = vmatprep.subr.bf16.mxu1 %v26033_v22 }
 0xb2f   : > { %24988 = vmatpush3.bf16.msra.mxu1 %v24987_v10 }
 0xb30   : > { %24989 = vmatprep.subr.bf16.mxu1 %v26033_v22 }
 0xb32   : > { %22290 = vmatmul.mubr.f32.vlgmr.msra.gmra.mrb[6].mxu1 %v29503_v29  ;;  %v29623_v29 = vand.u32 4294901760, %v14433_v33 }
 0xb33   : > { %24991 = vmatpush3.bf16.msra.mxu1 %v29484_v53  ;;  %22308 = vmatprep.mubr.msk.f32.mxu1 %vm26034_vm1, %v30529_v17 }
 0xb34   : > { %24992 = vmatprep.subr.bf16.mxu1 %v26033_v22 }
 0xb37   : > { %24994 = vmatpush3.bf16.msra.mxu1 %v29497_v50 }
 0xb38   : > { %24995 = vmatprep.subr.bf16.mxu1 %v26033_v22 }
 0xb3b   : > { %24997 = vmatpush3.bf16.msra.mxu1 %v29514_v56 }
 0xb3c   : > { %24998 = vmatprep.subr.bf16.mxu1 %v26033_v22 }
 0xb3f   : > { %25000 = vmatpush3.bf16.msra.mxu1 %v29522_v11 }
 0xb40   : > { %25001 = vmatprep.subr.bf16.mxu1 %v26033_v22 }
 0xb42   : > { %22309 = vmatmul.mubr.f32.vlgmr.msra.gmra.mrb[6].mxu1 %v13960_v2  ;;  %v14454_v2 = vand.u32 4294901760, %v14430_v38 }
 0xb43   : > { %25003 = vmatpush3.bf16.msra.mxu1 %v25002_v34  ;;  %22327 = vmatprep.mubr.msk.f32.mxu1 %vm26034_vm1, %v30529_v17 }
 0xb44   : > { %25004 = vmatprep.subr.bf16.mxu1 %v26033_v22  ;;  %v29667_v39 = vsub.f32 %v14430_v38, %v14454_v2  ;;  %v29751_v38 = vsub.f32 %v14975_v43, %v14987_v18 }
 0xb46   : > { %v14563_v9 = vand.u32 4294901760, %v29667_v39 }
 0xb47   : > { %25006 = vmatpush3.bf16.msra.mxu1 %v25005_v16  ;;  %v25044_v16 = vpack.c.bf16 %v14558_v15, %v14551_v60 }
 0xb48   : > { %25007 = vmatprep.subr.bf16.mxu1 %v26033_v22  ;;  %v14564_v10 = vsub.f32 %v29667_v39, %v14563_v9 }
 0xb4b   : > { %25009 = vmatpush3.bf16.msra.mxu1 %v25008_v30  ;;  %v14565_v30 = vand.u32 4294901760, %v14564_v10 }
 0xb4c   : > { %25010 = vmatprep.subr.bf16.mxu1 %v26033_v22 }
 0xb4f   : > { %25012 = vmatpush3.bf16.msra.mxu1 %v25011_v5 }
 0xb50   : > { %25013 = vmatprep.subr.bf16.mxu1 %v26033_v22 }
 0xb52   : > { %22328 = vmatmul.mubr.f32.vlgmr.msra.gmra.mrb[6].mxu1 %v29487_v13 }
 0xb53   : > { %25015 = vmatpush3.bf16.msra.mxu1 %v29484_v53  ;;  %22346 = vmatprep.mubr.msk.f32.mxu1 %vm26034_vm1, %v30529_v17  ;;  %v14427_v53 = vld [vmem:[#allocation5 + $0x5d8] sm:$0xff] }
 0xb54   : > { %25016 = vmatprep.subr.bf16.mxu1 %v26033_v22 }
 0xb57   : > { %25018 = vmatpush3.bf16.msra.mxu1 %v29497_v50  ;;  %v14445_v50 = vand.u32 4294901760, %v14427_v53 }
 0xb58   : > { %25019 = vmatprep.subr.bf16.mxu1 %v26033_v22 }
 0xb59   : > { %v29628_v41 = vsub.f32 %v14427_v53, %v14445_v50 }
 0xb5b   : > { %25021 = vmatpush3.bf16.msra.mxu1 %v29514_v56  ;;  %v29633_v56 = vpack.c.bf16 %v14445_v50, %v14442_v25  ;;  %v14542_v24 = vand.u32 4294901760, %v29628_v41  ;;  %v25053_v37 = vpack.c.bf16 %v29628_v41, %v29626_v14  ;;  %v14976_v25 = vld [vmem:[#allocation5 + $0x608] sm:$0xff]  ;;  %v14973_v50 = vld [vmem:[#allocation3 + $0x1] sm:$0xf] }
 0xb5c   : > { %25022 = vmatprep.subr.bf16.mxu1 %v26033_v22  ;;  %v14990_v12 = vand.u32 4294901760, %v14976_v25  ;;  %v14977_v14 = vld [vmem:[#allocation5 + $0x610] sm:$0xff] }
 0xb5d   : > { %v14543_v45 = vsub.f32 %v29628_v41, %v14542_v24  ;;  %v25077_v53 = vpack.c.bf16 %v14542_v24, %v14535_v61  ;;  %v14984_v41 = vsel %vm279_vm0, %v14973_v50, 0  ;;  %v14993_v63 = vand.u32 4294901760, %v14977_v14 }
 0xb5e   : > { %v29756_v57 = vpack.c.bf16 %v14990_v12, %v14987_v18  ;;  %v15072_v61 = vand.u32 4294901760, %v29751_v38 }
 0xb5f   : > { %25024 = vmatpush3.bf16.msra.mxu1 %v29522_v11  ;;  %v14457_v11 = vand.u32 4294901760, %v14431_v31  ;;  %v14544_v32 = vand.u32 4294901760, %v14543_v45 }
 0xb60   : > { %25025 = vmatprep.subr.bf16.mxu1 %v26033_v22  ;;  %v15073_v26 = vsub.f32 %v29751_v38, %v15072_v61 }
 0xb61   : > { %v29658_v20 = vpack.c.bf16 %v14457_v11, %v14454_v2  ;;  %v29669_v44 = vsub.f32 %v14431_v31, %v14457_v11  ;;  %v25041_v7 = vpack.c.bf16 %v14544_v32, %v14537_v35  ;;  %v29753_v31 = vsub.f32 %v14976_v25, %v14990_v12 }
 0xb62   : > { %22347 = vmatmul.mubr.f32.vlgmr.msra.gmra.mrb[6].mxu1 %v29487_v13  ;;  %v29639_v13 = vsub.f32 %v14433_v33, %v29623_v29  ;;  %v25080_v33 = vpack.c.bf16 %v14556_v28, %v14549_v1  ;;  %v29762_v2 = vsub.f32 %v14977_v14, %v14993_v63  ;;  %v29790_v1 = vsub.f32 %v14980_v42, %v15002_v46 }
 0xb63   : > { %25027 = vmatpush3.bf16.msra.mxu1 %v29620_v40  ;;  %22365 = vmatprep.mubr.msk.f32.mxu1 %vm26034_vm1, %v30529_v17  ;;  %v14570_v59 = vand.u32 4294901760, %v29669_v44  ;;  %v25059_v6 = vpack.c.bf16 %v29669_v44, %v29667_v39  ;;  %v15079_v24 = vand.u32 4294901760, %v29753_v31  ;;  %v29786_v39 = vpack.c.bf16 %v15002_v46, %v14999_v62  ;;  %v15531_v46 = vld [vmem:[#allocation5 + $0x668] sm:$0xff] }
 0xb64   : > { %25028 = vmatprep.subr.bf16.mxu1 %v26033_v22  ;;  %v14510_v21 = vand.u32 4294901760, %v29639_v13  ;;  %v15086_v27 = vand.u32 4294901760, %v29762_v2  ;;  %v25122_v25 = vpack.c.bf16 %v29753_v31, %v29751_v38 }
 0xb65   : > { %v14571_v34 = vsub.f32 %v29669_v44, %v14570_v59  ;;  %v25083_v51 = vpack.c.bf16 %v14570_v59, %v14563_v9  ;;  %v15080_v23 = vsub.f32 %v29753_v31, %v15079_v24  ;;  %v29788_v44 = vsub.f32 %v14979_v36, %v14999_v62  ;;  %v15526_v31 = vld [vmem:[#allocation5 + $0x640] sm:$0xff] }
 0xb66   : > { %v14511_v19 = vsub.f32 %v29639_v13, %v14510_v21  ;;  %v15087_v32 = vsub.f32 %v29762_v2, %v15086_v27  ;;  %v25146_v14 = vpack.c.bf16 %v15079_v24, %v15072_v61  ;;  %v15538_v36 = vand.u32 4294901760, %v15526_v31  ;;  %v15530_v62 = vld [vmem:[#allocation5 + $0x660] sm:$0xff] }
 0xb67   : > { %25030 = vmatpush3.bf16.msra.mxu1 %v29633_v56  ;;  %v14572_v5 = vand.u32 4294901760, %v14571_v34  ;;  %v15081_v35 = vand.u32 4294901760, %v15080_v23  ;;  %v15100_v59 = vand.u32 4294901760, %v29788_v44  ;;  %v25128_v18 = vpack.c.bf16 %v29790_v1, %v29788_v44  ;;  %v15533_v23 = vld [vmem:[#allocation5 + $0x678] sm:$0xff] }
 0xb68   : > { %25031 = vmatprep.subr.bf16.mxu1 %v26033_v22  ;;  %v14512_v52 = vand.u32 4294901760, %v14511_v19  ;;  %v15088_v15 = vand.u32 4294901760, %v15087_v32 }
 0xb69   : > { %v25047_v54 = vpack.c.bf16 %v14572_v5, %v14565_v30  ;;  %v15101_v34 = vsub.f32 %v29788_v44, %v15100_v59  ;;  %v15550_v44 = vand.u32 4294901760, %v15530_v62 }
 0xb6b   : > { %25033 = vmatpush3.bf16.msra.mxu1 %v29650_v0 }
 0xb6c   : > { %25034 = vmatprep.subr.bf16.mxu1 %v26033_v22 }
 0xb6f   : > { %25036 = vmatpush3.bf16.msra.mxu1 %v29658_v20 }
 0xb70   : > { %25037 = vmatprep.subr.bf16.mxu1 %v26033_v22 }
 0xb72   : > { %22366 = vmatmul.mubr.f32.vlgmr.msra.gmra.mrb[6].mxu1 %v14512_v52  ;;  %v15107_v52 = vand.u32 4294901760, %v29790_v1 }
 0xb73   : > { %25039 = vmatpush3.bf16.msra.mxu1 %v25038_v8  ;;  %22384 = vmatprep.mubr.msk.f32.mxu1 %vm26034_vm1, %v30529_v17  ;;  %v15074_v8 = vand.u32 4294901760, %v15073_v26  ;;  %v15532_v26 = vld [vmem:[#allocation5 + $0x670] sm:$0xff] }
 0xb74   : > { %25040 = vmatprep.subr.bf16.mxu1 %v26033_v22 }
 0xb75   : > { %v25110_v60 = vpack.c.bf16 %v15081_v35, %v15074_v8 }
 0xb77   : > { %25042 = vmatpush3.bf16.msra.mxu1 %v25041_v7 }
 0xb78   : > { %25043 = vmatprep.subr.bf16.mxu1 %v26033_v22 }
 0xb7b   : > { %25045 = vmatpush3.bf16.msra.mxu1 %v25044_v16  ;;  %v15108_v16 = vsub.f32 %v29790_v1, %v15107_v52  ;;  %v15553_v1 = vand.u32 4294901760, %v15531_v46 }
 0xb7c   : > { %25046 = vmatprep.subr.bf16.mxu1 %v26033_v22 }
 0xb7f   : > { %25048 = vmatpush3.bf16.msra.mxu1 %v25047_v54 }
 0xb80   : > { %25049 = vmatprep.subr.bf16.mxu1 %v26033_v22 }
 0xb82   : > { %22385 = vmatmul.mubr.f32.vlgmr.msra.gmra.mrb[6].mxu1 %v29623_v29 }
 0xb83   : > { %25051 = vmatpush3.bf16.msra.mxu1 %v25050_v47  ;;  %22403 = vmatprep.mubr.msk.f32.mxu1 %vm26034_vm1, %v30529_v17 }
 0xb84   : > { %25052 = vmatprep.subr.bf16.mxu1 %v26033_v22 }
 0xb87   : > { %25054 = vmatpush3.bf16.msra.mxu1 %v25053_v37  ;;  %v15102_v37 = vand.u32 4294901760, %v15101_v34 }
 0xb88   : > { %25055 = vmatprep.subr.bf16.mxu1 %v26033_v22 }
 0xb8b   : > { %25057 = vmatpush3.bf16.msra.mxu1 %v25056_v58  ;;  %v15109_v58 = vand.u32 4294901760, %v15108_v16 }
 0xb8c   : > { %25058 = vmatprep.subr.bf16.mxu1 %v26033_v22 }
 0xb8f   : > { %25060 = vmatpush3.bf16.msra.mxu1 %v25059_v6 }
 0xb90   : > { %25061 = vmatprep.subr.bf16.mxu1 %v26033_v22 }
 0xb92   : > { %22404 = vmatmul.mubr.f32.vlgmr.msra.gmra.mrb[6].mxu1 %v29639_v13  ;;  %v29759_v13 = vand.u32 4294901760, %v14984_v41 }
 0xb93   : > { %25063 = vmatpush3.bf16.msra.mxu1 %v29620_v40  ;;  %22422 = vmatprep.mubr.msk.f32.mxu1 %vm26034_vm1, %v30529_v17 }
 0xb94   : > { %25064 = vmatprep.subr.bf16.mxu1 %v26033_v22 }
 0xb97   : > { %25066 = vmatpush3.bf16.msra.mxu1 %v29633_v56 }
 0xb98   : > { %25067 = vmatprep.subr.bf16.mxu1 %v26033_v22 }
 0xb9b   : > { %25069 = vmatpush3.bf16.msra.mxu1 %v29650_v0 }
 0xb9c   : > { %25070 = vmatprep.subr.bf16.mxu1 %v26033_v22 }
 0xb9f   : > { %25072 = vmatpush3.bf16.msra.mxu1 %v29658_v20 }
 0xba0   : > { %25073 = vmatprep.subr.bf16.mxu1 %v26033_v22 }
 0xba2   : > { %22423 = vmatmul.mubr.f32.vlgmr.msra.gmra.mrb[6].mxu1 %v14510_v21  ;;  %v15005_v21 = vand.u32 4294901760, %v14981_v3 }
 0xba3   : > { %25075 = vmatpush3.bf16.msra.mxu1 %v25074_v4  ;;  %22441 = vmatprep.mubr.msk.f32.mxu1 %vm26034_vm1, %v30529_v17 }
 0xba4   : > { %25076 = vmatprep.subr.bf16.mxu1 %v26033_v22  ;;  %v29803_v48 = vsub.f32 %v14981_v3, %v15005_v21  ;;  %v29887_v3 = vsub.f32 %v15526_v31, %v15538_v36 }
 0xba6   : > { %v15114_v30 = vand.u32 4294901760, %v29803_v48 }
 0xba7   : > { %25078 = vmatpush3.bf16.msra.mxu1 %v25077_v53  ;;  %v25116_v53 = vpack.c.bf16 %v15109_v58, %v15102_v37 }
 0xba8   : > { %25079 = vmatprep.subr.bf16.mxu1 %v26033_v22  ;;  %v15115_v6 = vsub.f32 %v29803_v48, %v15114_v30 }
 0xbab   : > { %25081 = vmatpush3.bf16.msra.mxu1 %v25080_v33  ;;  %v15116_v33 = vand.u32 4294901760, %v15115_v6 }
 0xbac   : > { %25082 = vmatprep.subr.bf16.mxu1 %v26033_v22 }
 0xbaf   : > { %25084 = vmatpush3.bf16.msra.mxu1 %v25083_v51 }
 0xbb0   : > { %25085 = vmatprep.subr.bf16.mxu1 %v26033_v22 }
 0xbb2   : > { %22442 = vmatmul.mubr.f32.vlgmr.msra.gmra.mrb[6].mxu1 %v29623_v29 }
 0xbb3   : > { %25087 = vmatpush3.bf16.msra.mxu1 %v29620_v40  ;;  %22460 = vmatprep.mubr.msk.f32.mxu1 %vm26034_vm1, %v30529_v17  ;;  %v14978_v40 = vld [vmem:[#allocation5 + $0x618] sm:$0xff] }
 0xbb4   : > { %25088 = vmatprep.subr.bf16.mxu1 %v26033_v22 }
 0xbb7   : > { %25090 = vmatpush3.bf16.msra.mxu1 %v29633_v56  ;;  %v14996_v56 = vand.u32 4294901760, %v14978_v40 }
 0xbb8   : > { %25091 = vmatprep.subr.bf16.mxu1 %v26033_v22 }
 0xbb9   : > { %v29764_v11 = vsub.f32 %v14978_v40, %v14996_v56 }
 0xbbb   : > { %25093 = vmatpush3.bf16.msra.mxu1 %v29650_v0  ;;  %v29769_v0 = vpack.c.bf16 %v14996_v56, %v14993_v63  ;;  %v15093_v45 = vand.u32 4294901760, %v29764_v11  ;;  %v25125_v50 = vpack.c.bf16 %v29764_v11, %v29762_v2  ;;  %v15527_v63 = vld [vmem:[#allocation5 + $0x648] sm:$0xff]  ;;  %v15524_v56 = vld [vmem:[#allocation4 + $0x2] sm:$0xf]  ;;  %v15528_v2 = vld [vmem:[#allocation5 + $0x650] sm:$0xff] }
 0xbbc   : > { %25094 = vmatprep.subr.bf16.mxu1 %v26033_v22  ;;  %v15541_v42 = vand.u32 4294901760, %v15527_v63  ;;  %v15544_v24 = vand.u32 4294901760, %v15528_v2 }
 0xbbd   : > { %v15094_v55 = vsub.f32 %v29764_v11, %v15093_v45  ;;  %v25149_v40 = vpack.c.bf16 %v15093_v45, %v15086_v27  ;;  %v15535_v11 = vsel %vm279_vm0, %v15524_v56, 0  ;;  %v15623_v27 = vand.u32 4294901760, %v29887_v3 }
 0xbbe   : > { %v29892_v61 = vpack.c.bf16 %v15541_v42, %v15538_v36 }
 0xbbf   : > { %25096 = vmatpush3.bf16.msra.mxu1 %v29658_v20  ;;  %v15008_v20 = vand.u32 4294901760, %v14982_v49  ;;  %v15095_v10 = vand.u32 4294901760, %v15094_v55  ;;  %v15624_v8 = vsub.f32 %v29887_v3, %v15623_v27 }
 0xbc0   : > { %25097 = vmatprep.subr.bf16.mxu1 %v26033_v22 }
 0xbc1   : > { %v29794_v19 = vpack.c.bf16 %v15008_v20, %v15005_v21  ;;  %v29805_v9 = vsub.f32 %v14982_v49, %v15008_v20  ;;  %v25113_v47 = vpack.c.bf16 %v15095_v10, %v15088_v15  ;;  %v29889_v49 = vsub.f32 %v15527_v63, %v15541_v42 }
 0xbc2   : > { %22461 = vmatmul.mubr.f32.vlgmr.msra.gmra.mrb[6].mxu1 %v29623_v29  ;;  %v29775_v29 = vsub.f32 %v14984_v41, %v29759_v13  ;;  %v25152_v41 = vpack.c.bf16 %v15107_v52, %v15100_v59  ;;  %v29898_v21 = vsub.f32 %v15528_v2, %v15544_v24  ;;  %v29926_v59 = vsub.f32 %v15531_v46, %v15553_v1 }
 0xbc3   : > { %25099 = vmatpush3.bf16.msra.mxu1 %v29756_v57  ;;  %22479 = vmatprep.mubr.msk.f32.mxu1 %vm26034_vm1, %v30529_v17  ;;  %v15121_v5 = vand.u32 4294901760, %v29805_v9  ;;  %v25131_v12 = vpack.c.bf16 %v29805_v9, %v29803_v48  ;;  %v15630_v45 = vand.u32 4294901760, %v29889_v49  ;;  %v29922_v48 = vpack.c.bf16 %v15553_v1, %v15550_v44  ;;  %v16082_v1 = vld [vmem:[#allocation5 + $0x6a8] sm:$0xff] }
 0xbc4   : > { %25100 = vmatprep.subr.bf16.mxu1 %v26033_v22  ;;  %v15061_v28 = vand.u32 4294901760, %v29775_v29  ;;  %v15637_v32 = vand.u32 4294901760, %v29898_v21  ;;  %v25194_v63 = vpack.c.bf16 %v29889_v49, %v29887_v3 }
 0xbc5   : > { %v15122_v4 = vsub.f32 %v29805_v9, %v15121_v5  ;;  %v25155_v38 = vpack.c.bf16 %v15121_v5, %v15114_v30  ;;  %v15631_v35 = vsub.f32 %v29889_v49, %v15630_v45  ;;  %v29924_v9 = vsub.f32 %v15530_v62, %v15550_v44  ;;  %v16077_v49 = vld [vmem:[#allocation5 + $0x680] sm:$0xff] }
 0xbc6   : > { %v15062_v7 = vsub.f32 %v29775_v29, %v15061_v28  ;;  %v15638_v10 = vsub.f32 %v29898_v21, %v15637_v32  ;;  %v25218_v2 = vpack.c.bf16 %v15630_v45, %v15623_v27  ;;  %v16089_v62 = vand.u32 4294901760, %v16077_v49  ;;  %v16081_v44 = vld [vmem:[#allocation5 + $0x6a0] sm:$0xff] }
 0xbc7   : > { %25102 = vmatpush3.bf16.msra.mxu1 %v29769_v0  ;;  %v15123_v51 = vand.u32 4294901760, %v15122_v4  ;;  %v15632_v15 = vand.u32 4294901760, %v15631_v35  ;;  %v15651_v5 = vand.u32 4294901760, %v29924_v9  ;;  %v25200_v36 = vpack.c.bf16 %v29926_v59, %v29924_v9  ;;  %v16084_v35 = vld [vmem:[#allocation5 + $0x6b8] sm:$0xff] }
 0xbc8   : > { %25103 = vmatprep.subr.bf16.mxu1 %v26033_v22  ;;  %v15063_v54 = vand.u32 4294901760, %v15062_v7  ;;  %v15639_v58 = vand.u32 4294901760, %v15638_v10 }
 0xbc9   : > { %v25119_v43 = vpack.c.bf16 %v15123_v51, %v15116_v33  ;;  %v15652_v4 = vsub.f32 %v29924_v9, %v15651_v5  ;;  %v16101_v9 = vand.u32 4294901760, %v16081_v44 }
 0xbcb   : > { %25105 = vmatpush3.bf16.msra.mxu1 %v29786_v39 }
 0xbcc   : > { %25106 = vmatprep.subr.bf16.mxu1 %v26033_v22 }
 0xbcf   : > { %25108 = vmatpush3.bf16.msra.mxu1 %v29794_v19 }
 0xbd0   : > { %25109 = vmatprep.subr.bf16.mxu1 %v26033_v22 }
 0xbd2   : > { %22480 = vmatmul.mubr.f32.vlgmr.msra.gmra.mrb[6].mxu1 %v15063_v54  ;;  %v15658_v54 = vand.u32 4294901760, %v29926_v59 }
 0xbd3   : > { %25111 = vmatpush3.bf16.msra.mxu1 %v25110_v60  ;;  %22498 = vmatprep.mubr.msk.f32.mxu1 %vm26034_vm1, %v30529_v17  ;;  %v15625_v60 = vand.u32 4294901760, %v15624_v8  ;;  %v16083_v8 = vld [vmem:[#allocation5 + $0x6b0] sm:$0xff] }
 0xbd4   : > { %25112 = vmatprep.subr.bf16.mxu1 %v26033_v22 }
 0xbd5   : > { %v25182_v37 = vpack.c.bf16 %v15632_v15, %v15625_v60 }
 0xbd7   : > { %25114 = vmatpush3.bf16.msra.mxu1 %v25113_v47 }
 0xbd8   : > { %25115 = vmatprep.subr.bf16.mxu1 %v26033_v22 }
 0xbdb   : > { %25117 = vmatpush3.bf16.msra.mxu1 %v25116_v53  ;;  %v15659_v53 = vsub.f32 %v29926_v59, %v15658_v54  ;;  %v16104_v59 = vand.u32 4294901760, %v16082_v1 }
 0xbdc   : > { %25118 = vmatprep.subr.bf16.mxu1 %v26033_v22 }
 0xbdf   : > { %25120 = vmatpush3.bf16.msra.mxu1 %v25119_v43 }
 0xbe0   : > { %25121 = vmatprep.subr.bf16.mxu1 %v26033_v22 }
 0xbe2   : > { %22499 = vmatmul.mubr.f32.vlgmr.msra.gmra.mrb[6].mxu1 %v29759_v13 }
 0xbe3   : > { %25123 = vmatpush3.bf16.msra.mxu1 %v25122_v25  ;;  %22517 = vmatprep.mubr.msk.f32.mxu1 %vm26034_vm1, %v30529_v17 }
 0xbe4   : > { %25124 = vmatprep.subr.bf16.mxu1 %v26033_v22 }
 0xbe7   : > { %25126 = vmatpush3.bf16.msra.mxu1 %v25125_v50  ;;  %v15653_v50 = vand.u32 4294901760, %v15652_v4 }
 0xbe8   : > { %25127 = vmatprep.subr.bf16.mxu1 %v26033_v22 }
 0xbeb   : > { %25129 = vmatpush3.bf16.msra.mxu1 %v25128_v18  ;;  %v15660_v18 = vand.u32 4294901760, %v15659_v53 }
 0xbec   : > { %25130 = vmatprep.subr.bf16.mxu1 %v26033_v22 }
 0xbef   : > { %25132 = vmatpush3.bf16.msra.mxu1 %v25131_v12 }
 0xbf0   : > { %25133 = vmatprep.subr.bf16.mxu1 %v26033_v22 }
 0xbf2   : > { %22518 = vmatmul.mubr.f32.vlgmr.msra.gmra.mrb[6].mxu1 %v29775_v29  ;;  %v29895_v29 = vand.u32 4294901760, %v15535_v11 }
 0xbf3   : > { %25135 = vmatpush3.bf16.msra.mxu1 %v29756_v57  ;;  %22536 = vmatprep.mubr.msk.f32.mxu1 %vm26034_vm1, %v30529_v17 }
 0xbf4   : > { %25136 = vmatprep.subr.bf16.mxu1 %v26033_v22 }
 0xbf7   : > { %25138 = vmatpush3.bf16.msra.mxu1 %v29769_v0 }
 0xbf8   : > { %25139 = vmatprep.subr.bf16.mxu1 %v26033_v22 }
 0xbfb   : > { %25141 = vmatpush3.bf16.msra.mxu1 %v29786_v39 }
 0xbfc   : > { %25142 = vmatprep.subr.bf16.mxu1 %v26033_v22 }
 0xbff   : > { %25144 = vmatpush3.bf16.msra.mxu1 %v29794_v19 }
 0xc00   : > { %25145 = vmatprep.subr.bf16.mxu1 %v26033_v22 }
 0xc02   : > { %22537 = vmatmul.mubr.f32.vlgmr.msra.gmra.mrb[6].mxu1 %v15061_v28  ;;  %v15556_v28 = vand.u32 4294901760, %v15532_v26 }
 0xc03   : > { %25147 = vmatpush3.bf16.msra.mxu1 %v25146_v14  ;;  %22555 = vmatprep.mubr.msk.f32.mxu1 %vm26034_vm1, %v30529_v17 }
 0xc04   : > { %25148 = vmatprep.subr.bf16.mxu1 %v26033_v22  ;;  %v29939_v16 = vsub.f32 %v15532_v26, %v15556_v28  ;;  %v30023_v26 = vsub.f32 %v16077_v49, %v16089_v62 }
 0xc06   : > { %v15665_v33 = vand.u32 4294901760, %v29939_v16 }
 0xc07   : > { %25150 = vmatpush3.bf16.msra.mxu1 %v25149_v40  ;;  %v25188_v40 = vpack.c.bf16 %v15660_v18, %v15653_v50 }
 0xc08   : > { %25151 = vmatprep.subr.bf16.mxu1 %v26033_v22  ;;  %v15666_v12 = vsub.f32 %v29939_v16, %v15665_v33 }
 0xc0b   : > { %25153 = vmatpush3.bf16.msra.mxu1 %v25152_v41  ;;  %v15667_v41 = vand.u32 4294901760, %v15666_v12 }
 0xc0c   : > { %25154 = vmatprep.subr.bf16.mxu1 %v26033_v22 }
 0xc0f   : > { %25156 = vmatpush3.bf16.msra.mxu1 %v25155_v38 }
 0xc10   : > { %25157 = vmatprep.subr.bf16.mxu1 %v26033_v22 }
 0xc12   : > { %22556 = vmatmul.mubr.f32.vlgmr.msra.gmra.mrb[6].mxu1 %v29759_v13 }
 0xc13   : > { %25159 = vmatpush3.bf16.msra.mxu1 %v29756_v57  ;;  %22574 = vmatprep.mubr.msk.f32.mxu1 %vm26034_vm1, %v30529_v17  ;;  %v15529_v57 = vld [vmem:[#allocation5 + $0x658] sm:$0xff] }
 0xc14   : > { %25160 = vmatprep.subr.bf16.mxu1 %v26033_v22 }
 0xc17   : > { %25162 = vmatpush3.bf16.msra.mxu1 %v29769_v0  ;;  %v15547_v0 = vand.u32 4294901760, %v15529_v57 }
 0xc18   : > { %25163 = vmatprep.subr.bf16.mxu1 %v26033_v22 }
 0xc19   : > { %v29900_v20 = vsub.f32 %v15529_v57, %v15547_v0 }
 0xc1b   : > { %25165 = vmatpush3.bf16.msra.mxu1 %v29786_v39  ;;  %v29905_v39 = vpack.c.bf16 %v15547_v0, %v15544_v24  ;;  %v15644_v55 = vand.u32 4294901760, %v29900_v20  ;;  %v25197_v56 = vpack.c.bf16 %v29900_v20, %v29898_v21  ;;  %v16078_v24 = vld [vmem:[#allocation5 + $0x688] sm:$0xff]  ;;  %v16075_v0 = vld [vmem:[#allocation3 + $0x2] sm:$0xf] }
 0xc1c   : > { %25166 = vmatprep.subr.bf16.mxu1 %v26033_v22  ;;  %v16092_v46 = vand.u32 4294901760, %v16078_v24  ;;  %v16079_v21 = vld [vmem:[#allocation5 + $0x690] sm:$0xff] }
 0xc1d   : > { %v15645_v34 = vsub.f32 %v29900_v20, %v15644_v55  ;;  %v25221_v57 = vpack.c.bf16 %v15644_v55, %v15637_v32  ;;  %v16086_v20 = vsel %vm279_vm0, %v16075_v0, 0  ;;  %v16095_v45 = vand.u32 4294901760, %v16079_v21 }
 0xc1e   : > { %v30028_v27 = vpack.c.bf16 %v16092_v46, %v16089_v62  ;;  %v16174_v32 = vand.u32 4294901760, %v30023_v26 }
 0xc1f   : > { %25168 = vmatpush3.bf16.msra.mxu1 %v29794_v19  ;;  %v15559_v19 = vand.u32 4294901760, %v15533_v23  ;;  %v15646_v6 = vand.u32 4294901760, %v15645_v34 }
 0xc20   : > { %25169 = vmatprep.subr.bf16.mxu1 %v26033_v22  ;;  %v16175_v60 = vsub.f32 %v30023_v26, %v16174_v32 }
 0xc21   : > { %v29930_v7 = vpack.c.bf16 %v15559_v19, %v15556_v28  ;;  %v29941_v30 = vsub.f32 %v15533_v23, %v15559_v19  ;;  %v25185_v25 = vpack.c.bf16 %v15646_v6, %v15639_v58  ;;  %v30025_v23 = vsub.f32 %v16078_v24, %v16092_v46 }
 0xc22   : > { %22575 = vmatmul.mubr.f32.vlgmr.msra.gmra.mrb[6].mxu1 %v29759_v13  ;;  %v29911_v13 = vsub.f32 %v15535_v11, %v29895_v29  ;;  %v25224_v11 = vpack.c.bf16 %v15658_v54, %v15651_v5  ;;  %v30034_v28 = vsub.f32 %v16079_v21, %v16095_v45  ;;  %v30062_v5 = vsub.f32 %v16082_v1, %v16104_v59 }
 0xc23   : > { %25171 = vmatpush3.bf16.msra.mxu1 %v29892_v61  ;;  %22593 = vmatprep.mubr.msk.f32.mxu1 %vm26034_vm1, %v30529_v17  ;;  %v15672_v51 = vand.u32 4294901760, %v29941_v30  ;;  %v25203_v42 = vpack.c.bf16 %v29941_v30, %v29939_v16  ;;  %v16181_v55 = vand.u32 4294901760, %v30025_v23  ;;  %v30058_v16 = vpack.c.bf16 %v16104_v59, %v16101_v9  ;;  %v16633_v59 = vld [vmem:[#allocation5 + $0x6e8] sm:$0xff] }
 0xc24   : > { %25172 = vmatprep.subr.bf16.mxu1 %v26033_v22  ;;  %v15612_v52 = vand.u32 4294901760, %v29911_v13  ;;  %v16188_v10 = vand.u32 4294901760, %v30034_v28  ;;  %v25266_v24 = vpack.c.bf16 %v30025_v23, %v30023_v26 }
 0xc25   : > { %v15673_v14 = vsub.f32 %v29941_v30, %v15672_v51  ;;  %v25227_v3 = vpack.c.bf16 %v15672_v51, %v15665_v33  ;;  %v16182_v15 = vsub.f32 %v30025_v23, %v16181_v55  ;;  %v30060_v30 = vsub.f32 %v16081_v44, %v16101_v9  ;;  %v16628_v23 = vld [vmem:[#allocation5 + $0x6c0] sm:$0xff] }
 0xc26   : > { %v15613_v47 = vsub.f32 %v29911_v13, %v15612_v52  ;;  %v16189_v6 = vsub.f32 %v30034_v28, %v16188_v10  ;;  %v25290_v21 = vpack.c.bf16 %v16181_v55, %v16174_v32  ;;  %v16640_v44 = vand.u32 4294901760, %v16628_v23  ;;  %v16632_v9 = vld [vmem:[#allocation5 + $0x6e0] sm:$0xff] }
 0xc27   : > { %25174 = vmatpush3.bf16.msra.mxu1 %v29905_v39  ;;  %v15674_v38 = vand.u32 4294901760, %v15673_v14  ;;  %v16183_v58 = vand.u32 4294901760, %v16182_v15  ;;  %v16202_v51 = vand.u32 4294901760, %v30060_v30  ;;  %v25272_v62 = vpack.c.bf16 %v30062_v5, %v30060_v30  ;;  %v16635_v15 = vld [vmem:[#allocation5 + $0x6f8] sm:$0xff] }
 0xc28   : > { %25175 = vmatprep.subr.bf16.mxu1 %v26033_v22  ;;  %v15614_v43 = vand.u32 4294901760, %v15613_v47  ;;  %v16190_v18 = vand.u32 4294901760, %v16189_v6 }
 0xc29   : > { %v25191_v31 = vpack.c.bf16 %v15674_v38, %v15667_v41  ;;  %v16203_v14 = vsub.f32 %v30060_v30, %v16202_v51  ;;  %v16652_v30 = vand.u32 4294901760, %v16632_v9 }
 0xc2b   : > { %25177 = vmatpush3.bf16.msra.mxu1 %v29922_v48 }
 0xc2c   : > { %25178 = vmatprep.subr.bf16.mxu1 %v26033_v22 }
 0xc2f   : > { %25180 = vmatpush3.bf16.msra.mxu1 %v29930_v7 }
 0xc30   : > { %25181 = vmatprep.subr.bf16.mxu1 %v26033_v22 }
 0xc32   : > { %22594 = vmatmul.mubr.f32.vlgmr.msra.gmra.mrb[6].mxu1 %v15614_v43  ;;  %v16209_v43 = vand.u32 4294901760, %v30062_v5 }
 0xc33   : > { %25183 = vmatpush3.bf16.msra.mxu1 %v25182_v37  ;;  %22612 = vmatprep.mubr.msk.f32.mxu1 %vm26034_vm1, %v30529_v17  ;;  %v16176_v37 = vand.u32 4294901760, %v16175_v60  ;;  %v16634_v60 = vld [vmem:[#allocation5 + $0x6f0] sm:$0xff] }
 0xc34   : > { %25184 = vmatprep.subr.bf16.mxu1 %v26033_v22 }
 0xc35   : > { %v25254_v50 = vpack.c.bf16 %v16183_v58, %v16176_v37 }
 0xc37   : > { %25186 = vmatpush3.bf16.msra.mxu1 %v25185_v25 }
 0xc38   : > { %25187 = vmatprep.subr.bf16.mxu1 %v26033_v22 }
 0xc3b   : > { %25189 = vmatpush3.bf16.msra.mxu1 %v25188_v40  ;;  %v16210_v40 = vsub.f32 %v30062_v5, %v16209_v43  ;;  %v16655_v5 = vand.u32 4294901760, %v16633_v59 }
 0xc3c   : > { %25190 = vmatprep.subr.bf16.mxu1 %v26033_v22 }
 0xc3f   : > { %25192 = vmatpush3.bf16.msra.mxu1 %v25191_v31 }
 0xc40   : > { %25193 = vmatprep.subr.bf16.mxu1 %v26033_v22 }
 0xc42   : > { %22613 = vmatmul.mubr.f32.vlgmr.msra.gmra.mrb[6].mxu1 %v29895_v29 }
 0xc43   : > { %25195 = vmatpush3.bf16.msra.mxu1 %v25194_v63  ;;  %22631 = vmatprep.mubr.msk.f32.mxu1 %vm26034_vm1, %v30529_v17 }
 0xc44   : > { %25196 = vmatprep.subr.bf16.mxu1 %v26033_v22 }
 0xc47   : > { %25198 = vmatpush3.bf16.msra.mxu1 %v25197_v56  ;;  %v16204_v56 = vand.u32 4294901760, %v16203_v14 }
 0xc48   : > { %25199 = vmatprep.subr.bf16.mxu1 %v26033_v22 }
 0xc4b   : > { %25201 = vmatpush3.bf16.msra.mxu1 %v25200_v36  ;;  %v16211_v36 = vand.u32 4294901760, %v16210_v40 }
 0xc4c   : > { %25202 = vmatprep.subr.bf16.mxu1 %v26033_v22 }
 0xc4f   : > { %25204 = vmatpush3.bf16.msra.mxu1 %v25203_v42 }
 0xc50   : > { %25205 = vmatprep.subr.bf16.mxu1 %v26033_v22 }
 0xc52   : > { %22632 = vmatmul.mubr.f32.vlgmr.msra.gmra.mrb[6].mxu1 %v29911_v13  ;;  %v30031_v13 = vand.u32 4294901760, %v16086_v20 }
 0xc53   : > { %25207 = vmatpush3.bf16.msra.mxu1 %v29892_v61  ;;  %22650 = vmatprep.mubr.msk.f32.mxu1 %vm26034_vm1, %v30529_v17 }
 0xc54   : > { %25208 = vmatprep.subr.bf16.mxu1 %v26033_v22 }
 0xc57   : > { %25210 = vmatpush3.bf16.msra.mxu1 %v29905_v39 }
 0xc58   : > { %25211 = vmatprep.subr.bf16.mxu1 %v26033_v22 }
 0xc5b   : > { %25213 = vmatpush3.bf16.msra.mxu1 %v29922_v48 }
 0xc5c   : > { %25214 = vmatprep.subr.bf16.mxu1 %v26033_v22 }
 0xc5f   : > { %25216 = vmatpush3.bf16.msra.mxu1 %v29930_v7 }
 0xc60   : > { %25217 = vmatprep.subr.bf16.mxu1 %v26033_v22 }
 0xc62   : > { %22651 = vmatmul.mubr.f32.vlgmr.msra.gmra.mrb[6].mxu1 %v15612_v52  ;;  %v16107_v52 = vand.u32 4294901760, %v16083_v8 }
 0xc63   : > { %25219 = vmatpush3.bf16.msra.mxu1 %v25218_v2  ;;  %22669 = vmatprep.mubr.msk.f32.mxu1 %vm26034_vm1, %v30529_v17 }
 0xc64   : > { %25220 = vmatprep.subr.bf16.mxu1 %v26033_v22  ;;  %v30075_v53 = vsub.f32 %v16083_v8, %v16107_v52  ;;  %v30159_v8 = vsub.f32 %v16628_v23, %v16640_v44 }
 0xc66   : > { %v16216_v41 = vand.u32 4294901760, %v30075_v53 }
 0xc67   : > { %25222 = vmatpush3.bf16.msra.mxu1 %v25221_v57  ;;  %v25260_v57 = vpack.c.bf16 %v16211_v36, %v16204_v56 }
 0xc68   : > { %25223 = vmatprep.subr.bf16.mxu1 %v26033_v22  ;;  %v16217_v42 = vsub.f32 %v30075_v53, %v16216_v41 }
 0xc6b   : > { %25225 = vmatpush3.bf16.msra.mxu1 %v25224_v11  ;;  %v16218_v11 = vand.u32 4294901760, %v16217_v42 }
 0xc6c   : > { %25226 = vmatprep.subr.bf16.mxu1 %v26033_v22 }
 0xc6f   : > { %25228 = vmatpush3.bf16.msra.mxu1 %v25227_v3 }
 0xc70   : > { %25229 = vmatprep.subr.bf16.mxu1 %v26033_v22 }
 0xc72   : > { %22670 = vmatmul.mubr.f32.vlgmr.msra.gmra.mrb[6].mxu1 %v29895_v29 }
 0xc73   : > { %25231 = vmatpush3.bf16.msra.mxu1 %v29892_v61  ;;  %22688 = vmatprep.mubr.msk.f32.mxu1 %vm26034_vm1, %v30529_v17  ;;  %v16080_v61 = vld [vmem:[#allocation5 + $0x698] sm:$0xff] }
 0xc74   : > { %25232 = vmatprep.subr.bf16.mxu1 %v26033_v22 }
 0xc77   : > { %25234 = vmatpush3.bf16.msra.mxu1 %v29905_v39  ;;  %v16098_v39 = vand.u32 4294901760, %v16080_v61 }
 0xc78   : > { %25235 = vmatprep.subr.bf16.mxu1 %v26033_v22 }
 0xc79   : > { %v30036_v19 = vsub.f32 %v16080_v61, %v16098_v39 }
 0xc7b   : > { %25237 = vmatpush3.bf16.msra.mxu1 %v29922_v48  ;;  %v30041_v48 = vpack.c.bf16 %v16098_v39, %v16095_v45  ;;  %v16195_v34 = vand.u32 4294901760, %v30036_v19  ;;  %v25269_v0 = vpack.c.bf16 %v30036_v19, %v30034_v28  ;;  %v16629_v45 = vld [vmem:[#allocation5 + $0x6c8] sm:$0xff]  ;;  %v16626_v39 = vld [vmem:[#allocation4 + $0x3] sm:$0xf]  ;;  %v16630_v28 = vld [vmem:[#allocation5 + $0x6d0] sm:$0xff] }
 0xc7c   : > { %25238 = vmatprep.subr.bf16.mxu1 %v26033_v22  ;;  %v16643_v1 = vand.u32 4294901760, %v16629_v45  ;;  %v16646_v55 = vand.u32 4294901760, %v16630_v28 }
 0xc7d   : > { %v16196_v4 = vsub.f32 %v30036_v19, %v16195_v34  ;;  %v25293_v61 = vpack.c.bf16 %v16195_v34, %v16188_v10  ;;  %v16637_v19 = vsel %vm279_vm0, %v16626_v39, 0  ;;  %v16725_v10 = vand.u32 4294901760, %v30159_v8 }
 0xc7e   : > { %v30164_v32 = vpack.c.bf16 %v16643_v1, %v16640_v44 }
 0xc7f   : > { %25240 = vmatpush3.bf16.msra.mxu1 %v29930_v7  ;;  %v16110_v7 = vand.u32 4294901760, %v16084_v35  ;;  %v16197_v12 = vand.u32 4294901760, %v16196_v4  ;;  %v16726_v37 = vsub.f32 %v30159_v8, %v16725_v10 }
 0xc80   : > { %25241 = vmatprep.subr.bf16.mxu1 %v26033_v22 }
 0xc81   : > { %v30066_v47 = vpack.c.bf16 %v16110_v7, %v16107_v52  ;;  %v30077_v33 = vsub.f32 %v16084_v35, %v16110_v7  ;;  %v25257_v63 = vpack.c.bf16 %v16197_v12, %v16190_v18  ;;  %v30161_v35 = vsub.f32 %v16629_v45, %v16643_v1 }
 0xc82   : > { %22689 = vmatmul.mubr.f32.vlgmr.msra.gmra.mrb[6].mxu1 %v29895_v29  ;;  %v30047_v29 = vsub.f32 %v16086_v20, %v30031_v13  ;;  %v25296_v20 = vpack.c.bf16 %v16209_v43, %v16202_v51  ;;  %v30170_v52 = vsub.f32 %v16630_v28, %v16646_v55  ;;  %v30198_v51 = vsub.f32 %v16633_v59, %v16655_v5  ;;  %v17206_v59 = vld [vmem:[%s30475_s4 + $0x18] sm:$0xff] }
 0xc83   : > { %25243 = vmatpush3.bf16.msra.mxu1 %v30028_v27  ;;  %22707 = vmatprep.mubr.msk.f32.mxu1 %vm26034_vm1, %v30529_v17  ;;  %v16223_v38 = vand.u32 4294901760, %v30077_v33  ;;  %v25275_v46 = vpack.c.bf16 %v30077_v33, %v30075_v53  ;;  %v16732_v34 = vand.u32 4294901760, %v30161_v35  ;;  %v30194_v53 = vpack.c.bf16 %v16655_v5, %v16652_v30 }
 0xc84   : > { %25244 = vmatprep.subr.bf16.mxu1 %v26033_v22  ;;  %v16163_v54 = vand.u32 4294901760, %v30047_v29  ;;  %v16739_v6 = vand.u32 4294901760, %v30170_v52  ;;  %v25338_v45 = vpack.c.bf16 %v30161_v35, %v30159_v8 }
 0xc85   : > { %v16224_v2 = vsub.f32 %v30077_v33, %v16223_v38  ;;  %v25299_v26 = vpack.c.bf16 %v16223_v38, %v16216_v41  ;;  %v16733_v58 = vsub.f32 %v30161_v35, %v16732_v34  ;;  %v30196_v33 = vsub.f32 %v16632_v9, %v16652_v30  ;;  %v17203_v35 = vld [vmem:[%s30475_s4] sm:$0xff] }
 0xc86   : > { %v16164_v25 = vsub.f32 %v30047_v29, %v16163_v54  ;;  %v16740_v12 = vsub.f32 %v30170_v52, %v16739_v6  ;;  %v25362_v28 = vpack.c.bf16 %v16732_v34, %v16725_v10  ;;  %v17209_v34 = vld [vmem:[%s30475_s4 + $0x30] sm:$0xff] }
 0xc87   : > { %25246 = vmatpush3.bf16.msra.mxu1 %v30041_v48  ;;  %v16225_v3 = vand.u32 4294901760, %v16224_v2  ;;  %v16734_v18 = vand.u32 4294901760, %v16733_v58  ;;  %v16753_v38 = vand.u32 4294901760, %v30196_v33  ;;  %v25344_v44 = vpack.c.bf16 %v30198_v51, %v30196_v33 }
 0xc88   : > { %25247 = vmatprep.subr.bf16.mxu1 %v26033_v22  ;;  %v16165_v31 = vand.u32 4294901760, %v16164_v25  ;;  %v16741_v36 = vand.u32 4294901760, %v16740_v12 }
 0xc89   : > { %v25263_v49 = vpack.c.bf16 %v16225_v3, %v16218_v11  ;;  %v16754_v2 = vsub.f32 %v30196_v33, %v16753_v38 }
 0xc8b   : > { %25249 = vmatpush3.bf16.msra.mxu1 %v30058_v16 }
 0xc8c   : > { %25250 = vmatprep.subr.bf16.mxu1 %v26033_v22 }
 0xc8f   : > { %25252 = vmatpush3.bf16.msra.mxu1 %v30066_v47 }
 0xc90   : > { %25253 = vmatprep.subr.bf16.mxu1 %v26033_v22 }
 0xc92   : > { %22708 = vmatmul.mubr.f32.vlgmr.msra.gmra.mrb[6].mxu1 %v16165_v31  ;;  %v16760_v31 = vand.u32 4294901760, %v30198_v51 }
 0xc93   : > { %25255 = vmatpush3.bf16.msra.mxu1 %v25254_v50  ;;  %22726 = vmatprep.mubr.msk.f32.mxu1 %vm26034_vm1, %v30529_v17  ;;  %v16727_v50 = vand.u32 4294901760, %v16726_v37 }
 0xc94   : > { %25256 = vmatprep.subr.bf16.mxu1 %v26033_v22 }
 0xc95   : > { %v25326_v56 = vpack.c.bf16 %v16734_v18, %v16727_v50 }
 0xc97   : > { %25258 = vmatpush3.bf16.msra.mxu1 %v25257_v63 }
 0xc98   : > { %25259 = vmatprep.subr.bf16.mxu1 %v26033_v22 }
 0xc9b   : > { %25261 = vmatpush3.bf16.msra.mxu1 %v25260_v57  ;;  %v16761_v57 = vsub.f32 %v30198_v51, %v16760_v31 }
 0xc9c   : > { %25262 = vmatprep.subr.bf16.mxu1 %v26033_v22 }
 0xc9f   : > { %25264 = vmatpush3.bf16.msra.mxu1 %v25263_v49 }
 0xca0   : > { %25265 = vmatprep.subr.bf16.mxu1 %v26033_v22 }
 0xca2   : > { %22727 = vmatmul.mubr.f32.vlgmr.msra.gmra.mrb[6].mxu1 %v30031_v13 }
 0xca3   : > { %25267 = vmatpush3.bf16.msra.mxu1 %v25266_v24  ;;  %22745 = vmatprep.mubr.msk.f32.mxu1 %vm26034_vm1, %v30529_v17 }
 0xca4   : > { %25268 = vmatprep.subr.bf16.mxu1 %v26033_v22 }
 0xca7   : > { %25270 = vmatpush3.bf16.msra.mxu1 %v25269_v0  ;;  %v16755_v0 = vand.u32 4294901760, %v16754_v2 }
 0xca8   : > { %25271 = vmatprep.subr.bf16.mxu1 %v26033_v22 }
 0xcab   : > { %25273 = vmatpush3.bf16.msra.mxu1 %v25272_v62  ;;  %v16762_v62 = vand.u32 4294901760, %v16761_v57 }
 0xcac   : > { %25274 = vmatprep.subr.bf16.mxu1 %v26033_v22 }
 0xcaf   : > { %25276 = vmatpush3.bf16.msra.mxu1 %v25275_v46 }
 0xcb0   : > { %25277 = vmatprep.subr.bf16.mxu1 %v26033_v22 }
 0xcb2   : > { %22746 = vmatmul.mubr.f32.vlgmr.msra.gmra.mrb[6].mxu1 %v30047_v29  ;;  %v30167_v29 = vand.u32 4294901760, %v16637_v19 }
 0xcb3   : > { %25279 = vmatpush3.bf16.msra.mxu1 %v30028_v27  ;;  %22764 = vmatprep.mubr.msk.f32.mxu1 %vm26034_vm1, %v30529_v17 }
 0xcb4   : > { %25280 = vmatprep.subr.bf16.mxu1 %v26033_v22 }
 0xcb7   : > { %25282 = vmatpush3.bf16.msra.mxu1 %v30041_v48 }
 0xcb8   : > { %25283 = vmatprep.subr.bf16.mxu1 %v26033_v22 }
 0xcbb   : > { %25285 = vmatpush3.bf16.msra.mxu1 %v30058_v16 }
 0xcbc   : > { %25286 = vmatprep.subr.bf16.mxu1 %v26033_v22 }
 0xcbf   : > { %25288 = vmatpush3.bf16.msra.mxu1 %v30066_v47 }
 0xcc0   : > { %25289 = vmatprep.subr.bf16.mxu1 %v26033_v22 }
 0xcc2   : > { %22765 = vmatmul.mubr.f32.vlgmr.msra.gmra.mrb[6].mxu1 %v16163_v54  ;;  %v16658_v54 = vand.u32 4294901760, %v16634_v60 }
 0xcc3   : > { %25291 = vmatpush3.bf16.msra.mxu1 %v25290_v21  ;;  %22783 = vmatprep.mubr.msk.f32.mxu1 %vm26034_vm1, %v30529_v17 }
 0xcc4   : > { %25292 = vmatprep.subr.bf16.mxu1 %v26033_v22  ;;  %v30211_v40 = vsub.f32 %v16634_v60, %v16658_v54  ;;  %v17225_v60 = vand.u32 4294901760, %v17206_v59 }
 0xcc6   : > { %v16767_v11 = vand.u32 4294901760, %v30211_v40 }
 0xcc7   : > { %25294 = vmatpush3.bf16.msra.mxu1 %v25293_v61  ;;  %v25332_v61 = vpack.c.bf16 %v16762_v62, %v16755_v0 }
 0xcc8   : > { %25295 = vmatprep.subr.bf16.mxu1 %v26033_v22  ;;  %v16768_v46 = vsub.f32 %v30211_v40, %v16767_v11 }
 0xccb   : > { %25297 = vmatpush3.bf16.msra.mxu1 %v25296_v20  ;;  %v16769_v20 = vand.u32 4294901760, %v16768_v46 }
 0xccc   : > { %25298 = vmatprep.subr.bf16.mxu1 %v26033_v22 }
 0xccf   : > { %25300 = vmatpush3.bf16.msra.mxu1 %v25299_v26 }
 0xcd0   : > { %25301 = vmatprep.subr.bf16.mxu1 %v26033_v22 }
 0xcd2   : > { %22784 = vmatmul.mubr.f32.vlgmr.msra.gmra.mrb[6].mxu1 %v30031_v13 }
 0xcd3   : > { %25303 = vmatpush3.bf16.msra.mxu1 %v30028_v27  ;;  %22802 = vmatprep.mubr.msk.f32.mxu1 %vm26034_vm1, %v30529_v17  ;;  %v16631_v27 = vld [vmem:[#allocation5 + $0x6d8] sm:$0xff] }
 0xcd4   : > { %25304 = vmatprep.subr.bf16.mxu1 %v26033_v22 }
 0xcd7   : > { %25306 = vmatpush3.bf16.msra.mxu1 %v30041_v48  ;;  %v16649_v48 = vand.u32 4294901760, %v16631_v27 }
 0xcd8   : > { %25307 = vmatprep.subr.bf16.mxu1 %v26033_v22 }
 0xcd9   : > { %v30172_v7 = vsub.f32 %v16631_v27, %v16649_v48 }
 0xcdb   : > { %25309 = vmatpush3.bf16.msra.mxu1 %v30058_v16  ;;  %v30177_v16 = vpack.c.bf16 %v16649_v48, %v16646_v55  ;;  %v16746_v4 = vand.u32 4294901760, %v30172_v7  ;;  %v25341_v39 = vpack.c.bf16 %v30172_v7, %v30170_v52  ;;  %v17205_v55 = vld [vmem:[%s30475_s4 + $0x10] sm:$0xff]  ;;  %v17216_v48 = vand.u32 4294901760, %v17203_v35 }
 0xcdc   : > { %25310 = vmatprep.subr.bf16.mxu1 %v26033_v22  ;;  %v17222_v52 = vand.u32 4294901760, %v17205_v55 }
 0xcdd   : > { %v16747_v14 = vsub.f32 %v30172_v7, %v16746_v4  ;;  %v25365_v27 = vpack.c.bf16 %v16746_v4, %v16739_v6  ;;  %v17208_v7 = vld [vmem:[%s30475_s4 + $0x28] sm:$0xff]  ;;  %v30322_v5 = vsub.f32 %v17203_v35, %v17216_v48  ;;  %v17234_v4 = vand.u32 4294901760, %v17209_v34 }
 0xcde   : > { %v17231_v10 = vand.u32 4294901760, %v17208_v7  ;;  %v30333_v58 = vpack.c.bf16 %v17225_v60, %v17222_v52 }
 0xcdf   : > { %25312 = vmatpush3.bf16.msra.mxu1 %v30066_v47  ;;  %v16661_v47 = vand.u32 4294901760, %v16635_v15  ;;  %v16748_v42 = vand.u32 4294901760, %v16747_v14  ;;  %v30338_v33 = vsub.f32 %v17209_v34, %v17234_v4  ;;  %v17301_v50 = vand.u32 4294901760, %v30322_v5 }
 0xce0   : > { %25313 = vmatprep.subr.bf16.mxu1 %v26033_v22  ;;  %v30335_v6 = vsub.f32 %v17208_v7, %v17231_v10 }
 0xce1   : > { %v30202_v25 = vpack.c.bf16 %v16661_v47, %v16658_v54  ;;  %v30213_v41 = vsub.f32 %v16635_v15, %v16661_v47  ;;  %v25329_v24 = vpack.c.bf16 %v16748_v42, %v16741_v36  ;;  %v30326_v54 = vsub.f32 %v17205_v55, %v17222_v52  ;;  %v17862_v52 = vld [vmem:[%s30474_s3 + $0x3] ss:$0 sm:$0xff] }
 0xce2   : > { %22803 = vmatmul.mubr.f32.vlgmr.msra.gmra.mrb[6].mxu1 %v30031_v13  ;;  %v30183_v13 = vsub.f32 %v16637_v19, %v30167_v29  ;;  %v25368_v19 = vpack.c.bf16 %v16760_v31, %v16753_v38  ;;  %v30328_v47 = vsub.f32 %v17206_v59, %v17225_v60  ;;  %v17302_v12 = vsub.f32 %v30322_v5, %v17301_v50 }
 0xce3   : > { %25315 = vmatpush3.bf16.msra.mxu1 %v30164_v32  ;;  %22821 = vmatprep.mubr.msk.f32.mxu1 %vm26034_vm1, %v30529_v17  ;;  %v16774_v3 = vand.u32 4294901760, %v30213_v41  ;;  %v25347_v1 = vpack.c.bf16 %v30213_v41, %v30211_v40  ;;  %v17315_v40 = vand.u32 4294901760, %v30326_v54  ;;  %v17343_v62 = vand.u32 4294901760, %v30338_v33 }
 0xce4   : > { %25316 = vmatprep.subr.bf16.mxu1 %v26033_v22  ;;  %v16714_v43 = vand.u32 4294901760, %v30183_v13  ;;  %v17303_v38 = vand.u32 4294901760, %v17302_v12 }
 0xce5   : > { %v16775_v21 = vsub.f32 %v30213_v41, %v16774_v3  ;;  %v25371_v8 = vpack.c.bf16 %v16774_v3, %v16767_v11  ;;  %v17322_v41 = vand.u32 4294901760, %v30328_v47  ;;  %v17336_v11 = vand.u32 4294901760, %v30335_v6 }
 0xce6   : > { %v16715_v63 = vsub.f32 %v30183_v13, %v16714_v43 }
 0xce7   : > { %25318 = vmatpush3.bf16.msra.mxu1 %v30177_v16  ;;  %v16776_v26 = vand.u32 4294901760, %v16775_v21 }
 0xce8   : > { %25319 = vmatprep.subr.bf16.mxu1 %v26033_v22  ;;  %v16716_v49 = vand.u32 4294901760, %v16715_v63  ;;  %v17316_v63 = vsub.f32 %v30326_v54, %v17315_v40 }
 0xce9   : > { %v25335_v23 = vpack.c.bf16 %v16776_v26, %v16769_v20 }
 0xcea   : > { %v17317_v42 = vand.u32 4294901760, %v17316_v63 }
 0xceb   : > { %25321 = vmatpush3.bf16.msra.mxu1 %v30194_v53 }
 0xcec   : > { %25322 = vmatprep.subr.bf16.mxu1 %v26033_v22 }
 0xcef   : > { %25324 = vmatpush3.bf16.msra.mxu1 %v30202_v25 }
 0xcf0   : > { %25325 = vmatprep.subr.bf16.mxu1 %v26033_v22 }
 0xcf2   : > { %22822 = vmatmul.mubr.f32.vlgmr.msra.gmra.mrb[6].mxu1 %v16716_v49 }
 0xcf3   : > { %25327 = vmatpush3.bf16.msra.mxu1 %v25326_v56  ;;  %22840 = vmatprep.mubr.msk.f32.mxu1 %vm26034_vm1, %v30529_v17  ;;  %v17323_v56 = vsub.f32 %v30328_v47, %v17322_v41 }
 0xcf4   : > { %25328 = vmatprep.subr.bf16.mxu1 %v26033_v22 }
 0xcf5   : > { %v17324_v2 = vand.u32 4294901760, %v17323_v56 }
 0xcf7   : > { %25330 = vmatpush3.bf16.msra.mxu1 %v25329_v24  ;;  %v25401_v3 = vpack.c.bf16 %v17324_v2, %v17317_v42  ;;  %v17337_v24 = vsub.f32 %v30335_v6, %v17336_v11 }
 0xcf8   : > { %25331 = vmatprep.subr.bf16.mxu1 %v26033_v22 }
 0xcf9   : > { %v17338_v21 = vand.u32 4294901760, %v17337_v24 }
 0xcfb   : > { %25333 = vmatpush3.bf16.msra.mxu1 %v25332_v61  ;;  %v17344_v61 = vsub.f32 %v30338_v33, %v17343_v62 }
 0xcfc   : > { %25334 = vmatprep.subr.bf16.mxu1 %v26033_v22 }
 0xcff   : > { %25336 = vmatpush3.bf16.msra.mxu1 %v25335_v23  ;;  %v17345_v23 = vand.u32 4294901760, %v17344_v61 }
 0xd00   : > { %25337 = vmatprep.subr.bf16.mxu1 %v26033_v22 }
 0xd02   : > { %22841 = vmatmul.mubr.f32.vlgmr.msra.gmra.mrb[6].mxu1 %v30167_v29 }
 0xd03   : > { %25339 = vmatpush3.bf16.msra.mxu1 %v25338_v45  ;;  %22859 = vmatprep.mubr.msk.f32.mxu1 %vm26034_vm1, %v30529_v17 }
 0xd04   : > { %25340 = vmatprep.subr.bf16.mxu1 %v26033_v22 }
 0xd07   : > { %25342 = vmatpush3.bf16.msra.mxu1 %v25341_v39 }
 0xd08   : > { %25343 = vmatprep.subr.bf16.mxu1 %v26033_v22 }
 0xd0b   : > { %25345 = vmatpush3.bf16.msra.mxu1 %v25344_v44 }
 0xd0c   : > { %25346 = vmatprep.subr.bf16.mxu1 %v26033_v22 }
 0xd0f   : > { %25348 = vmatpush3.bf16.msra.mxu1 %v25347_v1  ;;  %v25413_v1 = vpack.c.bf16 %v30328_v47, %v30326_v54 }
 0xd10   : > { %25349 = vmatprep.subr.bf16.mxu1 %v26033_v22 }
 0xd12   : > { %22860 = vmatmul.mubr.f32.vlgmr.msra.gmra.mrb[6].mxu1 %v30183_v13 }
 0xd13   : > { %25351 = vmatpush3.bf16.msra.mxu1 %v30164_v32  ;;  %22878 = vmatprep.mubr.msk.f32.mxu1 %vm26034_vm1, %v30529_v17 }
 0xd14   : > { %25352 = vmatprep.subr.bf16.mxu1 %v26033_v22 }
 0xd17   : > { %25354 = vmatpush3.bf16.msra.mxu1 %v30177_v16 }
 0xd18   : > { %25355 = vmatprep.subr.bf16.mxu1 %v26033_v22 }
 0xd1b   : > { %25357 = vmatpush3.bf16.msra.mxu1 %v30194_v53 }
 0xd1c   : > { %25358 = vmatprep.subr.bf16.mxu1 %v26033_v22 }
 0xd1f   : > { %25360 = vmatpush3.bf16.msra.mxu1 %v30202_v25 }
 0xd20   : > { %25361 = vmatprep.subr.bf16.mxu1 %v26033_v22 }
 0xd22   : > { %22879 = vmatmul.mubr.f32.vlgmr.msra.gmra.mrb[6].mxu1 %v16714_v43 }
 0xd23   : > { %25363 = vmatpush3.bf16.msra.mxu1 %v25362_v28  ;;  %22897 = vmatprep.mubr.msk.f32.mxu1 %vm26034_vm1, %v30529_v17 }
 0xd24   : > { %25364 = vmatprep.subr.bf16.mxu1 %v26033_v22 }
 0xd27   : > { %25366 = vmatpush3.bf16.msra.mxu1 %v25365_v27 }
 0xd28   : > { %25367 = vmatprep.subr.bf16.mxu1 %v26033_v22 }
 0xd2b   : > { %25369 = vmatpush3.bf16.msra.mxu1 %v25368_v19 }
 0xd2c   : > { %25370 = vmatprep.subr.bf16.mxu1 %v26033_v22 }
 0xd2f   : > { %25372 = vmatpush3.bf16.msra.mxu1 %v25371_v8  ;;  %v25437_v8 = vpack.c.bf16 %v17322_v41, %v17315_v40 }
 0xd30   : > { %25373 = vmatprep.subr.bf16.mxu1 %v26033_v22 }
 0xd32   : > { %22898 = vmatmul.mubr.f32.vlgmr.msra.gmra.mrb[6].mxu1 %v30167_v29 }
 0xd33   : > { %25375 = vmatpush3.bf16.msra.mxu1 %v30164_v32  ;;  %22916 = vmatprep.mubr.msk.f32.mxu1 %vm26034_vm1, %v30529_v17  ;;  %v17204_v32 = vld [vmem:[%s30475_s4 + $0x8] sm:$0xff] }
 0xd34   : > { %25376 = vmatprep.subr.bf16.mxu1 %v26033_v22  ;;  %v17219_v9 = vand.u32 4294901760, %v17204_v32 }
 0xd36   : > { %v30320_v30 = vpack.c.bf16 %v17219_v9, %v17216_v48  ;;  %v30324_v13 = vsub.f32 %v17204_v32, %v17219_v9  ;;  %v17860_v48 = vld [vmem:[%s30473_s2 + $0x3] ss:$0 sm:$0xff] }
 0xd37   : > { %25378 = vmatpush3.bf16.msra.mxu1 %v30177_v16  ;;  %v17210_v16 = vld [vmem:[%s30475_s4 + $0x38] sm:$0xff] }
 0xd38   : > { %25379 = vmatprep.subr.bf16.mxu1 %v26033_v22  ;;  %25387 = vmatpush3.bf16.msra.mxu0 %v30320_v30  ;;  %v17308_v18 = vand.u32 4294901760, %v30324_v13  ;;  %v25410_v44 = vpack.c.bf16 %v30324_v13, %v30322_v5 }
 0xd39   : > { %25388 = vmatprep.subr.bf16.mxu0 %v26033_v22 }
 0xd3a   : > { %v17309_v14 = vsub.f32 %v30324_v13, %v17308_v18  ;;  %v25434_v19 = vpack.c.bf16 %v17308_v18, %v17301_v50 }
 0xd3b   : > { %25381 = vmatpush3.bf16.msra.mxu1 %v30194_v53  ;;  %v17237_v53 = vand.u32 4294901760, %v17210_v16 }
 0xd3c   : > { %25382 = vmatprep.subr.bf16.mxu1 %v26033_v22  ;;  %25390 = vmatpush3.bf16.msra.mxu0 %v30333_v58  ;;  %v17310_v31 = vand.u32 4294901760, %v17309_v14 }
 0xd3d   : > { %v30340_v51 = vsub.f32 %v17210_v16, %v17237_v53  ;;  %25391 = vmatprep.subr.bf16.mxu0 %v26033_v22 }
 0xd3e   : > { %v25398_v36 = vpack.c.bf16 %v17310_v31, %v17303_v38 }
 0xd3f   : > { %25384 = vmatpush3.bf16.msra.mxu1 %v30202_v25  ;;  %v30347_v25 = vpack.c.bf16 %v17237_v53, %v17234_v4  ;;  %v17350_v46 = vand.u32 4294901760, %v30340_v51  ;;  %v25419_v27 = vpack.c.bf16 %v30340_v51, %v30338_v33 }
 0xd41   : > { %v17351_v20 = vsub.f32 %v30340_v51, %v17350_v46  ;;  %v25443_v32 = vpack.c.bf16 %v17350_v46, %v17343_v62 }
 0xd42   : > { %22917 = vmatmul.mubr.f32.vlgmr.msra.gmra.mrb[6].mxu1 %v30167_v29  ;;  %v17207_v29 = vld [vmem:[%s30475_s4 + $0x20] sm:$0xff] }
 0xd43   : > { %v17228_v15 = vand.u32 4294901760, %v17207_v29  ;;  %v17352_v45 = vand.u32 4294901760, %v17351_v20 }
 0xd45   : > { %v30330_v37 = vsub.f32 %v17207_v29, %v17228_v15  ;;  %v30343_v43 = vpack.c.bf16 %v17231_v10, %v17228_v15  ;;  %v25407_v39 = vpack.c.bf16 %v17352_v45, %v17345_v23 }
 0xd47   : > { %25393 = vmatpush3.bf16.msra.mxu0 %v30343_v43  ;;  %v17329_v57 = vand.u32 4294901760, %v30330_v37  ;;  %v25416_v28 = vpack.c.bf16 %v30335_v6, %v30330_v37 }
 0xd48   : > { %25394 = vmatprep.subr.bf16.mxu0 %v26033_v22 }
 0xd49   : > { %v17330_v49 = vsub.f32 %v30330_v37, %v17329_v57  ;;  %v25440_v35 = vpack.c.bf16 %v17336_v11, %v17329_v57 }
 0xd4b   : > { %25396 = vmatpush3.bf16.msra.mxu0 %v30347_v25  ;;  %v17331_v0 = vand.u32 4294901760, %v17330_v49 }
 0xd4c   : > { %25397 = vmatprep.subr.bf16.mxu0 %v26033_v22 }
 0xd4d   : > { %v25404_v26 = vpack.c.bf16 %v17338_v21, %v17331_v0 }
 0xe15   : > { %v17172_v55 = vpop.f32.mrb[6].mxu1 }
 0xe16   : > { %v17177_v9 = vmax.f32 %v17172_v55, 0.0  ;;  %v22918_v59 = vpop.f32.mrb[7].mxu1 }
 0xe18   : > { %v17186_v29 = vmul.f32 %v17860_v48, %v17177_v9 }
 0xe1a   : > { %v17195_v7 = vadd.f32 %v17862_v52, %v17186_v29 }
 0xe1c   : > { %v17196_v60 = vsel %vm13319_vm2, %v17195_v7, -inf }
 0xe1d   : > { %v17197_v15 = vrot.slane %v17196_v60, 4 }
 0xe1f   : > { %v17198_v10 = vmax.f32 %v17196_v60, %v17197_v15 }
 0xe21   : > { %v17199_v34 = vrot.slane %v17198_v10, 2 }
 0xe23   : > { %v17200_v16 = vmax.f32 %v17198_v10, %v17199_v34 }
 0xe25   : > { %v17201_v5 = vrot.slane %v17200_v16, 1 }
 0xe27   : > { %v17202_v13 = vmax.f32 %v17200_v16, %v17201_v5 }
 0xe29   : > { %v17213_v54 = vsel %vm279_vm0, %v17202_v13, 0 }
 0xe2a   : > { %v17288_v47 = vand.u32 4294901760, %v17213_v54 }
 0xe2c   : > { %v17289_v37 = vsub.f32 %v17213_v54, %v17288_v47 }
 0xe2e   : > { %v17290_v6 = vand.u32 4294901760, %v17289_v37 }
 0xe30   : > { %v17291_v4 = vsub.f32 %v17289_v37, %v17290_v6 }
 0xe32   : > { %v17292_v53 = vand.u32 4294901760, %v17291_v4 }
 0xe34   : > { %22936 = vmatmul.mubr.f32.vlgmr.msra.gmra.mrb[6].mxu0 %v17292_v53 }
 0xe35   : > { %25399 = vmatpush3.bf16.msra.mxu0 %v25398_v36  ;;  %22954 = vmatprep.mubr.msk.f32.mxu0 %vm26034_vm1, %v30529_v17 }
 0xe36   : > { %25400 = vmatprep.subr.bf16.mxu0 %v26033_v22 }
 0xe39   : > { %25402 = vmatpush3.bf16.msra.mxu0 %v25401_v3 }
 0xe3a   : > { %25403 = vmatprep.subr.bf16.mxu0 %v26033_v22 }
 0xe3d   : > { %25405 = vmatpush3.bf16.msra.mxu0 %v25404_v26 }
 0xe3e   : > { %25406 = vmatprep.subr.bf16.mxu0 %v26033_v22 }
 0xe41   : > { %25408 = vmatpush3.bf16.msra.mxu0 %v25407_v39 }
 0xe42   : > { %25409 = vmatprep.subr.bf16.mxu0 %v26033_v22 }
 0xe44   : > { %22955 = vmatmul.mubr.f32.vlgmr.msra.gmra.mrb[6].mxu0 %v17288_v47 }
 0xe45   : > { %25411 = vmatpush3.bf16.msra.mxu0 %v25410_v44  ;;  %22973 = vmatprep.mubr.msk.f32.mxu0 %vm26034_vm1, %v30529_v17 }
 0xe46   : > { %25412 = vmatprep.subr.bf16.mxu0 %v26033_v22 }
 0xe49   : > { %25414 = vmatpush3.bf16.msra.mxu0 %v25413_v1 }
 0xe4a   : > { %25415 = vmatprep.subr.bf16.mxu0 %v26033_v22 }
 0xe4d   : > { %25417 = vmatpush3.bf16.msra.mxu0 %v25416_v28 }
 0xe4e   : > { %25418 = vmatprep.subr.bf16.mxu0 %v26033_v22 }
 0xe51   : > { %25420 = vmatpush3.bf16.msra.mxu0 %v25419_v27 }
 0xe52   : > { %25421 = vmatprep.subr.bf16.mxu0 %v26033_v22 }
 0xe54   : > { %22974 = vmatmul.mubr.f32.vlgmr.msra.gmra.mrb[6].mxu0 %v17289_v37 }
 0xe55   : > { %25423 = vmatpush3.bf16.msra.mxu0 %v30320_v30  ;;  %22992 = vmatprep.mubr.msk.f32.mxu0 %vm26034_vm1, %v30529_v17 }
 0xe56   : > { %25424 = vmatprep.subr.bf16.mxu0 %v26033_v22 }
 0xe59   : > { %25426 = vmatpush3.bf16.msra.mxu0 %v30333_v58 }
 0xe5a   : > { %25427 = vmatprep.subr.bf16.mxu0 %v26033_v22 }
 0xe5d   : > { %25429 = vmatpush3.bf16.msra.mxu0 %v30343_v43 }
 0xe5e   : > { %25430 = vmatprep.subr.bf16.mxu0 %v26033_v22 }
 0xe61   : > { %25432 = vmatpush3.bf16.msra.mxu0 %v30347_v25 }
 0xe62   : > { %25433 = vmatprep.subr.bf16.mxu0 %v26033_v22 }
 0xe64   : > { %22993 = vmatmul.mubr.f32.vlgmr.msra.gmra.mrb[6].mxu0 %v17290_v6 }
 0xe65   : > { %25435 = vmatpush3.bf16.msra.mxu0 %v25434_v19  ;;  %23011 = vmatprep.mubr.msk.f32.mxu0 %vm26034_vm1, %v30529_v17 }
 0xe66   : > { %25436 = vmatprep.subr.bf16.mxu0 %v26033_v22 }
 0xe69   : > { %25438 = vmatpush3.bf16.msra.mxu0 %v25437_v8 }
 0xe6a   : > { %25439 = vmatprep.subr.bf16.mxu0 %v26033_v22 }
 0xe6d   : > { %25441 = vmatpush3.bf16.msra.mxu0 %v25440_v35 }
 0xe6e   : > { %25442 = vmatprep.subr.bf16.mxu0 %v26033_v22 }
 0xe71   : > { %25444 = vmatpush3.bf16.msra.mxu0 %v25443_v32 }
 0xe72   : > { %25445 = vmatprep.subr.bf16.mxu0 %v26033_v22 }
 0xe74   : > { %23012 = vmatmul.mubr.f32.vlgmr.msra.gmra.mrb[6].mxu0 %v17288_v47 }
 0xe75   : > { %25447 = vmatpush3.bf16.msra.mxu0 %v30320_v30  ;;  %23030 = vmatprep.mubr.msk.f32.mxu0 %vm26034_vm1, %v30529_v17  ;;  %v17211_v30 = vld [vmem:[%s30476_s5] sm:$0x1] }
 0xe76   : > { %25448 = vmatprep.subr.bf16.mxu0 %v26033_v22 }
 0xe79   : > { %25450 = vmatpush3.bf16.msra.mxu0 %v30333_v58 }
 0xe7a   : > { %25451 = vmatprep.subr.bf16.mxu0 %v26033_v22 }
 0xe7d   : > { %25453 = vmatpush3.bf16.msra.mxu0 %v30343_v43 }
 0xe7e   : > { %25454 = vmatprep.subr.bf16.mxu0 %v26033_v22 }
 0xe81   : > { %25456 = vmatpush3.bf16.msra.mxu0 %v30347_v25 }
 0xe84   : > { %23031 = vmatmul.mubr.f32.vlgmr.msra.gmra.mrb[6].mxu0 %v17288_v47 }
 0xf57   : > { %v17748_v17 = vpop.f32.mrb[6].mxu0 }
 0xf58   : > { %v25461_v58 = vadd.f32 %v17748_v17, %v17211_v30  ;;  %v23032_v33 = vpop.f32.mrb[7].mxu0 }
 0xf5a   : > { %17753 = vst.msk [vmem:[%s258_s26] sm:$0x1] %vm17752_vm3, %v25461_v58 }
 0xf5b   : > { %25974 = shalt.err (!%p25971_p7)
}
 0xf5c   : > { %s25975_s15 = scalar_lea.hbm %s30429_s9, 16  ;;  %s25979_s18 = scalar_lea.hbm %s30477_s6, 32 }
 0xf5d   : > { %p25976_p8 = scmp.ne.s32.totalorder %s30429_s9, %s25975_s15  ;;  %p25980_p1 = scmp.lt.u32.totalorder %s30429_s9, %s30477_s6 }
 0xf5e   : > { %p25981_p0 = scmp.lt.u32.totalorder %s25979_s18, %s25975_s15  ;;  %p25983_p6 = scmp.lt.u32.totalorder %s25975_s15, %s30429_s9 }
 0xf5f   : > { %p25977_p11 = pnand %p25976_p8, %p30571_p9 }
 0xf60   : > { %p25982_p5 = por %p25981_p0, %p25980_p1 }
 0xf61   : > { %p25978_p13 = pneg %p25977_p11 }
 0xf62   : > { %p25984_p10 = por %p25983_p6, %p25982_p5 }
 0xf64   : > { %p25985_p12 = pnand %p25984_p10, %p25978_p13 }
 0xf66   : > { %25988 = shalt.err (!%p25985_p12)
}
 0xf67   : > { %25882 = dma.vmem_to_hbm [thread:$0]  (%p30571_p9), %s30431_s28, 16, %s30429_s9, %s17755_s11  }
 0xf68 PF: > { %p25894_p2 = scmp.ge.s32.totalorder %s26027_s24, 2  ;;  %s17779_s26 = sand.u32 1, %s26015_s21  }
 0xf69   : > { %p30572_p3 = scmp.ne.s32.totalorder %s30522_s8, 0  ;;  %s17780_s29 = scalar_lea.sflag [#allocation7], %s17779_s26 }
 0xf6b   : > { %p25889_p4 = pnand %p25894_p2, %p30572_p3 }
 0xf6d   : > { %26010 = dma.done.wait (!%p25889_p4), %s17780_s29, 16  }
 0xf6e   : > { %26012 = vsyncadd (!%p25889_p4), %s17780_s29, 4294967280  ;;  %p17_p7 = scmp.ge.s32.totalorder %s26096_s27, 4   ;;  %s30573_s21 = smov %s26019_s22 }
 0xf6f   : > { %s30574_s22 = smov %s26023_s23  ;;  %s30575_s23 = smov %s26107_s30 }
 0xf70   : > { %s30576_s24 = smov %s26096_s27  ;;  %19 = sbr.rel (!%p17_p7) target bundleno = 4 (0x4), region = 127 }
 0xf77   :  { %17784 = vsyncpa [#allocation6], 1 }
 0xf78   :  { %17786 = vsyncpa [#allocation6 + $0x1], 1 }
 0xf79   :  { %17787 = vsyncpa [#allocation7], 1 }
 0xf7a   :  { %17789 = vsyncpa [#allocation7 + $0x1], 1 }

</bundles_post_ra>
